<compile_context>
chip_gen: v5e
topology: v5e:2x2
jax: 0.10.0
libtpu: 0.0.40
codegen_flags: <defaults>
</compile_context>

<pallas_src>
import functools

import jax
import jax.numpy as jnp
from jax.experimental import pallas as pl
from jax.experimental.pallas import tpu as pltpu

INPUT_DIMS = 3
INTERNAL_DIMS = 128
OUTPUT_DIMS = 4
HIDDEN = 8                       # 1 input layer + 7 hidden layers + 1 output layer
MULTIRES = 8
EMBED_DIM = INPUT_DIMS * (1 + 2 * MULTIRES)   # 3 + 3*2*8 = 51
EMBED_PAD = 64                   # zero-padded K for the first matmul
OUT_PAD = 8                      # narrow output width (wrapper slices back to 4)
TILE_N = 2048                    # points per grid step (sweep 2048-4096; multiple of 8)
COMPUTE_DTYPE = jnp.bfloat16     # MXU operand dtype; accumulation stays f32


def positional_embed(p):
    """Matches Embedder(include_input=True, log_sampling=True, sin/cos), f32."""
    freqs = 2.0 ** jnp.linspace(0.0, float(MULTIRES - 1), MULTIRES)
    outs = [p]
    for k in range(MULTIRES):
        f = freqs[k]
        outs.append(jnp.sin(p * f))
        outs.append(jnp.cos(p * f))
    return jnp.concatenate(outs, axis=-1)   # (N, 51) f32


def decoder_kernel(x_ref, w0_ref, wh_ref, wout_ref, o_ref):
    # x_ref:    (TILE_N, EMBED_PAD)                       bf16 (cols >= 51 are zero)
    # w0_ref:   (EMBED_PAD, INTERNAL_DIMS)                bf16 (rows >= 51 are zero)
    # wh_ref:   (HIDDEN-1, INTERNAL_DIMS, INTERNAL_DIMS)  bf16
    # wout_ref: (INTERNAL_DIMS, OUT_PAD)                  bf16 (cols >= 4 are zero)
    # o_ref:    (TILE_N, OUT_PAD)                         f32
    h = jnp.dot(x_ref[...], w0_ref[...], preferred_element_type=jnp.float32)
    h = jnp.maximum(h, 0.0).astype(COMPUTE_DTYPE)
    for i in range(HIDDEN - 1):                 # static unroll: 7 hidden layers
        h = jnp.dot(h, wh_ref[i], preferred_element_type=jnp.float32)
        h = jnp.maximum(h, 0.0).astype(COMPUTE_DTYPE)
    o_ref[...] = jnp.dot(h, wout_ref[...], preferred_element_type=jnp.float32)


@functools.partial(jax.jit, static_argnames=("tile_n",))
def decoder_forward(p, w0, wh, wout, *, tile_n=TILE_N):
    n = p.shape[0]
    n_pad = ((n + tile_n - 1) // tile_n) * tile_n

    # Pad the cheap (N, 3) input first so the embedding is written directly at
    # the padded size (no extra (N, 51) round trip for the ragged tail).
    # Padded rows are arbitrary; they are sliced off and there are no biases.
    if n_pad != n:
        p = jnp.pad(p, ((0, n_pad - n), (0, 0)))

    x = positional_embed(p).astype(COMPUTE_DTYPE)                    # (n_pad, 51) bf16
    x = jnp.pad(x, ((0, 0), (0, EMBED_PAD - EMBED_DIM)))             # (n_pad, 64) bf16

    w0b = jnp.pad(w0, ((0, EMBED_PAD - EMBED_DIM), (0, 0))).astype(COMPUTE_DTYPE)
    whb = wh.astype(COMPUTE_DTYPE)
    woutb = jnp.pad(wout, ((0, 0), (0, OUT_PAD - OUTPUT_DIMS))).astype(COMPUTE_DTYPE)

    grid = (n_pad // tile_n,)
    out_padded = pl.pallas_call(
        decoder_kernel,
        out_shape=jax.ShapeDtypeStruct((n_pad, OUT_PAD), jnp.float32),
        grid_spec=pltpu.PrefetchScalarGridSpec(
            num_scalar_prefetch=0,
            grid=grid,
            in_specs=[
                pl.BlockSpec((tile_n, EMBED_PAD), lambda i: (i, 0)),
                # Weights: constant block index across the grid -> resident in
                # VMEM, not re-DMA'd per step.
                pl.BlockSpec((EMBED_PAD, INTERNAL_DIMS), lambda i: (0, 0)),
                pl.BlockSpec((HIDDEN - 1, INTERNAL_DIMS, INTERNAL_DIMS),
                             lambda i: (0, 0, 0)),
                pl.BlockSpec((INTERNAL_DIMS, OUT_PAD), lambda i: (0, 0)),
            ],
            # Narrow output block: last dim (8) == full array last dim -> legal,
            # and the HBM writeback is one contiguous chunk per tile.
            out_specs=pl.BlockSpec((tile_n, OUT_PAD), lambda i: (i, 0)),
        ),
        compiler_params=pltpu.CompilerParams(
            dimension_semantics=("parallel",),
            vmem_limit_bytes=32 * 1024 * 1024),
    )(x, w0b, whb, woutb)

    return out_padded[:n, :OUTPUT_DIMS]


def reference_forward_matched(p, w0, wh, wout):
    """Pure-JAX reference with the same bf16-operand / f32-accum quantization
    as the kernel, so tolerances stay tight."""
    x = positional_embed(p).astype(COMPUTE_DTYPE)
    w0b = w0.astype(COMPUTE_DTYPE)
    whb = wh.astype(COMPUTE_DTYPE)
    woutb = wout.astype(COMPUTE_DTYPE)
    h = jnp.dot(x, w0b, preferred_element_type=jnp.float32)
    h = jnp.maximum(h, 0.0).astype(COMPUTE_DTYPE)
    for i in range(HIDDEN - 1):
        h = jnp.dot(h, whb[i], preferred_element_type=jnp.float32)
        h = jnp.maximum(h, 0.0).astype(COMPUTE_DTYPE)
    return jnp.dot(h, woutb, preferred_element_type=jnp.float32)


def reference_forward_f32(p, w0, wh, wout):
    """All-f32 reference (matches the PyTorch Decoder's numerics)."""
    h = jnp.maximum(jnp.dot(positional_embed(p), w0), 0.0)
    for i in range(HIDDEN - 1):
        h = jnp.maximum(jnp.dot(h, wh[i]), 0.0)
    return jnp.dot(h, wout)


if __name__ == "__main__":
    key = jax.random.PRNGKey(0)
    k_p, k_w0, k_wh, k_wout = jax.random.split(key, 4)

    # Small, ragged point count (exercises the pad-to-TILE_N path; grid = 3).
    N = 4100
    p = jax.random.uniform(k_p, (N, INPUT_DIMS), jnp.float32) - 0.5

    # Deterministic synthetic weights (Kaiming-ish scale), no bias per module.
    w0 = jax.random.normal(k_w0, (EMBED_DIM, INTERNAL_DIMS), jnp.float32) \
        * (2.0 / EMBED_DIM) ** 0.5
    wh = jax.random.normal(k_wh, (HIDDEN - 1, INTERNAL_DIMS, INTERNAL_DIMS),
                           jnp.float32) * (2.0 / INTERNAL_DIMS) ** 0.5
    wout = jax.random.normal(k_wout, (INTERNAL_DIMS, OUTPUT_DIMS),
                             jnp.float32) * (1.0 / INTERNAL_DIMS) ** 0.5

    out = decoder_forward(p, w0, wh, wout)
    out = jax.block_until_ready(out)

    if out.shape != (N, OUTPUT_DIMS):
        raise AssertionError(f"bad output shape {out.shape}")

    # Tight check: kernel vs. bf16-matched reference (same quantization).
    ref_bf16 = reference_forward_matched(p, w0, wh, wout)
    if not jnp.allclose(out, ref_bf16, rtol=1e-2, atol=1e-2):
        err = jnp.max(jnp.abs(out - ref_bf16))
        raise AssertionError(
            f"Pallas output does not match bf16-matched reference, max abs err={err}")

    # Loose parity check vs. the all-f32 (PyTorch-equivalent) reference:
    # bf16 operands through 9 chained matmuls carry a few-percent error.
    ref_f32 = reference_forward_f32(p, w0, wh, wout)
    if not jnp.allclose(out, ref_f32, rtol=0.15, atol=0.15):
        err = jnp.max(jnp.abs(out - ref_f32))
        raise AssertionError(
            f"Pallas output deviates grossly from f32 reference, max abs err={err}")

    print("KERNEL_OK")
</pallas_src>

<mosaic_0001>
module attributes {stable_mosaic.version = 11 : i64} {
  func.func @decoder_kernel(%arg0: i32, %arg1: memref<2048x64xbf16, #tpu.memory_space<vmem>>, %arg2: memref<64x128xbf16, #tpu.memory_space<vmem>>, %arg3: memref<7x128x128xbf16, #tpu.memory_space<vmem>>, %arg4: memref<128x8xbf16, #tpu.memory_space<vmem>>, %arg5: memref<2048x8xf32, #tpu.memory_space<vmem>>) attributes {dimension_semantics = [#tpu.dimension_semantics<parallel>], iteration_bounds = array<i64: 3>, scalar_prefetch = 0 : i64, scratch_operands = 0 : i64, tpu.core_type = #tpu.core_type<tc>, window_params = [{transform_indices = @transform_0, window_bounds = array<i64: 2048, 64>}, {pipeline_mode = #tpu.pipeline_mode<synchronous>, transform_indices = @transform_1, window_bounds = array<i64: 64, 128>}, {pipeline_mode = #tpu.pipeline_mode<synchronous>, transform_indices = @transform_2, window_bounds = array<i64: 7, 128, 128>}, {pipeline_mode = #tpu.pipeline_mode<synchronous>, transform_indices = @transform_3, window_bounds = array<i64: 128, 8>}, {transform_indices = @transform_4, window_bounds = array<i64: 2048, 8>}]} {
    %c0 = arith.constant 0 : index
    %c0_0 = arith.constant 0 : index
    %0 = vector.load %arg1[%c0, %c0_0] : memref<2048x64xbf16, #tpu.memory_space<vmem>>, vector<2048x64xbf16>
    %c0_1 = arith.constant 0 : index
    %c0_2 = arith.constant 0 : index
    %1 = vector.load %arg2[%c0_1, %c0_2] : memref<64x128xbf16, #tpu.memory_space<vmem>>, vector<64x128xbf16>
    %cst = arith.constant dense<0.000000e+00> : vector<2048x128xf32>
    %2 = tpu.matmul %0, %1, %cst {dimension_numbers = #tpu.dot_dimension_numbers<[1], [0], [0], [1], [0, 0, 1, 1], [], []>} : vector<2048x64xbf16>, vector<64x128xbf16>, vector<2048x128xf32> -> vector<2048x128xf32>
    %cst_3 = arith.constant 0.000000e+00 : f32
    %3 = vector.broadcast %cst_3 : f32 to vector<2048x128xf32>
    %4 = arith.maximumf %2, %3 : vector<2048x128xf32>
    %5 = arith.truncf %4 : vector<2048x128xf32> to vector<2048x128xbf16>
    %c0_4 = arith.constant 0 : index
    %c0_5 = arith.constant 0 : index
    %c0_6 = arith.constant 0 : index
    %6 = vector.load %arg3[%c0_4, %c0_5, %c0_6] : memref<7x128x128xbf16, #tpu.memory_space<vmem>>, vector<1x128x128xbf16>
    %7 = vector.shape_cast %6 : vector<1x128x128xbf16> to vector<128x128xbf16>
    %cst_7 = arith.constant dense<0.000000e+00> : vector<2048x128xf32>
    %8 = tpu.matmul %5, %7, %cst_7 {dimension_numbers = #tpu.dot_dimension_numbers<[1], [0], [0], [1], [0, 0, 1, 1], [], []>} : vector<2048x128xbf16>, vector<128x128xbf16>, vector<2048x128xf32> -> vector<2048x128xf32>
    %cst_8 = arith.constant 0.000000e+00 : f32
    %9 = vector.broadcast %cst_8 : f32 to vector<2048x128xf32>
    %10 = arith.maximumf %8, %9 : vector<2048x128xf32>
    %11 = arith.truncf %10 : vector<2048x128xf32> to vector<2048x128xbf16>
    %c1 = arith.constant 1 : index
    %c0_9 = arith.constant 0 : index
    %c0_10 = arith.constant 0 : index
    %12 = vector.load %arg3[%c1, %c0_9, %c0_10] : memref<7x128x128xbf16, #tpu.memory_space<vmem>>, vector<1x128x128xbf16>
    %13 = vector.shape_cast %12 : vector<1x128x128xbf16> to vector<128x128xbf16>
    %cst_11 = arith.constant dense<0.000000e+00> : vector<2048x128xf32>
    %14 = tpu.matmul %11, %13, %cst_11 {dimension_numbers = #tpu.dot_dimension_numbers<[1], [0], [0], [1], [0, 0, 1, 1], [], []>} : vector<2048x128xbf16>, vector<128x128xbf16>, vector<2048x128xf32> -> vector<2048x128xf32>
    %cst_12 = arith.constant 0.000000e+00 : f32
    %15 = vector.broadcast %cst_12 : f32 to vector<2048x128xf32>
    %16 = arith.maximumf %14, %15 : vector<2048x128xf32>
    %17 = arith.truncf %16 : vector<2048x128xf32> to vector<2048x128xbf16>
    %c2 = arith.constant 2 : index
    %c0_13 = arith.constant 0 : index
    %c0_14 = arith.constant 0 : index
    %18 = vector.load %arg3[%c2, %c0_13, %c0_14] : memref<7x128x128xbf16, #tpu.memory_space<vmem>>, vector<1x128x128xbf16>
    %19 = vector.shape_cast %18 : vector<1x128x128xbf16> to vector<128x128xbf16>
    %cst_15 = arith.constant dense<0.000000e+00> : vector<2048x128xf32>
    %20 = tpu.matmul %17, %19, %cst_15 {dimension_numbers = #tpu.dot_dimension_numbers<[1], [0], [0], [1], [0, 0, 1, 1], [], []>} : vector<2048x128xbf16>, vector<128x128xbf16>, vector<2048x128xf32> -> vector<2048x128xf32>
    %cst_16 = arith.constant 0.000000e+00 : f32
    %21 = vector.broadcast %cst_16 : f32 to vector<2048x128xf32>
    %22 = arith.maximumf %20, %21 : vector<2048x128xf32>
    %23 = arith.truncf %22 : vector<2048x128xf32> to vector<2048x128xbf16>
    %c3 = arith.constant 3 : index
    %c0_17 = arith.constant 0 : index
    %c0_18 = arith.constant 0 : index
    %24 = vector.load %arg3[%c3, %c0_17, %c0_18] : memref<7x128x128xbf16, #tpu.memory_space<vmem>>, vector<1x128x128xbf16>
    %25 = vector.shape_cast %24 : vector<1x128x128xbf16> to vector<128x128xbf16>
    %cst_19 = arith.constant dense<0.000000e+00> : vector<2048x128xf32>
    %26 = tpu.matmul %23, %25, %cst_19 {dimension_numbers = #tpu.dot_dimension_numbers<[1], [0], [0], [1], [0, 0, 1, 1], [], []>} : vector<2048x128xbf16>, vector<128x128xbf16>, vector<2048x128xf32> -> vector<2048x128xf32>
    %cst_20 = arith.constant 0.000000e+00 : f32
    %27 = vector.broadcast %cst_20 : f32 to vector<2048x128xf32>
    %28 = arith.maximumf %26, %27 : vector<2048x128xf32>
    %29 = arith.truncf %28 : vector<2048x128xf32> to vector<2048x128xbf16>
    %c4 = arith.constant 4 : index
    %c0_21 = arith.constant 0 : index
    %c0_22 = arith.constant 0 : index
    %30 = vector.load %arg3[%c4, %c0_21, %c0_22] : memref<7x128x128xbf16, #tpu.memory_space<vmem>>, vector<1x128x128xbf16>
    %31 = vector.shape_cast %30 : vector<1x128x128xbf16> to vector<128x128xbf16>
    %cst_23 = arith.constant dense<0.000000e+00> : vector<2048x128xf32>
    %32 = tpu.matmul %29, %31, %cst_23 {dimension_numbers = #tpu.dot_dimension_numbers<[1], [0], [0], [1], [0, 0, 1, 1], [], []>} : vector<2048x128xbf16>, vector<128x128xbf16>, vector<2048x128xf32> -> vector<2048x128xf32>
    %cst_24 = arith.constant 0.000000e+00 : f32
    %33 = vector.broadcast %cst_24 : f32 to vector<2048x128xf32>
    %34 = arith.maximumf %32, %33 : vector<2048x128xf32>
    %35 = arith.truncf %34 : vector<2048x128xf32> to vector<2048x128xbf16>
    %c5 = arith.constant 5 : index
    %c0_25 = arith.constant 0 : index
    %c0_26 = arith.constant 0 : index
    %36 = vector.load %arg3[%c5, %c0_25, %c0_26] : memref<7x128x128xbf16, #tpu.memory_space<vmem>>, vector<1x128x128xbf16>
    %37 = vector.shape_cast %36 : vector<1x128x128xbf16> to vector<128x128xbf16>
    %cst_27 = arith.constant dense<0.000000e+00> : vector<2048x128xf32>
    %38 = tpu.matmul %35, %37, %cst_27 {dimension_numbers = #tpu.dot_dimension_numbers<[1], [0], [0], [1], [0, 0, 1, 1], [], []>} : vector<2048x128xbf16>, vector<128x128xbf16>, vector<2048x128xf32> -> vector<2048x128xf32>
    %cst_28 = arith.constant 0.000000e+00 : f32
    %39 = vector.broadcast %cst_28 : f32 to vector<2048x128xf32>
    %40 = arith.maximumf %38, %39 : vector<2048x128xf32>
    %41 = arith.truncf %40 : vector<2048x128xf32> to vector<2048x128xbf16>
    %c6 = arith.constant 6 : index
    %c0_29 = arith.constant 0 : index
    %c0_30 = arith.constant 0 : index
    %42 = vector.load %arg3[%c6, %c0_29, %c0_30] : memref<7x128x128xbf16, #tpu.memory_space<vmem>>, vector<1x128x128xbf16>
    %43 = vector.shape_cast %42 : vector<1x128x128xbf16> to vector<128x128xbf16>
    %cst_31 = arith.constant dense<0.000000e+00> : vector<2048x128xf32>
    %44 = tpu.matmul %41, %43, %cst_31 {dimension_numbers = #tpu.dot_dimension_numbers<[1], [0], [0], [1], [0, 0, 1, 1], [], []>} : vector<2048x128xbf16>, vector<128x128xbf16>, vector<2048x128xf32> -> vector<2048x128xf32>
    %cst_32 = arith.constant 0.000000e+00 : f32
    %45 = vector.broadcast %cst_32 : f32 to vector<2048x128xf32>
    %46 = arith.maximumf %44, %45 : vector<2048x128xf32>
    %47 = arith.truncf %46 : vector<2048x128xf32> to vector<2048x128xbf16>
    %c0_33 = arith.constant 0 : index
    %c0_34 = arith.constant 0 : index
    %48 = vector.load %arg4[%c0_33, %c0_34] : memref<128x8xbf16, #tpu.memory_space<vmem>>, vector<128x8xbf16>
    %cst_35 = arith.constant dense<0.000000e+00> : vector<2048x8xf32>
    %49 = tpu.matmul %47, %48, %cst_35 {dimension_numbers = #tpu.dot_dimension_numbers<[1], [0], [0], [1], [0, 0, 1, 1], [], []>} : vector<2048x128xbf16>, vector<128x8xbf16>, vector<2048x8xf32> -> vector<2048x8xf32>
    %c0_36 = arith.constant 0 : index
    %c0_37 = arith.constant 0 : index
    %50 = vector.load %arg5[%c0_36, %c0_37] : memref<2048x8xf32, #tpu.memory_space<vmem>>, vector<2048x8xf32>
    tpu.vector_store %arg5[%c0_36, %c0_37], %49 {strides = array<i32>} : memref<2048x8xf32, #tpu.memory_space<vmem>>, vector<2048x8xf32>,
    return
  }
  func.func @transform_0(%arg0: i32) -> (i32, i32) {
    %c0_i32 = arith.constant 0 : i32
    %c0_i32_0 = arith.constant 0 : i32
    return %arg0, %c0_i32 : i32, i32
  }
  func.func @transform_1(%arg0: i32) -> (i32, i32) {
    %c0_i32 = arith.constant 0 : i32
    %c0_i32_0 = arith.constant 0 : i32
    %c0_i32_1 = arith.constant 0 : i32
    return %c0_i32, %c0_i32_0 : i32, i32
  }
  func.func @transform_2(%arg0: i32) -> (i32, i32, i32) {
    %c0_i32 = arith.constant 0 : i32
    %c0_i32_0 = arith.constant 0 : i32
    %c0_i32_1 = arith.constant 0 : i32
    %c0_i32_2 = arith.constant 0 : i32
    return %c0_i32, %c0_i32_0, %c0_i32_1 : i32, i32, i32
  }
  func.func @transform_3(%arg0: i32) -> (i32, i32) {
    %c0_i32 = arith.constant 0 : i32
    %c0_i32_0 = arith.constant 0 : i32
    %c0_i32_1 = arith.constant 0 : i32
    return %c0_i32, %c0_i32_0 : i32, i32
  }
  func.func @transform_4(%arg0: i32) -> (i32, i32) {
    %c0_i32 = arith.constant 0 : i32
    %c0_i32_0 = arith.constant 0 : i32
    return %arg0, %c0_i32 : i32, i32
  }
}

</mosaic_0001>

<bundles_post_ra>
// kernel: decoder_forward.1
= control target key start
LH: loop header
LB: loop body
LE: loop exit
PB: predicated region body
PF: predicated region fallthrough
CT: control target
= control target key end

     0   :  { %s12541_s15 = smov 0   ;;  %s14409_s0 = inlined_call_operand.vmem [shape: bf16[6144,64], index: 0, kind: input, shape index: {}]   ;;  %s14410_s1 = inlined_call_operand.vmem [shape: bf16[64,128], index: 1, kind: input, shape index: {}]   ;;  %s14411_s2 = inlined_call_operand.vmem [shape: bf16[7,128,128], index: 2, kind: input, shape index: {}]   ;;  %s14412_s3 = inlined_call_operand.vmem [shape: bf16[128,8], index: 3, kind: input, shape index: {}]   ;;  %s14413_s4 = inlined_call_operand.vmem [shape: f32[6144,8], index: 4, kind: output, shape index: {}]  }
   0x1 LB: > { %s11259_s16 = sadd.s32 4294967295, %s12514_s15   ;;  %p11263_p0 = scmp.ge.s32.totalorder %s12514_s15, 1  ;;  %s12514_s15 = sphi %s12541_s15, %s14_s15  }
   0x2   : > { %p163_p1 = scmp.lt.s32.totalorder %s12514_s15, 4 }
   0x4   : > { %p164_p2 = pnand %p11263_p0, %p163_p1 }
   0x6   : > { %167 = sbr.rel (%p164_p2) target bundleno = 5203 (0x1453), region = 36 }
   0xb   : > { %v12409_v0 = vld [vmem:[%s14410_s1 + $0x18] sm:$0xff]  ;;  %s11264_s19 = sshll.u32 %s11259_s16, 8  ;;  %v12408_v1 = vld [vmem:[%s14410_s1 + $0x10] sm:$0xff]  ;;  %v12407_v2 = vld [vmem:[%s14410_s1 + $0x8] sm:$0xff]  ;;  %vm1130_vm0 = vcmask 523264   ;;  %vm10946_vm1 = vcmask 64512  }
   0xc   : > { %p190_p3 = scmp.lt.s32.totalorder %s11264_s19, 767  ;;  %12474 = vmatpush.bf16.msra.mxu1 %v12409_v0  ;;  %12475 = vmatpush.bf16.msra.mxu2 %v12409_v0  ;;  %v12406_v3 = vld [vmem:[%s14410_s1] sm:$0xff]  ;;  %v12417_v4 = vld [vmem:[%s14411_s2 + $0x38] sm:$0xff]  ;;  %v12416_v8 = vld [vmem:[%s14411_s2 + $0x30] sm:$0xff] }
   0xd   : > { %12476 = vmatpush.bf16.msra.mxu3 %v12409_v0  ;;  %1519 = vmatpush.bf16.msra.mxu0 %v12409_v0  ;;  %v12415_v13 = vld [vmem:[%s14411_s2 + $0x28] sm:$0xff]  ;;  %v12425_v16 = vld [vmem:[%s14411_s2 + $0x78] sm:$0xff]  ;;  %v12414_v38 = vld [vmem:[%s14411_s2 + $0x20] sm:$0xff] }
   0xe   : > { %s14681_s19 = smov (!%p190_p3, %s11264_s19), 767  ;;  %v12424_v46 = vld [vmem:[%s14411_s2 + $0x70] sm:$0xff] }
   0xf   : > { %s11265_s24 = sshll.u32 %s14681_s19, 2  ;;  %s11267_s28 = sshll.u32 %s14681_s19, 3 }
  0x10   : > { %12477 = vmatpush.bf16.msra.mxu1 %v12408_v1  ;;  %12478 = vmatpush.bf16.msra.mxu2 %v12408_v1  ;;  %s12567_s29 = scalar_lea.vmem %s14409_s0, %s11265_s24  ;;  %s13799_s5 = scalar_lea.vmem %s14413_s4, %s11267_s28 }
  0x11   : > { %12479 = vmatpush.bf16.msra.mxu3 %v12408_v1  ;;  %1520 = vmatpush.bf16.msra.mxu0 %v12408_v1  ;;  %v12311_v5 = vld [vmem:[%s12567_s29 + $0x108] sm:$0xff]  ;;  %v12312_v6 = vld [vmem:[%s12567_s29 + $0x110] sm:$0xff]  ;;  %v12313_v7 = vld [vmem:[%s12567_s29 + $0x118] sm:$0xff] }
  0x12   : > { %v12314_v9 = vld [vmem:[%s12567_s29 + $0x120] sm:$0xff]  ;;  %v12315_v10 = vld [vmem:[%s12567_s29 + $0x128] sm:$0xff]  ;;  %v12316_v11 = vld [vmem:[%s12567_s29 + $0x130] sm:$0xff] }
  0x13   : > { %v12317_v12 = vld [vmem:[%s12567_s29 + $0x138] sm:$0xff]  ;;  %v12318_v14 = vld [vmem:[%s12567_s29 + $0x140] sm:$0xff]  ;;  %v12344_v15 = vld [vmem:[%s12567_s29 + $0x210] sm:$0xff] }
  0x14   : > { %12480 = vmatpush.bf16.msra.mxu1 %v12407_v2  ;;  %12481 = vmatpush.bf16.msra.mxu2 %v12407_v2  ;;  %v12319_v17 = vld [vmem:[%s12567_s29 + $0x148] sm:$0xff]  ;;  %v12345_v19 = vld [vmem:[%s12567_s29 + $0x218] sm:$0xff]  ;;  %v12320_v24 = vld [vmem:[%s12567_s29 + $0x150] sm:$0xff] }
  0x15   : > { %12482 = vmatpush.bf16.msra.mxu3 %v12407_v2  ;;  %1521 = vmatpush.bf16.msra.mxu0 %v12407_v2  ;;  %v12346_v26 = vld [vmem:[%s12567_s29 + $0x220] sm:$0xff]  ;;  %v12321_v31 = vld [vmem:[%s12567_s29 + $0x158] sm:$0xff]  ;;  %v12347_v33 = vld [vmem:[%s12567_s29 + $0x228] sm:$0xff] }
  0x16   : > { %v12322_v39 = vld [vmem:[%s12567_s29 + $0x160] sm:$0xff]  ;;  %v12348_v41 = vld [vmem:[%s12567_s29 + $0x230] sm:$0xff]  ;;  %v12323_v47 = vld [vmem:[%s12567_s29 + $0x168] sm:$0xff] }
  0x17   : > { %v12349_v49 = vld [vmem:[%s12567_s29 + $0x238] sm:$0xff]  ;;  %v12324_v54 = vld [vmem:[%s12567_s29 + $0x170] sm:$0xff]  ;;  %v12350_v56 = vld [vmem:[%s12567_s29 + $0x240] sm:$0xff] }
  0x18   : > { %12483 = vmatpush.bf16.msra.mxu1 %v12406_v3  ;;  %12484 = vmatpush.bf16.msra.mxu2 %v12406_v3  ;;  %v12325_v61 = vld [vmem:[%s12567_s29 + $0x178] sm:$0xff]  ;;  %v12351_v63 = vld [vmem:[%s12567_s29 + $0x248] sm:$0xff] }
  0x19   : > { %12485 = vmatpush.bf16.msra.mxu3 %v12406_v3  ;;  %1522 = vmatpush.bf16.msra.mxu0 %v12406_v3 }
  0x1b   : > { %11829 = vmatmul.msk.bf16.vlgmr.msra.gmra.mxu1 %vm1130_vm0, %v12311_v5  ;;  %11862 = vmatmul.msk.bf16.vlgmr.msra.gmra.mxu2 %vm1130_vm0, %v12344_v15  ;;  %v12326_v5 = vld [vmem:[%s12567_s29 + $0x180] sm:$0xff] }
  0x1c   : > { %2612 = vmatpush.bf16.msrb.mxu1 %v12417_v4  ;;  %3710 = vmatpush.bf16.msrb.mxu2 %v12425_v16  ;;  %v12413_v4 = vld [vmem:[%s14411_s2 + $0x18] sm:$0xff] }
  0x20   : > { %2613 = vmatpush.bf16.msrb.mxu1 %v12416_v8  ;;  %3711 = vmatpush.bf16.msrb.mxu2 %v12424_v46 }
  0x24   : > { %2614 = vmatpush.bf16.msrb.mxu1 %v12415_v13  ;;  %v12423_v13 = vld [vmem:[%s14411_s2 + $0x68] sm:$0xff] }
  0x25   : > { %3712 = vmatpush.bf16.msrb.mxu2 %v12423_v13 }
  0x28   : > { %2615 = vmatpush.bf16.msrb.mxu1 %v12414_v38 }
  0x2b   : > { %11830 = vmatmul.msk.bf16.gmra.mxu1 %vm1130_vm0, %v12312_v6  ;;  %11863 = vmatmul.msk.bf16.gmra.mxu2 %vm1130_vm0, %v12345_v19 }
  0x2c   : > { %2616 = vmatpush.bf16.msrb.mxu1 %v12413_v4 }
  0x3b   : > { %11831 = vmatmul.msk.bf16.gmra.mxu1 %vm1130_vm0, %v12313_v7  ;;  %11864 = vmatmul.msk.bf16.gmra.mxu2 %vm1130_vm0, %v12346_v26  ;;  %v12352_v7 = vld [vmem:[%s12567_s29 + $0x250] sm:$0xff] }
  0x4b   : > { %11832 = vmatmul.msk.bf16.gmra.mxu1 %vm1130_vm0, %v12314_v9  ;;  %11865 = vmatmul.msk.bf16.gmra.mxu2 %vm1130_vm0, %v12347_v33 }
  0x5b   : > { %11833 = vmatmul.msk.bf16.gmra.mxu1 %vm1130_vm0, %v12315_v10  ;;  %11866 = vmatmul.msk.bf16.gmra.mxu2 %vm1130_vm0, %v12348_v41  ;;  %v12329_v41 = vld [vmem:[%s12567_s29 + $0x198] sm:$0xff] }
  0x6b   : > { %11834 = vmatmul.msk.bf16.gmra.mxu1 %vm1130_vm0, %v12316_v11  ;;  %11867 = vmatmul.msk.bf16.gmra.mxu2 %vm1130_vm0, %v12349_v49  ;;  %v12376_v49 = vld [vmem:[%s12567_s29 + $0x310] sm:$0xff] }
  0x6c   : > { %11894 = vmatmul.msk.bf16.vlgmr.msra.gmra.mxu3 %vm1130_vm0, %v12376_v49 }
  0x7b   : > { %11835 = vmatmul.msk.bf16.gmra.mxu1 %vm1130_vm0, %v12317_v12  ;;  %11868 = vmatmul.msk.bf16.gmra.mxu2 %vm1130_vm0, %v12350_v56  ;;  %v12412_v56 = vld [vmem:[%s14411_s2 + $0x10] sm:$0xff] }
  0x7c   : > { %2617 = vmatpush.bf16.msrb.mxu1 %v12412_v56  ;;  %v12380_v56 = vld [vmem:[%s12567_s29 + $0x330] sm:$0xff] }
  0x8b   : > { %11836 = vmatmul.msk.bf16.gmra.mxu1 %vm1130_vm0, %v12318_v14  ;;  %11869 = vmatmul.msk.bf16.gmra.mxu2 %vm1130_vm0, %v12351_v63  ;;  %v12327_v14 = vld [vmem:[%s12567_s29 + $0x188] sm:$0xff] }
  0x98   : > { %v1689_v18 = vpop.f32.mrf.mxu1 }
  0x99   : > { %v2230_v21 = vmax.f32 %v1689_v18, 0.0 }
  0x9b   : > { %11837 = vmatmul.msk.bf16.gmra.mxu1 %vm1130_vm0, %v12319_v17  ;;  %11870 = vmatmul.msk.bf16.gmra.mxu2 %vm1130_vm0, %v12352_v7 }
  0x9e   : > { %v1854_v9 = vpop.f32.mrf.mxu2 }
  0x9f   : > { %v2296_v15 = vmax.f32 %v1854_v9, 0.0  ;;  %v12422_v9 = vld [vmem:[%s14411_s2 + $0x60] sm:$0xff] }
  0xa0   : > { %v1691_v20 = vpop.f32.mrf.mxu1  ;;  %3713 = vmatpush.bf16.msrb.mxu2 %v12422_v9 }
  0xa1   : > { %v2231_v22 = vmax.f32 %v1691_v20, 0.0  ;;  %v12353_v20 = vld [vmem:[%s12567_s29 + $0x258] sm:$0xff] }
  0xa3   : > { %v12603_v23 = vpack.c.bf16 %v2231_v22, %v2230_v21 }
  0xa6   : > { %v1856_v17 = vpop.f32.mrf.mxu2 }
  0xa7   : > { %v2297_v18 = vmax.f32 %v1856_v17, 0.0  ;;  %v12357_v17 = vld [vmem:[%s12567_s29 + $0x278] sm:$0xff] }
  0xa8   : > { %v1694_v25 = vpop.f32.mrf.mxu1 }
  0xa9   : > { %v2232_v28 = vmax.f32 %v1694_v25, 0.0  ;;  %v12661_v19 = vpack.c.bf16 %v2297_v18, %v2296_v15  ;;  %v12378_v18 = vld [vmem:[%s12567_s29 + $0x320] sm:$0xff] }
  0xab   : > { %11838 = vmatmul.msk.bf16.gmra.mxu1 %vm1130_vm0, %v12320_v24  ;;  %11871 = vmatmul.msk.bf16.gmra.mxu2 %vm1130_vm0, %v12353_v20 }
  0xae   : > { %v1859_v22 = vpop.f32.mrf.mxu2 }
  0xb0   : > { %v1696_v27 = vpop.f32.mrf.mxu1 }
  0xb1   : > { %v2233_v29 = vmax.f32 %v1696_v27, 0.0  ;;  %v12328_v27 = vld [vmem:[%s12567_s29 + $0x190] sm:$0xff] }
  0xb3   : > { %v12609_v30 = vpack.c.bf16 %v2233_v29, %v2232_v28  ;;  %v2298_v28 = vmax.f32 %v1859_v22, 0.0 }
  0xb8   : > { %v1699_v32 = vpop.f32.mrf.mxu1 }
  0xb9   : > { %v2234_v35 = vmax.f32 %v1699_v32, 0.0 }
  0xbb   : > { %11839 = vmatmul.msk.bf16.gmra.mxu1 %vm1130_vm0, %v12321_v31  ;;  %v1861_v31 = vpop.f32.mrf.mxu2 }
  0xbc   : > { %v2299_v32 = vmax.f32 %v1861_v31, 0.0 }
  0xbe   : > { %v12669_v33 = vpack.c.bf16 %v2299_v32, %v2298_v28 }
  0xc0   : > { %v1701_v34 = vpop.f32.mrf.mxu1 }
  0xc1   : > { %v2235_v36 = vmax.f32 %v1701_v34, 0.0  ;;  %v12354_v34 = vld [vmem:[%s12567_s29 + $0x260] sm:$0xff] }
  0xc2   : > { %11872 = vmatmul.msk.bf16.gmra.mxu2 %vm1130_vm0, %v12354_v34 }
  0xc3   : > { %v12615_v37 = vpack.c.bf16 %v2235_v36, %v2234_v35  ;;  %v1864_v36 = vpop.f32.mrf.mxu2 }
  0xc8   : > { %v1704_v40 = vpop.f32.mrf.mxu1 }
  0xc9   : > { %v2236_v43 = vmax.f32 %v1704_v40, 0.0 }
  0xcb   : > { %11840 = vmatmul.msk.bf16.gmra.mxu1 %vm1130_vm0, %v12322_v39 }
  0xd0   : > { %v1706_v42 = vpop.f32.mrf.mxu1 }
  0xd1   : > { %v2237_v44 = vmax.f32 %v1706_v42, 0.0  ;;  %v2300_v42 = vmax.f32 %v1864_v36, 0.0  ;;  %v12379_v36 = vld [vmem:[%s12567_s29 + $0x328] sm:$0xff] }
  0xd3   : > { %v12624_v45 = vpack.c.bf16 %v2237_v44, %v2236_v43  ;;  %v1866_v44 = vpop.f32.mrf.mxu2 }
  0xd4   : > { %v2301_v46 = vmax.f32 %v1866_v44, 0.0  ;;  %v12333_v44 = vld [vmem:[%s12567_s29 + $0x1b8] sm:$0xff] }
  0xd8   : > { %v1709_v48 = vpop.f32.mrf.mxu1 }
  0xd9   : > { %v2238_v51 = vmax.f32 %v1709_v48, 0.0  ;;  %v12355_v48 = vld [vmem:[%s12567_s29 + $0x268] sm:$0xff] }
  0xda   : > { %11873 = vmatmul.msk.bf16.gmra.mxu2 %vm1130_vm0, %v12355_v48  ;;  %v12278_v48 = vld [vmem:[%s12567_s29] sm:$0xff] }
  0xdb   : > { %11841 = vmatmul.msk.bf16.gmra.mxu1 %vm1130_vm0, %v12323_v47  ;;  %v12677_v47 = vpack.c.bf16 %v2301_v46, %v2300_v42  ;;  %11796 = vmatmul.msk.bf16.vlgmr.msra.gmra.mxu0 %vm1130_vm0, %v12278_v48 }
  0xe0   : > { %v1711_v50 = vpop.f32.mrf.mxu1 }
  0xe1   : > { %v2239_v52 = vmax.f32 %v1711_v50, 0.0 }
  0xe3   : > { %v12633_v53 = vpack.c.bf16 %v2239_v52, %v2238_v51  ;;  %v1869_v51 = vpop.f32.mrf.mxu2 }
  0xe8   : > { %v1714_v55 = vpop.f32.mrf.mxu1 }
  0xe9   : > { %v2240_v58 = vmax.f32 %v1714_v55, 0.0 }
  0xeb   : > { %11842 = vmatmul.msk.bf16.gmra.mxu1 %vm1130_vm0, %v12324_v54 }
  0xf0   : > { %v1716_v57 = vpop.f32.mrf.mxu1 }
  0xf1   : > { %v2241_v59 = vmax.f32 %v1716_v57, 0.0  ;;  %v12433_v57 = vld [vmem:[%s14411_s2 + $0xb8] sm:$0xff] }
  0xf2   : > { %4808 = vmatpush.bf16.msrb.mxu3 %v12433_v57 }
  0xf3   : > { %v12639_v60 = vpack.c.bf16 %v2241_v59, %v2240_v58  ;;  %v12330_v58 = vld [vmem:[%s12567_s29 + $0x1a0] sm:$0xff]  ;;  %v2302_v59 = vmax.f32 %v1869_v51, 0.0 }
  0xf8   : > { %v1719_v62 = vpop.f32.mrf.mxu1 }
  0xf9   : > { %v2242_v1 = vmax.f32 %v1719_v62, 0.0  ;;  %v1871_v62 = vpop.f32.mrf.mxu2 }
  0xfa   : > { %v2303_v63 = vmax.f32 %v1871_v62, 0.0 }
  0xfb   : > { %11843 = vmatmul.msk.bf16.gmra.mxu1 %vm1130_vm0, %v12325_v61 }
 0x100   : > { %v1721_v0 = vpop.f32.mrf.mxu1 }
 0x101   : > { %v2243_v2 = vmax.f32 %v1721_v0, 0.0  ;;  %v12693_v0 = vpack.c.bf16 %v2303_v63, %v2302_v59  ;;  %v12432_v63 = vld [vmem:[%s14411_s2 + $0xb0] sm:$0xff] }
 0x102   : > { %4809 = vmatpush.bf16.msrb.mxu3 %v12432_v63 }
 0x103   : > { %v12645_v3 = vpack.c.bf16 %v2243_v2, %v2242_v1  ;;  %v12356_v1 = vld [vmem:[%s12567_s29 + $0x270] sm:$0xff]  ;;  %v12377_v2 = vld [vmem:[%s12567_s29 + $0x318] sm:$0xff] }
 0x104   : > { %11874 = vmatmul.msk.bf16.gmra.mxu2 %vm1130_vm0, %v12356_v1  ;;  %11895 = vmatmul.msk.bf16.gmra.mxu3 %vm1130_vm0, %v12377_v2  ;;  %v12411_v1 = vld [vmem:[%s14411_s2 + $0x8] sm:$0xff]  ;;  %v12334_v2 = vld [vmem:[%s12567_s29 + $0x1c0] sm:$0xff] }
 0x105   : > { %2618 = vmatpush.bf16.msrb.mxu1 %v12411_v1 }
 0x108   : > { %v1724_v6 = vpop.f32.mrf.mxu1 }
 0x109   : > { %v2244_v10 = vmax.f32 %v1724_v6, 0.0 }
 0x10b   : > { %11844 = vmatmul.msk.bf16.gmra.mxu1 %vm1130_vm0, %v12326_v5  ;;  %v1874_v5 = vpop.f32.mrf.mxu2 }
 0x110   : > { %v1726_v8 = vpop.f32.mrf.mxu1 }
 0x111   : > { %v2245_v11 = vmax.f32 %v1726_v8, 0.0 }
 0x113   : > { %v12654_v12 = vpack.c.bf16 %v2245_v11, %v2244_v10  ;;  %v12331_v10 = vld [vmem:[%s12567_s29 + $0x1a8] sm:$0xff]  ;;  %v2304_v11 = vmax.f32 %v1874_v5, 0.0 }
 0x114   : > { %11875 = vmatmul.msk.bf16.gmra.mxu2 %vm1130_vm0, %v12357_v17  ;;  %11896 = vmatmul.msk.bf16.gmra.mxu3 %vm1130_vm0, %v12378_v18  ;;  %v12279_v5 = vld [vmem:[%s12567_s29 + $0x8] sm:$0xff] }
 0x115   : > { %11797 = vmatmul.msk.bf16.gmra.mxu0 %vm1130_vm0, %v12279_v5 }
 0x118   : > { %v1729_v16 = vpop.f32.mrf.mxu1 }
 0x119   : > { %v2246_v24 = vmax.f32 %v1729_v16, 0.0 }
 0x11b   : > { %11845 = vmatmul.msk.bf16.gmra.mxu1 %vm1130_vm0, %v12327_v14  ;;  %v1876_v14 = vpop.f32.mrf.mxu2 }
 0x11c   : > { %v2305_v15 = vmax.f32 %v1876_v14, 0.0 }
 0x11e   : > { %v12706_v16 = vpack.c.bf16 %v2305_v15, %v2304_v11  ;;  %v12360_v11 = vld [vmem:[%s12567_s29 + $0x290] sm:$0xff] }
 0x120   : > { %v1731_v21 = vpop.f32.mrf.mxu1 }
 0x121   : > { %v2247_v25 = vmax.f32 %v1731_v21, 0.0 }
 0x123   : > { %v12665_v26 = vpack.c.bf16 %v2247_v25, %v2246_v24  ;;  %v1879_v21 = vpop.f32.mrf.mxu2 }
 0x124   : > { %v2306_v28 = vmax.f32 %v1879_v21, 0.0  ;;  %11897 = vmatmul.msk.bf16.gmra.mxu3 %vm1130_vm0, %v12379_v36  ;;  %v12421_v21 = vld [vmem:[%s14411_s2 + $0x58] sm:$0xff]  ;;  %v12382_v36 = vld [vmem:[%s12567_s29 + $0x340] sm:$0xff] }
 0x125   : > { %3714 = vmatpush.bf16.msrb.mxu2 %v12421_v21 }
 0x128   : > { %v1734_v29 = vpop.f32.mrf.mxu1 }
 0x129   : > { %v2248_v38 = vmax.f32 %v1734_v29, 0.0 }
 0x12b   : > { %11846 = vmatmul.msk.bf16.gmra.mxu1 %vm1130_vm0, %v12328_v27  ;;  %v12332_v27 = vld [vmem:[%s12567_s29 + $0x1b0] sm:$0xff]  ;;  %v1881_v31 = vpop.f32.mrf.mxu2 }
 0x12c   : > { %v2307_v32 = vmax.f32 %v1881_v31, 0.0 }
 0x12e   : > { %v12716_v34 = vpack.c.bf16 %v2307_v32, %v2306_v28 }
 0x130   : > { %v1736_v35 = vpop.f32.mrf.mxu1  ;;  %14414 = vst [vmem:[#allocation2_spill] sm:$0xff] %v12716_v34 }
 0x131   : > { %v2249_v39 = vmax.f32 %v1736_v35, 0.0  ;;  %v12358_v35 = vld [vmem:[%s12567_s29 + $0x280] sm:$0xff] }
 0x132   : > { %11876 = vmatmul.msk.bf16.gmra.mxu2 %vm1130_vm0, %v12358_v35  ;;  %v12361_v35 = vld [vmem:[%s12567_s29 + $0x298] sm:$0xff] }
 0x133   : > { %v12673_v40 = vpack.c.bf16 %v2249_v39, %v2248_v38  ;;  %v1884_v39 = vpop.f32.mrf.mxu2 }
 0x134   : > { %v2308_v46 = vmax.f32 %v1884_v39, 0.0  ;;  %11898 = vmatmul.msk.bf16.gmra.mxu3 %vm1130_vm0, %v12380_v56 }
 0x138   : > { %v1739_v43 = vpop.f32.mrf.mxu1 }
 0x139   : > { %v2250_v52 = vmax.f32 %v1739_v43, 0.0 }
 0x13b   : > { %11847 = vmatmul.msk.bf16.gmra.mxu1 %vm1130_vm0, %v12329_v41 }
 0x140   : > { %v1741_v50 = vpop.f32.mrf.mxu1 }
 0x141   : > { %v2251_v54 = vmax.f32 %v1741_v50, 0.0  ;;  %v1886_v50 = vpop.f32.mrf.mxu2 }
 0x142   : > { %v2309_v51 = vmax.f32 %v1886_v50, 0.0 }
 0x143   : > { %v12683_v55 = vpack.c.bf16 %v2251_v54, %v2250_v52  ;;  %v12359_v54 = vld [vmem:[%s12567_s29 + $0x288] sm:$0xff] }
 0x144   : > { %v12728_v52 = vpack.c.bf16 %v2309_v51, %v2308_v46  ;;  %11877 = vmatmul.msk.bf16.gmra.mxu2 %vm1130_vm0, %v12359_v54  ;;  %v12336_v46 = vld [vmem:[%s12567_s29 + $0x1d0] sm:$0xff] }
 0x146   : > { %14415 = vst [vmem:[#allocation3_spill] sm:$0xff] %v12728_v52 }
 0x148   : > { %v1744_v61 = vpop.f32.mrf.mxu1 }
 0x149   : > { %v2252_v6 = vmax.f32 %v1744_v61, 0.0 }
 0x14b   : > { %11848 = vmatmul.msk.bf16.gmra.mxu1 %vm1130_vm0, %v12330_v58  ;;  %v1889_v58 = vpop.f32.mrf.mxu2 }
 0x150   : > { %v1746_v4 = vpop.f32.mrf.mxu1 }
 0x151   : > { %v2253_v7 = vmax.f32 %v1746_v4, 0.0  ;;  %v2310_v4 = vmax.f32 %v1889_v58, 0.0  ;;  %v12383_v58 = vld [vmem:[%s12567_s29 + $0x348] sm:$0xff] }
 0x153   : > { %v12699_v8 = vpack.c.bf16 %v2253_v7, %v2252_v6  ;;  %v1891_v7 = vpop.f32.mrf.mxu2 }
 0x154   : > { %v2311_v9 = vmax.f32 %v1891_v7, 0.0  ;;  %11878 = vmatmul.msk.bf16.gmra.mxu2 %vm1130_vm0, %v12360_v11 }
 0x158   : > { %v1749_v13 = vpop.f32.mrf.mxu1 }
 0x159   : > { %v2254_v22 = vmax.f32 %v1749_v13, 0.0  ;;  %v12381_v13 = vld [vmem:[%s12567_s29 + $0x338] sm:$0xff] }
 0x15a   : > { %11899 = vmatmul.msk.bf16.gmra.mxu3 %vm1130_vm0, %v12381_v13 }
 0x15b   : > { %11849 = vmatmul.msk.bf16.gmra.mxu1 %vm1130_vm0, %v12331_v10  ;;  %v12746_v10 = vpack.c.bf16 %v2311_v9, %v2310_v4  ;;  %v1894_v15 = vpop.f32.mrf.mxu2  ;;  %v12337_v4 = vld [vmem:[%s12567_s29 + $0x1d8] sm:$0xff] }
 0x15d   : > { %14416 = vst [vmem:[#allocation4_spill] sm:$0xff] %v12746_v10 }
 0x160   : > { %v1751_v20 = vpop.f32.mrf.mxu1 }
 0x161   : > { %v2255_v24 = vmax.f32 %v1751_v20, 0.0 }
 0x163   : > { %v12712_v25 = vpack.c.bf16 %v2255_v24, %v2254_v22  ;;  %v12335_v22 = vld [vmem:[%s12567_s29 + $0x1c8] sm:$0xff]  ;;  %v2312_v24 = vmax.f32 %v1894_v15, 0.0 }
 0x164   : > { %11879 = vmatmul.msk.bf16.gmra.mxu2 %vm1130_vm0, %v12361_v35  ;;  %v12363_v15 = vld [vmem:[%s12567_s29 + $0x2a8] sm:$0xff] }
 0x168   : > { %v1754_v29 = vpop.f32.mrf.mxu1 }
 0x169   : > { %v2256_v41 = vmax.f32 %v1754_v29, 0.0  ;;  %v1896_v29 = vpop.f32.mrf.mxu2 }
 0x16a   : > { %v2313_v31 = vmax.f32 %v1896_v29, 0.0  ;;  %11900 = vmatmul.msk.bf16.gmra.mxu3 %vm1130_vm0, %v12382_v36  ;;  %v12283_v36 = vld [vmem:[%s12567_s29 + $0x28] sm:$0xff] }
 0x16b   : > { %11850 = vmatmul.msk.bf16.gmra.mxu1 %vm1130_vm0, %v12332_v27  ;;  %v12280_v27 = vld [vmem:[%s12567_s29 + $0x10] sm:$0xff] }
 0x16c   : > { %11798 = vmatmul.msk.bf16.gmra.mxu0 %vm1130_vm0, %v12280_v27  ;;  %v12761_v32 = vpack.c.bf16 %v2313_v31, %v2312_v24  ;;  %v12338_v31 = vld [vmem:[%s12567_s29 + $0x1e0] sm:$0xff] }
 0x16e   : > { %14417 = vst [vmem:[#allocation5_spill] sm:$0xff] %v12761_v32 }
 0x170   : > { %v1756_v38 = vpop.f32.mrf.mxu1 }
 0x171   : > { %v2257_v42 = vmax.f32 %v1756_v38, 0.0  ;;  %v1899_v39 = vpop.f32.mrf.mxu2 }
 0x172   : > { %v2314_v48 = vmax.f32 %v1899_v39, 0.0 }
 0x173   : > { %v12722_v43 = vpack.c.bf16 %v2257_v42, %v2256_v41 }
 0x178   : > { %v1759_v49 = vpop.f32.mrf.mxu1 }
 0x179   : > { %v2258_v59 = vmax.f32 %v1759_v49, 0.0  ;;  %v12281_v49 = vld [vmem:[%s12567_s29 + $0x18] sm:$0xff]  ;;  %v1901_v51 = vpop.f32.mrf.mxu2 }
 0x17a   : > { %v2315_v54 = vmax.f32 %v1901_v51, 0.0  ;;  %11901 = vmatmul.msk.bf16.gmra.mxu3 %vm1130_vm0, %v12383_v58  ;;  %v12364_v51 = vld [vmem:[%s12567_s29 + $0x2b0] sm:$0xff] }
 0x17b   : > { %11851 = vmatmul.msk.bf16.gmra.mxu1 %vm1130_vm0, %v12333_v44 }
 0x17c   : > { %11799 = vmatmul.msk.bf16.gmra.mxu0 %vm1130_vm0, %v12281_v49  ;;  %v12773_v56 = vpack.c.bf16 %v2315_v54, %v2314_v48  ;;  %v12410_v48 = vld [vmem:[%s14411_s2] sm:$0xff]  ;;  %v12385_v54 = vld [vmem:[%s12567_s29 + $0x358] sm:$0xff] }
 0x17d   : > { %2619 = vmatpush.bf16.msrb.mxu1 %v12410_v48  ;;  %v12285_v48 = vld [vmem:[%s12567_s29 + $0x38] sm:$0xff] }
 0x17e   : > { %14418 = vst [vmem:[#allocation6_spill] sm:$0xff] %v12773_v56 }
 0x180   : > { %v1761_v57 = vpop.f32.mrf.mxu1 }
 0x181   : > { %v2259_v61 = vmax.f32 %v1761_v57, 0.0  ;;  %v12362_v57 = vld [vmem:[%s12567_s29 + $0x2a0] sm:$0xff] }
 0x182   : > { %11880 = vmatmul.msk.bf16.gmra.mxu2 %vm1130_vm0, %v12362_v57 }
 0x183   : > { %v12734_v62 = vpack.c.bf16 %v2259_v61, %v2258_v59  ;;  %v1904_v61 = vpop.f32.mrf.mxu2 }
 0x184   : > { %v2316_v5 = vmax.f32 %v1904_v61, 0.0 }
 0x188   : > { %v1764_v6 = vpop.f32.mrf.mxu1 }
 0x189   : > { %v2260_v17 = vmax.f32 %v1764_v6, 0.0  ;;  %v12282_v6 = vld [vmem:[%s12567_s29 + $0x20] sm:$0xff] }
 0x18b   : > { %11852 = vmatmul.msk.bf16.gmra.mxu1 %vm1130_vm0, %v12334_v2  ;;  %v1906_v9 = vpop.f32.mrf.mxu2 }
 0x18c   : > { %v2317_v11 = vmax.f32 %v1906_v9, 0.0  ;;  %11800 = vmatmul.msk.bf16.gmra.mxu0 %vm1130_vm0, %v12282_v6  ;;  %v12339_v6 = vld [vmem:[%s12567_s29 + $0x1e8] sm:$0xff]  ;;  %v12284_v9 = vld [vmem:[%s12567_s29 + $0x30] sm:$0xff] }
 0x18e   : > { %v12785_v13 = vpack.c.bf16 %v2317_v11, %v2316_v5  ;;  %v12420_v5 = vld [vmem:[%s14411_s2 + $0x50] sm:$0xff] }
 0x18f   : > { %3715 = vmatpush.bf16.msrb.mxu2 %v12420_v5  ;;  %v12387_v5 = vld [vmem:[%s12567_s29 + $0x368] sm:$0xff] }
 0x190   : > { %v1766_v14 = vpop.f32.mrf.mxu1  ;;  %14419 = vst [vmem:[#allocation7_spill] sm:$0xff] %v12785_v13 }
 0x191   : > { %v2261_v18 = vmax.f32 %v1766_v14, 0.0  ;;  %v12441_v14 = vld [vmem:[%s14411_s2 + $0xf8] sm:$0xff] }
 0x192   : > { %5906 = vmatpush.bf16.msrb.mxu0 %v12441_v14  ;;  %11881 = vmatmul.msk.bf16.gmra.mxu2 %vm1130_vm0, %v12363_v15 }
 0x193   : > { %v12752_v20 = vpack.c.bf16 %v2261_v18, %v2260_v17  ;;  %v12384_v17 = vld [vmem:[%s12567_s29 + $0x350] sm:$0xff]  ;;  %v12431_v18 = vld [vmem:[%s14411_s2 + $0xa8] sm:$0xff] }
 0x194   : > { %11902 = vmatmul.msk.bf16.gmra.mxu3 %vm1130_vm0, %v12384_v17 }
 0x195   : > { %4810 = vmatpush.bf16.msrb.mxu3 %v12431_v18 }
 0x198   : > { %v1769_v28 = vpop.f32.mrf.mxu1 }
 0x199   : > { %v2262_v41 = vmax.f32 %v1769_v28, 0.0  ;;  %v2014_v28 = vpop.f32.mrf.mxu3 }
 0x19a   : > { %v2360_v39 = vmax.f32 %v2014_v28, 0.0 }
 0x19b   : > { %11853 = vmatmul.msk.bf16.gmra.mxu1 %vm1130_vm0, %v12335_v22  ;;  %v1909_v22 = vpop.f32.mrf.mxu2 }
 0x19c   : > { %v2318_v35 = vmax.f32 %v1909_v22, 0.0  ;;  %11801 = vmatmul.msk.bf16.gmra.mxu0 %vm1130_vm0, %v12283_v36 }
 0x1a0   : > { %v1771_v38 = vpop.f32.mrf.mxu1 }
 0x1a1   : > { %v2263_v42 = vmax.f32 %v1771_v38, 0.0 }
 0x1a2   : > { %11882 = vmatmul.msk.bf16.gmra.mxu2 %vm1130_vm0, %v12364_v51 }
 0x1a3   : > { %v12767_v44 = vpack.c.bf16 %v2263_v42, %v2262_v41  ;;  %v1911_v41 = vpop.f32.mrf.mxu2 }
 0x1a4   : > { %v2319_v42 = vmax.f32 %v1911_v41, 0.0  ;;  %11903 = vmatmul.msk.bf16.gmra.mxu3 %vm1130_vm0, %v12385_v54 }
 0x1a8   : > { %v1774_v50 = vpop.f32.mrf.mxu1 }
 0x1a9   : > { %v2264_v63 = vmax.f32 %v1774_v50, 0.0  ;;  %v12806_v50 = vpack.c.bf16 %v2319_v42, %v2318_v35  ;;  %v12340_v42 = vld [vmem:[%s12567_s29 + $0x1f0] sm:$0xff] }
 0x1ab   : > { %11854 = vmatmul.msk.bf16.gmra.mxu1 %vm1130_vm0, %v12336_v46  ;;  %v2016_v46 = vpop.f32.mrf.mxu3  ;;  %14420 = vst [vmem:[#allocation8_spill] sm:$0xff] %v12806_v50 }
 0x1ac   : > { %v2361_v49 = vmax.f32 %v2016_v46, 0.0  ;;  %11802 = vmatmul.msk.bf16.gmra.mxu0 %vm1130_vm0, %v12284_v9 }
 0x1ae   : > { %v12810_v57 = vpack.c.bf16 %v2361_v49, %v2360_v39 }
 0x1b0   : > { %v1776_v59 = vpop.f32.mrf.mxu1  ;;  %14421 = vst [vmem:[#allocation9_spill] sm:$0xff] %v12810_v57 }
 0x1b1   : > { %v2265_v1 = vmax.f32 %v1776_v59, 0.0  ;;  %v1914_v59 = vpop.f32.mrf.mxu2 }
 0x1b3   : > { %v12779_v2 = vpack.c.bf16 %v2265_v1, %v2264_v63  ;;  %v2019_v1 = vpop.f32.mrf.mxu3 }
 0x1b4   : > { %v2362_v14 = vmax.f32 %v2019_v1, 0.0  ;;  %v12366_v1 = vld [vmem:[%s12567_s29 + $0x2c0] sm:$0xff] }
 0x1b8   : > { %v1779_v7 = vpop.f32.mrf.mxu1 }
 0x1b9   : > { %v2266_v24 = vmax.f32 %v1779_v7, 0.0  ;;  %v2320_v7 = vmax.f32 %v1914_v59, 0.0  ;;  %v1916_v15 = vpop.f32.mrf.mxu2 }
 0x1ba   : > { %v2321_v17 = vmax.f32 %v1916_v15, 0.0 }
 0x1bb   : > { %11855 = vmatmul.msk.bf16.gmra.mxu1 %vm1130_vm0, %v12337_v4  ;;  %v2021_v18 = vpop.f32.mrf.mxu3 }
 0x1bc   : > { %v12823_v22 = vpack.c.bf16 %v2321_v17, %v2320_v7  ;;  %11803 = vmatmul.msk.bf16.gmra.mxu0 %vm1130_vm0, %v12285_v48 }
 0x1be   : > { %14422 = vst [vmem:[#allocation10_spill] sm:$0xff] %v12823_v22 }
 0x1c0   : > { %v1781_v21 = vpop.f32.mrf.mxu1 }
 0x1c1   : > { %v2267_v27 = vmax.f32 %v1781_v21, 0.0  ;;  %v2363_v21 = vmax.f32 %v2021_v18, 0.0  ;;  %v1919_v35 = vpop.f32.mrf.mxu2  ;;  %v12847_v18 = vpop.f32.mrf.mxu0 }
 0x1c2   : > { %v2322_v46 = vmax.f32 %v1919_v35, 0.0 }
 0x1c3   : > { %v12797_v29 = vpack.c.bf16 %v2267_v27, %v2266_v24  ;;  %v12365_v24 = vld [vmem:[%s12567_s29 + $0x2b8] sm:$0xff]  ;;  %v12386_v27 = vld [vmem:[%s12567_s29 + $0x360] sm:$0xff]  ;;  %v12827_v28 = vpack.c.bf16 %v2363_v21, %v2362_v14  ;;  %v2024_v39 = vpop.f32.mrf.mxu3 }
 0x1c4   : > { %11883 = vmatmul.msk.bf16.gmra.mxu2 %vm1130_vm0, %v12365_v24  ;;  %11904 = vmatmul.msk.bf16.gmra.mxu3 %vm1130_vm0, %v12386_v27  ;;  %v2364_v51 = vmax.f32 %v2024_v39, 0.0  ;;  %v12341_v21 = vld [vmem:[%s12567_s29 + $0x1f8] sm:$0xff]  ;;  %v12286_v27 = vld [vmem:[%s12567_s29 + $0x40] sm:$0xff] }
 0x1c5   : > { %14423 = vst [vmem:[#allocation11_spill] sm:$0xff] %v12827_v28 }
 0x1c8   : > { %v1784_v38 = vpop.f32.mrf.mxu1 }
 0x1c9   : > { %v2268_v61 = vmax.f32 %v1784_v38, 0.0  ;;  %v1921_v54 = vpop.f32.mrf.mxu2 }
 0x1cb   : > { %11856 = vmatmul.msk.bf16.gmra.mxu1 %vm1130_vm0, %v12338_v31  ;;  %v2026_v59 = vpop.f32.mrf.mxu3 }
 0x1cc   : > { %11804 = vmatmul.msk.bf16.gmra.mxu0 %vm1130_vm0, %v12286_v27 }
 0x1d0   : > { %v1786_v58 = vpop.f32.mrf.mxu1 }
 0x1d1   : > { %v2269_v63 = vmax.f32 %v1786_v58, 0.0  ;;  %v2323_v58 = vmax.f32 %v1921_v54, 0.0  ;;  %v1924_v9 = vpop.f32.mrf.mxu2  ;;  %v12440_v54 = vld [vmem:[%s14411_s2 + $0xf0] sm:$0xff] }
 0x1d2   : > { %v2324_v24 = vmax.f32 %v1924_v9, 0.0  ;;  %5907 = vmatpush.bf16.msrb.mxu0 %v12440_v54 }
 0x1d3   : > { %v12814_v4 = vpack.c.bf16 %v2269_v63, %v2268_v61  ;;  %v2365_v61 = vmax.f32 %v2026_v59, 0.0  ;;  %v12837_v63 = vpack.c.bf16 %v2323_v58, %v2322_v46  ;;  %v2029_v15 = vpop.f32.mrf.mxu3  ;;  %v12867_v59 = vpop.f32.mrf.mxu0 }
 0x1d4   : > { %11884 = vmatmul.msk.bf16.gmra.mxu2 %vm1130_vm0, %v12366_v1  ;;  %11905 = vmatmul.msk.bf16.gmra.mxu3 %vm1130_vm0, %v12387_v5  ;;  %v2366_v35 = vmax.f32 %v2029_v15, 0.0  ;;  %v12342_v15 = vld [vmem:[%s12567_s29 + $0x200] sm:$0xff] }
 0x1d5   : > { %14424 = vst [vmem:[#allocation12_spill] sm:$0xff] %v12837_v63 }
 0x1d8   : > { %v1789_v11 = vpop.f32.mrf.mxu1 }
 0x1d9   : > { %v2270_v36 = vmax.f32 %v1789_v11, 0.0 }
 0x1db   : > { %11857 = vmatmul.msk.bf16.gmra.mxu1 %vm1130_vm0, %v12339_v6  ;;  %v12841_v6 = vpack.c.bf16 %v2365_v61, %v2364_v51  ;;  %v2031_v39 = vpop.f32.mrf.mxu3  ;;  %v12388_v51 = vld [vmem:[%s12567_s29 + $0x370] sm:$0xff] }
 0x1dc   : > { %v2367_v46 = vmax.f32 %v2031_v39, 0.0 }
 0x1dd   : > { %14425 = vst [vmem:[#allocation13_spill] sm:$0xff] %v12841_v6 }
 0x1de   : > { %v12863_v58 = vpack.c.bf16 %v2367_v46, %v2366_v35  ;;  %v12449_v46 = vld [vmem:[%s14411_s2 + $0x138] sm:$0xff] }
 0x1df   : > { %7004 = vmatpush.bf16.msra.mxu1 %v12449_v46 }
 0x1e0   : > { %v1791_v31 = vpop.f32.mrf.mxu1  ;;  %14427 = vst [vmem:[#allocation15_spill] sm:$0xff] %v12863_v58 }
 0x1e1   : > { %v2271_v38 = vmax.f32 %v1791_v31, 0.0 }
 0x1e3   : > { %v12831_v41 = vpack.c.bf16 %v2271_v38, %v2270_v36  ;;  %v1926_v36 = vpop.f32.mrf.mxu2  ;;  %v2034_v9 = vpop.f32.mrf.mxu3 }
 0x1e4   : > { %v2325_v38 = vmax.f32 %v1926_v36, 0.0  ;;  %11906 = vmatmul.msk.bf16.gmra.mxu3 %vm1130_vm0, %v12388_v51  ;;  %v2368_v35 = vmax.f32 %v2034_v9, 0.0  ;;  %v12389_v51 = vld [vmem:[%s12567_s29 + $0x378] sm:$0xff] }
 0x1e6   : > { %v12856_v48 = vpack.c.bf16 %v2325_v38, %v2324_v24  ;;  %v12287_v24 = vld [vmem:[%s12567_s29 + $0x48] sm:$0xff] }
 0x1e7   : > { %11805 = vmatmul.msk.bf16.gmra.mxu0 %vm1130_vm0, %v12287_v24  ;;  %v12419_v24 = vld [vmem:[%s14411_s2 + $0x48] sm:$0xff] }
 0x1e8   : > { %v1794_v49 = vpop.f32.mrf.mxu1  ;;  %14426 = vst [vmem:[#allocation14_spill] sm:$0xff] %v12856_v48  ;;  %3716 = vmatpush.bf16.msrb.mxu2 %v12419_v24  ;;  %v12390_v24 = vld [vmem:[%s12567_s29 + $0x380] sm:$0xff] }
 0x1e9   : > { %v2272_v11 = vmax.f32 %v1794_v49, 0.0  ;;  %v12367_v49 = vld [vmem:[%s12567_s29 + $0x2c8] sm:$0xff] }
 0x1ea   : > { %11885 = vmatmul.msk.bf16.gmra.mxu2 %vm1130_vm0, %v12367_v49  ;;  %v12368_v49 = vld [vmem:[%s12567_s29 + $0x2d0] sm:$0xff] }
 0x1eb   : > { %11858 = vmatmul.msk.bf16.gmra.mxu1 %vm1130_vm0, %v12340_v42  ;;  %v12430_v42 = vld [vmem:[%s14411_s2 + $0xa0] sm:$0xff]  ;;  %v1929_v1 = vpop.f32.mrf.mxu2  ;;  %v2036_v39 = vpop.f32.mrf.mxu3 }
 0x1ec   : > { %4811 = vmatpush.bf16.msrb.mxu3 %v12430_v42  ;;  %v2369_v42 = vmax.f32 %v2036_v39, 0.0  ;;  %v12288_v39 = vld [vmem:[%s12567_s29 + $0x50] sm:$0xff] }
 0x1ee   : > { %v12884_v54 = vpack.c.bf16 %v2369_v42, %v2368_v35 }
 0x1f0   : > { %v1796_v7 = vpop.f32.mrf.mxu1  ;;  %14429 = vst [vmem:[#allocation17_spill] sm:$0xff] %v12884_v54 }
 0x1f1   : > { %v2273_v14 = vmax.f32 %v1796_v7, 0.0 }
 0x1f3   : > { %v12845_v17 = vpack.c.bf16 %v2273_v14, %v2272_v11  ;;  %v12871_v14 = vpop.f32.mrf.mxu0  ;;  %v1931_v36 = vpop.f32.mrf.mxu2 }
 0x1f4   : > { %v2327_v38 = vmax.f32 %v1931_v36, 0.0  ;;  %11907 = vmatmul.msk.bf16.gmra.mxu3 %vm1130_vm0, %v12389_v51  ;;  %v12343_v36 = vld [vmem:[%s12567_s29 + $0x208] sm:$0xff] }
 0x1f7   : > { %11806 = vmatmul.msk.bf16.gmra.mxu0 %vm1130_vm0, %v12288_v39 }
 0x1f8   : > { %v1799_v31 = vpop.f32.mrf.mxu1 }
 0x1f9   : > { %v2274_v5 = vmax.f32 %v1799_v31, 0.0 }
 0x1fa   : > { %11886 = vmatmul.msk.bf16.gmra.mxu2 %vm1130_vm0, %v12368_v49 }
 0x1fb   : > { %11859 = vmatmul.msk.bf16.gmra.mxu1 %vm1130_vm0, %v12341_v21  ;;  %v2326_v21 = vmax.f32 %v1929_v1, 0.0 }
 0x1fd   : > { %v12877_v31 = vpack.c.bf16 %v2327_v38, %v2326_v21 }
 0x1ff   : > { %14428 = vst [vmem:[#allocation16_spill] sm:$0xff] %v12877_v31 }
 0x200   : > { %v1801_v61 = vpop.f32.mrf.mxu1 }
 0x201   : > { %v2275_v7 = vmax.f32 %v1801_v61, 0.0  ;;  %v12888_v61 = vpop.f32.mrf.mxu0 }
 0x203   : > { %v12869_v11 = vpack.c.bf16 %v2275_v7, %v2274_v5  ;;  %v1934_v5 = vpop.f32.mrf.mxu2 }
 0x204   : > { %v2328_v38 = vmax.f32 %v1934_v5, 0.0  ;;  %11908 = vmatmul.msk.bf16.gmra.mxu3 %vm1130_vm0, %v12390_v24 }
 0x208   : > { %v1804_v27 = vpop.f32.mrf.mxu1 }
 0x209   : > { %v2276_v7 = vmax.f32 %v1804_v27, 0.0  ;;  %v12895_v35 = vpop.f32.mrf.mxu0 }
 0x20b   : > { %11860 = vmatmul.msk.bf16.gmra.mxu1 %vm1130_vm0, %v12342_v15  ;;  %v2039_v15 = vpop.f32.mrf.mxu3  ;;  %v1936_v49 = vpop.f32.mrf.mxu2 }
 0x20c   : > { %v2370_v46 = vmax.f32 %v2039_v15, 0.0  ;;  %v2329_v27 = vmax.f32 %v1936_v49, 0.0 }
 0x210   : > { %v1806_v1 = vpop.f32.mrf.mxu1 }
 0x211   : > { %v2277_v9 = vmax.f32 %v1806_v1, 0.0  ;;  %v12909_v5 = vpop.f32.mrf.mxu0 }
 0x213   : > { %v12890_v21 = vpack.c.bf16 %v2277_v9, %v2276_v7  ;;  %v2041_v51 = vpop.f32.mrf.mxu3  ;;  %v12901_v7 = vpack.c.bf16 %v2329_v27, %v2328_v38  ;;  %v12369_v9 = vld [vmem:[%s12567_s29 + $0x2d8] sm:$0xff]  ;;  %v1939_v49 = vpop.f32.mrf.mxu2  ;;  %v2165_v38 = vmax.f32 %v12867_v59, 0.0 }
 0x214   : > { %v2371_v1 = vmax.f32 %v2041_v51, 0.0  ;;  %11887 = vmatmul.msk.bf16.gmra.mxu2 %vm1130_vm0, %v12369_v9  ;;  %v2330_v27 = vmax.f32 %v1939_v49, 0.0 }
 0x215   : > { %14430 = vst [vmem:[#allocation18_spill] sm:$0xff] %v12901_v7 }
 0x216   : > { %v12905_v54 = vpack.c.bf16 %v2371_v1, %v2370_v46  ;;  %v12289_v1 = vld [vmem:[%s12567_s29 + $0x58] sm:$0xff] }
 0x217   : > { %11807 = vmatmul.msk.bf16.gmra.mxu0 %vm1130_vm0, %v12289_v1 }
 0x218   : > { %v1809_v42 = vpop.f32.mrf.mxu1  ;;  %14431 = vst [vmem:[#allocation19_spill] sm:$0xff] %v12905_v54 }
 0x219   : > { %v2278_v58 = vmax.f32 %v1809_v42, 0.0  ;;  %v12915_v46 = vpop.f32.mrf.mxu0 }
 0x21b   : > { %11861 = vmatmul.msk.bf16.gmra.mxu1 %vm1130_vm0, %v12343_v36  ;;  %v2044_v51 = vpop.f32.mrf.mxu3  ;;  %v2164_v36 = vmax.f32 %v12847_v18, 0.0  ;;  %v1941_v54 = vpop.f32.mrf.mxu2  ;;  %v12370_v18 = vld [vmem:[%s12567_s29 + $0x2e0] sm:$0xff] }
 0x21c   : > { %v2372_v24 = vmax.f32 %v2044_v51, 0.0  ;;  %v2331_v57 = vmax.f32 %v1941_v54, 0.0 }
 0x21d   : > { %v2420_v28 = vpack.c.bf16 %v2165_v38, %v2164_v36 }
 0x220   : > { %v1811_v15 = vpop.f32.mrf.mxu1 }
 0x221   : > { %v2279_v39 = vmax.f32 %v1811_v15, 0.0  ;;  %v12919_v15 = vpack.c.bf16 %v2331_v57, %v2330_v27  ;;  %v12927_v59 = vpop.f32.mrf.mxu0  ;;  %v12429_v57 = vld [vmem:[%s14411_s2 + $0x98] sm:$0xff]  ;;  %v2167_v27 = vmax.f32 %v12888_v61, 0.0  ;;  %v12392_v61 = vld [vmem:[%s12567_s29 + $0x390] sm:$0xff] }
 0x222   : > { %4812 = vmatpush.bf16.msrb.mxu3 %v12429_v57  ;;  %v12439_v57 = vld [vmem:[%s14411_s2 + $0xe8] sm:$0xff] }
 0x223   : > { %v12911_v6 = vpack.c.bf16 %v2279_v39, %v2278_v58  ;;  %v2046_v42 = vpop.f32.mrf.mxu3  ;;  %14432 = vst [vmem:[#allocation20_spill] sm:$0xff] %v12919_v15  ;;  %v12391_v39 = vld [vmem:[%s12567_s29 + $0x388] sm:$0xff]  ;;  %v1944_v54 = vpop.f32.mrf.mxu2  ;;  %5908 = vmatpush.bf16.msrb.mxu0 %v12439_v57 }
 0x224   : > { %v2373_v58 = vmax.f32 %v2046_v42, 0.0  ;;  %11888 = vmatmul.msk.bf16.gmra.mxu2 %vm1130_vm0, %v12370_v18  ;;  %11909 = vmatmul.msk.bf16.gmra.mxu3 %vm1130_vm0, %v12391_v39  ;;  %v2332_v42 = vmax.f32 %v1944_v54, 0.0  ;;  %v12371_v15 = vld [vmem:[%s12567_s29 + $0x2e8] sm:$0xff] }
 0x226   : > { %v12923_v7 = vpack.c.bf16 %v2373_v58, %v2372_v24  ;;  %v12290_v58 = vld [vmem:[%s12567_s29 + $0x60] sm:$0xff] }
 0x227   : > { %11808 = vmatmul.msk.bf16.gmra.mxu0 %vm1130_vm0, %v12290_v58 }
 0x228   : > { %v1814_v9 = vpop.f32.mrf.mxu1  ;;  %14433 = vst [vmem:[#allocation21_spill] sm:$0xff] %v12923_v7 }
 0x229   : > { %v2280_v51 = vmax.f32 %v1814_v9, 0.0  ;;  %v12936_v24 = vpop.f32.mrf.mxu0 }
 0x22b   : > { %2620 = vmatmul.bf16.vlgmr.msrb.gmra.mxu1 %v2420_v28  ;;  %v2049_v38 = vpop.f32.mrf.mxu3  ;;  %v2166_v28 = vmax.f32 %v12871_v14, 0.0  ;;  %v1946_v39 = vpop.f32.mrf.mxu2 }
 0x22c   : > { %v2374_v18 = vmax.f32 %v2049_v38, 0.0 }
 0x230   : > { %v1816_v49 = vpop.f32.mrf.mxu1 }
 0x231   : > { %v2281_v36 = vmax.f32 %v1816_v49, 0.0  ;;  %v2421_v49 = vpack.c.bf16 %v2167_v27, %v2166_v28  ;;  %v12951_v38 = vpop.f32.mrf.mxu0 }
 0x233   : > { %v12929_v1 = vpack.c.bf16 %v2281_v36, %v2280_v51  ;;  %v2333_v51 = vmax.f32 %v1946_v39, 0.0  ;;  %v2051_v36 = vpop.f32.mrf.mxu3  ;;  %v1949_v27 = vpop.f32.mrf.mxu2 }
 0x234   : > { %v2375_v7 = vmax.f32 %v2051_v36, 0.0  ;;  %11889 = vmatmul.msk.bf16.gmra.mxu2 %vm1130_vm0, %v12371_v15  ;;  %11910 = vmatmul.msk.bf16.gmra.mxu3 %vm1130_vm0, %v12392_v61  ;;  %v2334_v15 = vmax.f32 %v1949_v27, 0.0  ;;  %v12291_v36 = vld [vmem:[%s12567_s29 + $0x68] sm:$0xff] }
 0x235   : > { %v12940_v14 = vpack.c.bf16 %v2333_v51, %v2332_v42  ;;  %v2168_v51 = vmax.f32 %v12895_v35, 0.0  ;;  %v12372_v35 = vld [vmem:[%s12567_s29 + $0x2f0] sm:$0xff] }
 0x236   : > { %v12947_v54 = vpack.c.bf16 %v2375_v7, %v2374_v18  ;;  %v2169_v7 = vmax.f32 %v12909_v5, 0.0 }
 0x237   : > { %14434 = vst [vmem:[#allocation22_spill] sm:$0xff] %v12940_v14  ;;  %11809 = vmatmul.msk.bf16.gmra.mxu0 %vm1130_vm0, %v12291_v36 }
 0x238   : > { %v1819_v9 = vpop.f32.mrf.mxu1  ;;  %14435 = vst [vmem:[#allocation23_spill] sm:$0xff] %v12947_v54  ;;  %v2422_v14 = vpack.c.bf16 %v2169_v7, %v2168_v51 }
 0x239   : > { %v2282_v42 = vmax.f32 %v1819_v9, 0.0  ;;  %v12957_v18 = vpop.f32.mrf.mxu0 }
 0x23b   : > { %2625 = vmatmul.bf16.gmra.mxu1 %v2421_v49  ;;  %v2054_v39 = vpop.f32.mrf.mxu3  ;;  %v1951_v54 = vpop.f32.mrf.mxu2 }
 0x23c   : > { %v2376_v57 = vmax.f32 %v2054_v39, 0.0  ;;  %v2335_v31 = vmax.f32 %v1951_v54, 0.0 }
 0x240   : > { %v1821_v28 = vpop.f32.mrf.mxu1 }
 0x241   : > { %v2283_v58 = vmax.f32 %v1821_v28, 0.0  ;;  %v12969_v27 = vpop.f32.mrf.mxu0 }
 0x243   : > { %v12953_v49 = vpack.c.bf16 %v2283_v58, %v2282_v42  ;;  %v2056_v9 = vpop.f32.mrf.mxu3  ;;  %v12961_v42 = vpack.c.bf16 %v2335_v31, %v2334_v15  ;;  %v12393_v58 = vld [vmem:[%s12567_s29 + $0x398] sm:$0xff]  ;;  %v12971_v54 = vpop.f32.mrf.mxu2  ;;  %v2170_v15 = vmax.f32 %v12915_v46, 0.0 }
 0x244   : > { %v2377_v28 = vmax.f32 %v2056_v9, 0.0  ;;  %11890 = vmatmul.msk.bf16.gmra.mxu2 %vm1130_vm0, %v12372_v35  ;;  %11911 = vmatmul.msk.bf16.gmra.mxu3 %vm1130_vm0, %v12393_v58  ;;  %14438 = vst [vmem:[#allocation26_spill] sm:$0xff] %v12971_v54  ;;  %v12394_v54 = vld [vmem:[%s12567_s29 + $0x3a0] sm:$0xff] }
 0x245   : > { %14436 = vst [vmem:[#allocation24_spill] sm:$0xff] %v12961_v42 }
 0x246   : > { %v12965_v5 = vpack.c.bf16 %v2377_v28, %v2376_v57  ;;  %v2171_v57 = vmax.f32 %v12927_v59, 0.0  ;;  %v12292_v28 = vld [vmem:[%s12567_s29 + $0x70] sm:$0xff] }
 0x247   : > { %11810 = vmatmul.msk.bf16.gmra.mxu0 %vm1130_vm0, %v12292_v28 }
 0x248   : > { %v1824_v61 = vpop.f32.mrf.mxu1  ;;  %14437 = vst [vmem:[#allocation25_spill] sm:$0xff] %v12965_v5  ;;  %v12373_v5 = vld [vmem:[%s12567_s29 + $0x2f8] sm:$0xff] }
 0x249   : > { %v2284_v51 = vmax.f32 %v1824_v61, 0.0  ;;  %v12980_v9 = vpop.f32.mrf.mxu0 }
 0x24b   : > { %2630 = vmatmul.bf16.gmra.mxu1 %v2422_v14  ;;  %v2059_v36 = vpop.f32.mrf.mxu3  ;;  %v12418_v14 = vld [vmem:[%s14411_s2 + $0x40] sm:$0xff]  ;;  %v12983_v58 = vpop.f32.mrf.mxu2 }
 0x24c   : > { %3717 = vmatpush.bf16.msrb.mxu2 %v12418_v14  ;;  %v2378_v61 = vmax.f32 %v2059_v36, 0.0  ;;  %14439 = vst [vmem:[#allocation27_spill] sm:$0xff] %v12983_v58 }
 0x250   : > { %v1826_v39 = vpop.f32.mrf.mxu1 }
 0x251   : > { %v2285_v7 = vmax.f32 %v1826_v39, 0.0  ;;  %v2423_v39 = vpack.c.bf16 %v2171_v57, %v2170_v15  ;;  %v12992_v59 = vpop.f32.mrf.mxu0 }
 0x253   : > { %v12973_v31 = vpack.c.bf16 %v2285_v7, %v2284_v51  ;;  %v2061_v51 = vpop.f32.mrf.mxu3  ;;  %v12994_v14 = vpop.f32.mrf.mxu2 }
 0x254   : > { %v2379_v7 = vmax.f32 %v2061_v51, 0.0  ;;  %11891 = vmatmul.msk.bf16.gmra.mxu2 %vm1130_vm0, %v12373_v5  ;;  %11912 = vmatmul.msk.bf16.gmra.mxu3 %vm1130_vm0, %v12394_v54  ;;  %14441 = vst [vmem:[#allocation29_spill] sm:$0xff] %v12994_v14  ;;  %v2172_v51 = vmax.f32 %v12936_v24, 0.0  ;;  %v12293_v5 = vld [vmem:[%s12567_s29 + $0x78] sm:$0xff] }
 0x256   : > { %v12988_v46 = vpack.c.bf16 %v2379_v7, %v2378_v61  ;;  %v2173_v61 = vmax.f32 %v12951_v38, 0.0 }
 0x257   : > { %11811 = vmatmul.msk.bf16.gmra.mxu0 %vm1130_vm0, %v12293_v5  ;;  %v2175_v5 = vmax.f32 %v12969_v27, 0.0 }
 0x258   : > { %v1829_v35 = vpop.f32.mrf.mxu1  ;;  %14440 = vst [vmem:[#allocation28_spill] sm:$0xff] %v12988_v46  ;;  %v2424_v42 = vpack.c.bf16 %v2173_v61, %v2172_v51 }
 0x259   : > { %v2286_v15 = vmax.f32 %v1829_v35, 0.0  ;;  %v13000_v7 = vpop.f32.mrf.mxu0 }
 0x25b   : > { %2635 = vmatmul.bf16.gmra.mxu1 %v2423_v39  ;;  %v2064_v28 = vpop.f32.mrf.mxu3  ;;  %v13003_v58 = vpop.f32.mrf.mxu2 }
 0x25c   : > { %v2380_v46 = vmax.f32 %v2064_v28, 0.0  ;;  %14442 = vst [vmem:[#allocation30_spill] sm:$0xff] %v13003_v58 }
 0x260   : > { %v1831_v36 = vpop.f32.mrf.mxu1 }
 0x261   : > { %v2287_v57 = vmax.f32 %v1831_v36, 0.0  ;;  %v12374_v36 = vld [vmem:[%s12567_s29 + $0x300] sm:$0xff]  ;;  %v13012_v24 = vpop.f32.mrf.mxu0 }
 0x263   : > { %v12996_v39 = vpack.c.bf16 %v2287_v57, %v2286_v15  ;;  %v2066_v14 = vpop.f32.mrf.mxu3  ;;  %v12395_v15 = vld [vmem:[%s12567_s29 + $0x3a8] sm:$0xff]  ;;  %v13014_v61 = vpop.f32.mrf.mxu2 }
 0x264   : > { %v2381_v35 = vmax.f32 %v2066_v14, 0.0  ;;  %11892 = vmatmul.msk.bf16.gmra.mxu2 %vm1130_vm0, %v12374_v36  ;;  %11913 = vmatmul.msk.bf16.gmra.mxu3 %vm1130_vm0, %v12395_v15  ;;  %14444 = vst [vmem:[#allocation32_spill] sm:$0xff] %v13014_v61  ;;  %v2174_v14 = vmax.f32 %v12957_v18, 0.0  ;;  %v12396_v61 = vld [vmem:[%s12567_s29 + $0x3b0] sm:$0xff] }
 0x266   : > { %v13008_v57 = vpack.c.bf16 %v2381_v35, %v2380_v46  ;;  %v12428_v46 = vld [vmem:[%s14411_s2 + $0x90] sm:$0xff] }
 0x267   : > { %4813 = vmatpush.bf16.msrb.mxu3 %v12428_v46 }
 0x268   : > { %v1834_v54 = vpop.f32.mrf.mxu1  ;;  %14443 = vst [vmem:[#allocation31_spill] sm:$0xff] %v13008_v57 }
 0x269   : > { %v2288_v28 = vmax.f32 %v1834_v54, 0.0  ;;  %v13023_v35 = vpop.f32.mrf.mxu0  ;;  %v12294_v54 = vld [vmem:[%s12567_s29 + $0x80] sm:$0xff] }
 0x26a   : > { %11812 = vmatmul.msk.bf16.gmra.mxu0 %vm1130_vm0, %v12294_v54 }
 0x26b   : > { %2640 = vmatmul.bf16.gmra.mxu1 %v2424_v42  ;;  %v2069_v51 = vpop.f32.mrf.mxu3  ;;  %v13029_v48 = vpop.f32.mrf.mxu2 }
 0x26c   : > { %v2382_v15 = vmax.f32 %v2069_v51, 0.0  ;;  %14445 = vst [vmem:[#allocation33_spill] sm:$0xff] %v13029_v48 }
 0x270   : > { %v1836_v38 = vpop.f32.mrf.mxu1 }
 0x271   : > { %v2289_v58 = vmax.f32 %v1836_v38, 0.0  ;;  %v2425_v38 = vpack.c.bf16 %v2175_v5, %v2174_v14  ;;  %v1566_v27 = vpop.f32.mrf.mxu0 }
 0x273   : > { %v13016_v42 = vpack.c.bf16 %v2289_v58, %v2288_v28  ;;  %v2071_v57 = vpop.f32.mrf.mxu3  ;;  %v12375_v28 = vld [vmem:[%s12567_s29 + $0x308] sm:$0xff] }
 0x274   : > { %v2383_v58 = vmax.f32 %v2071_v57, 0.0  ;;  %11893 = vmatmul.msk.bf16.gmra.mxu2 %vm1130_vm0, %v12375_v28  ;;  %11914 = vmatmul.msk.bf16.gmra.mxu3 %vm1130_vm0, %v12396_v61  ;;  %v12438_v57 = vld [vmem:[%s14411_s2 + $0xe0] sm:$0xff]  ;;  %v12295_v28 = vld [vmem:[%s12567_s29 + $0x88] sm:$0xff] }
 0x275   : > { %5909 = vmatpush.bf16.msrb.mxu0 %v12438_v57 }
 0x276   : > { %v13031_v18 = vpack.c.bf16 %v2383_v58, %v2382_v15  ;;  %v2177_v15 = vmax.f32 %v12992_v59, 0.0  ;;  %v13042_v58 = vpop.f32.mrf.mxu2 }
 0x277   : > { %14447 = vst [vmem:[#allocation35_spill] sm:$0xff] %v13042_v58 }
 0x278   : > { %v1839_v36 = vpop.f32.mrf.mxu1  ;;  %14446 = vst [vmem:[#allocation34_spill] sm:$0xff] %v13031_v18 }
 0x279   : > { %v2290_v51 = vmax.f32 %v1839_v36, 0.0  ;;  %v13044_v61 = vpop.f32.mrf.mxu0 }
 0x27a   : > { %11813 = vmatmul.msk.bf16.gmra.mxu0 %vm1130_vm0, %v12295_v28 }
 0x27b   : > { %2645 = vmatmul.bf16.gmra.mxu1 %v2425_v38  ;;  %v2074_v5 = vpop.f32.mrf.mxu3  ;;  %v2176_v38 = vmax.f32 %v12980_v9, 0.0 }
 0x27d   : > { %v2426_v18 = vpack.c.bf16 %v2177_v15, %v2176_v38  ;;  %v12457_v15 = vld [vmem:[%s14411_s2 + $0x178] sm:$0xff] }
 0x27e   : > { %v13054_v57 = vpop.f32.mrf.mxu2  ;;  %8102 = vmatpush.bf16.msra.mxu2 %v12457_v15 }
 0x27f   : > { %14449 = vst [vmem:[#allocation37_spill] sm:$0xff] %v13054_v57 }
 0x280   : > { %v1841_v46 = vpop.f32.mrf.mxu1 }
 0x281   : > { %v2291_v14 = vmax.f32 %v1841_v46, 0.0  ;;  %v2384_v46 = vmax.f32 %v2074_v5, 0.0  ;;  %v13052_v9 = vpop.f32.mrf.mxu0 }
 0x283   : > { %v13035_v54 = vpack.c.bf16 %v2291_v14, %v2290_v51  ;;  %v2076_v48 = vpop.f32.mrf.mxu3  ;;  %v12397_v14 = vld [vmem:[%s12567_s29 + $0x3b8] sm:$0xff] }
 0x284   : > { %v2385_v51 = vmax.f32 %v2076_v48, 0.0  ;;  %11915 = vmatmul.msk.bf16.gmra.mxu3 %vm1130_vm0, %v12397_v14  ;;  %v2178_v48 = vmax.f32 %v13000_v7, 0.0 }
 0x286   : > { %v13049_v63 = vpack.c.bf16 %v2385_v51, %v2384_v46  ;;  %v12296_v46 = vld [vmem:[%s12567_s29 + $0x90] sm:$0xff] }
 0x288   : > { %v1844_v36 = vpop.f32.mrf.mxu1  ;;  %14448 = vst [vmem:[#allocation36_spill] sm:$0xff] %v13049_v63 }
 0x289   : > { %v2292_v58 = vmax.f32 %v1844_v36, 0.0  ;;  %v13063_v28 = vpop.f32.mrf.mxu0 }
 0x28a   : > { %11814 = vmatmul.msk.bf16.gmra.mxu0 %vm1130_vm0, %v12296_v46 }
 0x28b   : > { %2650 = vmatmul.bf16.gmra.mxu1 %v2426_v18  ;;  %v2079_v5 = vpop.f32.mrf.mxu3  ;;  %v2179_v18 = vmax.f32 %v13012_v24, 0.0  ;;  %v12398_v24 = vld [vmem:[%s12567_s29 + $0x3c0] sm:$0xff] }
 0x28c   : > { %v2386_v14 = vmax.f32 %v2079_v5, 0.0 }
 0x28d   : > { %v2427_v36 = vpack.c.bf16 %v2179_v18, %v2178_v48 }
 0x290   : > { %v1846_v59 = vpop.f32.mrf.mxu1 }
 0x291   : > { %v2293_v22 = vmax.f32 %v1846_v59, 0.0  ;;  %v13073_v63 = vpop.f32.mrf.mxu0 }
 0x293   : > { %v13056_v38 = vpack.c.bf16 %v2293_v22, %v2292_v58  ;;  %v2081_v59 = vpop.f32.mrf.mxu3  ;;  %v13067_v22 = vpop.f32.mrf.mxu2 }
 0x294   : > { %14450 = vst [vmem:[#allocation38_spill] sm:$0xff] %v13067_v22  ;;  %v2387_v7 = vmax.f32 %v2081_v59, 0.0  ;;  %11916 = vmatmul.msk.bf16.gmra.mxu3 %vm1130_vm0, %v12398_v24  ;;  %v2180_v22 = vmax.f32 %v13023_v35, 0.0  ;;  %v2181_v59 = vmax.f32 %v1566_v27, 0.0 }
 0x296   : > { %v13070_v58 = vpack.c.bf16 %v2387_v7, %v2386_v14  ;;  %v12297_v14 = vld [vmem:[%s12567_s29 + $0x98] sm:$0xff]  ;;  %v2428_v24 = vpack.c.bf16 %v2181_v59, %v2180_v22 }
 0x298   : > { %v1849_v51 = vpop.f32.mrf.mxu1  ;;  %14451 = vst [vmem:[#allocation39_spill] sm:$0xff] %v13070_v58 }
 0x299   : > { %v2294_v57 = vmax.f32 %v1849_v51, 0.0 }
 0x29a   : > { %11815 = vmatmul.msk.bf16.gmra.mxu0 %vm1130_vm0, %v12297_v14 }
 0x29b   : > { %2655 = vmatmul.bf16.gmra.mxu1 %v2427_v36  ;;  %v2084_v48 = vpop.f32.mrf.mxu3  ;;  %v13077_v46 = vpop.f32.mrf.mxu2 }
 0x29c   : > { %14452 = vst [vmem:[#allocation40_spill] sm:$0xff] %v13077_v46  ;;  %v13080_v36 = vpop.f32.mrf.mxu0  ;;  %v2388_v58 = vmax.f32 %v2084_v48, 0.0  ;;  %v2183_v46 = vmax.f32 %v13052_v9, 0.0 }
 0x2a0   : > { %v1851_v15 = vpop.f32.mrf.mxu1 }
 0x2a1   : > { %v2295_v5 = vmax.f32 %v1851_v15, 0.0  ;;  %v12399_v15 = vld [vmem:[%s12567_s29 + $0x3c8] sm:$0xff] }
 0x2a3   : > { %v13075_v18 = vpack.c.bf16 %v2295_v5, %v2294_v57  ;;  %v2086_v50 = vpop.f32.mrf.mxu3  ;;  %v12427_v57 = vld [vmem:[%s14411_s2 + $0x88] sm:$0xff]  ;;  %v13090_v35 = vpop.f32.mrf.mxu2 }
 0x2a4   : > { %v2389_v51 = vmax.f32 %v2086_v50, 0.0  ;;  %4814 = vmatpush.bf16.msrb.mxu3 %v12427_v57  ;;  %14454 = vst [vmem:[#allocation42_spill] sm:$0xff] %v13090_v35  ;;  %v1581_v27 = vpop.f32.mrf.mxu0 }
 0x2a5   : > { %11917 = vmatmul.msk.bf16.gmra.mxu3 %vm1130_vm0, %v12399_v15 }
 0x2a6   : > { %v13088_v5 = vpack.c.bf16 %v2389_v51, %v2388_v58  ;;  %v12298_v58 = vld [vmem:[%s12567_s29 + $0xa0] sm:$0xff] }
 0x2a8   : > { %v2621_v7 = vpop.f32.mrf.mxu1  ;;  %14453 = vst [vmem:[#allocation41_spill] sm:$0xff] %v13088_v5 }
 0x2a9   : > { %v3261_v48 = vmax.f32 %v2621_v7, 0.0 }
 0x2aa   : > { %11816 = vmatmul.msk.bf16.gmra.mxu0 %vm1130_vm0, %v12298_v58  ;;  %v12299_v58 = vld [vmem:[%s12567_s29 + $0xa8] sm:$0xff] }
 0x2ab   : > { %2660 = vmatmul.bf16.gmra.mxu1 %v2428_v24  ;;  %v2089_v50 = vpop.f32.mrf.mxu3  ;;  %v2182_v24 = vmax.f32 %v13044_v61, 0.0  ;;  %v13098_v57 = vpop.f32.mrf.mxu2 }
 0x2ac   : > { %v13095_v13 = vpop.f32.mrf.mxu0  ;;  %14455 = vst [vmem:[#allocation43_spill] sm:$0xff] %v13098_v57  ;;  %v2390_v5 = vmax.f32 %v2089_v50, 0.0  ;;  %v2184_v50 = vmax.f32 %v13063_v28, 0.0 }
 0x2ad   : > { %v2429_v15 = vpack.c.bf16 %v2183_v46, %v2182_v24 }
 0x2b0   : > { %v2623_v22 = vpop.f32.mrf.mxu1 }
 0x2b1   : > { %v3262_v59 = vmax.f32 %v2623_v22, 0.0  ;;  %v12400_v22 = vld [vmem:[%s12567_s29 + $0x3d0] sm:$0xff] }
 0x2b3   : > { %v3517_v14 = vpack.c.bf16 %v3262_v59, %v3261_v48  ;;  %v2091_v35 = vpop.f32.mrf.mxu3  ;;  %v13105_v32 = vpop.f32.mrf.mxu2 }
 0x2b4   : > { %v2391_v7 = vmax.f32 %v2091_v35, 0.0  ;;  %v1586_v61 = vpop.f32.mrf.mxu0  ;;  %14457 = vst [vmem:[#allocation45_spill] sm:$0xff] %v13105_v32  ;;  %v12437_v35 = vld [vmem:[%s14411_s2 + $0xd8] sm:$0xff] }
 0x2b5   : > { %3718 = vmatmul.bf16.vlgmr.msrb.gmra.mxu2 %v3517_v14  ;;  %11918 = vmatmul.msk.bf16.gmra.mxu3 %vm1130_vm0, %v12400_v22 }
 0x2b6   : > { %v13102_v48 = vpack.c.bf16 %v2391_v7, %v2390_v5  ;;  %v2185_v5 = vmax.f32 %v13073_v63, 0.0  ;;  %5910 = vmatpush.bf16.msrb.mxu0 %v12437_v35 }
 0x2b8   : > { %v2626_v51 = vpop.f32.mrf.mxu1  ;;  %14456 = vst [vmem:[#allocation44_spill] sm:$0xff] %v13102_v48  ;;  %v2430_v7 = vpack.c.bf16 %v2185_v5, %v2184_v50  ;;  %v2186_v5 = vmax.f32 %v13080_v36, 0.0 }
 0x2b9   : > { %v3263_v59 = vmax.f32 %v2626_v51, 0.0 }
 0x2ba   : > { %11817 = vmatmul.msk.bf16.gmra.mxu0 %vm1130_vm0, %v12299_v58  ;;  %v2187_v58 = vmax.f32 %v1581_v27, 0.0 }
 0x2bb   : > { %2665 = vmatmul.bf16.gmra.mxu1 %v2429_v15  ;;  %v2094_v56 = vpop.f32.mrf.mxu3 }
 0x2bc   : > { %v13112_v24 = vpop.f32.mrf.mxu0  ;;  %v2392_v15 = vmax.f32 %v2094_v56, 0.0 }
 0x2c0   : > { %v2628_v9 = vpop.f32.mrf.mxu1 }
 0x2c1   : > { %v3264_v14 = vmax.f32 %v2628_v9, 0.0 }
 0x2c3   : > { %v3518_v46 = vpack.c.bf16 %v3264_v14, %v3263_v59  ;;  %v2096_v22 = vpop.f32.mrf.mxu3  ;;  %v12401_v59 = vld [vmem:[%s12567_s29 + $0x3d8] sm:$0xff]  ;;  %v13117_v14 = vpop.f32.mrf.mxu2 }
 0x2c4   : > { %v2393_v9 = vmax.f32 %v2096_v22, 0.0  ;;  %14458 = vst [vmem:[#allocation46_spill] sm:$0xff] %v13117_v14  ;;  %v1591_v63 = vpop.f32.mrf.mxu0  ;;  %v12300_v14 = vld [vmem:[%s12567_s29 + $0xb0] sm:$0xff] }
 0x2c5   : > { %3723 = vmatmul.bf16.gmra.mxu2 %v3518_v46  ;;  %11919 = vmatmul.msk.bf16.gmra.mxu3 %vm1130_vm0, %v12401_v59 }
 0x2c6   : > { %v13119_v28 = vpack.c.bf16 %v2393_v9, %v2392_v15 }
 0x2c8   : > { %v2631_v51 = vpop.f32.mrf.mxu1  ;;  %14459 = vst [vmem:[#allocation47_spill] sm:$0xff] %v13119_v28  ;;  %v2431_v28 = vpack.c.bf16 %v2187_v58, %v2186_v5  ;;  %v2189_v58 = vmax.f32 %v1586_v61, 0.0 }
 0x2c9   : > { %v3265_v35 = vmax.f32 %v2631_v51, 0.0 }
 0x2ca   : > { %11818 = vmatmul.msk.bf16.gmra.mxu0 %vm1130_vm0, %v12300_v14  ;;  %v2188_v14 = vmax.f32 %v13095_v13, 0.0  ;;  %v12403_v13 = vld [vmem:[%s12567_s29 + $0x3e8] sm:$0xff] }
 0x2cb   : > { %2670 = vmatmul.bf16.gmra.mxu1 %v2430_v7  ;;  %v2099_v56 = vpop.f32.mrf.mxu3  ;;  %v13123_v7 = vpop.f32.mrf.mxu2 }
 0x2cc   : > { %14460 = vst [vmem:[#allocation48_spill] sm:$0xff] %v13123_v7  ;;  %v13125_v22 = vpop.f32.mrf.mxu0  ;;  %v2394_v9 = vmax.f32 %v2099_v56, 0.0 }
 0x2d0   : > { %v2633_v46 = vpop.f32.mrf.mxu1 }
 0x2d1   : > { %v3266_v48 = vmax.f32 %v2633_v46, 0.0  ;;  %v12402_v46 = vld [vmem:[%s12567_s29 + $0x3e0] sm:$0xff] }
 0x2d3   : > { %v3519_v50 = vpack.c.bf16 %v3266_v48, %v3265_v35  ;;  %v2101_v59 = vpop.f32.mrf.mxu3  ;;  %v13133_v35 = vpop.f32.mrf.mxu2 }
 0x2d4   : > { %v2395_v51 = vmax.f32 %v2101_v59, 0.0  ;;  %v1596_v36 = vpop.f32.mrf.mxu0  ;;  %14462 = vst [vmem:[#allocation50_spill] sm:$0xff] %v13133_v35 }
 0x2d5   : > { %3728 = vmatmul.bf16.gmra.mxu2 %v3519_v50  ;;  %11920 = vmatmul.msk.bf16.gmra.mxu3 %vm1130_vm0, %v12402_v46 }
 0x2d6   : > { %v13130_v48 = vpack.c.bf16 %v2395_v51, %v2394_v9  ;;  %v12301_v9 = vld [vmem:[%s12567_s29 + $0xb8] sm:$0xff]  ;;  %v2432_v51 = vpack.c.bf16 %v2189_v58, %v2188_v14 }
 0x2d8   : > { %v2636_v15 = vpop.f32.mrf.mxu1  ;;  %14461 = vst [vmem:[#allocation49_spill] sm:$0xff] %v13130_v48 }
 0x2d9   : > { %v3267_v50 = vmax.f32 %v2636_v15, 0.0  ;;  %v12426_v15 = vld [vmem:[%s14411_s2 + $0x80] sm:$0xff] }
 0x2da   : > { %11819 = vmatmul.msk.bf16.gmra.mxu0 %vm1130_vm0, %v12301_v9  ;;  %4815 = vmatpush.bf16.msrb.mxu3 %v12426_v15 }
 0x2db   : > { %2675 = vmatmul.bf16.gmra.mxu1 %v2431_v28  ;;  %v13135_v56 = vpop.f32.mrf.mxu3 }
 0x2dc   : > { %14463 = vst [vmem:[#allocation51_spill] sm:$0xff] %v13135_v56  ;;  %v13138_v28 = vpop.f32.mrf.mxu0  ;;  %v2191_v56 = vmax.f32 %v1591_v63, 0.0 }
 0x2e0   : > { %v2638_v27 = vpop.f32.mrf.mxu1 }
 0x2e1   : > { %v3268_v7 = vmax.f32 %v2638_v27, 0.0  ;;  %v13147_v27 = vpop.f32.mrf.mxu2 }
 0x2e2   : > { %14465 = vst [vmem:[#allocation53_spill] sm:$0xff] %v13147_v27 }
 0x2e3   : > { %v3520_v5 = vpack.c.bf16 %v3268_v7, %v3267_v50  ;;  %v13141_v46 = vpop.f32.mrf.mxu3 }
 0x2e4   : > { %14464 = vst [vmem:[#allocation52_spill] sm:$0xff] %v13141_v46  ;;  %v1601_v61 = vpop.f32.mrf.mxu0  ;;  %v2190_v46 = vmax.f32 %v13112_v24, 0.0 }
 0x2e5   : > { %3733 = vmatmul.bf16.gmra.mxu2 %v3520_v5  ;;  %11921 = vmatmul.msk.bf16.gmra.mxu3 %vm1130_vm0, %v12403_v13 }
 0x2e6   : > { %v2433_v27 = vpack.c.bf16 %v2191_v56, %v2190_v46  ;;  %v2192_v56 = vmax.f32 %v13125_v22, 0.0  ;;  %v2193_v46 = vmax.f32 %v1596_v36, 0.0  ;;  %v12448_v22 = vld [vmem:[%s14411_s2 + $0x130] sm:$0xff]  ;;  %v12405_v36 = vld [vmem:[%s12567_s29 + $0x3f8] sm:$0xff] }
 0x2e7   : > { %7005 = vmatpush.bf16.msra.mxu1 %v12448_v22 }
 0x2e8   : > { %v2641_v59 = vpop.f32.mrf.mxu1 }
 0x2e9   : > { %v3269_v50 = vmax.f32 %v2641_v59, 0.0  ;;  %v13153_v9 = vpop.f32.mrf.mxu2  ;;  %v12404_v59 = vld [vmem:[%s12567_s29 + $0x3f0] sm:$0xff] }
 0x2ea   : > { %14467 = vst [vmem:[#allocation55_spill] sm:$0xff] %v13153_v9  ;;  %v12304_v9 = vld [vmem:[%s12567_s29 + $0xd0] sm:$0xff] }
 0x2eb   : > { %2680 = vmatmul.bf16.gmra.mxu1 %v2432_v51  ;;  %v13151_v14 = vpop.f32.mrf.mxu3  ;;  %v12302_v51 = vld [vmem:[%s12567_s29 + $0xc0] sm:$0xff] }
 0x2ec   : > { %14466 = vst [vmem:[#allocation54_spill] sm:$0xff] %v13151_v14  ;;  %v13156_v48 = vpop.f32.mrf.mxu0  ;;  %11820 = vmatmul.msk.bf16.gmra.mxu0 %vm1130_vm0, %v12302_v51 }
 0x2f0   : > { %v2643_v7 = vpop.f32.mrf.mxu1 }
 0x2f1   : > { %v3270_v5 = vmax.f32 %v2643_v7, 0.0  ;;  %v13163_v7 = vpop.f32.mrf.mxu2 }
 0x2f2   : > { %14469 = vst [vmem:[#allocation57_spill] sm:$0xff] %v13163_v7 }
 0x2f3   : > { %v3521_v58 = vpack.c.bf16 %v3270_v5, %v3269_v50  ;;  %v13159_v13 = vpop.f32.mrf.mxu3 }
 0x2f4   : > { %14468 = vst [vmem:[#allocation56_spill] sm:$0xff] %v13159_v13  ;;  %v1606_v50 = vpop.f32.mrf.mxu0 }
 0x2f5   : > { %3738 = vmatmul.bf16.gmra.mxu2 %v3521_v58  ;;  %11922 = vmatmul.msk.bf16.gmra.mxu3 %vm1130_vm0, %v12404_v59  ;;  %v12303_v59 = vld [vmem:[%s12567_s29 + $0xc8] sm:$0xff] }
 0x2f8   : > { %v2646_v15 = vpop.f32.mrf.mxu1 }
 0x2f9   : > { %v3271_v63 = vmax.f32 %v2646_v15, 0.0  ;;  %v13175_v13 = vpop.f32.mrf.mxu2 }
 0x2fa   : > { %14471 = vst [vmem:[#allocation59_spill] sm:$0xff] %v13175_v13 }
 0x2fb   : > { %2685 = vmatmul.bf16.gmra.mxu1 %v2433_v27  ;;  %v13166_v14 = vpop.f32.mrf.mxu3  ;;  %v12436_v27 = vld [vmem:[%s14411_s2 + $0xd0] sm:$0xff] }
 0x2fc   : > { %14470 = vst [vmem:[#allocation58_spill] sm:$0xff] %v13166_v14  ;;  %v13172_v51 = vpop.f32.mrf.mxu0  ;;  %5911 = vmatpush.bf16.msrb.mxu0 %v12436_v27 }
 0x2fd   : > { %11821 = vmatmul.msk.bf16.gmra.mxu0 %vm1130_vm0, %v12303_v59  ;;  %v2195_v59 = vmax.f32 %v1601_v61, 0.0 }
 0x300   : > { %v2648_v24 = vpop.f32.mrf.mxu1 }
 0x301   : > { %v3272_v5 = vmax.f32 %v2648_v24, 0.0  ;;  %v2434_v24 = vpack.c.bf16 %v2193_v46, %v2192_v56  ;;  %v13185_v13 = vpop.f32.mrf.mxu2  ;;  %v2194_v46 = vmax.f32 %v13138_v28, 0.0 }
 0x302   : > { %14473 = vst [vmem:[#allocation61_spill] sm:$0xff] %v13185_v13  ;;  %v2197_v13 = vmax.f32 %v1606_v50, 0.0 }
 0x303   : > { %v3522_v58 = vpack.c.bf16 %v3272_v5, %v3271_v63  ;;  %v13182_v63 = vpop.f32.mrf.mxu3  ;;  %v2435_v22 = vpack.c.bf16 %v2195_v59, %v2194_v46  ;;  %v12465_v46 = vld [vmem:[%s14411_s2 + $0x1b8] sm:$0xff] }
 0x304   : > { %14472 = vst [vmem:[#allocation60_spill] sm:$0xff] %v13182_v63  ;;  %v1611_v5 = vpop.f32.mrf.mxu0  ;;  %9200 = vmatpush.bf16.msra.mxu3 %v12465_v46 }
 0x305   : > { %3743 = vmatmul.bf16.gmra.mxu2 %v3522_v58  ;;  %11923 = vmatmul.msk.bf16.gmra.mxu3 %vm1130_vm0, %v12405_v36 }
 0x308   : > { %v2651_v15 = vpop.f32.mrf.mxu1 }
 0x309   : > { %v3273_v27 = vmax.f32 %v2651_v15, 0.0  ;;  %v13194_v15 = vpop.f32.mrf.mxu2 }
 0x30a   : > { %14475 = vst [vmem:[#allocation63_spill] sm:$0xff] %v13194_v15  ;;  %v2199_v15 = vmax.f32 %v1611_v5, 0.0 }
 0x30b   : > { %2690 = vmatmul.bf16.gmra.mxu1 %v2434_v24  ;;  %v13190_v7 = vpop.f32.mrf.mxu3 }
 0x30c   : > { %v13188_v24 = vpop.f32.mrf.mxu0  ;;  %14474 = vst [vmem:[#allocation62_spill] sm:$0xff] %v13190_v7 }
 0x30d   : > { %11822 = vmatmul.msk.bf16.gmra.mxu0 %vm1130_vm0, %v12304_v9  ;;  %v2200_v32 = vmax.f32 %v13188_v24, 0.0 }
 0x310   : > { %v2653_v58 = vpop.f32.mrf.mxu1 }
 0x311   : > { %v3274_v14 = vmax.f32 %v2653_v58, 0.0  ;;  %v13202_v9 = vpop.f32.mrf.mxu2 }
 0x312   : > { %14477 = vst [vmem:[#allocation65_spill] sm:$0xff] %v13202_v9  ;;  %v2198_v9 = vmax.f32 %v13172_v51, 0.0 }
 0x313   : > { %v3523_v56 = vpack.c.bf16 %v3274_v14, %v3273_v27  ;;  %v13196_v28 = vpop.f32.mrf.mxu3 }
 0x314   : > { %v1616_v36 = vpop.f32.mrf.mxu0  ;;  %14476 = vst [vmem:[#allocation64_spill] sm:$0xff] %v13196_v28 }
 0x315   : > { %3748 = vmatmul.bf16.gmra.mxu2 %v3523_v56  ;;  %v2196_v56 = vmax.f32 %v13156_v48, 0.0  ;;  %v2201_v57 = vmax.f32 %v1616_v36, 0.0 }
 0x318   : > { %v2656_v63 = vpop.f32.mrf.mxu1 }
 0x319   : > { %v3275_v14 = vmax.f32 %v2656_v63, 0.0  ;;  %v2436_v63 = vpack.c.bf16 %v2197_v13, %v2196_v56  ;;  %v13210_v50 = vpop.f32.mrf.mxu2  ;;  %v12306_v13 = vld [vmem:[%s12567_s29 + $0xe0] sm:$0xff] }
 0x31a   : > { %14479 = vst [vmem:[#allocation67_spill] sm:$0xff] %v13210_v50 }
 0x31b   : > { %2695 = vmatmul.bf16.gmra.mxu1 %v2435_v22  ;;  %v12305_v22 = vld [vmem:[%s12567_s29 + $0xd8] sm:$0xff] }
 0x31c   : > { %v13204_v59 = vpop.f32.mrf.mxu0 }
 0x31d   : > { %11823 = vmatmul.msk.bf16.gmra.mxu0 %vm1130_vm0, %v12305_v22 }
 0x320   : > { %v2658_v58 = vpop.f32.mrf.mxu1 }
 0x321   : > { %v3276_v27 = vmax.f32 %v2658_v58, 0.0  ;;  %v13208_v58 = vpop.f32.mrf.mxu3 }
 0x322   : > { %14478 = vst [vmem:[#allocation66_spill] sm:$0xff] %v13208_v58 }
 0x323   : > { %v3524_v61 = vpack.c.bf16 %v3276_v27, %v3275_v14 }
 0x324   : > { %v1621_v48 = vpop.f32.mrf.mxu0 }
 0x325   : > { %3753 = vmatmul.bf16.gmra.mxu2 %v3524_v61 }
 0x328   : > { %v2661_v7 = vpop.f32.mrf.mxu1 }
 0x329   : > { %v3277_v27 = vmax.f32 %v2661_v7, 0.0  ;;  %v13213_v46 = vpop.f32.mrf.mxu3 }
 0x32a   : > { %14480 = vst [vmem:[#allocation68_spill] sm:$0xff] %v13213_v46 }
 0x32b   : > { %2700 = vmatmul.bf16.gmra.mxu1 %v2436_v63  ;;  %v2437_v63 = vpack.c.bf16 %v2199_v15, %v2198_v9  ;;  %v12435_v15 = vld [vmem:[%s14411_s2 + $0xc8] sm:$0xff] }
 0x32c   : > { %v13215_v35 = vpop.f32.mrf.mxu0  ;;  %5912 = vmatpush.bf16.msrb.mxu0 %v12435_v15 }
 0x32d   : > { %11824 = vmatmul.msk.bf16.gmra.mxu0 %vm1130_vm0, %v12306_v13  ;;  %v12307_v13 = vld [vmem:[%s12567_s29 + $0xe8] sm:$0xff] }
 0x330   : > { %v2663_v14 = vpop.f32.mrf.mxu1 }
 0x331   : > { %v3278_v61 = vmax.f32 %v2663_v14, 0.0  ;;  %v13221_v7 = vpop.f32.mrf.mxu3 }
 0x332   : > { %14481 = vst [vmem:[#allocation69_spill] sm:$0xff] %v13221_v7  ;;  %v2202_v7 = vmax.f32 %v13204_v59, 0.0 }
 0x333   : > { %v3525_v28 = vpack.c.bf16 %v3278_v61, %v3277_v27 }
 0x334   : > { %v13219_v58 = vpop.f32.mrf.mxu0 }
 0x335   : > { %3758 = vmatmul.bf16.gmra.mxu2 %v3525_v28 }
 0x338   : > { %v2666_v56 = vpop.f32.mrf.mxu1  ;;  %v3719_v22 = vpop.f32.mrf.mxu2 }
 0x339   : > { %v3279_v5 = vmax.f32 %v2666_v56, 0.0  ;;  %v4359_v28 = vmax.f32 %v3719_v22, 0.0  ;;  %v2438_v22 = vpack.c.bf16 %v2201_v57, %v2200_v32  ;;  %v2203_v32 = vmax.f32 %v1621_v48, 0.0 }
 0x33b   : > { %2705 = vmatmul.bf16.gmra.mxu1 %v2437_v63  ;;  %v2439_v10 = vpack.c.bf16 %v2203_v32, %v2202_v7  ;;  %v12309_v32 = vld [vmem:[%s12567_s29 + $0xf8] sm:$0xff] }
 0x33c   : > { %v13227_v9 = vpop.f32.mrf.mxu0 }
 0x33d   : > { %11825 = vmatmul.msk.bf16.gmra.mxu0 %vm1130_vm0, %v12307_v13  ;;  %v12308_v13 = vld [vmem:[%s12567_s29 + $0xf0] sm:$0xff] }
 0x340   : > { %v2668_v14 = vpop.f32.mrf.mxu1  ;;  %v3721_v51 = vpop.f32.mrf.mxu2 }
 0x341   : > { %v3280_v27 = vmax.f32 %v2668_v14, 0.0  ;;  %v4360_v61 = vmax.f32 %v3721_v51, 0.0  ;;  %v13230_v14 = vpop.f32.mrf.mxu3 }
 0x342   : > { %14482 = vst [vmem:[#allocation70_spill] sm:$0xff] %v13230_v14 }
 0x343   : > { %v3526_v46 = vpack.c.bf16 %v3280_v27, %v3279_v5  ;;  %v4615_v50 = vpack.c.bf16 %v4360_v61, %v4359_v28 }
 0x344   : > { %v1631_v24 = vpop.f32.mrf.mxu0 }
 0x345   : > { %3763 = vmatmul.bf16.gmra.mxu2 %v3526_v46  ;;  %4816 = vmatmul.bf16.vlgmr.msrb.gmra.mxu3 %v4615_v50 }
 0x348   : > { %v2671_v63 = vpop.f32.mrf.mxu1  ;;  %v3724_v56 = vpop.f32.mrf.mxu2 }
 0x349   : > { %v3281_v46 = vmax.f32 %v2671_v63, 0.0  ;;  %v4361_v51 = vmax.f32 %v3724_v56, 0.0  ;;  %v13233_v15 = vpop.f32.mrf.mxu3 }
 0x34a   : > { %14483 = vst [vmem:[#allocation71_spill] sm:$0xff] %v13233_v15 }
 0x34b   : > { %2710 = vmatmul.bf16.gmra.mxu1 %v2438_v22 }
 0x34c   : > { %v13236_v57 = vpop.f32.mrf.mxu0 }
 0x34d   : > { %11826 = vmatmul.msk.bf16.gmra.mxu0 %vm1130_vm0, %v12308_v13 }
 0x350   : > { %v2673_v36 = vpop.f32.mrf.mxu1  ;;  %v3726_v50 = vpop.f32.mrf.mxu2 }
 0x351   : > { %v3282_v5 = vmax.f32 %v2673_v36, 0.0  ;;  %v4362_v28 = vmax.f32 %v3726_v50, 0.0  ;;  %v13240_v63 = vpop.f32.mrf.mxu3 }
 0x352   : > { %14484 = vst [vmem:[#allocation72_spill] sm:$0xff] %v13240_v63 }
 0x353   : > { %v3527_v27 = vpack.c.bf16 %v3282_v5, %v3281_v46  ;;  %v4616_v61 = vpack.c.bf16 %v4362_v28, %v4361_v51 }
 0x354   : > { %v1636_v56 = vpop.f32.mrf.mxu0 }
 0x355   : > { %3768 = vmatmul.bf16.gmra.mxu2 %v3527_v27  ;;  %4821 = vmatmul.bf16.gmra.mxu3 %v4616_v61  ;;  %v2204_v27 = vmax.f32 %v13215_v35, 0.0  ;;  %v2205_v61 = vmax.f32 %v13219_v58, 0.0 }
 0x357   : > { %v2440_v15 = vpack.c.bf16 %v2205_v61, %v2204_v27 }
 0x358   : > { %v2676_v22 = vpop.f32.mrf.mxu1  ;;  %v3729_v14 = vpop.f32.mrf.mxu2 }
 0x359   : > { %v3283_v46 = vmax.f32 %v2676_v22, 0.0  ;;  %v4363_v59 = vmax.f32 %v3729_v14, 0.0 }
 0x35b   : > { %2715 = vmatmul.bf16.gmra.mxu1 %v2439_v10  ;;  %v13246_v10 = vpop.f32.mrf.mxu3 }
 0x35c   : > { %v13244_v7 = vpop.f32.mrf.mxu0  ;;  %14485 = vst [vmem:[#allocation73_spill] sm:$0xff] %v13246_v10 }
 0x35d   : > { %11827 = vmatmul.msk.bf16.gmra.mxu0 %vm1130_vm0, %v12309_v32 }
 0x360   : > { %v2678_v36 = vpop.f32.mrf.mxu1  ;;  %v3731_v50 = vpop.f32.mrf.mxu2 }
 0x361   : > { %v3284_v48 = vmax.f32 %v2678_v36, 0.0  ;;  %v4364_v51 = vmax.f32 %v3731_v50, 0.0 }
 0x363   : > { %v3528_v5 = vpack.c.bf16 %v3284_v48, %v3283_v46  ;;  %v4617_v28 = vpack.c.bf16 %v4364_v51, %v4363_v59  ;;  %v13250_v59 = vpop.f32.mrf.mxu3 }
 0x364   : > { %v1641_v14 = vpop.f32.mrf.mxu0  ;;  %14486 = vst [vmem:[#allocation74_spill] sm:$0xff] %v13250_v59 }
 0x365   : > { %3773 = vmatmul.bf16.gmra.mxu2 %v3528_v5  ;;  %4826 = vmatmul.bf16.gmra.mxu3 %v4617_v28  ;;  %v2206_v5 = vmax.f32 %v13227_v9, 0.0  ;;  %v2207_v28 = vmax.f32 %v1631_v24, 0.0 }
 0x367   : > { %v2441_v10 = vpack.c.bf16 %v2207_v28, %v2206_v5 }
 0x368   : > { %v2681_v13 = vpop.f32.mrf.mxu1  ;;  %v3734_v63 = vpop.f32.mrf.mxu2 }
 0x369   : > { %v3285_v35 = vmax.f32 %v2681_v13, 0.0  ;;  %v4365_v50 = vmax.f32 %v3734_v63, 0.0 }
 0x36b   : > { %2720 = vmatmul.bf16.gmra.mxu1 %v2440_v15  ;;  %v12310_v15 = vld [vmem:[%s12567_s29 + $0x100] sm:$0xff]  ;;  %v13257_v63 = vpop.f32.mrf.mxu3 }
 0x36c   : > { %v13253_v27 = vpop.f32.mrf.mxu0  ;;  %14487 = vst [vmem:[#allocation75_spill] sm:$0xff] %v13257_v63 }
 0x36d   : > { %11828 = vmatmul.msk.bf16.gmra.mxu0 %vm1130_vm0, %v12310_v15 }
 0x370   : > { %v2683_v22 = vpop.f32.mrf.mxu1  ;;  %v3736_v36 = vpop.f32.mrf.mxu2 }
 0x371   : > { %v3286_v58 = vmax.f32 %v2683_v22, 0.0  ;;  %v4366_v46 = vmax.f32 %v3736_v36, 0.0 }
 0x373   : > { %v3529_v48 = vpack.c.bf16 %v3286_v58, %v3285_v35  ;;  %v4618_v51 = vpack.c.bf16 %v4366_v46, %v4365_v50  ;;  %v13260_v5 = vpop.f32.mrf.mxu3 }
 0x374   : > { %v1646_v24 = vpop.f32.mrf.mxu0  ;;  %14488 = vst [vmem:[#allocation76_spill] sm:$0xff] %v13260_v5 }
 0x375   : > { %3778 = vmatmul.bf16.gmra.mxu2 %v3529_v48  ;;  %4831 = vmatmul.bf16.gmra.mxu3 %v4618_v51  ;;  %v2208_v48 = vmax.f32 %v13236_v57, 0.0  ;;  %v2209_v51 = vmax.f32 %v1636_v56, 0.0 }
 0x377   : > { %v2442_v15 = vpack.c.bf16 %v2209_v51, %v2208_v48  ;;  %v2211_v48 = vmax.f32 %v1641_v14, 0.0 }
 0x378   : > { %v2686_v61 = vpop.f32.mrf.mxu1  ;;  %v3739_v32 = vpop.f32.mrf.mxu2 }
 0x379   : > { %v3287_v36 = vmax.f32 %v2686_v61, 0.0  ;;  %v4367_v35 = vmax.f32 %v3739_v32, 0.0  ;;  %v12434_v61 = vld [vmem:[%s14411_s2 + $0xc0] sm:$0xff] }
 0x37a   : > { %5913 = vmatpush.bf16.msrb.mxu0 %v12434_v61 }
 0x37b   : > { %2725 = vmatmul.bf16.gmra.mxu1 %v2441_v10 }
 0x37c   : > { %v1649_v32 = vpop.f32.mrf.mxu0 }
 0x380   : > { %v2688_v13 = vpop.f32.mrf.mxu1  ;;  %v3741_v22 = vpop.f32.mrf.mxu2 }
 0x381   : > { %v3288_v50 = vmax.f32 %v2688_v13, 0.0  ;;  %v4368_v9 = vmax.f32 %v3741_v22, 0.0  ;;  %v13265_v13 = vpop.f32.mrf.mxu3 }
 0x382   : > { %14489 = vst [vmem:[#allocation77_spill] sm:$0xff] %v13265_v13 }
 0x383   : > { %v3530_v58 = vpack.c.bf16 %v3288_v50, %v3287_v36  ;;  %v4619_v46 = vpack.c.bf16 %v4368_v9, %v4367_v35 }
 0x384   : > { %v1651_v51 = vpop.f32.mrf.mxu0 }
 0x385   : > { %3783 = vmatmul.bf16.gmra.mxu2 %v3530_v58  ;;  %4836 = vmatmul.bf16.gmra.mxu3 %v4619_v46  ;;  %v2210_v46 = vmax.f32 %v13244_v7, 0.0 }
 0x387   : > { %v2443_v5 = vpack.c.bf16 %v2211_v48, %v2210_v46 }
 0x388   : > { %v2691_v28 = vpop.f32.mrf.mxu1  ;;  %v3744_v10 = vpop.f32.mrf.mxu2 }
 0x389   : > { %v3289_v57 = vmax.f32 %v2691_v28, 0.0  ;;  %v4369_v56 = vmax.f32 %v3744_v10, 0.0  ;;  %v13271_v28 = vpop.f32.mrf.mxu3 }
 0x38a   : > { %14490 = vst [vmem:[#allocation78_spill] sm:$0xff] %v13271_v28 }
 0x38b   : > { %2730 = vmatmul.bf16.gmra.mxu1 %v2442_v15  ;;  %v12456_v15 = vld [vmem:[%s14411_s2 + $0x170] sm:$0xff] }
 0x38c   : > { %8103 = vmatpush.bf16.msra.mxu2 %v12456_v15  ;;  %v1654_v10 = vpop.f32.mrf.mxu0  ;;  %v2213_v15 = vmax.f32 %v1646_v24, 0.0  ;;  %v2215_v24 = vmax.f32 %v1651_v51, 0.0 }
 0x38d   : > { %v2216_v51 = vmax.f32 %v1654_v10, 0.0 }
 0x390   : > { %v2693_v22 = vpop.f32.mrf.mxu1  ;;  %v3746_v36 = vpop.f32.mrf.mxu2 }
 0x391   : > { %v3290_v35 = vmax.f32 %v2693_v22, 0.0  ;;  %v4370_v50 = vmax.f32 %v3746_v36, 0.0 }
 0x393   : > { %v3531_v9 = vpack.c.bf16 %v3290_v35, %v3289_v57  ;;  %v4620_v58 = vpack.c.bf16 %v4370_v50, %v4369_v56  ;;  %v13273_v35 = vpop.f32.mrf.mxu3 }
 0x394   : > { %14491 = vst [vmem:[#allocation79_spill] sm:$0xff] %v13273_v35 }
 0x395   : > { %3788 = vmatmul.bf16.gmra.mxu2 %v3531_v9  ;;  %4841 = vmatmul.bf16.gmra.mxu3 %v4620_v58  ;;  %v2212_v58 = vmax.f32 %v13253_v27, 0.0  ;;  %v2214_v27 = vmax.f32 %v1649_v32, 0.0 }
 0x397   : > { %v2444_v28 = vpack.c.bf16 %v2213_v15, %v2212_v58 }
 0x398   : > { %v2696_v61 = vpop.f32.mrf.mxu1  ;;  %v3749_v13 = vpop.f32.mrf.mxu2 }
 0x399   : > { %v3291_v57 = vmax.f32 %v2696_v61, 0.0  ;;  %v4371_v7 = vmax.f32 %v3749_v13, 0.0 }
 0x39b   : > { %2735 = vmatmul.bf16.gmra.mxu1 %v2443_v5  ;;  %v1656_v5 = vpop.f32.mrf.mxu0  ;;  %v13276_v63 = vpop.f32.mrf.mxu3 }
 0x39c   : > { %14492 = vst [vmem:[#allocation80_spill] sm:$0xff] %v13276_v63 }
 0x3a0   : > { %v2698_v22 = vpop.f32.mrf.mxu1  ;;  %v3751_v36 = vpop.f32.mrf.mxu2 }
 0x3a1   : > { %v3292_v14 = vmax.f32 %v2698_v22, 0.0  ;;  %v4372_v56 = vmax.f32 %v3751_v36, 0.0 }
 0x3a3   : > { %v3532_v50 = vpack.c.bf16 %v3292_v14, %v3291_v57  ;;  %v4621_v9 = vpack.c.bf16 %v4372_v56, %v4371_v7  ;;  %v1659_v14 = vpop.f32.mrf.mxu0  ;;  %v13278_v56 = vpop.f32.mrf.mxu3 }
 0x3a4   : > { %14493 = vst [vmem:[#allocation81_spill] sm:$0xff] %v13278_v56 }
 0x3a5   : > { %3793 = vmatmul.bf16.gmra.mxu2 %v3532_v50  ;;  %4846 = vmatmul.bf16.gmra.mxu3 %v4621_v9 }
 0x3a8   : > { %v2701_v46 = vpop.f32.mrf.mxu1  ;;  %v3754_v48 = vpop.f32.mrf.mxu2 }
 0x3a9   : > { %v3293_v22 = vmax.f32 %v2701_v46, 0.0  ;;  %v4373_v36 = vmax.f32 %v3754_v48, 0.0 }
 0x3ab   : > { %2740 = vmatmul.bf16.gmra.mxu1 %v2444_v28  ;;  %v2445_v28 = vpack.c.bf16 %v2215_v24, %v2214_v27  ;;  %v1661_v58 = vpop.f32.mrf.mxu0  ;;  %v13280_v46 = vpop.f32.mrf.mxu3 }
 0x3ac   : > { %14494 = vst [vmem:[#allocation82_spill] sm:$0xff] %v13280_v46 }
 0x3b0   : > { %v2703_v61 = vpop.f32.mrf.mxu1  ;;  %v3756_v13 = vpop.f32.mrf.mxu2 }
 0x3b1   : > { %v3294_v59 = vmax.f32 %v2703_v61, 0.0  ;;  %v4374_v35 = vmax.f32 %v3756_v13, 0.0 }
 0x3b3   : > { %v3533_v57 = vpack.c.bf16 %v3294_v59, %v3293_v22  ;;  %v4622_v7 = vpack.c.bf16 %v4374_v35, %v4373_v36  ;;  %v2217_v22 = vmax.f32 %v1656_v5, 0.0  ;;  %v1664_v36 = vpop.f32.mrf.mxu0 }
 0x3b5   : > { %3798 = vmatmul.bf16.gmra.mxu2 %v3533_v57  ;;  %4851 = vmatmul.bf16.gmra.mxu3 %v4622_v7  ;;  %v2446_v27 = vpack.c.bf16 %v2217_v22, %v2216_v51  ;;  %v2218_v22 = vmax.f32 %v1659_v14, 0.0 }
 0x3b8   : > { %v2706_v50 = vpop.f32.mrf.mxu1  ;;  %v3759_v9 = vpop.f32.mrf.mxu2 }
 0x3b9   : > { %v3295_v48 = vmax.f32 %v2706_v50, 0.0  ;;  %v4375_v61 = vmax.f32 %v3759_v9, 0.0 }
 0x3bb   : > { %2745 = vmatmul.bf16.gmra.mxu1 %v2445_v28  ;;  %v12473_v28 = vld [vmem:[%s14412_s3 + $0x38] sm:$0xff] }
 0x3bc   : > { %10297 = vmatpush.bf16.msra.mxu0 %v12473_v28 }
 0x3c0   : > { %v2708_v15 = vpop.f32.mrf.mxu1  ;;  %v3761_v63 = vpop.f32.mrf.mxu2 }
 0x3c1   : > { %v3296_v59 = vmax.f32 %v2708_v15, 0.0  ;;  %v4376_v35 = vmax.f32 %v3761_v63, 0.0 }
 0x3c3   : > { %v3534_v13 = vpack.c.bf16 %v3296_v59, %v3295_v48  ;;  %v4623_v32 = vpack.c.bf16 %v4376_v35, %v4375_v61  ;;  %v1666_v61 = vpop.f32.mrf.mxu0 }
 0x3c5   : > { %3803 = vmatmul.bf16.gmra.mxu2 %v3534_v13  ;;  %4856 = vmatmul.bf16.gmra.mxu3 %v4623_v32 }
 0x3c8   : > { %v2711_v57 = vpop.f32.mrf.mxu1  ;;  %v3764_v7 = vpop.f32.mrf.mxu2 }
 0x3c9   : > { %v4817_v24 = vpop.f32.mrf.mxu3  ;;  %v3297_v63 = vmax.f32 %v2711_v57, 0.0  ;;  %v4377_v15 = vmax.f32 %v3764_v7, 0.0 }
 0x3ca   : > { %v5457_v59 = vmax.f32 %v4817_v24, 0.0 }
 0x3cb   : > { %2750 = vmatmul.bf16.gmra.mxu1 %v2446_v27  ;;  %v2219_v27 = vmax.f32 %v1661_v58, 0.0  ;;  %v1669_v57 = vpop.f32.mrf.mxu0 }
 0x3cd   : > { %v2447_v56 = vpack.c.bf16 %v2219_v27, %v2218_v22 }
 0x3d0   : > { %v2713_v50 = vpop.f32.mrf.mxu1  ;;  %v3766_v9 = vpop.f32.mrf.mxu2 }
 0x3d1   : > { %v3298_v48 = vmax.f32 %v2713_v50, 0.0  ;;  %v4378_v10 = vmax.f32 %v3766_v9, 0.0  ;;  %v4819_v5 = vpop.f32.mrf.mxu3 }
 0x3d2   : > { %v5458_v35 = vmax.f32 %v4819_v5, 0.0 }
 0x3d3   : > { %v3535_v13 = vpack.c.bf16 %v3298_v48, %v3297_v63  ;;  %v4624_v32 = vpack.c.bf16 %v4378_v10, %v4377_v15 }
 0x3d4   : > { %v5713_v51 = vpack.c.bf16 %v5458_v35, %v5457_v59  ;;  %v2220_v59 = vmax.f32 %v1664_v36, 0.0  ;;  %v2221_v35 = vmax.f32 %v1666_v61, 0.0 }
 0x3d5   : > { %3808 = vmatmul.bf16.gmra.mxu2 %v3535_v13  ;;  %4861 = vmatmul.bf16.gmra.mxu3 %v4624_v32  ;;  %v1671_v13 = vpop.f32.mrf.mxu0 }
 0x3d6   : > { %5914 = vmatmul.bf16.vlgmr.msrb.gmra.mxu0 %v5713_v51  ;;  %v2448_v51 = vpack.c.bf16 %v2221_v35, %v2220_v59 }
 0x3d8   : > { %v2716_v46 = vpop.f32.mrf.mxu1  ;;  %v3769_v28 = vpop.f32.mrf.mxu2 }
 0x3d9   : > { %v4822_v52 = vpop.f32.mrf.mxu3  ;;  %v3299_v9 = vmax.f32 %v2716_v46, 0.0  ;;  %v4379_v34 = vmax.f32 %v3769_v28, 0.0 }
 0x3da   : > { %v5459_v15 = vmax.f32 %v4822_v52, 0.0 }
 0x3db   : > { %2755 = vmatmul.bf16.gmra.mxu1 %v2447_v56 }
 0x3dd   : > { %v1674_v46 = vpop.f32.mrf.mxu0 }
 0x3e0   : > { %v2718_v7 = vpop.f32.mrf.mxu1  ;;  %v3771_v50 = vpop.f32.mrf.mxu2 }
 0x3e1   : > { %v3300_v24 = vmax.f32 %v2718_v7, 0.0  ;;  %v4380_v5 = vmax.f32 %v3771_v50, 0.0  ;;  %v4824_v63 = vpop.f32.mrf.mxu3 }
 0x3e2   : > { %v5460_v48 = vmax.f32 %v4824_v63, 0.0 }
 0x3e3   : > { %v3536_v14 = vpack.c.bf16 %v3300_v24, %v3299_v9  ;;  %v4625_v58 = vpack.c.bf16 %v4380_v5, %v4379_v34 }
 0x3e4   : > { %v5714_v10 = vpack.c.bf16 %v5460_v48, %v5459_v15  ;;  %v2222_v15 = vmax.f32 %v1669_v57, 0.0  ;;  %v2223_v48 = vmax.f32 %v1671_v13, 0.0 }
 0x3e5   : > { %3813 = vmatmul.bf16.gmra.mxu2 %v3536_v14  ;;  %4866 = vmatmul.bf16.gmra.mxu3 %v4625_v58  ;;  %v1676_v35 = vpop.f32.mrf.mxu0 }
 0x3e6   : > { %5919 = vmatmul.bf16.gmra.mxu0 %v5714_v10  ;;  %v2449_v10 = vpack.c.bf16 %v2223_v48, %v2222_v15  ;;  %v12447_v48 = vld [vmem:[%s14411_s2 + $0x128] sm:$0xff] }
 0x3e7   : > { %7006 = vmatpush.bf16.msra.mxu1 %v12447_v48 }
 0x3e8   : > { %v2721_v56 = vpop.f32.mrf.mxu1  ;;  %v3774_v32 = vpop.f32.mrf.mxu2 }
 0x3e9   : > { %v4827_v22 = vpop.f32.mrf.mxu3  ;;  %v3301_v7 = vmax.f32 %v2721_v56, 0.0  ;;  %v4381_v52 = vmax.f32 %v3774_v32, 0.0 }
 0x3ea   : > { %v5461_v24 = vmax.f32 %v4827_v22, 0.0 }
 0x3eb   : > { %2760 = vmatmul.bf16.gmra.mxu1 %v2448_v51 }
 0x3f0   : > { %v2723_v27 = vpop.f32.mrf.mxu1  ;;  %v3776_v28 = vpop.f32.mrf.mxu2 }
 0x3f1   : > { %v3302_v50 = vmax.f32 %v2723_v27, 0.0  ;;  %v4382_v9 = vmax.f32 %v3776_v28, 0.0  ;;  %v4829_v34 = vpop.f32.mrf.mxu3 }
 0x3f2   : > { %v5462_v36 = vmax.f32 %v4829_v34, 0.0 }
 0x3f3   : > { %v3537_v61 = vpack.c.bf16 %v3302_v50, %v3301_v7  ;;  %v4626_v5 = vpack.c.bf16 %v4382_v9, %v4381_v52  ;;  %v1679_v9 = vpop.f32.mrf.mxu0 }
 0x3f4   : > { %v5715_v63 = vpack.c.bf16 %v5462_v36, %v5461_v24  ;;  %v2224_v24 = vmax.f32 %v1674_v46, 0.0  ;;  %v2225_v36 = vmax.f32 %v1676_v35, 0.0 }
 0x3f5   : > { %3818 = vmatmul.bf16.gmra.mxu2 %v3537_v61  ;;  %4871 = vmatmul.bf16.gmra.mxu3 %v4626_v5 }
 0x3f6   : > { %5924 = vmatmul.bf16.gmra.mxu0 %v5715_v63  ;;  %v2450_v63 = vpack.c.bf16 %v2225_v36, %v2224_v24 }
 0x3f8   : > { %v2726_v14 = vpop.f32.mrf.mxu1  ;;  %v3779_v58 = vpop.f32.mrf.mxu2 }
 0x3f9   : > { %v4832_v59 = vpop.f32.mrf.mxu3  ;;  %v3303_v51 = vmax.f32 %v2726_v14, 0.0  ;;  %v4383_v27 = vmax.f32 %v3779_v58, 0.0 }
 0x3fa   : > { %v5463_v52 = vmax.f32 %v4832_v59, 0.0 }
 0x3fb   : > { %2765 = vmatmul.bf16.gmra.mxu1 %v2449_v10  ;;  %v1681_v14 = vpop.f32.mrf.mxu0 }
 0x400   : > { %v2728_v56 = vpop.f32.mrf.mxu1  ;;  %v3781_v32 = vpop.f32.mrf.mxu2 }
 0x401   : > { %v3304_v22 = vmax.f32 %v2728_v56, 0.0  ;;  %v4384_v28 = vmax.f32 %v3781_v32, 0.0  ;;  %v4834_v7 = vpop.f32.mrf.mxu3 }
 0x402   : > { %v5464_v50 = vmax.f32 %v4834_v7, 0.0 }
 0x403   : > { %v3538_v57 = vpack.c.bf16 %v3304_v22, %v3303_v51  ;;  %v4627_v13 = vpack.c.bf16 %v4384_v28, %v4383_v27 }
 0x404   : > { %v5716_v34 = vpack.c.bf16 %v5464_v50, %v5463_v52  ;;  %v2226_v52 = vmax.f32 %v1679_v9, 0.0  ;;  %v2227_v50 = vmax.f32 %v1681_v14, 0.0 }
 0x405   : > { %3823 = vmatmul.bf16.gmra.mxu2 %v3538_v57  ;;  %4876 = vmatmul.bf16.gmra.mxu3 %v4627_v13  ;;  %v1684_v57 = vpop.f32.mrf.mxu0 }
 0x406   : > { %5929 = vmatmul.bf16.gmra.mxu0 %v5716_v34  ;;  %v2451_v24 = vpack.c.bf16 %v2227_v50, %v2226_v52 }
 0x408   : > { %v2731_v61 = vpop.f32.mrf.mxu1  ;;  %v3784_v5 = vpop.f32.mrf.mxu2 }
 0x409   : > { %v4837_v15 = vpop.f32.mrf.mxu3  ;;  %v3305_v59 = vmax.f32 %v2731_v61, 0.0  ;;  %v4385_v56 = vmax.f32 %v3784_v5, 0.0 }
 0x40a   : > { %v5465_v51 = vmax.f32 %v4837_v15, 0.0 }
 0x40b   : > { %2770 = vmatmul.bf16.gmra.mxu1 %v2450_v63 }
 0x410   : > { %v2733_v58 = vpop.f32.mrf.mxu1  ;;  %v3786_v10 = vpop.f32.mrf.mxu2 }
 0x411   : > { %v3306_v46 = vmax.f32 %v2733_v58, 0.0  ;;  %v4386_v35 = vmax.f32 %v3786_v10, 0.0  ;;  %v4839_v32 = vpop.f32.mrf.mxu3 }
 0x412   : > { %v5466_v27 = vmax.f32 %v4839_v32, 0.0  ;;  %v2228_v32 = vmax.f32 %v1684_v57, 0.0 }
 0x413   : > { %v3539_v22 = vpack.c.bf16 %v3306_v46, %v3305_v59  ;;  %v4628_v28 = vpack.c.bf16 %v4386_v35, %v4385_v56  ;;  %v1686_v56 = vpop.f32.mrf.mxu0 }
 0x414   : > { %v5717_v7 = vpack.c.bf16 %v5466_v27, %v5465_v51  ;;  %v2229_v51 = vmax.f32 %v1686_v56, 0.0  ;;  %v12464_v27 = vld [vmem:[%s14411_s2 + $0x1b0] sm:$0xff] }
 0x415   : > { %3828 = vmatmul.bf16.gmra.mxu2 %v3539_v22  ;;  %4881 = vmatmul.bf16.gmra.mxu3 %v4628_v28 }
 0x416   : > { %5934 = vmatmul.bf16.gmra.mxu0 %v5717_v7  ;;  %9201 = vmatpush.bf16.msra.mxu3 %v12464_v27  ;;  %v2452_v7 = vpack.c.bf16 %v2229_v51, %v2228_v32 }
 0x418   : > { %v2736_v13 = vpop.f32.mrf.mxu1  ;;  %v3789_v34 = vpop.f32.mrf.mxu2 }
 0x419   : > { %v4842_v36 = vpop.f32.mrf.mxu3  ;;  %v3307_v63 = vmax.f32 %v2736_v13, 0.0  ;;  %v4387_v48 = vmax.f32 %v3789_v34, 0.0 }
 0x41a   : > { %v5467_v59 = vmax.f32 %v4842_v36, 0.0 }
 0x41b   : > { %2775 = vmatmul.bf16.gmra.mxu1 %v2451_v24 }
 0x420   : > { %v2738_v61 = vpop.f32.mrf.mxu1  ;;  %v3791_v5 = vpop.f32.mrf.mxu2 }
 0x421   : > { %v3308_v15 = vmax.f32 %v2738_v61, 0.0  ;;  %v4388_v58 = vmax.f32 %v3791_v5, 0.0  ;;  %v4844_v10 = vpop.f32.mrf.mxu3 }
 0x422   : > { %v5468_v9 = vmax.f32 %v4844_v10, 0.0 }
 0x423   : > { %v3540_v14 = vpack.c.bf16 %v3308_v15, %v3307_v63  ;;  %v4629_v46 = vpack.c.bf16 %v4388_v58, %v4387_v48 }
 0x424   : > { %v5718_v35 = vpack.c.bf16 %v5468_v9, %v5467_v59 }
 0x425   : > { %3833 = vmatmul.bf16.gmra.mxu2 %v3540_v14  ;;  %4886 = vmatmul.bf16.gmra.mxu3 %v4629_v46 }
 0x426   : > { %5939 = vmatmul.bf16.gmra.mxu0 %v5718_v35 }
 0x428   : > { %v2741_v22 = vpop.f32.mrf.mxu1  ;;  %v3794_v28 = vpop.f32.mrf.mxu2 }
 0x429   : > { %v4847_v52 = vpop.f32.mrf.mxu3  ;;  %v3309_v34 = vmax.f32 %v2741_v22, 0.0  ;;  %v4389_v24 = vmax.f32 %v3794_v28, 0.0 }
 0x42a   : > { %v5469_v5 = vmax.f32 %v4847_v52, 0.0 }
 0x42b   : > { %2780 = vmatmul.bf16.gmra.mxu1 %v2452_v7 }
 0x430   : > { %v2743_v50 = vpop.f32.mrf.mxu1  ;;  %v3796_v13 = vpop.f32.mrf.mxu2 }
 0x431   : > { %v3310_v36 = vmax.f32 %v2743_v50, 0.0  ;;  %v4390_v57 = vmax.f32 %v3796_v13, 0.0  ;;  %v4849_v61 = vpop.f32.mrf.mxu3 }
 0x432   : > { %v5470_v63 = vmax.f32 %v4849_v61, 0.0 }
 0x433   : > { %v3541_v48 = vpack.c.bf16 %v3310_v36, %v3309_v34  ;;  %v4630_v15 = vpack.c.bf16 %v4390_v57, %v4389_v24 }
 0x434   : > { %v5719_v58 = vpack.c.bf16 %v5470_v63, %v5469_v5 }
 0x435   : > { %3838 = vmatmul.bf16.gmra.mxu2 %v3541_v48  ;;  %4891 = vmatmul.bf16.gmra.mxu3 %v4630_v15 }
 0x436   : > { %5944 = vmatmul.bf16.gmra.mxu0 %v5719_v58 }
 0x438   : > { %v2746_v10 = vpop.f32.mrf.mxu1  ;;  %v3799_v59 = vpop.f32.mrf.mxu2 }
 0x439   : > { %v4852_v56 = vpop.f32.mrf.mxu3  ;;  %v3311_v46 = vmax.f32 %v2746_v10, 0.0  ;;  %v4391_v35 = vmax.f32 %v3799_v59, 0.0 }
 0x43a   : > { %v5471_v22 = vmax.f32 %v4852_v56, 0.0 }
 0x43b   : > { %2785 = vmatmul.bf16.gmra.mxu1 %v12603_v23 }
 0x440   : > { %v2748_v9 = vpop.f32.mrf.mxu1  ;;  %v3801_v14 = vpop.f32.mrf.mxu2 }
 0x441   : > { %v3312_v32 = vmax.f32 %v2748_v9, 0.0  ;;  %v4392_v51 = vmax.f32 %v3801_v14, 0.0  ;;  %v4854_v27 = vpop.f32.mrf.mxu3 }
 0x442   : > { %v5472_v28 = vmax.f32 %v4854_v27, 0.0 }
 0x443   : > { %v3542_v7 = vpack.c.bf16 %v3312_v32, %v3311_v46  ;;  %v4631_v52 = vpack.c.bf16 %v4392_v51, %v4391_v35 }
 0x444   : > { %v5720_v50 = vpack.c.bf16 %v5472_v28, %v5471_v22 }
 0x445   : > { %3843 = vmatmul.bf16.gmra.mxu2 %v3542_v7  ;;  %4896 = vmatmul.bf16.gmra.mxu3 %v4631_v52 }
 0x446   : > { %5949 = vmatmul.bf16.gmra.mxu0 %v5720_v50 }
 0x448   : > { %v2751_v13 = vpop.f32.mrf.mxu1  ;;  %v3804_v34 = vpop.f32.mrf.mxu2 }
 0x449   : > { %v4857_v24 = vpop.f32.mrf.mxu3  ;;  %v3313_v57 = vmax.f32 %v2751_v13, 0.0  ;;  %v4393_v61 = vmax.f32 %v3804_v34, 0.0 }
 0x44a   : > { %v5473_v15 = vmax.f32 %v4857_v24, 0.0 }
 0x44b   : > { %2790 = vmatmul.bf16.gmra.mxu1 %v12609_v30 }
 0x450   : > { %v2753_v23 = vpop.f32.mrf.mxu1  ;;  %v3806_v36 = vpop.f32.mrf.mxu2 }
 0x451   : > { %v3314_v5 = vmax.f32 %v2753_v23, 0.0  ;;  %v4394_v63 = vmax.f32 %v3806_v36, 0.0  ;;  %v4859_v48 = vpop.f32.mrf.mxu3 }
 0x452   : > { %v5474_v58 = vmax.f32 %v4859_v48, 0.0 }
 0x453   : > { %v3543_v10 = vpack.c.bf16 %v3314_v5, %v3313_v57  ;;  %v4632_v59 = vpack.c.bf16 %v4394_v63, %v4393_v61  ;;  %v5915_v56 = vpop.f32.mrf.mxu0 }
 0x454   : > { %v5721_v9 = vpack.c.bf16 %v5474_v58, %v5473_v15  ;;  %v6555_v32 = vmax.f32 %v5915_v56, 0.0 }
 0x455   : > { %3848 = vmatmul.bf16.gmra.mxu2 %v3543_v10  ;;  %4901 = vmatmul.bf16.gmra.mxu3 %v4632_v59 }
 0x456   : > { %5954 = vmatmul.bf16.gmra.mxu0 %v5721_v9 }
 0x458   : > { %v2756_v14 = vpop.f32.mrf.mxu1  ;;  %v3809_v46 = vpop.f32.mrf.mxu2 }
 0x459   : > { %v4862_v35 = vpop.f32.mrf.mxu3  ;;  %v3315_v7 = vmax.f32 %v2756_v14, 0.0  ;;  %v4395_v52 = vmax.f32 %v3809_v46, 0.0 }
 0x45a   : > { %v5475_v24 = vmax.f32 %v4862_v35, 0.0 }
 0x45b   : > { %v5917_v30 = vpop.f32.mrf.mxu0  ;;  %2795 = vmatmul.bf16.gmra.mxu1 %v12615_v37 }
 0x45c   : > { %v6556_v51 = vmax.f32 %v5917_v30, 0.0 }
 0x45e   : > { %v13294_v27 = vpack.c.bf16 %v6556_v51, %v6555_v32 }
 0x460   : > { %v2758_v22 = vpop.f32.mrf.mxu1  ;;  %v3811_v28 = vpop.f32.mrf.mxu2 }
 0x461   : > { %v3316_v50 = vmax.f32 %v2758_v22, 0.0  ;;  %v4396_v13 = vmax.f32 %v3811_v28, 0.0  ;;  %v4864_v34 = vpop.f32.mrf.mxu3 }
 0x462   : > { %v5476_v23 = vmax.f32 %v4864_v34, 0.0 }
 0x463   : > { %v3544_v36 = vpack.c.bf16 %v3316_v50, %v3315_v7  ;;  %v4633_v57 = vpack.c.bf16 %v4396_v13, %v4395_v52  ;;  %v5920_v61 = vpop.f32.mrf.mxu0 }
 0x464   : > { %v5722_v5 = vpack.c.bf16 %v5476_v23, %v5475_v24  ;;  %v6557_v58 = vmax.f32 %v5920_v61, 0.0 }
 0x465   : > { %3853 = vmatmul.bf16.gmra.mxu2 %v3544_v36  ;;  %4906 = vmatmul.bf16.gmra.mxu3 %v4633_v57 }
 0x466   : > { %5959 = vmatmul.bf16.gmra.mxu0 %v5722_v5 }
 0x468   : > { %v2761_v37 = vpop.f32.mrf.mxu1  ;;  %v3814_v63 = vpop.f32.mrf.mxu2 }
 0x469   : > { %v4867_v48 = vpop.f32.mrf.mxu3  ;;  %v3317_v14 = vmax.f32 %v2761_v37, 0.0  ;;  %v4397_v46 = vmax.f32 %v3814_v63, 0.0 }
 0x46a   : > { %v5477_v51 = vmax.f32 %v4867_v48, 0.0 }
 0x46b   : > { %v5922_v15 = vpop.f32.mrf.mxu0  ;;  %2800 = vmatmul.bf16.gmra.mxu1 %v12624_v45 }
 0x46c   : > { %v6558_v10 = vmax.f32 %v5922_v15, 0.0 }
 0x46e   : > { %v13297_v59 = vpack.c.bf16 %v6558_v10, %v6557_v58 }
 0x470   : > { %v2763_v56 = vpop.f32.mrf.mxu1  ;;  %v3816_v9 = vpop.f32.mrf.mxu2 }
 0x471   : > { %v3318_v35 = vmax.f32 %v2763_v56, 0.0  ;;  %v4398_v30 = vmax.f32 %v3816_v9, 0.0  ;;  %v4869_v32 = vpop.f32.mrf.mxu3 }
 0x472   : > { %v5478_v22 = vmax.f32 %v4869_v32, 0.0 }
 0x473   : > { %v3545_v28 = vpack.c.bf16 %v3318_v35, %v3317_v14  ;;  %v4634_v7 = vpack.c.bf16 %v4398_v30, %v4397_v46  ;;  %v5925_v52 = vpop.f32.mrf.mxu0 }
 0x474   : > { %v5723_v50 = vpack.c.bf16 %v5478_v22, %v5477_v51  ;;  %v6559_v23 = vmax.f32 %v5925_v52, 0.0 }
 0x475   : > { %3858 = vmatmul.bf16.gmra.mxu2 %v3545_v28  ;;  %4911 = vmatmul.bf16.gmra.mxu3 %v4634_v7 }
 0x476   : > { %5964 = vmatmul.bf16.gmra.mxu0 %v5723_v50 }
 0x478   : > { %v2766_v45 = vpop.f32.mrf.mxu1  ;;  %v3819_v13 = vpop.f32.mrf.mxu2 }
 0x479   : > { %v4872_v34 = vpop.f32.mrf.mxu3  ;;  %v3319_v37 = vmax.f32 %v2766_v45, 0.0  ;;  %v4399_v63 = vmax.f32 %v3819_v13, 0.0 }
 0x47a   : > { %v5479_v10 = vmax.f32 %v4872_v34, 0.0 }
 0x47b   : > { %v5927_v24 = vpop.f32.mrf.mxu0  ;;  %2805 = vmatmul.bf16.gmra.mxu1 %v12633_v53 }
 0x47c   : > { %v6560_v36 = vmax.f32 %v5927_v24, 0.0 }
 0x47e   : > { %v13300_v57 = vpack.c.bf16 %v6560_v36, %v6559_v23 }
 0x480   : > { %v2768_v61 = vpop.f32.mrf.mxu1  ;;  %v3821_v5 = vpop.f32.mrf.mxu2 }
 0x481   : > { %v3320_v48 = vmax.f32 %v2768_v61, 0.0  ;;  %v4400_v15 = vmax.f32 %v3821_v5, 0.0  ;;  %v4874_v58 = vpop.f32.mrf.mxu3 }
 0x482   : > { %v5480_v56 = vmax.f32 %v4874_v58, 0.0 }
 0x483   : > { %v3546_v9 = vpack.c.bf16 %v3320_v48, %v3319_v37  ;;  %v4635_v14 = vpack.c.bf16 %v4400_v15, %v4399_v63  ;;  %v5930_v46 = vpop.f32.mrf.mxu0 }
 0x484   : > { %v5724_v35 = vpack.c.bf16 %v5480_v56, %v5479_v10  ;;  %v6561_v22 = vmax.f32 %v5930_v46, 0.0 }
 0x485   : > { %3863 = vmatmul.bf16.gmra.mxu2 %v3546_v9  ;;  %4916 = vmatmul.bf16.gmra.mxu3 %v4635_v14 }
 0x486   : > { %5969 = vmatmul.bf16.gmra.mxu0 %v5724_v35 }
 0x488   : > { %v2771_v53 = vpop.f32.mrf.mxu1  ;;  %v3824_v30 = vpop.f32.mrf.mxu2 }
 0x489   : > { %v4877_v32 = vpop.f32.mrf.mxu3  ;;  %v3321_v45 = vmax.f32 %v2771_v53, 0.0  ;;  %v4401_v13 = vmax.f32 %v3824_v30, 0.0 }
 0x48a   : > { %v5481_v36 = vmax.f32 %v4877_v32, 0.0 }
 0x48b   : > { %v5932_v51 = vpop.f32.mrf.mxu0  ;;  %2810 = vmatmul.bf16.gmra.mxu1 %v12639_v60  ;;  %v12455_v60 = vld [vmem:[%s14411_s2 + $0x168] sm:$0xff] }
 0x48c   : > { %v6562_v28 = vmax.f32 %v5932_v51, 0.0  ;;  %8104 = vmatpush.bf16.msra.mxu2 %v12455_v60 }
 0x48e   : > { %v13303_v7 = vpack.c.bf16 %v6562_v28, %v6561_v22 }
 0x490   : > { %v2773_v52 = vpop.f32.mrf.mxu1  ;;  %v3826_v50 = vpop.f32.mrf.mxu2 }
 0x491   : > { %v3322_v34 = vmax.f32 %v2773_v52, 0.0  ;;  %v4402_v24 = vmax.f32 %v3826_v50, 0.0  ;;  %v4879_v23 = vpop.f32.mrf.mxu3 }
 0x492   : > { %v5482_v61 = vmax.f32 %v4879_v23, 0.0 }
 0x493   : > { %v3547_v5 = vpack.c.bf16 %v3322_v34, %v3321_v45  ;;  %v4636_v37 = vpack.c.bf16 %v4402_v24, %v4401_v13  ;;  %v5935_v63 = vpop.f32.mrf.mxu0 }
 0x494   : > { %v5725_v48 = vpack.c.bf16 %v5482_v61, %v5481_v36  ;;  %v6563_v9 = vmax.f32 %v5935_v63, 0.0 }
 0x495   : > { %3868 = vmatmul.bf16.gmra.mxu2 %v3547_v5  ;;  %4921 = vmatmul.bf16.gmra.mxu3 %v4636_v37 }
 0x496   : > { %5974 = vmatmul.bf16.gmra.mxu0 %v5725_v48 }
 0x498   : > { %v2776_v15 = vpop.f32.mrf.mxu1  ;;  %v3829_v58 = vpop.f32.mrf.mxu2 }
 0x499   : > { %v4882_v10 = vpop.f32.mrf.mxu3  ;;  %v3323_v30 = vmax.f32 %v2776_v15, 0.0  ;;  %v4403_v32 = vmax.f32 %v3829_v58, 0.0 }
 0x49a   : > { %v5483_v52 = vmax.f32 %v4882_v10, 0.0 }
 0x49b   : > { %v5937_v56 = vpop.f32.mrf.mxu0  ;;  %2815 = vmatmul.bf16.gmra.mxu1 %v12645_v3 }
 0x49c   : > { %v6564_v14 = vmax.f32 %v5937_v56, 0.0 }
 0x49e   : > { %v13309_v46 = vpack.c.bf16 %v6564_v14, %v6563_v9 }
 0x4a0   : > { %v2778_v35 = vpop.f32.mrf.mxu1  ;;  %v3831_v53 = vpop.f32.mrf.mxu2 }
 0x4a1   : > { %v3324_v51 = vmax.f32 %v2778_v35, 0.0  ;;  %v4404_v22 = vmax.f32 %v3831_v53, 0.0  ;;  %v4884_v28 = vpop.f32.mrf.mxu3 }
 0x4a2   : > { %v5484_v50 = vmax.f32 %v4884_v28, 0.0 }
 0x4a3   : > { %v3548_v45 = vpack.c.bf16 %v3324_v51, %v3323_v30  ;;  %v4637_v13 = vpack.c.bf16 %v4404_v22, %v4403_v32  ;;  %v5940_v34 = vpop.f32.mrf.mxu0 }
 0x4a4   : > { %v5726_v24 = vpack.c.bf16 %v5484_v50, %v5483_v52  ;;  %v6565_v5 = vmax.f32 %v5940_v34, 0.0 }
 0x4a5   : > { %3873 = vmatmul.bf16.gmra.mxu2 %v3548_v45  ;;  %4926 = vmatmul.bf16.gmra.mxu3 %v4637_v13 }
 0x4a6   : > { %5979 = vmatmul.bf16.gmra.mxu0 %v5726_v24 }
 0x4a8   : > { %v2781_v3 = vpop.f32.mrf.mxu1  ;;  %v3834_v23 = vpop.f32.mrf.mxu2 }
 0x4a9   : > { %v4887_v36 = vpop.f32.mrf.mxu3  ;;  %v3325_v15 = vmax.f32 %v2781_v3, 0.0  ;;  %v4405_v58 = vmax.f32 %v3834_v23, 0.0 }
 0x4aa   : > { %v5485_v14 = vmax.f32 %v4887_v36, 0.0 }
 0x4ab   : > { %v5942_v61 = vpop.f32.mrf.mxu0  ;;  %2820 = vmatmul.bf16.gmra.mxu1 %v12654_v12 }
 0x4ac   : > { %v6566_v37 = vmax.f32 %v5942_v61, 0.0 }
 0x4ae   : > { %v13312_v63 = vpack.c.bf16 %v6566_v37, %v6565_v5 }
 0x4b0   : > { %v2783_v48 = vpop.f32.mrf.mxu1  ;;  %v3836_v60 = vpop.f32.mrf.mxu2 }
 0x4b1   : > { %v3326_v10 = vmax.f32 %v2783_v48, 0.0  ;;  %v4406_v56 = vmax.f32 %v3836_v60, 0.0  ;;  %v4889_v9 = vpop.f32.mrf.mxu3 }
 0x4b2   : > { %v5486_v35 = vmax.f32 %v4889_v9, 0.0 }
 0x4b3   : > { %v3549_v53 = vpack.c.bf16 %v3326_v10, %v3325_v15  ;;  %v4638_v30 = vpack.c.bf16 %v4406_v56, %v4405_v58  ;;  %v5945_v32 = vpop.f32.mrf.mxu0 }
 0x4b4   : > { %v5727_v51 = vpack.c.bf16 %v5486_v35, %v5485_v14  ;;  %v6567_v50 = vmax.f32 %v5945_v32, 0.0  ;;  %v12472_v32 = vld [vmem:[%s14412_s3 + $0x30] sm:$0xff] }
 0x4b5   : > { %3878 = vmatmul.bf16.gmra.mxu2 %v3549_v53  ;;  %4931 = vmatmul.bf16.gmra.mxu3 %v4638_v30 }
 0x4b6   : > { %5984 = vmatmul.bf16.gmra.mxu0 %v5727_v51 }
 0x4b7   : > { %10298 = vmatpush.bf16.msra.mxu0 %v12472_v32 }
 0x4b8   : > { %v2786_v12 = vpop.f32.mrf.mxu1  ;;  %v3839_v22 = vpop.f32.mrf.mxu2 }
 0x4b9   : > { %v4892_v28 = vpop.f32.mrf.mxu3  ;;  %v3327_v3 = vmax.f32 %v2786_v12, 0.0  ;;  %v4407_v23 = vmax.f32 %v3839_v22, 0.0 }
 0x4ba   : > { %v5487_v37 = vmax.f32 %v4892_v28, 0.0 }
 0x4bb   : > { %v5947_v52 = vpop.f32.mrf.mxu0  ;;  %2825 = vmatmul.bf16.gmra.mxu1 %v12665_v26 }
 0x4bc   : > { %v6568_v45 = vmax.f32 %v5947_v52, 0.0 }
 0x4be   : > { %v13315_v13 = vpack.c.bf16 %v6568_v45, %v6567_v50 }
 0x4c0   : > { %v2788_v34 = vpop.f32.mrf.mxu1  ;;  %v3841_v24 = vpop.f32.mrf.mxu2 }
 0x4c1   : > { %v3328_v36 = vmax.f32 %v2788_v34, 0.0  ;;  %v4408_v61 = vmax.f32 %v3841_v24, 0.0  ;;  %v4894_v5 = vpop.f32.mrf.mxu3 }
 0x4c2   : > { %v5488_v48 = vmax.f32 %v4894_v5, 0.0 }
 0x4c3   : > { %v3550_v60 = vpack.c.bf16 %v3328_v36, %v3327_v3  ;;  %v4639_v15 = vpack.c.bf16 %v4408_v61, %v4407_v23  ;;  %v5950_v58 = vpop.f32.mrf.mxu0 }
 0x4c4   : > { %v5728_v10 = vpack.c.bf16 %v5488_v48, %v5487_v37  ;;  %v6569_v35 = vmax.f32 %v5950_v58, 0.0 }
 0x4c5   : > { %3883 = vmatmul.bf16.gmra.mxu2 %v3550_v60  ;;  %4936 = vmatmul.bf16.gmra.mxu3 %v4639_v15 }
 0x4c6   : > { %5989 = vmatmul.bf16.gmra.mxu0 %v5728_v10 }
 0x4c8   : > { %v2791_v26 = vpop.f32.mrf.mxu1  ;;  %v3844_v56 = vpop.f32.mrf.mxu2 }
 0x4c9   : > { %v4897_v9 = vpop.f32.mrf.mxu3  ;;  %v3329_v22 = vmax.f32 %v2791_v26, 0.0  ;;  %v4409_v28 = vmax.f32 %v3844_v56, 0.0 }
 0x4ca   : > { %v5489_v34 = vmax.f32 %v4897_v9, 0.0 }
 0x4cb   : > { %v5952_v14 = vpop.f32.mrf.mxu0  ;;  %2830 = vmatmul.bf16.gmra.mxu1 %v12673_v40 }
 0x4cc   : > { %v6570_v53 = vmax.f32 %v5952_v14, 0.0 }
 0x4ce   : > { %v13318_v30 = vpack.c.bf16 %v6570_v53, %v6569_v35 }
 0x4d0   : > { %v2793_v51 = vpop.f32.mrf.mxu1  ;;  %v3846_v12 = vpop.f32.mrf.mxu2 }
 0x4d1   : > { %v3330_v52 = vmax.f32 %v2793_v51, 0.0  ;;  %v4410_v50 = vmax.f32 %v3846_v12, 0.0  ;;  %v4899_v45 = vpop.f32.mrf.mxu3 }
 0x4d2   : > { %v5490_v24 = vmax.f32 %v4899_v45, 0.0 }
 0x4d3   : > { %v3551_v3 = vpack.c.bf16 %v3330_v52, %v3329_v22  ;;  %v4640_v40 = vpack.c.bf16 %v4410_v50, %v4409_v28  ;;  %v5955_v23 = vpop.f32.mrf.mxu0 }
 0x4d4   : > { %v5729_v36 = vpack.c.bf16 %v5490_v24, %v5489_v34  ;;  %v6571_v60 = vmax.f32 %v5955_v23, 0.0 }
 0x4d5   : > { %3888 = vmatmul.bf16.gmra.mxu2 %v3551_v3  ;;  %4941 = vmatmul.bf16.gmra.mxu3 %v4640_v40 }
 0x4d6   : > { %5994 = vmatmul.bf16.gmra.mxu0 %v5729_v36 }
 0x4d8   : > { %v2796_v61 = vpop.f32.mrf.mxu1  ;;  %v3849_v5 = vpop.f32.mrf.mxu2 }
 0x4d9   : > { %v4902_v37 = vpop.f32.mrf.mxu3  ;;  %v3331_v56 = vmax.f32 %v2796_v61, 0.0  ;;  %v4411_v9 = vmax.f32 %v3849_v5, 0.0 }
 0x4da   : > { %v5491_v32 = vmax.f32 %v4902_v37, 0.0 }
 0x4db   : > { %v5957_v48 = vpop.f32.mrf.mxu0  ;;  %2835 = vmatmul.bf16.gmra.mxu1 %v12683_v55 }
 0x4dc   : > { %v6572_v15 = vmax.f32 %v5957_v48, 0.0 }
 0x4de   : > { %v13324_v58 = vpack.c.bf16 %v6572_v15, %v6571_v60 }
 0x4e0   : > { %v2798_v10 = vpop.f32.mrf.mxu1  ;;  %v3851_v26 = vpop.f32.mrf.mxu2 }
 0x4e1   : > { %v3332_v14 = vmax.f32 %v2798_v10, 0.0  ;;  %v4412_v35 = vmax.f32 %v3851_v26, 0.0  ;;  %v4904_v53 = vpop.f32.mrf.mxu3 }
 0x4e2   : > { %v5492_v51 = vmax.f32 %v4904_v53, 0.0 }
 0x4e3   : > { %v3552_v12 = vpack.c.bf16 %v3332_v14, %v3331_v56  ;;  %v4641_v22 = vpack.c.bf16 %v4412_v35, %v4411_v9  ;;  %v5960_v28 = vpop.f32.mrf.mxu0 }
 0x4e4   : > { %v5730_v52 = vpack.c.bf16 %v5492_v51, %v5491_v32  ;;  %v6573_v24 = vmax.f32 %v5960_v28, 0.0 }
 0x4e5   : > { %3893 = vmatmul.bf16.gmra.mxu2 %v3552_v12  ;;  %4946 = vmatmul.bf16.gmra.mxu3 %v4641_v22 }
 0x4e6   : > { %5999 = vmatmul.bf16.gmra.mxu0 %v5730_v52 }
 0x4e8   : > { %v2801_v55 = vpop.f32.mrf.mxu1  ;;  %v3854_v50 = vpop.f32.mrf.mxu2 }
 0x4e9   : > { %v4907_v45 = vpop.f32.mrf.mxu3  ;;  %v3333_v61 = vmax.f32 %v2801_v55, 0.0  ;;  %v4413_v5 = vmax.f32 %v3854_v50, 0.0 }
 0x4ea   : > { %v5493_v15 = vmax.f32 %v4907_v45, 0.0 }
 0x4eb   : > { %v5962_v34 = vpop.f32.mrf.mxu0  ;;  %2840 = vmatmul.bf16.gmra.mxu1 %v12699_v8 }
 0x4ec   : > { %v6574_v3 = vmax.f32 %v5962_v34, 0.0 }
 0x4ee   : > { %v13327_v40 = vpack.c.bf16 %v6574_v3, %v6573_v24 }
 0x4f0   : > { %v2803_v23 = vpop.f32.mrf.mxu1  ;;  %v3856_v36 = vpop.f32.mrf.mxu2 }
 0x4f1   : > { %v3334_v37 = vmax.f32 %v2803_v23, 0.0  ;;  %v4414_v48 = vmax.f32 %v3856_v36, 0.0  ;;  %v4909_v60 = vpop.f32.mrf.mxu3 }
 0x4f2   : > { %v5494_v10 = vmax.f32 %v4909_v60, 0.0 }
 0x4f3   : > { %v3553_v26 = vpack.c.bf16 %v3334_v37, %v3333_v61  ;;  %v4642_v56 = vpack.c.bf16 %v4414_v48, %v4413_v5  ;;  %v5965_v9 = vpop.f32.mrf.mxu0 }
 0x4f4   : > { %v5731_v14 = vpack.c.bf16 %v5494_v10, %v5493_v15  ;;  %v6575_v51 = vmax.f32 %v5965_v9, 0.0  ;;  %v12446_v9 = vld [vmem:[%s14411_s2 + $0x120] sm:$0xff] }
 0x4f5   : > { %3898 = vmatmul.bf16.gmra.mxu2 %v3553_v26  ;;  %4951 = vmatmul.bf16.gmra.mxu3 %v4642_v56 }
 0x4f6   : > { %6004 = vmatmul.bf16.gmra.mxu0 %v5731_v14  ;;  %7007 = vmatpush.bf16.msra.mxu1 %v12446_v9 }
 0x4f8   : > { %v2806_v8 = vpop.f32.mrf.mxu1  ;;  %v3859_v35 = vpop.f32.mrf.mxu2 }
 0x4f9   : > { %v4912_v53 = vpop.f32.mrf.mxu3  ;;  %v3335_v55 = vmax.f32 %v2806_v8, 0.0  ;;  %v4415_v50 = vmax.f32 %v3859_v35, 0.0 }
 0x4fa   : > { %v5495_v3 = vmax.f32 %v4912_v53, 0.0 }
 0x4fb   : > { %v5967_v32 = vpop.f32.mrf.mxu0  ;;  %2845 = vmatmul.bf16.gmra.mxu1 %v12712_v25 }
 0x4fc   : > { %v6576_v12 = vmax.f32 %v5967_v32, 0.0 }
 0x4fe   : > { %v13330_v22 = vpack.c.bf16 %v6576_v12, %v6575_v51 }
 0x500   : > { %v2808_v28 = vpop.f32.mrf.mxu1  ;;  %v3861_v52 = vpop.f32.mrf.mxu2 }
 0x501   : > { %v3336_v45 = vmax.f32 %v2808_v28, 0.0  ;;  %v4416_v34 = vmax.f32 %v3861_v52, 0.0  ;;  %v4914_v24 = vpop.f32.mrf.mxu3 }
 0x502   : > { %v5496_v23 = vmax.f32 %v4914_v24, 0.0 }
 0x503   : > { %v3554_v36 = vpack.c.bf16 %v3336_v45, %v3335_v55  ;;  %v4643_v61 = vpack.c.bf16 %v4416_v34, %v4415_v50  ;;  %v5970_v5 = vpop.f32.mrf.mxu0 }
 0x504   : > { %v5732_v37 = vpack.c.bf16 %v5496_v23, %v5495_v3  ;;  %v6577_v10 = vmax.f32 %v5970_v5, 0.0 }
 0x505   : > { %3903 = vmatmul.bf16.gmra.mxu2 %v3554_v36  ;;  %4956 = vmatmul.bf16.gmra.mxu3 %v4643_v61 }
 0x506   : > { %6009 = vmatmul.bf16.gmra.mxu0 %v5732_v37 }
 0x508   : > { %v2811_v25 = vpop.f32.mrf.mxu1  ;;  %v3864_v48 = vpop.f32.mrf.mxu2 }
 0x509   : > { %v4917_v60 = vpop.f32.mrf.mxu3  ;;  %v3337_v35 = vmax.f32 %v2811_v25, 0.0  ;;  %v4417_v53 = vmax.f32 %v3864_v48, 0.0 }
 0x50a   : > { %v5497_v28 = vmax.f32 %v4917_v60, 0.0 }
 0x50b   : > { %v5972_v15 = vpop.f32.mrf.mxu0  ;;  %2850 = vmatmul.bf16.gmra.mxu1 %v12722_v43 }
 0x50c   : > { %v6578_v26 = vmax.f32 %v5972_v15, 0.0 }
 0x50e   : > { %v13333_v56 = vpack.c.bf16 %v6578_v26, %v6577_v10 }
 0x510   : > { %v2813_v14 = vpop.f32.mrf.mxu1  ;;  %v3866_v8 = vpop.f32.mrf.mxu2 }
 0x511   : > { %v3338_v32 = vmax.f32 %v2813_v14, 0.0  ;;  %v4418_v51 = vmax.f32 %v3866_v8, 0.0  ;;  %v4919_v12 = vpop.f32.mrf.mxu3 }
 0x512   : > { %v5498_v52 = vmax.f32 %v4919_v12, 0.0 }
 0x513   : > { %v3555_v55 = vpack.c.bf16 %v3338_v32, %v3337_v35  ;;  %v4644_v43 = vpack.c.bf16 %v4418_v51, %v4417_v53  ;;  %v5975_v50 = vpop.f32.mrf.mxu0 }
 0x514   : > { %v5733_v45 = vpack.c.bf16 %v5498_v52, %v5497_v28  ;;  %v6579_v36 = vmax.f32 %v5975_v50, 0.0 }
 0x515   : > { %3908 = vmatmul.bf16.gmra.mxu2 %v3555_v55  ;;  %4961 = vmatmul.bf16.gmra.mxu3 %v4644_v43 }
 0x516   : > { %6014 = vmatmul.bf16.gmra.mxu0 %v5733_v45 }
 0x518   : > { %v2816_v34 = vpop.f32.mrf.mxu1  ;;  %v3869_v24 = vpop.f32.mrf.mxu2 }
 0x519   : > { %v4922_v3 = vpop.f32.mrf.mxu3  ;;  %v3339_v48 = vmax.f32 %v2816_v34, 0.0  ;;  %v4419_v60 = vmax.f32 %v3869_v24, 0.0 }
 0x51a   : > { %v5499_v9 = vmax.f32 %v4922_v3, 0.0 }
 0x51b   : > { %v5977_v23 = vpop.f32.mrf.mxu0  ;;  %2855 = vmatmul.bf16.gmra.mxu1 %v12734_v62  ;;  %v12463_v62 = vld [vmem:[%s14411_s2 + $0x1a8] sm:$0xff] }
 0x51c   : > { %v6580_v61 = vmax.f32 %v5977_v23, 0.0  ;;  %9202 = vmatpush.bf16.msra.mxu3 %v12463_v62 }
 0x51e   : > { %v13339_v5 = vpack.c.bf16 %v6580_v61, %v6579_v36 }
 0x520   : > { %v2818_v37 = vpop.f32.mrf.mxu1  ;;  %v3871_v25 = vpop.f32.mrf.mxu2 }
 0x521   : > { %v3340_v15 = vmax.f32 %v2818_v37, 0.0  ;;  %v4420_v10 = vmax.f32 %v3871_v25, 0.0  ;;  %v4924_v26 = vpop.f32.mrf.mxu3 }
 0x522   : > { %v5500_v14 = vmax.f32 %v4924_v26, 0.0 }
 0x523   : > { %v3556_v8 = vpack.c.bf16 %v3340_v15, %v3339_v48  ;;  %v4645_v35 = vpack.c.bf16 %v4420_v10, %v4419_v60  ;;  %v5980_v53 = vpop.f32.mrf.mxu0 }
 0x524   : > { %v5734_v32 = vpack.c.bf16 %v5500_v14, %v5499_v9  ;;  %v6581_v55 = vmax.f32 %v5980_v53, 0.0 }
 0x525   : > { %3913 = vmatmul.bf16.gmra.mxu2 %v3556_v8  ;;  %4966 = vmatmul.bf16.gmra.mxu3 %v4645_v35 }
 0x526   : > { %6019 = vmatmul.bf16.gmra.mxu0 %v5734_v32 }
 0x528   : > { %v2821_v51 = vpop.f32.mrf.mxu1  ;;  %v3874_v12 = vpop.f32.mrf.mxu2 }
 0x529   : > { %v4927_v28 = vpop.f32.mrf.mxu3  ;;  %v3341_v24 = vmax.f32 %v2821_v51, 0.0  ;;  %v4421_v3 = vmax.f32 %v3874_v12, 0.0 }
 0x52a   : > { %v5501_v37 = vmax.f32 %v4927_v28, 0.0 }
 0x52b   : > { %v5982_v52 = vpop.f32.mrf.mxu0  ;;  %2860 = vmatmul.bf16.gmra.mxu1 %v12752_v20 }
 0x52c   : > { %v6582_v43 = vmax.f32 %v5982_v52, 0.0 }
 0x52e   : > { %v13345_v50 = vpack.c.bf16 %v6582_v43, %v6581_v55 }
 0x530   : > { %v2823_v45 = vpop.f32.mrf.mxu1  ;;  %v3876_v34 = vpop.f32.mrf.mxu2 }
 0x531   : > { %v3342_v23 = vmax.f32 %v2823_v45, 0.0  ;;  %v4422_v36 = vmax.f32 %v3876_v34, 0.0  ;;  %v4929_v61 = vpop.f32.mrf.mxu3 }
 0x532   : > { %v5502_v25 = vmax.f32 %v4929_v61, 0.0 }
 0x533   : > { %v3557_v48 = vpack.c.bf16 %v3342_v23, %v3341_v24  ;;  %v4646_v60 = vpack.c.bf16 %v4422_v36, %v4421_v3  ;;  %v5985_v15 = vpop.f32.mrf.mxu0 }
 0x534   : > { %v5735_v10 = vpack.c.bf16 %v5502_v25, %v5501_v37  ;;  %v6583_v8 = vmax.f32 %v5985_v15, 0.0 }
 0x535   : > { %3918 = vmatmul.bf16.gmra.mxu2 %v3557_v48  ;;  %4971 = vmatmul.bf16.gmra.mxu3 %v4646_v60 }
 0x536   : > { %6024 = vmatmul.bf16.gmra.mxu0 %v5735_v10 }
 0x538   : > { %v2826_v20 = vpop.f32.mrf.mxu1  ;;  %v3879_v26 = vpop.f32.mrf.mxu2 }
 0x539   : > { %v4932_v9 = vpop.f32.mrf.mxu3  ;;  %v3343_v51 = vmax.f32 %v2826_v20, 0.0  ;;  %v4423_v12 = vmax.f32 %v3879_v26, 0.0 }
 0x53a   : > { %v5503_v43 = vmax.f32 %v4932_v9, 0.0 }
 0x53b   : > { %v5987_v14 = vpop.f32.mrf.mxu0  ;;  %2865 = vmatmul.bf16.gmra.mxu1 %v12767_v44 }
 0x53c   : > { %v6584_v35 = vmax.f32 %v5987_v14, 0.0 }
 0x53e   : > { %v13348_v53 = vpack.c.bf16 %v6584_v35, %v6583_v8 }
 0x540   : > { %v2828_v32 = vpop.f32.mrf.mxu1  ;;  %v3881_v62 = vpop.f32.mrf.mxu2 }
 0x541   : > { %v3344_v28 = vmax.f32 %v2828_v32, 0.0  ;;  %v4424_v52 = vmax.f32 %v3881_v62, 0.0  ;;  %v4934_v55 = vpop.f32.mrf.mxu3 }
 0x542   : > { %v5504_v45 = vmax.f32 %v4934_v55, 0.0 }
 0x543   : > { %v3558_v34 = vpack.c.bf16 %v3344_v28, %v3343_v51  ;;  %v4647_v24 = vpack.c.bf16 %v4424_v52, %v4423_v12  ;;  %v5990_v3 = vpop.f32.mrf.mxu0 }
 0x544   : > { %v5736_v23 = vpack.c.bf16 %v5504_v45, %v5503_v43  ;;  %v6585_v25 = vmax.f32 %v5990_v3, 0.0 }
 0x545   : > { %3923 = vmatmul.bf16.gmra.mxu2 %v3558_v34  ;;  %4976 = vmatmul.bf16.gmra.mxu3 %v4647_v24 }
 0x546   : > { %6029 = vmatmul.bf16.gmra.mxu0 %v5736_v23 }
 0x548   : > { %v2831_v44 = vpop.f32.mrf.mxu1  ;;  %v3884_v36 = vpop.f32.mrf.mxu2 }
 0x549   : > { %v4937_v61 = vpop.f32.mrf.mxu3  ;;  %v3345_v20 = vmax.f32 %v2831_v44, 0.0  ;;  %v4425_v26 = vmax.f32 %v3884_v36, 0.0 }
 0x54a   : > { %v5505_v35 = vmax.f32 %v4937_v61, 0.0 }
 0x54b   : > { %v5992_v37 = vpop.f32.mrf.mxu0  ;;  %2870 = vmatmul.bf16.gmra.mxu1 %v12779_v2 }
 0x54c   : > { %v6586_v48 = vmax.f32 %v5992_v37, 0.0 }
 0x54e   : > { %v13351_v60 = vpack.c.bf16 %v6586_v48, %v6585_v25 }
 0x550   : > { %v2833_v15 = vpop.f32.mrf.mxu1  ;;  %v3886_v10 = vpop.f32.mrf.mxu2 }
 0x551   : > { %v3346_v9 = vmax.f32 %v2833_v15, 0.0  ;;  %v4426_v14 = vmax.f32 %v3886_v10, 0.0  ;;  %v4939_v8 = vpop.f32.mrf.mxu3 }
 0x552   : > { %v5506_v32 = vmax.f32 %v4939_v8, 0.0 }
 0x553   : > { %v3559_v62 = vpack.c.bf16 %v3346_v9, %v3345_v20  ;;  %v4648_v51 = vpack.c.bf16 %v4426_v14, %v4425_v26  ;;  %v5995_v12 = vpop.f32.mrf.mxu0 }
 0x554   : > { %v5737_v28 = vpack.c.bf16 %v5506_v32, %v5505_v35  ;;  %v6587_v45 = vmax.f32 %v5995_v12, 0.0 }
 0x555   : > { %3928 = vmatmul.bf16.gmra.mxu2 %v3559_v62  ;;  %4981 = vmatmul.bf16.gmra.mxu3 %v4648_v51 }
 0x556   : > { %6034 = vmatmul.bf16.gmra.mxu0 %v5737_v28 }
 0x558   : > { %v2836_v2 = vpop.f32.mrf.mxu1  ;;  %v3889_v52 = vpop.f32.mrf.mxu2 }
 0x559   : > { %v4942_v55 = vpop.f32.mrf.mxu3  ;;  %v3347_v44 = vmax.f32 %v2836_v2, 0.0  ;;  %v4427_v36 = vmax.f32 %v3889_v52, 0.0 }
 0x55a   : > { %v5507_v48 = vmax.f32 %v4942_v55, 0.0 }
 0x55b   : > { %v5997_v43 = vpop.f32.mrf.mxu0  ;;  %2875 = vmatmul.bf16.gmra.mxu1 %v12797_v29 }
 0x55c   : > { %v6588_v34 = vmax.f32 %v5997_v43, 0.0 }
 0x55e   : > { %v13354_v24 = vpack.c.bf16 %v6588_v34, %v6587_v45 }
 0x560   : > { %v2838_v3 = vpop.f32.mrf.mxu1  ;;  %v3891_v23 = vpop.f32.mrf.mxu2 }
 0x561   : > { %v3348_v61 = vmax.f32 %v2838_v3, 0.0  ;;  %v4428_v37 = vmax.f32 %v3891_v23, 0.0  ;;  %v4944_v25 = vpop.f32.mrf.mxu3 }
 0x562   : > { %v5508_v15 = vmax.f32 %v4944_v25, 0.0 }
 0x563   : > { %v3560_v10 = vpack.c.bf16 %v3348_v61, %v3347_v44  ;;  %v4649_v20 = vpack.c.bf16 %v4428_v37, %v4427_v36  ;;  %v6000_v26 = vpop.f32.mrf.mxu0 }
 0x564   : > { %v5738_v9 = vpack.c.bf16 %v5508_v15, %v5507_v48  ;;  %v6589_v32 = vmax.f32 %v6000_v26, 0.0 }
 0x565   : > { %3933 = vmatmul.bf16.gmra.mxu2 %v3560_v10  ;;  %4986 = vmatmul.bf16.gmra.mxu3 %v4649_v20 }
 0x566   : > { %6039 = vmatmul.bf16.gmra.mxu0 %v5738_v9 }
 0x568   : > { %v2841_v29 = vpop.f32.mrf.mxu1  ;;  %v3894_v14 = vpop.f32.mrf.mxu2 }
 0x569   : > { %v4947_v8 = vpop.f32.mrf.mxu3  ;;  %v3349_v2 = vmax.f32 %v2841_v29, 0.0  ;;  %v4429_v52 = vmax.f32 %v3894_v14, 0.0 }
 0x56a   : > { %v5509_v34 = vmax.f32 %v4947_v8, 0.0 }
 0x56b   : > { %v6002_v35 = vpop.f32.mrf.mxu0  ;;  %2880 = vmatmul.bf16.gmra.mxu1 %v12814_v4 }
 0x56c   : > { %v6590_v62 = vmax.f32 %v6002_v35, 0.0 }
 0x56e   : > { %v13357_v51 = vpack.c.bf16 %v6590_v62, %v6589_v32 }
 0x570   : > { %v2843_v12 = vpop.f32.mrf.mxu1  ;;  %v3896_v28 = vpop.f32.mrf.mxu2 }
 0x571   : > { %v3350_v55 = vmax.f32 %v2843_v12, 0.0  ;;  %v4430_v43 = vmax.f32 %v3896_v28, 0.0  ;;  %v4949_v45 = vpop.f32.mrf.mxu3 }
 0x572   : > { %v5510_v3 = vmax.f32 %v4949_v45, 0.0 }
 0x573   : > { %v3561_v23 = vpack.c.bf16 %v3350_v55, %v3349_v2  ;;  %v4650_v44 = vpack.c.bf16 %v4430_v43, %v4429_v52  ;;  %v6005_v36 = vpop.f32.mrf.mxu0 }
 0x574   : > { %v5739_v61 = vpack.c.bf16 %v5510_v3, %v5509_v34  ;;  %v6591_v15 = vmax.f32 %v6005_v36, 0.0 }
 0x575   : > { %3938 = vmatmul.bf16.gmra.mxu2 %v3561_v23  ;;  %4991 = vmatmul.bf16.gmra.mxu3 %v4650_v44 }
 0x576   : > { %6044 = vmatmul.bf16.gmra.mxu0 %v5739_v61 }
 0x578   : > { %v2846_v4 = vpop.f32.mrf.mxu1  ;;  %v3899_v37 = vpop.f32.mrf.mxu2 }
 0x579   : > { %v4952_v25 = vpop.f32.mrf.mxu3  ;;  %v3351_v29 = vmax.f32 %v2846_v4, 0.0  ;;  %v4431_v14 = vmax.f32 %v3899_v37, 0.0 }
 0x57a   : > { %v5511_v62 = vmax.f32 %v4952_v25, 0.0 }
 0x57b   : > { %v6007_v48 = vpop.f32.mrf.mxu0  ;;  %2885 = vmatmul.bf16.gmra.mxu1 %v12831_v41 }
 0x57c   : > { %v6592_v10 = vmax.f32 %v6007_v48, 0.0 }
 0x57e   : > { %v13360_v20 = vpack.c.bf16 %v6592_v10, %v6591_v15 }
 0x580   : > { %v2848_v26 = vpop.f32.mrf.mxu1  ;;  %v3901_v9 = vpop.f32.mrf.mxu2 }
 0x581   : > { %v3352_v8 = vmax.f32 %v2848_v26, 0.0  ;;  %v4432_v35 = vmax.f32 %v3901_v9, 0.0  ;;  %v4954_v32 = vpop.f32.mrf.mxu3 }
 0x582   : > { %v5512_v12 = vmax.f32 %v4954_v32, 0.0 }
 0x583   : > { %v3562_v28 = vpack.c.bf16 %v3352_v8, %v3351_v29  ;;  %v4651_v2 = vpack.c.bf16 %v4432_v35, %v4431_v14  ;;  %v6010_v52 = vpop.f32.mrf.mxu0 }
 0x584   : > { %v5740_v55 = vpack.c.bf16 %v5512_v12, %v5511_v62  ;;  %v6593_v3 = vmax.f32 %v6010_v52, 0.0 }
 0x585   : > { %3943 = vmatmul.bf16.gmra.mxu2 %v3562_v28  ;;  %4996 = vmatmul.bf16.gmra.mxu3 %v4651_v2 }
 0x586   : > { %6049 = vmatmul.bf16.gmra.mxu0 %v5740_v55 }
 0x588   : > { %v2851_v41 = vpop.f32.mrf.mxu1  ;;  %v3904_v43 = vpop.f32.mrf.mxu2 }
 0x589   : > { %v4957_v45 = vpop.f32.mrf.mxu3  ;;  %v3353_v4 = vmax.f32 %v2851_v41, 0.0  ;;  %v4433_v37 = vmax.f32 %v3904_v43, 0.0 }
 0x58a   : > { %v5513_v10 = vmax.f32 %v4957_v45, 0.0 }
 0x58b   : > { %v6012_v34 = vpop.f32.mrf.mxu0  ;;  %2890 = vmatmul.bf16.gmra.mxu1 %v12845_v17  ;;  %v12454_v17 = vld [vmem:[%s14411_s2 + $0x160] sm:$0xff] }
 0x58c   : > { %v6594_v23 = vmax.f32 %v6012_v34, 0.0  ;;  %8105 = vmatpush.bf16.msra.mxu2 %v12454_v17 }
 0x58e   : > { %v13363_v44 = vpack.c.bf16 %v6594_v23, %v6593_v3 }
 0x590   : > { %v2853_v36 = vpop.f32.mrf.mxu1  ;;  %v3906_v61 = vpop.f32.mrf.mxu2 }
 0x591   : > { %v3354_v25 = vmax.f32 %v2853_v36, 0.0  ;;  %v4434_v48 = vmax.f32 %v3906_v61, 0.0  ;;  %v4959_v15 = vpop.f32.mrf.mxu3 }
 0x592   : > { %v5514_v26 = vmax.f32 %v4959_v15, 0.0 }
 0x593   : > { %v3563_v9 = vpack.c.bf16 %v3354_v25, %v3353_v4  ;;  %v4652_v29 = vpack.c.bf16 %v4434_v48, %v4433_v37  ;;  %v6015_v14 = vpop.f32.mrf.mxu0 }
 0x594   : > { %v5741_v8 = vpack.c.bf16 %v5514_v26, %v5513_v10  ;;  %v6595_v28 = vmax.f32 %v6015_v14, 0.0 }
 0x595   : > { %3948 = vmatmul.bf16.gmra.mxu2 %v3563_v9  ;;  %5001 = vmatmul.bf16.gmra.mxu3 %v4652_v29 }
 0x596   : > { %6054 = vmatmul.bf16.gmra.mxu0 %v5741_v8 }
 0x598   : > { %v2856_v35 = vpop.f32.mrf.mxu1  ;;  %v3909_v32 = vpop.f32.mrf.mxu2 }
 0x599   : > { %v4962_v62 = vpop.f32.mrf.mxu3  ;;  %v3355_v43 = vmax.f32 %v2856_v35, 0.0  ;;  %v4435_v45 = vmax.f32 %v3909_v32, 0.0 }
 0x59a   : > { %v5515_v36 = vmax.f32 %v4962_v62, 0.0 }
 0x59b   : > { %v6017_v12 = vpop.f32.mrf.mxu0  ;;  %2895 = vmatmul.bf16.gmra.mxu1 %v12869_v11 }
 0x59c   : > { %v6596_v2 = vmax.f32 %v6017_v12, 0.0 }
 0x59e   : > { %v13369_v52 = vpack.c.bf16 %v6596_v2, %v6595_v28 }
 0x5a0   : > { %v2858_v55 = vpop.f32.mrf.mxu1  ;;  %v3911_v41 = vpop.f32.mrf.mxu2 }
 0x5a1   : > { %v3356_v34 = vmax.f32 %v2858_v55, 0.0  ;;  %v4436_v3 = vmax.f32 %v3911_v41, 0.0  ;;  %v4964_v23 = vpop.f32.mrf.mxu3 }
 0x5a2   : > { %v5516_v61 = vmax.f32 %v4964_v23, 0.0 }
 0x5a3   : > { %v3564_v4 = vpack.c.bf16 %v3356_v34, %v3355_v43  ;;  %v4653_v37 = vpack.c.bf16 %v4436_v3, %v4435_v45  ;;  %v6020_v25 = vpop.f32.mrf.mxu0 }
 0x5a4   : > { %v5742_v48 = vpack.c.bf16 %v5516_v61, %v5515_v36  ;;  %v6597_v9 = vmax.f32 %v6020_v25, 0.0 }
 0x5a5   : > { %3953 = vmatmul.bf16.gmra.mxu2 %v3564_v4  ;;  %5006 = vmatmul.bf16.gmra.mxu3 %v4653_v37 }
 0x5a6   : > { %6059 = vmatmul.bf16.gmra.mxu0 %v5742_v48 }
 0x5a8   : > { %v2861_v11 = vpop.f32.mrf.mxu1  ;;  %v3914_v15 = vpop.f32.mrf.mxu2 }
 0x5a9   : > { %v4967_v10 = vpop.f32.mrf.mxu3  ;;  %v3357_v35 = vmax.f32 %v2861_v11, 0.0  ;;  %v4437_v32 = vmax.f32 %v3914_v15, 0.0 }
 0x5aa   : > { %v5517_v2 = vmax.f32 %v4967_v10, 0.0 }
 0x5ab   : > { %v6022_v26 = vpop.f32.mrf.mxu0  ;;  %2900 = vmatmul.bf16.gmra.mxu1 %v12890_v21 }
 0x5ac   : > { %v6598_v29 = vmax.f32 %v6022_v26, 0.0 }
 0x5ae   : > { %v13372_v14 = vpack.c.bf16 %v6598_v29, %v6597_v9 }
 0x5b0   : > { %v2863_v8 = vpop.f32.mrf.mxu1  ;;  %v3916_v17 = vpop.f32.mrf.mxu2 }
 0x5b1   : > { %v3358_v62 = vmax.f32 %v2863_v8, 0.0  ;;  %v4438_v12 = vmax.f32 %v3916_v17, 0.0  ;;  %v4969_v28 = vpop.f32.mrf.mxu3 }
 0x5b2   : > { %v5518_v55 = vmax.f32 %v4969_v28, 0.0 }
 0x5b3   : > { %v3565_v41 = vpack.c.bf16 %v3358_v62, %v3357_v35  ;;  %v4654_v43 = vpack.c.bf16 %v4438_v12, %v4437_v32  ;;  %v6025_v45 = vpop.f32.mrf.mxu0 }
 0x5b4   : > { %v5743_v34 = vpack.c.bf16 %v5518_v55, %v5517_v2  ;;  %v6599_v61 = vmax.f32 %v6025_v45, 0.0  ;;  %v12471_v45 = vld [vmem:[%s14412_s3 + $0x28] sm:$0xff] }
 0x5b5   : > { %3958 = vmatmul.bf16.gmra.mxu2 %v3565_v41  ;;  %5011 = vmatmul.bf16.gmra.mxu3 %v4654_v43 }
 0x5b6   : > { %6064 = vmatmul.bf16.gmra.mxu0 %v5743_v34 }
 0x5b7   : > { %10299 = vmatpush.bf16.msra.mxu0 %v12471_v45 }
 0x5b8   : > { %v2866_v21 = vpop.f32.mrf.mxu1  ;;  %v3919_v3 = vpop.f32.mrf.mxu2 }
 0x5b9   : > { %v4972_v23 = vpop.f32.mrf.mxu3  ;;  %v3359_v11 = vmax.f32 %v2866_v21, 0.0  ;;  %v4439_v15 = vmax.f32 %v3919_v3, 0.0 }
 0x5ba   : > { %v5519_v29 = vmax.f32 %v4972_v23, 0.0 }
 0x5bb   : > { %v6027_v36 = vpop.f32.mrf.mxu0  ;;  %2905 = vmatmul.bf16.gmra.mxu1 %v12911_v6 }
 0x5bc   : > { %v6600_v4 = vmax.f32 %v6027_v36, 0.0 }
 0x5be   : > { %v13375_v37 = vpack.c.bf16 %v6600_v4, %v6599_v61 }
 0x5c0   : > { %v2868_v25 = vpop.f32.mrf.mxu1  ;;  %v3921_v48 = vpop.f32.mrf.mxu2 }
 0x5c1   : > { %v3360_v10 = vmax.f32 %v2868_v25, 0.0  ;;  %v4440_v26 = vmax.f32 %v3921_v48, 0.0  ;;  %v4974_v9 = vpop.f32.mrf.mxu3 }
 0x5c2   : > { %v5520_v8 = vmax.f32 %v4974_v9, 0.0 }
 0x5c3   : > { %v3566_v17 = vpack.c.bf16 %v3360_v10, %v3359_v11  ;;  %v4655_v35 = vpack.c.bf16 %v4440_v26, %v4439_v15  ;;  %v6030_v32 = vpop.f32.mrf.mxu0 }
 0x5c4   : > { %v5744_v62 = vpack.c.bf16 %v5520_v8, %v5519_v29  ;;  %v6601_v55 = vmax.f32 %v6030_v32, 0.0 }
 0x5c5   : > { %3963 = vmatmul.bf16.gmra.mxu2 %v3566_v17  ;;  %5016 = vmatmul.bf16.gmra.mxu3 %v4655_v35 }
 0x5c6   : > { %6069 = vmatmul.bf16.gmra.mxu0 %v5744_v62 }
 0x5c8   : > { %v2871_v6 = vpop.f32.mrf.mxu1  ;;  %v3924_v12 = vpop.f32.mrf.mxu2 }
 0x5c9   : > { %v4977_v28 = vpop.f32.mrf.mxu3  ;;  %v3361_v3 = vmax.f32 %v2871_v6, 0.0  ;;  %v4441_v23 = vmax.f32 %v3924_v12, 0.0 }
 0x5ca   : > { %v5521_v25 = vmax.f32 %v4977_v28, 0.0 }
 0x5cb   : > { %v6032_v2 = vpop.f32.mrf.mxu0  ;;  %2910 = vmatmul.bf16.gmra.mxu1 %v12929_v1 }
 0x5cc   : > { %v6602_v41 = vmax.f32 %v6032_v2, 0.0 }
 0x5ce   : > { %v13378_v43 = vpack.c.bf16 %v6602_v41, %v6601_v55 }
 0x5d0   : > { %v2873_v34 = vpop.f32.mrf.mxu1  ;;  %v3926_v21 = vpop.f32.mrf.mxu2 }
 0x5d1   : > { %v3362_v36 = vmax.f32 %v2873_v34, 0.0  ;;  %v4442_v61 = vmax.f32 %v3926_v21, 0.0  ;;  %v4979_v4 = vpop.f32.mrf.mxu3 }
 0x5d2   : > { %v5522_v48 = vmax.f32 %v4979_v4, 0.0 }
 0x5d3   : > { %v3567_v11 = vpack.c.bf16 %v3362_v36, %v3361_v3  ;;  %v4656_v1 = vpack.c.bf16 %v4442_v61, %v4441_v23  ;;  %v6035_v15 = vpop.f32.mrf.mxu0 }
 0x5d4   : > { %v5745_v10 = vpack.c.bf16 %v5522_v48, %v5521_v25  ;;  %v6603_v17 = vmax.f32 %v6035_v15, 0.0 }
 0x5d5   : > { %3968 = vmatmul.bf16.gmra.mxu2 %v3567_v11  ;;  %5021 = vmatmul.bf16.gmra.mxu3 %v4656_v1 }
 0x5d6   : > { %6074 = vmatmul.bf16.gmra.mxu0 %v5745_v10 }
 0x5d8   : > { %v2876_v26 = vpop.f32.mrf.mxu1  ;;  %v3929_v9 = vpop.f32.mrf.mxu2 }
 0x5d9   : > { %v4982_v29 = vpop.f32.mrf.mxu3  ;;  %v3363_v12 = vmax.f32 %v2876_v26, 0.0  ;;  %v4443_v28 = vmax.f32 %v3929_v9, 0.0 }
 0x5da   : > { %v5523_v45 = vmax.f32 %v4982_v29, 0.0 }
 0x5db   : > { %v6037_v8 = vpop.f32.mrf.mxu0  ;;  %2915 = vmatmul.bf16.gmra.mxu1 %v12953_v49 }
 0x5dc   : > { %v6604_v35 = vmax.f32 %v6037_v8, 0.0 }
 0x5de   : > { %v13384_v32 = vpack.c.bf16 %v6604_v35, %v6603_v17 }
 0x5e0   : > { %v2878_v62 = vpop.f32.mrf.mxu1  ;;  %v3931_v6 = vpop.f32.mrf.mxu2 }
 0x5e1   : > { %v3364_v2 = vmax.f32 %v2878_v62, 0.0  ;;  %v4444_v55 = vmax.f32 %v3931_v6, 0.0  ;;  %v4984_v41 = vpop.f32.mrf.mxu3 }
 0x5e2   : > { %v5524_v34 = vmax.f32 %v4984_v41, 0.0 }
 0x5e3   : > { %v3568_v21 = vpack.c.bf16 %v3364_v2, %v3363_v12  ;;  %v4657_v3 = vpack.c.bf16 %v4444_v55, %v4443_v28  ;;  %v6040_v23 = vpop.f32.mrf.mxu0 }
 0x5e4   : > { %v5746_v36 = vpack.c.bf16 %v5524_v34, %v5523_v45  ;;  %v6605_v48 = vmax.f32 %v6040_v23, 0.0 }
 0x5e5   : > { %3973 = vmatmul.bf16.gmra.mxu2 %v3568_v21  ;;  %5026 = vmatmul.bf16.gmra.mxu3 %v4657_v3 }
 0x5e6   : > { %6079 = vmatmul.bf16.gmra.mxu0 %v5746_v36 }
 0x5e8   : > { %v2881_v49 = vpop.f32.mrf.mxu1  ;;  %v3934_v61 = vpop.f32.mrf.mxu2 }
 0x5e9   : > { %v4987_v4 = vpop.f32.mrf.mxu3  ;;  %v3365_v26 = vmax.f32 %v2881_v49, 0.0  ;;  %v4445_v9 = vmax.f32 %v3934_v61, 0.0 }
 0x5ea   : > { %v5525_v35 = vmax.f32 %v4987_v4, 0.0 }
 0x5eb   : > { %v6042_v25 = vpop.f32.mrf.mxu0  ;;  %2920 = vmatmul.bf16.gmra.mxu1 %v12973_v31 }
 0x5ec   : > { %v6606_v11 = vmax.f32 %v6042_v25, 0.0 }
 0x5ee   : > { %v13387_v1 = vpack.c.bf16 %v6606_v11, %v6605_v48 }
 0x5f0   : > { %v2883_v15 = vpop.f32.mrf.mxu1  ;;  %v3936_v10 = vpop.f32.mrf.mxu2 }
 0x5f1   : > { %v3366_v29 = vmax.f32 %v2883_v15, 0.0  ;;  %v4446_v8 = vmax.f32 %v3936_v10, 0.0  ;;  %v4989_v17 = vpop.f32.mrf.mxu3 }
 0x5f2   : > { %v5526_v62 = vmax.f32 %v4989_v17, 0.0 }
 0x5f3   : > { %v3569_v6 = vpack.c.bf16 %v3366_v29, %v3365_v26  ;;  %v4658_v12 = vpack.c.bf16 %v4446_v8, %v4445_v9  ;;  %v6045_v28 = vpop.f32.mrf.mxu0 }
 0x5f4   : > { %v5747_v2 = vpack.c.bf16 %v5526_v62, %v5525_v35  ;;  %v6607_v34 = vmax.f32 %v6045_v28, 0.0  ;;  %v12445_v28 = vld [vmem:[%s14411_s2 + $0x118] sm:$0xff] }
 0x5f5   : > { %3978 = vmatmul.bf16.gmra.mxu2 %v3569_v6  ;;  %5031 = vmatmul.bf16.gmra.mxu3 %v4658_v12 }
 0x5f6   : > { %6084 = vmatmul.bf16.gmra.mxu0 %v5747_v2  ;;  %7008 = vmatpush.bf16.msra.mxu1 %v12445_v28 }
 0x5f8   : > { %v2886_v31 = vpop.f32.mrf.mxu1  ;;  %v3939_v55 = vpop.f32.mrf.mxu2 }
 0x5f9   : > { %v4992_v41 = vpop.f32.mrf.mxu3  ;;  %v3367_v49 = vmax.f32 %v2886_v31, 0.0  ;;  %v4447_v61 = vmax.f32 %v3939_v55, 0.0 }
 0x5fa   : > { %v5527_v11 = vmax.f32 %v4992_v41, 0.0 }
 0x5fb   : > { %v6047_v45 = vpop.f32.mrf.mxu0  ;;  %2925 = vmatmul.bf16.gmra.mxu1 %v12996_v39 }
 0x5fc   : > { %v6608_v21 = vmax.f32 %v6047_v45, 0.0 }
 0x5fe   : > { %v13390_v3 = vpack.c.bf16 %v6608_v21, %v6607_v34 }
 0x600   : > { %v2888_v23 = vpop.f32.mrf.mxu1  ;;  %v3941_v36 = vpop.f32.mrf.mxu2 }
 0x601   : > { %v3368_v4 = vmax.f32 %v2888_v23, 0.0  ;;  %v4448_v25 = vmax.f32 %v3941_v36, 0.0  ;;  %v4994_v48 = vpop.f32.mrf.mxu3 }
 0x602   : > { %v5528_v15 = vmax.f32 %v4994_v48, 0.0 }
 0x603   : > { %v3570_v10 = vpack.c.bf16 %v3368_v4, %v3367_v49  ;;  %v4659_v26 = vpack.c.bf16 %v4448_v25, %v4447_v61  ;;  %v6050_v9 = vpop.f32.mrf.mxu0 }
 0x604   : > { %v5748_v29 = vpack.c.bf16 %v5528_v15, %v5527_v11  ;;  %v6609_v62 = vmax.f32 %v6050_v9, 0.0 }
 0x605   : > { %3983 = vmatmul.bf16.gmra.mxu2 %v3570_v10  ;;  %5036 = vmatmul.bf16.gmra.mxu3 %v4659_v26 }
 0x606   : > { %6089 = vmatmul.bf16.gmra.mxu0 %v5748_v29 }
 0x608   : > { %v2891_v39 = vpop.f32.mrf.mxu1  ;;  %v3944_v8 = vpop.f32.mrf.mxu2 }
 0x609   : > { %v4997_v17 = vpop.f32.mrf.mxu3  ;;  %v3369_v55 = vmax.f32 %v2891_v39, 0.0  ;;  %v4449_v41 = vmax.f32 %v3944_v8, 0.0 }
 0x60a   : > { %v5529_v23 = vmax.f32 %v4997_v17, 0.0 }
 0x60b   : > { %v6052_v35 = vpop.f32.mrf.mxu0  ;;  %2930 = vmatmul.bf16.gmra.mxu1 %v13016_v42 }
 0x60c   : > { %v6610_v6 = vmax.f32 %v6052_v35, 0.0 }
 0x60e   : > { %v13393_v12 = vpack.c.bf16 %v6610_v6, %v6609_v62 }
 0x610   : > { %v2893_v2 = vpop.f32.mrf.mxu1  ;;  %v3946_v31 = vpop.f32.mrf.mxu2 }
 0x611   : > { %v3370_v45 = vmax.f32 %v2893_v2, 0.0  ;;  %v4450_v34 = vmax.f32 %v3946_v31, 0.0  ;;  %v4999_v21 = vpop.f32.mrf.mxu3 }
 0x612   : > { %v5530_v36 = vmax.f32 %v4999_v21, 0.0 }
 0x613   : > { %v3571_v49 = vpack.c.bf16 %v3370_v45, %v3369_v55  ;;  %v4660_v42 = vpack.c.bf16 %v4450_v34, %v4449_v41  ;;  %v6055_v61 = vpop.f32.mrf.mxu0 }
 0x614   : > { %v5749_v4 = vpack.c.bf16 %v5530_v36, %v5529_v23  ;;  %v6611_v10 = vmax.f32 %v6055_v61, 0.0 }
 0x615   : > { %3988 = vmatmul.bf16.gmra.mxu2 %v3571_v49  ;;  %5041 = vmatmul.bf16.gmra.mxu3 %v4660_v42 }
 0x616   : > { %6094 = vmatmul.bf16.gmra.mxu0 %v5749_v4 }
 0x618   : > { %v2896_v25 = vpop.f32.mrf.mxu1  ;;  %v3949_v48 = vpop.f32.mrf.mxu2 }
 0x619   : > { %v5002_v11 = vpop.f32.mrf.mxu3  ;;  %v3371_v8 = vmax.f32 %v2896_v25, 0.0  ;;  %v4451_v17 = vmax.f32 %v3949_v48, 0.0 }
 0x61a   : > { %v5531_v28 = vmax.f32 %v5002_v11, 0.0 }
 0x61b   : > { %v6057_v15 = vpop.f32.mrf.mxu0  ;;  %2935 = vmatmul.bf16.gmra.mxu1 %v13035_v54  ;;  %v12462_v54 = vld [vmem:[%s14411_s2 + $0x1a0] sm:$0xff] }
 0x61c   : > { %v6612_v26 = vmax.f32 %v6057_v15, 0.0  ;;  %9203 = vmatpush.bf16.msra.mxu3 %v12462_v54 }
 0x61e   : > { %v13399_v9 = vpack.c.bf16 %v6612_v26, %v6611_v10 }
 0x620   : > { %v2898_v29 = vpop.f32.mrf.mxu1  ;;  %v3951_v39 = vpop.f32.mrf.mxu2 }
 0x621   : > { %v3372_v35 = vmax.f32 %v2898_v29, 0.0  ;;  %v4452_v62 = vmax.f32 %v3951_v39, 0.0  ;;  %v5004_v6 = vpop.f32.mrf.mxu3 }
 0x622   : > { %v5532_v2 = vmax.f32 %v5004_v6, 0.0 }
 0x623   : > { %v3572_v31 = vpack.c.bf16 %v3372_v35, %v3371_v8  ;;  %v4661_v55 = vpack.c.bf16 %v4452_v62, %v4451_v17  ;;  %v6060_v41 = vpop.f32.mrf.mxu0 }
 0x624   : > { %v5750_v45 = vpack.c.bf16 %v5532_v2, %v5531_v28  ;;  %v6613_v49 = vmax.f32 %v6060_v41, 0.0 }
 0x625   : > { %3993 = vmatmul.bf16.gmra.mxu2 %v3572_v31  ;;  %5046 = vmatmul.bf16.gmra.mxu3 %v4661_v55 }
 0x626   : > { %6099 = vmatmul.bf16.gmra.mxu0 %v5750_v45 }
 0x628   : > { %v2901_v34 = vpop.f32.mrf.mxu1  ;;  %v3954_v21 = vpop.f32.mrf.mxu2 }
 0x629   : > { %v5007_v23 = vpop.f32.mrf.mxu3  ;;  %v3373_v48 = vmax.f32 %v2901_v34, 0.0  ;;  %v4453_v11 = vmax.f32 %v3954_v21, 0.0 }
 0x62a   : > { %v5533_v29 = vmax.f32 %v5007_v23, 0.0 }
 0x62b   : > { %v6062_v36 = vpop.f32.mrf.mxu0  ;;  %2940 = vmatmul.bf16.gmra.mxu1 %v13056_v38 }
 0x62c   : > { %v6614_v42 = vmax.f32 %v6062_v36, 0.0 }
 0x62e   : > { %v13405_v61 = vpack.c.bf16 %v6614_v42, %v6613_v49 }
 0x630   : > { %v2903_v4 = vpop.f32.mrf.mxu1  ;;  %v3956_v25 = vpop.f32.mrf.mxu2 }
 0x631   : > { %v3374_v15 = vmax.f32 %v2903_v4, 0.0  ;;  %v4454_v10 = vmax.f32 %v3956_v25, 0.0  ;;  %v5009_v26 = vpop.f32.mrf.mxu3 }
 0x632   : > { %v5534_v39 = vmax.f32 %v5009_v26, 0.0 }
 0x633   : > { %v3573_v8 = vpack.c.bf16 %v3374_v15, %v3373_v48  ;;  %v4662_v17 = vpack.c.bf16 %v4454_v10, %v4453_v11  ;;  %v6065_v35 = vpop.f32.mrf.mxu0 }
 0x634   : > { %v5751_v62 = vpack.c.bf16 %v5534_v39, %v5533_v29  ;;  %v6615_v31 = vmax.f32 %v6065_v35, 0.0 }
 0x635   : > { %3998 = vmatmul.bf16.gmra.mxu2 %v3573_v8  ;;  %5051 = vmatmul.bf16.gmra.mxu3 %v4662_v17 }
 0x636   : > { %6104 = vmatmul.bf16.gmra.mxu0 %v5751_v62 }
 0x638   : > { %v2906_v38 = vpop.f32.mrf.mxu1  ;;  %v3959_v6 = vpop.f32.mrf.mxu2 }
 0x639   : > { %v5012_v28 = vpop.f32.mrf.mxu3  ;;  %v3375_v34 = vmax.f32 %v2906_v38, 0.0  ;;  %v4455_v21 = vmax.f32 %v3959_v6, 0.0 }
 0x63a   : > { %v5535_v42 = vmax.f32 %v5012_v28, 0.0 }
 0x63b   : > { %v6067_v2 = vpop.f32.mrf.mxu0  ;;  %2945 = vmatmul.bf16.gmra.mxu1 %v13075_v18 }
 0x63c   : > { %v6616_v55 = vmax.f32 %v6067_v2, 0.0 }
 0x63e   : > { %v13408_v41 = vpack.c.bf16 %v6616_v55, %v6615_v31 }
 0x640   : > { %v2908_v45 = vpop.f32.mrf.mxu1  ;;  %v3961_v54 = vpop.f32.mrf.mxu2 }
 0x641   : > { %v3376_v23 = vmax.f32 %v2908_v45, 0.0  ;;  %v4456_v36 = vmax.f32 %v3961_v54, 0.0  ;;  %v5014_v49 = vpop.f32.mrf.mxu3 }
 0x642   : > { %v5536_v4 = vmax.f32 %v5014_v49, 0.0 }
 0x643   : > { %v3574_v25 = vpack.c.bf16 %v3376_v23, %v3375_v34  ;;  %v4663_v48 = vpack.c.bf16 %v4456_v36, %v4455_v21  ;;  %v6070_v11 = vpop.f32.mrf.mxu0 }
 0x644   : > { %v5752_v15 = vpack.c.bf16 %v5536_v4, %v5535_v42  ;;  %v6617_v39 = vmax.f32 %v6070_v11, 0.0 }
 0x645   : > { %4003 = vmatmul.bf16.gmra.mxu2 %v3574_v25  ;;  %5056 = vmatmul.bf16.gmra.mxu3 %v4663_v48 }
 0x646   : > { %6109 = vmatmul.bf16.gmra.mxu0 %v5752_v15 }
 0x648   : > { %v2911_v18 = vpop.f32.mrf.mxu1  ;;  %v3964_v10 = vpop.f32.mrf.mxu2 }
 0x649   : > { %v5017_v26 = vpop.f32.mrf.mxu3  ;;  %v3377_v38 = vmax.f32 %v2911_v18, 0.0  ;;  %v4457_v6 = vmax.f32 %v3964_v10, 0.0 }
 0x64a   : > { %v5537_v55 = vmax.f32 %v5017_v26, 0.0 }
 0x64b   : > { %v6072_v29 = vpop.f32.mrf.mxu0  ;;  %2950 = vmatmul.bf16.gmra.mxu1 %v12661_v19 }
 0x64c   : > { %v6618_v8 = vmax.f32 %v6072_v29, 0.0 }
 0x64e   : > { %v13411_v17 = vpack.c.bf16 %v6618_v8, %v6617_v39 }
 0x650   : > { %v2913_v35 = vpop.f32.mrf.mxu1  ;;  %v3966_v62 = vpop.f32.mrf.mxu2 }
 0x651   : > { %v3378_v28 = vmax.f32 %v2913_v35, 0.0  ;;  %v4458_v2 = vmax.f32 %v3966_v62, 0.0  ;;  %v5019_v31 = vpop.f32.mrf.mxu3 }
 0x652   : > { %v5538_v45 = vmax.f32 %v5019_v31, 0.0 }
 0x653   : > { %v3575_v54 = vpack.c.bf16 %v3378_v28, %v3377_v38  ;;  %v4664_v34 = vpack.c.bf16 %v4458_v2, %v4457_v6  ;;  %v6075_v21 = vpop.f32.mrf.mxu0 }
 0x654   : > { %v5753_v23 = vpack.c.bf16 %v5538_v45, %v5537_v55  ;;  %v6619_v4 = vmax.f32 %v6075_v21, 0.0 }
 0x655   : > { %4008 = vmatmul.bf16.gmra.mxu2 %v3575_v54  ;;  %5061 = vmatmul.bf16.gmra.mxu3 %v4664_v34 }
 0x656   : > { %6114 = vmatmul.bf16.gmra.mxu0 %v5753_v23 }
 0x658   : > { %v2916_v19 = vpop.f32.mrf.mxu1  ;;  %v3969_v36 = vpop.f32.mrf.mxu2 }
 0x659   : > { %v5022_v49 = vpop.f32.mrf.mxu3  ;;  %v3379_v18 = vmax.f32 %v2916_v19, 0.0  ;;  %v4459_v10 = vmax.f32 %v3969_v36, 0.0 }
 0x65a   : > { %v5539_v8 = vmax.f32 %v5022_v49, 0.0 }
 0x65b   : > { %v6077_v42 = vpop.f32.mrf.mxu0  ;;  %2955 = vmatmul.bf16.gmra.mxu1 %v12669_v33 }
 0x65c   : > { %v6620_v25 = vmax.f32 %v6077_v42, 0.0 }
 0x65e   : > { %v13414_v48 = vpack.c.bf16 %v6620_v25, %v6619_v4 }
 0x660   : > { %v2918_v11 = vpop.f32.mrf.mxu1  ;;  %v3971_v15 = vpop.f32.mrf.mxu2 }
 0x661   : > { %v3380_v26 = vmax.f32 %v2918_v11, 0.0  ;;  %v4460_v29 = vmax.f32 %v3971_v15, 0.0  ;;  %v5024_v39 = vpop.f32.mrf.mxu3 }
 0x662   : > { %v5540_v35 = vmax.f32 %v5024_v39, 0.0 }
 0x663   : > { %v3576_v62 = vpack.c.bf16 %v3380_v26, %v3379_v18  ;;  %v4665_v38 = vpack.c.bf16 %v4460_v29, %v4459_v10  ;;  %v6080_v6 = vpop.f32.mrf.mxu0 }
 0x664   : > { %v5754_v28 = vpack.c.bf16 %v5540_v35, %v5539_v8  ;;  %v6621_v45 = vmax.f32 %v6080_v6, 0.0 }
 0x665   : > { %4013 = vmatmul.bf16.gmra.mxu2 %v3576_v62  ;;  %5066 = vmatmul.bf16.gmra.mxu3 %v4665_v38 }
 0x666   : > { %6119 = vmatmul.bf16.gmra.mxu0 %v5754_v28 }
 0x668   : > { %v2921_v33 = vpop.f32.mrf.mxu1  ;;  %v3974_v2 = vpop.f32.mrf.mxu2 }
 0x669   : > { %v5027_v31 = vpop.f32.mrf.mxu3  ;;  %v3381_v19 = vmax.f32 %v2921_v33, 0.0  ;;  %v4461_v36 = vmax.f32 %v3974_v2, 0.0 }
 0x66a   : > { %v5541_v25 = vmax.f32 %v5027_v31, 0.0 }
 0x66b   : > { %v6082_v55 = vpop.f32.mrf.mxu0  ;;  %2960 = vmatmul.bf16.gmra.mxu1 %v12677_v47 }
 0x66c   : > { %v6622_v54 = vmax.f32 %v6082_v55, 0.0 }
 0x66e   : > { %v13417_v34 = vpack.c.bf16 %v6622_v54, %v6621_v45 }
 0x670   : > { %v2923_v21 = vpop.f32.mrf.mxu1  ;;  %v3976_v23 = vpop.f32.mrf.mxu2 }
 0x671   : > { %v3382_v49 = vmax.f32 %v2923_v21, 0.0  ;;  %v4462_v42 = vmax.f32 %v3976_v23, 0.0  ;;  %v5029_v4 = vpop.f32.mrf.mxu3 }
 0x672   : > { %v5542_v11 = vmax.f32 %v5029_v4, 0.0 }
 0x673   : > { %v3577_v15 = vpack.c.bf16 %v3382_v49, %v3381_v19  ;;  %v4666_v18 = vpack.c.bf16 %v4462_v42, %v4461_v36  ;;  %v6085_v10 = vpop.f32.mrf.mxu0 }
 0x674   : > { %v5755_v26 = vpack.c.bf16 %v5542_v11, %v5541_v25  ;;  %v6623_v35 = vmax.f32 %v6085_v10, 0.0 }
 0x675   : > { %4018 = vmatmul.bf16.gmra.mxu2 %v3577_v15  ;;  %5071 = vmatmul.bf16.gmra.mxu3 %v4666_v18 }
 0x676   : > { %6124 = vmatmul.bf16.gmra.mxu0 %v5755_v26 }
 0x678   : > { %v2926_v47 = vpop.f32.mrf.mxu1  ;;  %v3979_v29 = vpop.f32.mrf.mxu2 }
 0x679   : > { %v5032_v39 = vpop.f32.mrf.mxu3  ;;  %v3383_v33 = vmax.f32 %v2926_v47, 0.0  ;;  %v4463_v2 = vmax.f32 %v3979_v29, 0.0 }
 0x67a   : > { %v5543_v54 = vmax.f32 %v5032_v39, 0.0 }
 0x67b   : > { %v6087_v8 = vpop.f32.mrf.mxu0  ;;  %2965 = vmatmul.bf16.gmra.mxu1 %v12693_v0 }
 0x67c   : > { %v6624_v62 = vmax.f32 %v6087_v8, 0.0 }
 0x67e   : > { %v13420_v38 = vpack.c.bf16 %v6624_v62, %v6623_v35 }
 0x680   : > { %v2928_v6 = vpop.f32.mrf.mxu1  ;;  %v3981_v28 = vpop.f32.mrf.mxu2 }
 0x681   : > { %v3384_v31 = vmax.f32 %v2928_v6, 0.0  ;;  %v4464_v55 = vmax.f32 %v3981_v28, 0.0  ;;  %v5034_v45 = vpop.f32.mrf.mxu3 }
 0x682   : > { %v5544_v21 = vmax.f32 %v5034_v45, 0.0 }
 0x683   : > { %v3578_v23 = vpack.c.bf16 %v3384_v31, %v3383_v33  ;;  %v4667_v19 = vpack.c.bf16 %v4464_v55, %v4463_v2  ;;  %v6090_v36 = vpop.f32.mrf.mxu0 }
 0x684   : > { %v5756_v49 = vpack.c.bf16 %v5544_v21, %v5543_v54  ;;  %v6625_v11 = vmax.f32 %v6090_v36, 0.0 }
 0x685   : > { %4023 = vmatmul.bf16.gmra.mxu2 %v3578_v23  ;;  %5076 = vmatmul.bf16.gmra.mxu3 %v4667_v19  ;;  %v14495_v23 = vld [vmem:[#allocation2_spill] sm:$0xff] }
 0x686   : > { %6129 = vmatmul.bf16.gmra.mxu0 %v5756_v49 }
 0x688   : > { %v2931_v0 = vpop.f32.mrf.mxu1  ;;  %v3984_v42 = vpop.f32.mrf.mxu2 }
 0x689   : > { %v5037_v4 = vpop.f32.mrf.mxu3  ;;  %v3385_v47 = vmax.f32 %v2931_v0, 0.0  ;;  %v4465_v29 = vmax.f32 %v3984_v42, 0.0 }
 0x68a   : > { %v5545_v62 = vmax.f32 %v5037_v4, 0.0 }
 0x68b   : > { %v6092_v25 = vpop.f32.mrf.mxu0  ;;  %2970 = vmatmul.bf16.gmra.mxu1 %v12706_v16  ;;  %v12453_v16 = vld [vmem:[%s14411_s2 + $0x158] sm:$0xff] }
 0x68c   : > { %v6626_v15 = vmax.f32 %v6092_v25, 0.0  ;;  %8106 = vmatpush.bf16.msra.mxu2 %v12453_v16 }
 0x68e   : > { %v13423_v18 = vpack.c.bf16 %v6626_v15, %v6625_v11 }
 0x690   : > { %v2933_v10 = vpop.f32.mrf.mxu1  ;;  %v3986_v26 = vpop.f32.mrf.mxu2 }
 0x691   : > { %v3386_v39 = vmax.f32 %v2933_v10, 0.0  ;;  %v4466_v8 = vmax.f32 %v3986_v26, 0.0  ;;  %v5039_v35 = vpop.f32.mrf.mxu3 }
 0x692   : > { %v5546_v6 = vmax.f32 %v5039_v35, 0.0 }
 0x693   : > { %v3579_v28 = vpack.c.bf16 %v3386_v39, %v3385_v47  ;;  %v4668_v33 = vpack.c.bf16 %v4466_v8, %v4465_v29  ;;  %v6095_v2 = vpop.f32.mrf.mxu0 }
 0x694   : > { %v5757_v31 = vpack.c.bf16 %v5546_v6, %v5545_v62  ;;  %v6627_v19 = vmax.f32 %v6095_v2, 0.0  ;;  %v14496_v2 = vld [vmem:[#allocation3_spill] sm:$0xff] }
 0x695   : > { %4028 = vmatmul.bf16.gmra.mxu2 %v3579_v28  ;;  %5081 = vmatmul.bf16.gmra.mxu3 %v4668_v33 }
 0x696   : > { %6134 = vmatmul.bf16.gmra.mxu0 %v5757_v31 }
 0x698   : > { %v2936_v55 = vpop.f32.mrf.mxu1  ;;  %v3989_v45 = vpop.f32.mrf.mxu2 }
 0x699   : > { %v5042_v54 = vpop.f32.mrf.mxu3  ;;  %v3387_v4 = vmax.f32 %v2936_v55, 0.0  ;;  %v4467_v25 = vmax.f32 %v3989_v45, 0.0 }
 0x69a   : > { %v5547_v26 = vmax.f32 %v5042_v54, 0.0 }
 0x69b   : > { %v6097_v21 = vpop.f32.mrf.mxu0  ;;  %2975 = vmatmul.bf16.gmra.mxu1 %v14495_v23 }
 0x69c   : > { %v6628_v36 = vmax.f32 %v6097_v21, 0.0 }
 0x69e   : > { %v13429_v49 = vpack.c.bf16 %v6628_v36, %v6627_v19 }
 0x6a0   : > { %v2938_v0 = vpop.f32.mrf.mxu1  ;;  %v3991_v42 = vpop.f32.mrf.mxu2 }
 0x6a1   : > { %v3388_v11 = vmax.f32 %v2938_v0, 0.0  ;;  %v4468_v15 = vmax.f32 %v3991_v42, 0.0  ;;  %v5044_v10 = vpop.f32.mrf.mxu3 }
 0x6a2   : > { %v5548_v47 = vmax.f32 %v5044_v10, 0.0 }
 0x6a3   : > { %v3580_v29 = vpack.c.bf16 %v3388_v11, %v3387_v4  ;;  %v4669_v39 = vpack.c.bf16 %v4468_v15, %v4467_v25  ;;  %v6100_v8 = vpop.f32.mrf.mxu0 }
 0x6a4   : > { %v5758_v35 = vpack.c.bf16 %v5548_v47, %v5547_v26  ;;  %v6629_v31 = vmax.f32 %v6100_v8, 0.0  ;;  %v14497_v8 = vld [vmem:[#allocation4_spill] sm:$0xff] }
 0x6a5   : > { %4033 = vmatmul.bf16.gmra.mxu2 %v3580_v29  ;;  %5086 = vmatmul.bf16.gmra.mxu3 %v4669_v39 }
 0x6a6   : > { %6139 = vmatmul.bf16.gmra.mxu0 %v5758_v35 }
 0x6a8   : > { %v2941_v62 = vpop.f32.mrf.mxu1  ;;  %v3994_v6 = vpop.f32.mrf.mxu2 }
 0x6a9   : > { %v5047_v28 = vpop.f32.mrf.mxu3  ;;  %v3389_v21 = vmax.f32 %v2941_v62, 0.0  ;;  %v4469_v23 = vmax.f32 %v3994_v6, 0.0 }
 0x6aa   : > { %v5549_v42 = vmax.f32 %v5047_v28, 0.0 }
 0x6ab   : > { %v6102_v33 = vpop.f32.mrf.mxu0  ;;  %2980 = vmatmul.bf16.gmra.mxu1 %v14496_v2 }
 0x6ac   : > { %v6630_v16 = vmax.f32 %v6102_v33, 0.0 }
 0x6ae   : > { %v13432_v55 = vpack.c.bf16 %v6630_v16, %v6629_v31 }
 0x6b0   : > { %v2943_v45 = vpop.f32.mrf.mxu1  ;;  %v3996_v54 = vpop.f32.mrf.mxu2 }
 0x6b1   : > { %v3390_v19 = vmax.f32 %v2943_v45, 0.0  ;;  %v4470_v36 = vmax.f32 %v3996_v54, 0.0  ;;  %v5049_v0 = vpop.f32.mrf.mxu3 }
 0x6b2   : > { %v5550_v4 = vmax.f32 %v5049_v0, 0.0 }
 0x6b3   : > { %v3581_v25 = vpack.c.bf16 %v3390_v19, %v3389_v21  ;;  %v4670_v11 = vpack.c.bf16 %v4470_v36, %v4469_v23  ;;  %v6105_v15 = vpop.f32.mrf.mxu0 }
 0x6b4   : > { %v5759_v10 = vpack.c.bf16 %v5550_v4, %v5549_v42  ;;  %v6631_v35 = vmax.f32 %v6105_v15, 0.0 }
 0x6b5   : > { %4038 = vmatmul.bf16.gmra.mxu2 %v3581_v25  ;;  %5091 = vmatmul.bf16.gmra.mxu3 %v4670_v11 }
 0x6b6   : > { %6144 = vmatmul.bf16.gmra.mxu0 %v5759_v10  ;;  %v14498_v10 = vld [vmem:[#allocation5_spill] sm:$0xff] }
 0x6b8   : > { %v2946_v26 = vpop.f32.mrf.mxu1  ;;  %v3999_v47 = vpop.f32.mrf.mxu2 }
 0x6b9   : > { %v5052_v29 = vpop.f32.mrf.mxu3  ;;  %v3391_v2 = vmax.f32 %v2946_v26, 0.0  ;;  %v4471_v31 = vmax.f32 %v3999_v47, 0.0 }
 0x6ba   : > { %v5551_v21 = vmax.f32 %v5052_v29, 0.0  ;;  %v12470_v29 = vld [vmem:[%s14412_s3 + $0x20] sm:$0xff] }
 0x6bb   : > { %v6107_v39 = vpop.f32.mrf.mxu0  ;;  %2985 = vmatmul.bf16.gmra.mxu1 %v14497_v8  ;;  %10300 = vmatpush.bf16.msra.mxu0 %v12470_v29 }
 0x6bc   : > { %v6632_v62 = vmax.f32 %v6107_v39, 0.0 }
 0x6be   : > { %v13435_v6 = vpack.c.bf16 %v6632_v62, %v6631_v35 }
 0x6c0   : > { %v2948_v33 = vpop.f32.mrf.mxu1  ;;  %v4001_v28 = vpop.f32.mrf.mxu2 }
 0x6c1   : > { %v3392_v16 = vmax.f32 %v2948_v33, 0.0  ;;  %v4472_v45 = vmax.f32 %v4001_v28, 0.0  ;;  %v5054_v54 = vpop.f32.mrf.mxu3 }
 0x6c2   : > { %v5552_v23 = vmax.f32 %v5054_v54, 0.0 }
 0x6c3   : > { %v3582_v19 = vpack.c.bf16 %v3392_v16, %v3391_v2  ;;  %v4671_v36 = vpack.c.bf16 %v4472_v45, %v4471_v31  ;;  %v6110_v0 = vpop.f32.mrf.mxu0 }
 0x6c4   : > { %v5760_v42 = vpack.c.bf16 %v5552_v23, %v5551_v21  ;;  %v6633_v26 = vmax.f32 %v6110_v0, 0.0 }
 0x6c5   : > { %4043 = vmatmul.bf16.gmra.mxu2 %v3582_v19  ;;  %5096 = vmatmul.bf16.gmra.mxu3 %v4671_v36 }
 0x6c6   : > { %6149 = vmatmul.bf16.gmra.mxu0 %v5760_v42 }
 0x6c8   : > { %v2951_v4 = vpop.f32.mrf.mxu1  ;;  %v4004_v25 = vpop.f32.mrf.mxu2 }
 0x6c9   : > { %v5057_v11 = vpop.f32.mrf.mxu3  ;;  %v3393_v62 = vmax.f32 %v2951_v4, 0.0  ;;  %v4473_v33 = vmax.f32 %v4004_v25, 0.0 }
 0x6ca   : > { %v5553_v16 = vmax.f32 %v5057_v11, 0.0 }
 0x6cb   : > { %v6112_v15 = vpop.f32.mrf.mxu0  ;;  %2990 = vmatmul.bf16.gmra.mxu1 %v14498_v10  ;;  %v14500_v10 = vld [vmem:[#allocation6_spill] sm:$0xff] }
 0x6cc   : > { %v6634_v47 = vmax.f32 %v6112_v15, 0.0 }
 0x6ce   : > { %v13438_v39 = vpack.c.bf16 %v6634_v47, %v6633_v26 }
 0x6d0   : > { %14499 = vst [vmem:[#allocation2_spill] sm:$0xff] %v13438_v39  ;;  %v2953_v8 = vpop.f32.mrf.mxu1  ;;  %v4006_v35 = vpop.f32.mrf.mxu2 }
 0x6d1   : > { %v3394_v28 = vmax.f32 %v2953_v8, 0.0  ;;  %v4474_v2 = vmax.f32 %v4006_v35, 0.0  ;;  %v5059_v31 = vpop.f32.mrf.mxu3 }
 0x6d2   : > { %v5554_v45 = vmax.f32 %v5059_v31, 0.0 }
 0x6d3   : > { %v3583_v54 = vpack.c.bf16 %v3394_v28, %v3393_v62  ;;  %v4672_v21 = vpack.c.bf16 %v4474_v2, %v4473_v33  ;;  %v6115_v23 = vpop.f32.mrf.mxu0 }
 0x6d4   : > { %v5761_v19 = vpack.c.bf16 %v5554_v45, %v5553_v16  ;;  %v6635_v4 = vmax.f32 %v6115_v23, 0.0 }
 0x6d5   : > { %4048 = vmatmul.bf16.gmra.mxu2 %v3583_v54  ;;  %5101 = vmatmul.bf16.gmra.mxu3 %v4672_v21 }
 0x6d6   : > { %6154 = vmatmul.bf16.gmra.mxu0 %v5761_v19 }
 0x6d8   : > { %v2956_v36 = vpop.f32.mrf.mxu1  ;;  %v4009_v0 = vpop.f32.mrf.mxu2 }
 0x6d9   : > { %v5062_v42 = vpop.f32.mrf.mxu3  ;;  %v3395_v29 = vmax.f32 %v2956_v36, 0.0  ;;  %v4475_v8 = vmax.f32 %v4009_v0, 0.0 }
 0x6da   : > { %v5555_v28 = vmax.f32 %v5062_v42, 0.0 }
 0x6db   : > { %v6117_v15 = vpop.f32.mrf.mxu0  ;;  %2995 = vmatmul.bf16.gmra.mxu1 %v14500_v10  ;;  %v14502_v10 = vld [vmem:[#allocation7_spill] sm:$0xff] }
 0x6dc   : > { %v6636_v25 = vmax.f32 %v6117_v15, 0.0 }
 0x6de   : > { %v13444_v26 = vpack.c.bf16 %v6636_v25, %v6635_v4 }
 0x6e0   : > { %14501 = vst [vmem:[#allocation3_spill] sm:$0xff] %v13444_v26  ;;  %v2958_v47 = vpop.f32.mrf.mxu1  ;;  %v4011_v11 = vpop.f32.mrf.mxu2 }
 0x6e1   : > { %v3396_v35 = vmax.f32 %v2958_v47, 0.0  ;;  %v4476_v62 = vmax.f32 %v4011_v11, 0.0  ;;  %v5064_v33 = vpop.f32.mrf.mxu3 }
 0x6e2   : > { %v5556_v2 = vmax.f32 %v5064_v33, 0.0 }
 0x6e3   : > { %v3584_v31 = vpack.c.bf16 %v3396_v35, %v3395_v29  ;;  %v4673_v16 = vpack.c.bf16 %v4476_v62, %v4475_v8  ;;  %v6120_v45 = vpop.f32.mrf.mxu0 }
 0x6e4   : > { %v5762_v54 = vpack.c.bf16 %v5556_v2, %v5555_v28  ;;  %v6637_v36 = vmax.f32 %v6120_v45, 0.0 }
 0x6e5   : > { %4053 = vmatmul.bf16.gmra.mxu2 %v3584_v31  ;;  %5106 = vmatmul.bf16.gmra.mxu3 %v4673_v16 }
 0x6e6   : > { %6159 = vmatmul.bf16.gmra.mxu0 %v5762_v54 }
 0x6e8   : > { %v2961_v21 = vpop.f32.mrf.mxu1  ;;  %v4014_v23 = vpop.f32.mrf.mxu2 }
 0x6e9   : > { %v5067_v19 = vpop.f32.mrf.mxu3  ;;  %v3397_v47 = vmax.f32 %v2961_v21, 0.0  ;;  %v4477_v11 = vmax.f32 %v4014_v23, 0.0 }
 0x6ea   : > { %v5557_v62 = vmax.f32 %v5067_v19, 0.0 }
 0x6eb   : > { %v6122_v15 = vpop.f32.mrf.mxu0  ;;  %3000 = vmatmul.bf16.gmra.mxu1 %v14502_v10 }
 0x6ec   : > { %v6638_v0 = vmax.f32 %v6122_v15, 0.0 }
 0x6ee   : > { %v13447_v4 = vpack.c.bf16 %v6638_v0, %v6637_v36  ;;  %v14504_v36 = vld [vmem:[#allocation8_spill] sm:$0xff] }
 0x6f0   : > { %14503 = vst [vmem:[#allocation4_spill] sm:$0xff] %v13447_v4  ;;  %v2963_v25 = vpop.f32.mrf.mxu1  ;;  %v4016_v42 = vpop.f32.mrf.mxu2  ;;  %v14522_v4 = vld [vmem:[#allocation26_spill] sm:$0xff] }
 0x6f1   : > { %v3398_v29 = vmax.f32 %v2963_v25, 0.0  ;;  %v4478_v8 = vmax.f32 %v4016_v42, 0.0  ;;  %v5069_v35 = vpop.f32.mrf.mxu3  ;;  %v2336_v26 = vmax.f32 %v14522_v4, 0.0 }
 0x6f2   : > { %v5558_v33 = vmax.f32 %v5069_v35, 0.0 }
 0x6f3   : > { %v3585_v28 = vpack.c.bf16 %v3398_v29, %v3397_v47  ;;  %v4674_v2 = vpack.c.bf16 %v4478_v8, %v4477_v11  ;;  %v6125_v31 = vpop.f32.mrf.mxu0 }
 0x6f4   : > { %v5763_v16 = vpack.c.bf16 %v5558_v33, %v5557_v62  ;;  %v6639_v21 = vmax.f32 %v6125_v31, 0.0 }
 0x6f5   : > { %4058 = vmatmul.bf16.gmra.mxu2 %v3585_v28  ;;  %5111 = vmatmul.bf16.gmra.mxu3 %v4674_v2 }
 0x6f6   : > { %6164 = vmatmul.bf16.gmra.mxu0 %v5763_v16 }
 0x6f8   : > { %v2966_v45 = vpop.f32.mrf.mxu1  ;;  %v4019_v54 = vpop.f32.mrf.mxu2 }
 0x6f9   : > { %v5072_v15 = vpop.f32.mrf.mxu3  ;;  %v3399_v42 = vmax.f32 %v2966_v45, 0.0  ;;  %v4479_v47 = vmax.f32 %v4019_v54, 0.0 }
 0x6fa   : > { %v5559_v35 = vmax.f32 %v5072_v15, 0.0  ;;  %v12444_v15 = vld [vmem:[%s14411_s2 + $0x110] sm:$0xff] }
 0x6fb   : > { %v6127_v10 = vpop.f32.mrf.mxu0  ;;  %3005 = vmatmul.bf16.gmra.mxu1 %v14504_v36 }
 0x6fc   : > { %v6640_v23 = vmax.f32 %v6127_v10, 0.0  ;;  %7009 = vmatpush.bf16.msra.mxu1 %v12444_v15 }
 0x6fe   : > { %v13450_v0 = vpack.c.bf16 %v6640_v23, %v6639_v21  ;;  %v14506_v23 = vld [vmem:[#allocation10_spill] sm:$0xff] }
 0x700   : > { %14505 = vst [vmem:[#allocation5_spill] sm:$0xff] %v13450_v0  ;;  %v2968_v25 = vpop.f32.mrf.mxu1  ;;  %v4021_v19 = vpop.f32.mrf.mxu2  ;;  %v14508_v0 = vld [vmem:[#allocation12_spill] sm:$0xff] }
 0x701   : > { %v3400_v11 = vmax.f32 %v2968_v25, 0.0  ;;  %v4480_v29 = vmax.f32 %v4021_v19, 0.0  ;;  %v5074_v8 = vpop.f32.mrf.mxu3 }
 0x702   : > { %v5560_v62 = vmax.f32 %v5074_v8, 0.0 }
 0x703   : > { %v3586_v33 = vpack.c.bf16 %v3400_v11, %v3399_v42  ;;  %v4675_v28 = vpack.c.bf16 %v4480_v29, %v4479_v47  ;;  %v6130_v2 = vpop.f32.mrf.mxu0 }
 0x704   : > { %v5764_v16 = vpack.c.bf16 %v5560_v62, %v5559_v35  ;;  %v6641_v45 = vmax.f32 %v6130_v2, 0.0 }
 0x705   : > { %4063 = vmatmul.bf16.gmra.mxu2 %v3586_v33  ;;  %5116 = vmatmul.bf16.gmra.mxu3 %v4675_v28 }
 0x706   : > { %6169 = vmatmul.bf16.gmra.mxu0 %v5764_v16 }
 0x708   : > { %v2971_v31 = vpop.f32.mrf.mxu1  ;;  %v4024_v10 = vpop.f32.mrf.mxu2 }
 0x709   : > { %v5077_v36 = vpop.f32.mrf.mxu3  ;;  %v3401_v47 = vmax.f32 %v2971_v31, 0.0  ;;  %v4481_v11 = vmax.f32 %v4024_v10, 0.0 }
 0x70a   : > { %v5561_v62 = vmax.f32 %v5077_v36, 0.0 }
 0x70b   : > { %v6132_v21 = vpop.f32.mrf.mxu0  ;;  %3010 = vmatmul.bf16.gmra.mxu1 %v14506_v23 }
 0x70c   : > { %v6642_v54 = vmax.f32 %v6132_v21, 0.0 }
 0x70e   : > { %v13453_v25 = vpack.c.bf16 %v6642_v54, %v6641_v45 }
 0x710   : > { %14507 = vst [vmem:[#allocation6_spill] sm:$0xff] %v13453_v25  ;;  %v2973_v19 = vpop.f32.mrf.mxu1  ;;  %v4026_v42 = vpop.f32.mrf.mxu2 }
 0x711   : > { %v3402_v29 = vmax.f32 %v2973_v19, 0.0  ;;  %v4482_v8 = vmax.f32 %v4026_v42, 0.0  ;;  %v5079_v35 = vpop.f32.mrf.mxu3 }
 0x712   : > { %v5562_v33 = vmax.f32 %v5079_v35, 0.0 }
 0x713   : > { %v3587_v28 = vpack.c.bf16 %v3402_v29, %v3401_v47  ;;  %v4676_v16 = vpack.c.bf16 %v4482_v8, %v4481_v11  ;;  %v6135_v2 = vpop.f32.mrf.mxu0 }
 0x714   : > { %v5765_v21 = vpack.c.bf16 %v5562_v33, %v5561_v62  ;;  %v6643_v31 = vmax.f32 %v6135_v2, 0.0 }
 0x715   : > { %4068 = vmatmul.bf16.gmra.mxu2 %v3587_v28  ;;  %5121 = vmatmul.bf16.gmra.mxu3 %v4676_v16 }
 0x716   : > { %6174 = vmatmul.bf16.gmra.mxu0 %v5765_v21 }
 0x718   : > { %v2976_v23 = vpop.f32.mrf.mxu1  ;;  %v4029_v45 = vpop.f32.mrf.mxu2 }
 0x719   : > { %v5082_v54 = vpop.f32.mrf.mxu3  ;;  %v3403_v42 = vmax.f32 %v2976_v23, 0.0  ;;  %v4483_v47 = vmax.f32 %v4029_v45, 0.0 }
 0x71a   : > { %v5563_v35 = vmax.f32 %v5082_v54, 0.0 }
 0x71b   : > { %v6137_v25 = vpop.f32.mrf.mxu0  ;;  %3015 = vmatmul.bf16.gmra.mxu1 %v14508_v0  ;;  %v12461_v0 = vld [vmem:[%s14411_s2 + $0x198] sm:$0xff] }
 0x71c   : > { %v6644_v10 = vmax.f32 %v6137_v25, 0.0  ;;  %9204 = vmatpush.bf16.msra.mxu3 %v12461_v0 }
 0x71e   : > { %v13459_v15 = vpack.c.bf16 %v6644_v10, %v6643_v31  ;;  %v14510_v31 = vld [vmem:[#allocation14_spill] sm:$0xff] }
 0x720   : > { %14509 = vst [vmem:[#allocation7_spill] sm:$0xff] %v13459_v15  ;;  %v2978_v19 = vpop.f32.mrf.mxu1  ;;  %v4031_v36 = vpop.f32.mrf.mxu2 }
 0x721   : > { %v3404_v11 = vmax.f32 %v2978_v19, 0.0  ;;  %v4484_v29 = vmax.f32 %v4031_v36, 0.0  ;;  %v5084_v8 = vpop.f32.mrf.mxu3 }
 0x722   : > { %v5564_v62 = vmax.f32 %v5084_v8, 0.0 }
 0x723   : > { %v3588_v33 = vpack.c.bf16 %v3404_v11, %v3403_v42  ;;  %v4677_v28 = vpack.c.bf16 %v4484_v29, %v4483_v47  ;;  %v6140_v16 = vpop.f32.mrf.mxu0 }
 0x724   : > { %v5766_v21 = vpack.c.bf16 %v5564_v62, %v5563_v35  ;;  %v6645_v54 = vmax.f32 %v6140_v16, 0.0 }
 0x725   : > { %4073 = vmatmul.bf16.gmra.mxu2 %v3588_v33  ;;  %5126 = vmatmul.bf16.gmra.mxu3 %v4677_v28 }
 0x726   : > { %6179 = vmatmul.bf16.gmra.mxu0 %v5766_v21 }
 0x728   : > { %v2981_v25 = vpop.f32.mrf.mxu1  ;;  %v4034_v2 = vpop.f32.mrf.mxu2 }
 0x729   : > { %v5087_v23 = vpop.f32.mrf.mxu3  ;;  %v3405_v47 = vmax.f32 %v2981_v25, 0.0  ;;  %v4485_v11 = vmax.f32 %v4034_v2, 0.0 }
 0x72a   : > { %v5565_v62 = vmax.f32 %v5087_v23, 0.0 }
 0x72b   : > { %v6142_v45 = vpop.f32.mrf.mxu0  ;;  %3020 = vmatmul.bf16.gmra.mxu1 %v14510_v31 }
 0x72c   : > { %v6646_v10 = vmax.f32 %v6142_v45, 0.0 }
 0x72e   : > { %v13465_v19 = vpack.c.bf16 %v6646_v10, %v6645_v54  ;;  %v14512_v10 = vld [vmem:[#allocation16_spill] sm:$0xff] }
 0x730   : > { %14511 = vst [vmem:[#allocation8_spill] sm:$0xff] %v13465_v19  ;;  %v2983_v36 = vpop.f32.mrf.mxu1  ;;  %v4036_v42 = vpop.f32.mrf.mxu2 }
 0x731   : > { %v3406_v29 = vmax.f32 %v2983_v36, 0.0  ;;  %v4486_v8 = vmax.f32 %v4036_v42, 0.0  ;;  %v5089_v35 = vpop.f32.mrf.mxu3 }
 0x732   : > { %v5566_v33 = vmax.f32 %v5089_v35, 0.0 }
 0x733   : > { %v3589_v28 = vpack.c.bf16 %v3406_v29, %v3405_v47  ;;  %v4678_v21 = vpack.c.bf16 %v4486_v8, %v4485_v11  ;;  %v6145_v0 = vpop.f32.mrf.mxu0 }
 0x734   : > { %v5767_v15 = vpack.c.bf16 %v5566_v33, %v5565_v62  ;;  %v6647_v25 = vmax.f32 %v6145_v0, 0.0 }
 0x735   : > { %4078 = vmatmul.bf16.gmra.mxu2 %v3589_v28  ;;  %5131 = vmatmul.bf16.gmra.mxu3 %v4678_v21 }
 0x736   : > { %6184 = vmatmul.bf16.gmra.mxu0 %v5767_v15 }
 0x738   : > { %v2986_v16 = vpop.f32.mrf.mxu1  ;;  %v4039_v45 = vpop.f32.mrf.mxu2 }
 0x739   : > { %v5092_v31 = vpop.f32.mrf.mxu3  ;;  %v3407_v35 = vmax.f32 %v2986_v16, 0.0  ;;  %v4487_v47 = vmax.f32 %v4039_v45, 0.0 }
 0x73a   : > { %v5567_v62 = vmax.f32 %v5092_v31, 0.0 }
 0x73b   : > { %v6147_v54 = vpop.f32.mrf.mxu0  ;;  %3025 = vmatmul.bf16.gmra.mxu1 %v14512_v10 }
 0x73c   : > { %v6648_v2 = vmax.f32 %v6147_v54, 0.0 }
 0x73e   : > { %v13468_v36 = vpack.c.bf16 %v6648_v2, %v6647_v25  ;;  %v14514_v2 = vld [vmem:[#allocation18_spill] sm:$0xff] }
 0x740   : > { %14513 = vst [vmem:[#allocation10_spill] sm:$0xff] %v13468_v36  ;;  %v2988_v42 = vpop.f32.mrf.mxu1  ;;  %v4041_v23 = vpop.f32.mrf.mxu2 }
 0x741   : > { %v3408_v11 = vmax.f32 %v2988_v42, 0.0  ;;  %v4488_v29 = vmax.f32 %v4041_v23, 0.0  ;;  %v5094_v8 = vpop.f32.mrf.mxu3 }
 0x742   : > { %v5568_v33 = vmax.f32 %v5094_v8, 0.0 }
 0x743   : > { %v3590_v15 = vpack.c.bf16 %v3408_v11, %v3407_v35  ;;  %v4679_v28 = vpack.c.bf16 %v4488_v29, %v4487_v47  ;;  %v6150_v21 = vpop.f32.mrf.mxu0 }
 0x744   : > { %v5768_v19 = vpack.c.bf16 %v5568_v33, %v5567_v62  ;;  %v6649_v16 = vmax.f32 %v6150_v21, 0.0 }
 0x745   : > { %4083 = vmatmul.bf16.gmra.mxu2 %v3590_v15  ;;  %5136 = vmatmul.bf16.gmra.mxu3 %v4679_v28 }
 0x746   : > { %6189 = vmatmul.bf16.gmra.mxu0 %v5768_v19 }
 0x748   : > { %v2991_v0 = vpop.f32.mrf.mxu1  ;;  %v4044_v54 = vpop.f32.mrf.mxu2 }
 0x749   : > { %v5097_v10 = vpop.f32.mrf.mxu3  ;;  %v3409_v8 = vmax.f32 %v2991_v0, 0.0  ;;  %v4489_v35 = vmax.f32 %v4044_v54, 0.0 }
 0x74a   : > { %v5569_v62 = vmax.f32 %v5097_v10, 0.0 }
 0x74b   : > { %v6152_v25 = vpop.f32.mrf.mxu0  ;;  %3030 = vmatmul.bf16.gmra.mxu1 %v14514_v2 }
 0x74c   : > { %v6650_v45 = vmax.f32 %v6152_v25, 0.0 }
 0x74e   : > { %v13471_v42 = vpack.c.bf16 %v6650_v45, %v6649_v16  ;;  %v14516_v45 = vld [vmem:[#allocation20_spill] sm:$0xff] }
 0x750   : > { %14515 = vst [vmem:[#allocation12_spill] sm:$0xff] %v13471_v42  ;;  %v2993_v23 = vpop.f32.mrf.mxu1  ;;  %v4046_v31 = vpop.f32.mrf.mxu2 }
 0x751   : > { %v3410_v47 = vmax.f32 %v2993_v23, 0.0  ;;  %v4490_v11 = vmax.f32 %v4046_v31, 0.0  ;;  %v5099_v29 = vpop.f32.mrf.mxu3 }
 0x752   : > { %v5570_v33 = vmax.f32 %v5099_v29, 0.0 }
 0x753   : > { %v3591_v19 = vpack.c.bf16 %v3410_v47, %v3409_v8  ;;  %v4680_v15 = vpack.c.bf16 %v4490_v11, %v4489_v35  ;;  %v6155_v28 = vpop.f32.mrf.mxu0 }
 0x754   : > { %v5769_v36 = vpack.c.bf16 %v5570_v33, %v5569_v62  ;;  %v6651_v0 = vmax.f32 %v6155_v28, 0.0 }
 0x755   : > { %4088 = vmatmul.bf16.gmra.mxu2 %v3591_v19  ;;  %5141 = vmatmul.bf16.gmra.mxu3 %v4680_v15 }
 0x756   : > { %6194 = vmatmul.bf16.gmra.mxu0 %v5769_v36 }
 0x758   : > { %v2996_v21 = vpop.f32.mrf.mxu1  ;;  %v4049_v25 = vpop.f32.mrf.mxu2 }
 0x759   : > { %v5102_v2 = vpop.f32.mrf.mxu3  ;;  %v3411_v29 = vmax.f32 %v2996_v21, 0.0  ;;  %v4491_v8 = vmax.f32 %v4049_v25, 0.0 }
 0x75a   : > { %v5571_v62 = vmax.f32 %v5102_v2, 0.0 }
 0x75b   : > { %v6157_v16 = vpop.f32.mrf.mxu0  ;;  %3035 = vmatmul.bf16.gmra.mxu1 %v14516_v45 }
 0x75c   : > { %v6652_v54 = vmax.f32 %v6157_v16, 0.0 }
 0x75e   : > { %v13474_v23 = vpack.c.bf16 %v6652_v54, %v6651_v0  ;;  %v14518_v54 = vld [vmem:[#allocation22_spill] sm:$0xff] }
 0x760   : > { %14517 = vst [vmem:[#allocation14_spill] sm:$0xff] %v13474_v23  ;;  %v2998_v31 = vpop.f32.mrf.mxu1  ;;  %v4051_v10 = vpop.f32.mrf.mxu2 }
 0x761   : > { %v3412_v35 = vmax.f32 %v2998_v31, 0.0  ;;  %v4492_v47 = vmax.f32 %v4051_v10, 0.0  ;;  %v5104_v11 = vpop.f32.mrf.mxu3 }
 0x762   : > { %v5572_v33 = vmax.f32 %v5104_v11, 0.0 }
 0x763   : > { %v3592_v36 = vpack.c.bf16 %v3412_v35, %v3411_v29  ;;  %v4681_v19 = vpack.c.bf16 %v4492_v47, %v4491_v8  ;;  %v6160_v15 = vpop.f32.mrf.mxu0 }
 0x764   : > { %v5770_v42 = vpack.c.bf16 %v5572_v33, %v5571_v62  ;;  %v6653_v21 = vmax.f32 %v6160_v15, 0.0 }
 0x765   : > { %4093 = vmatmul.bf16.gmra.mxu2 %v3592_v36  ;;  %5146 = vmatmul.bf16.gmra.mxu3 %v4681_v19 }
 0x766   : > { %6199 = vmatmul.bf16.gmra.mxu0 %v5770_v42 }
 0x768   : > { %v3001_v28 = vpop.f32.mrf.mxu1  ;;  %v4054_v16 = vpop.f32.mrf.mxu2 }
 0x769   : > { %v5107_v45 = vpop.f32.mrf.mxu3  ;;  %v3413_v11 = vmax.f32 %v3001_v28, 0.0  ;;  %v4493_v29 = vmax.f32 %v4054_v16, 0.0 }
 0x76a   : > { %v5573_v62 = vmax.f32 %v5107_v45, 0.0 }
 0x76b   : > { %v6162_v0 = vpop.f32.mrf.mxu0  ;;  %3040 = vmatmul.bf16.gmra.mxu1 %v14518_v54 }
 0x76c   : > { %v6654_v25 = vmax.f32 %v6162_v0, 0.0 }
 0x76e   : > { %v13477_v31 = vpack.c.bf16 %v6654_v25, %v6653_v21  ;;  %v14520_v25 = vld [vmem:[#allocation24_spill] sm:$0xff] }
 0x770   : > { %14519 = vst [vmem:[#allocation16_spill] sm:$0xff] %v13477_v31  ;;  %v3003_v10 = vpop.f32.mrf.mxu1  ;;  %v4056_v2 = vpop.f32.mrf.mxu2 }
 0x771   : > { %v3414_v8 = vmax.f32 %v3003_v10, 0.0  ;;  %v4494_v35 = vmax.f32 %v4056_v2, 0.0  ;;  %v5109_v47 = vpop.f32.mrf.mxu3 }
 0x772   : > { %v5574_v33 = vmax.f32 %v5109_v47, 0.0 }
 0x773   : > { %v3593_v42 = vpack.c.bf16 %v3414_v8, %v3413_v11  ;;  %v4682_v36 = vpack.c.bf16 %v4494_v35, %v4493_v29  ;;  %v6165_v19 = vpop.f32.mrf.mxu0 }
 0x774   : > { %v5771_v23 = vpack.c.bf16 %v5574_v33, %v5573_v62  ;;  %v6655_v28 = vmax.f32 %v6165_v19, 0.0 }
 0x775   : > { %4098 = vmatmul.bf16.gmra.mxu2 %v3593_v42  ;;  %5151 = vmatmul.bf16.gmra.mxu3 %v4682_v36 }
 0x776   : > { %6204 = vmatmul.bf16.gmra.mxu0 %v5771_v23 }
 0x778   : > { %v3006_v15 = vpop.f32.mrf.mxu1  ;;  %v4059_v0 = vpop.f32.mrf.mxu2 }
 0x779   : > { %v5112_v54 = vpop.f32.mrf.mxu3  ;;  %v3415_v47 = vmax.f32 %v3006_v15, 0.0  ;;  %v4495_v11 = vmax.f32 %v4059_v0, 0.0 }
 0x77a   : > { %v5575_v62 = vmax.f32 %v5112_v54, 0.0 }
 0x77b   : > { %v6167_v21 = vpop.f32.mrf.mxu0  ;;  %3045 = vmatmul.bf16.gmra.mxu1 %v14520_v25  ;;  %v14523_v25 = vld [vmem:[#allocation27_spill] sm:$0xff] }
 0x77c   : > { %v6656_v16 = vmax.f32 %v6167_v21, 0.0  ;;  %v2337_v19 = vmax.f32 %v14523_v25, 0.0 }
 0x77e   : > { %v13480_v10 = vpack.c.bf16 %v6656_v16, %v6655_v28  ;;  %v2506_v15 = vpack.c.bf16 %v2337_v19, %v2336_v26  ;;  %v14525_v19 = vld [vmem:[#allocation29_spill] sm:$0xff] }
 0x780   : > { %14521 = vst [vmem:[#allocation18_spill] sm:$0xff] %v13480_v10  ;;  %v3008_v2 = vpop.f32.mrf.mxu1  ;;  %v4061_v45 = vpop.f32.mrf.mxu2  ;;  %v2338_v10 = vmax.f32 %v14525_v19, 0.0 }
 0x781   : > { %v3416_v29 = vmax.f32 %v3008_v2, 0.0  ;;  %v4496_v8 = vmax.f32 %v4061_v45, 0.0  ;;  %v5114_v35 = vpop.f32.mrf.mxu3 }
 0x782   : > { %v5576_v33 = vmax.f32 %v5114_v35, 0.0 }
 0x783   : > { %v3594_v23 = vpack.c.bf16 %v3416_v29, %v3415_v47  ;;  %v4683_v42 = vpack.c.bf16 %v4496_v8, %v4495_v11  ;;  %v6170_v36 = vpop.f32.mrf.mxu0 }
 0x784   : > { %v5772_v31 = vpack.c.bf16 %v5576_v33, %v5575_v62  ;;  %v6657_v2 = vmax.f32 %v6170_v36, 0.0 }
 0x785   : > { %4103 = vmatmul.bf16.gmra.mxu2 %v3594_v23  ;;  %5156 = vmatmul.bf16.gmra.mxu3 %v4683_v42 }
 0x786   : > { %6209 = vmatmul.bf16.gmra.mxu0 %v5772_v31 }
 0x788   : > { %v3011_v21 = vpop.f32.mrf.mxu1  ;;  %v4064_v28 = vpop.f32.mrf.mxu2 }
 0x789   : > { %v5117_v0 = vpop.f32.mrf.mxu3  ;;  %v3417_v29 = vmax.f32 %v3011_v21, 0.0  ;;  %v4497_v8 = vmax.f32 %v4064_v28, 0.0  ;;  %v12452_v21 = vld [vmem:[%s14411_s2 + $0x150] sm:$0xff] }
 0x78a   : > { %v5577_v33 = vmax.f32 %v5117_v0, 0.0  ;;  %8107 = vmatpush.bf16.msra.mxu2 %v12452_v21 }
 0x78b   : > { %v6172_v16 = vpop.f32.mrf.mxu0  ;;  %3050 = vmatmul.bf16.gmra.mxu1 %v2506_v15  ;;  %v14526_v15 = vld [vmem:[#allocation30_spill] sm:$0xff] }
 0x78c   : > { %v6658_v54 = vmax.f32 %v6172_v16, 0.0  ;;  %v2339_v36 = vmax.f32 %v14526_v15, 0.0 }
 0x78e   : > { %v13484_v45 = vpack.c.bf16 %v6658_v54, %v6657_v2  ;;  %v2507_v0 = vpack.c.bf16 %v2339_v36, %v2338_v10  ;;  %v14528_v36 = vld [vmem:[#allocation32_spill] sm:$0xff] }
 0x790   : > { %14524 = vst [vmem:[#allocation20_spill] sm:$0xff] %v13484_v45  ;;  %v3013_v47 = vpop.f32.mrf.mxu1  ;;  %v4066_v11 = vpop.f32.mrf.mxu2  ;;  %v2340_v45 = vmax.f32 %v14528_v36, 0.0 }
 0x791   : > { %v3418_v4 = vmax.f32 %v3013_v47, 0.0  ;;  %v4498_v35 = vmax.f32 %v4066_v11, 0.0  ;;  %v5119_v62 = vpop.f32.mrf.mxu3 }
 0x792   : > { %v5578_v23 = vmax.f32 %v5119_v62, 0.0 }
 0x793   : > { %v3595_v31 = vpack.c.bf16 %v3418_v4, %v3417_v29  ;;  %v4684_v42 = vpack.c.bf16 %v4498_v35, %v4497_v8  ;;  %v6175_v25 = vpop.f32.mrf.mxu0 }
 0x794   : > { %v5773_v26 = vpack.c.bf16 %v5578_v23, %v5577_v33  ;;  %v6659_v47 = vmax.f32 %v6175_v25, 0.0 }
 0x795   : > { %4108 = vmatmul.bf16.gmra.mxu2 %v3595_v31  ;;  %5161 = vmatmul.bf16.gmra.mxu3 %v4684_v42 }
 0x796   : > { %6214 = vmatmul.bf16.gmra.mxu0 %v5773_v26 }
 0x798   : > { %v3016_v28 = vpop.f32.mrf.mxu1  ;;  %v4069_v16 = vpop.f32.mrf.mxu2 }
 0x799   : > { %v5122_v2 = vpop.f32.mrf.mxu3  ;;  %v3419_v35 = vmax.f32 %v3016_v28, 0.0  ;;  %v4499_v62 = vmax.f32 %v4069_v16, 0.0 }
 0x79a   : > { %v5579_v42 = vmax.f32 %v5122_v2, 0.0 }
 0x79b   : > { %v6177_v54 = vpop.f32.mrf.mxu0  ;;  %3055 = vmatmul.bf16.gmra.mxu1 %v2507_v0  ;;  %v14529_v0 = vld [vmem:[#allocation33_spill] sm:$0xff] }
 0x79c   : > { %v6660_v11 = vmax.f32 %v6177_v54, 0.0  ;;  %v2341_v25 = vmax.f32 %v14529_v0, 0.0 }
 0x79e   : > { %v13491_v29 = vpack.c.bf16 %v6660_v11, %v6659_v47  ;;  %v2508_v28 = vpack.c.bf16 %v2341_v25, %v2340_v45  ;;  %v14531_v25 = vld [vmem:[#allocation35_spill] sm:$0xff] }
 0x7a0   : > { %14527 = vst [vmem:[#allocation22_spill] sm:$0xff] %v13491_v29  ;;  %v3018_v8 = vpop.f32.mrf.mxu1  ;;  %v4071_v4 = vpop.f32.mrf.mxu2  ;;  %v2342_v29 = vmax.f32 %v14531_v25, 0.0 }
 0x7a1   : > { %v3420_v33 = vmax.f32 %v3018_v8, 0.0  ;;  %v4500_v23 = vmax.f32 %v4071_v4, 0.0  ;;  %v5124_v31 = vpop.f32.mrf.mxu3 }
 0x7a2   : > { %v5580_v26 = vmax.f32 %v5124_v31, 0.0 }
 0x7a3   : > { %v3596_v19 = vpack.c.bf16 %v3420_v33, %v3419_v35  ;;  %v4685_v15 = vpack.c.bf16 %v4500_v23, %v4499_v62  ;;  %v6180_v21 = vpop.f32.mrf.mxu0 }
 0x7a4   : > { %v5774_v10 = vpack.c.bf16 %v5580_v26, %v5579_v42  ;;  %v6661_v8 = vmax.f32 %v6180_v21, 0.0 }
 0x7a5   : > { %4113 = vmatmul.bf16.gmra.mxu2 %v3596_v19  ;;  %5166 = vmatmul.bf16.gmra.mxu3 %v4685_v15 }
 0x7a6   : > { %6219 = vmatmul.bf16.gmra.mxu0 %v5774_v10 }
 0x7a8   : > { %v3021_v54 = vpop.f32.mrf.mxu1  ;;  %v4074_v47 = vpop.f32.mrf.mxu2 }
 0x7a9   : > { %v5127_v16 = vpop.f32.mrf.mxu3  ;;  %v3421_v33 = vmax.f32 %v3021_v54, 0.0  ;;  %v4501_v23 = vmax.f32 %v4074_v47, 0.0 }
 0x7aa   : > { %v5581_v19 = vmax.f32 %v5127_v16, 0.0 }
 0x7ab   : > { %v6182_v11 = vpop.f32.mrf.mxu0  ;;  %3060 = vmatmul.bf16.gmra.mxu1 %v2508_v28  ;;  %v14532_v28 = vld [vmem:[#allocation37_spill] sm:$0xff] }
 0x7ac   : > { %v6662_v2 = vmax.f32 %v6182_v11, 0.0  ;;  %v2343_v21 = vmax.f32 %v14532_v28, 0.0 }
 0x7ae   : > { %v13495_v4 = vpack.c.bf16 %v6662_v2, %v6661_v8  ;;  %v2509_v54 = vpack.c.bf16 %v2343_v21, %v2342_v29  ;;  %v14534_v21 = vld [vmem:[#allocation38_spill] sm:$0xff] }
 0x7b0   : > { %14530 = vst [vmem:[#allocation24_spill] sm:$0xff] %v13495_v4  ;;  %v3023_v35 = vpop.f32.mrf.mxu1  ;;  %v4076_v62 = vpop.f32.mrf.mxu2  ;;  %v2344_v4 = vmax.f32 %v14534_v21, 0.0 }
 0x7b1   : > { %v3422_v31 = vmax.f32 %v3023_v35, 0.0  ;;  %v4502_v42 = vmax.f32 %v4076_v62, 0.0  ;;  %v5129_v26 = vpop.f32.mrf.mxu3 }
 0x7b2   : > { %v5582_v15 = vmax.f32 %v5129_v26, 0.0 }
 0x7b3   : > { %v3597_v10 = vpack.c.bf16 %v3422_v31, %v3421_v33  ;;  %v4686_v36 = vpack.c.bf16 %v4502_v42, %v4501_v23  ;;  %v6185_v0 = vpop.f32.mrf.mxu0 }
 0x7b4   : > { %v5775_v45 = vpack.c.bf16 %v5582_v15, %v5581_v19  ;;  %v6663_v35 = vmax.f32 %v6185_v0, 0.0 }
 0x7b5   : > { %4118 = vmatmul.bf16.gmra.mxu2 %v3597_v10  ;;  %5171 = vmatmul.bf16.gmra.mxu3 %v4686_v36 }
 0x7b6   : > { %6224 = vmatmul.bf16.gmra.mxu0 %v5775_v45 }
 0x7b8   : > { %v3026_v11 = vpop.f32.mrf.mxu1  ;;  %v4079_v8 = vpop.f32.mrf.mxu2 }
 0x7b9   : > { %v5132_v47 = vpop.f32.mrf.mxu3  ;;  %v3423_v31 = vmax.f32 %v3026_v11, 0.0  ;;  %v4503_v42 = vmax.f32 %v4079_v8, 0.0 }
 0x7ba   : > { %v5583_v10 = vmax.f32 %v5132_v47, 0.0 }
 0x7bb   : > { %v6187_v2 = vpop.f32.mrf.mxu0  ;;  %3065 = vmatmul.bf16.gmra.mxu1 %v2509_v54  ;;  %v14535_v54 = vld [vmem:[#allocation40_spill] sm:$0xff] }
 0x7bc   : > { %v6664_v16 = vmax.f32 %v6187_v2, 0.0  ;;  %v2345_v0 = vmax.f32 %v14535_v54, 0.0 }
 0x7be   : > { %v13499_v62 = vpack.c.bf16 %v6664_v16, %v6663_v35  ;;  %v2510_v11 = vpack.c.bf16 %v2345_v0, %v2344_v4  ;;  %v14537_v0 = vld [vmem:[#allocation42_spill] sm:$0xff] }
 0x7c0   : > { %14533 = vst [vmem:[#allocation26_spill] sm:$0xff] %v13499_v62  ;;  %v3028_v33 = vpop.f32.mrf.mxu1  ;;  %v4081_v23 = vpop.f32.mrf.mxu2 }
 0x7c1   : > { %v3424_v26 = vmax.f32 %v3028_v33, 0.0  ;;  %v4504_v19 = vmax.f32 %v4081_v23, 0.0  ;;  %v5134_v15 = vpop.f32.mrf.mxu3 }
 0x7c2   : > { %v5584_v36 = vmax.f32 %v5134_v15, 0.0 }
 0x7c3   : > { %v3598_v45 = vpack.c.bf16 %v3424_v26, %v3423_v31  ;;  %v4687_v25 = vpack.c.bf16 %v4504_v19, %v4503_v42  ;;  %v6190_v28 = vpop.f32.mrf.mxu0  ;;  %v12469_v31 = vld [vmem:[%s14412_s3 + $0x18] sm:$0xff] }
 0x7c4   : > { %v5776_v29 = vpack.c.bf16 %v5584_v36, %v5583_v10  ;;  %v6665_v33 = vmax.f32 %v6190_v28, 0.0  ;;  %10301 = vmatpush.bf16.msra.mxu0 %v12469_v31 }
 0x7c5   : > { %4123 = vmatmul.bf16.gmra.mxu2 %v3598_v45  ;;  %5176 = vmatmul.bf16.gmra.mxu3 %v4687_v25 }
 0x7c6   : > { %6229 = vmatmul.bf16.gmra.mxu0 %v5776_v29 }
 0x7c8   : > { %v3031_v2 = vpop.f32.mrf.mxu1  ;;  %v4084_v35 = vpop.f32.mrf.mxu2 }
 0x7c9   : > { %v5137_v8 = vpop.f32.mrf.mxu3  ;;  %v3425_v19 = vmax.f32 %v3031_v2, 0.0  ;;  %v4505_v15 = vmax.f32 %v4084_v35, 0.0 }
 0x7ca   : > { %v5585_v4 = vmax.f32 %v5137_v8, 0.0 }
 0x7cb   : > { %v6192_v16 = vpop.f32.mrf.mxu0  ;;  %3070 = vmatmul.bf16.gmra.mxu1 %v2510_v11  ;;  %v2346_v11 = vmax.f32 %v14537_v0, 0.0 }
 0x7cc   : > { %v6666_v47 = vmax.f32 %v6192_v16, 0.0  ;;  %v14538_v16 = vld [vmem:[#allocation43_spill] sm:$0xff] }
 0x7ce   : > { %v13503_v23 = vpack.c.bf16 %v6666_v47, %v6665_v33  ;;  %v2347_v33 = vmax.f32 %v14538_v16, 0.0 }
 0x7d0   : > { %14536 = vst [vmem:[#allocation27_spill] sm:$0xff] %v13503_v23  ;;  %v3033_v42 = vpop.f32.mrf.mxu1  ;;  %v4086_v26 = vpop.f32.mrf.mxu2  ;;  %v2511_v2 = vpack.c.bf16 %v2347_v33, %v2346_v11  ;;  %v14540_v33 = vld [vmem:[#allocation45_spill] sm:$0xff] }
 0x7d1   : > { %v3426_v10 = vmax.f32 %v3033_v42, 0.0  ;;  %v4506_v36 = vmax.f32 %v4086_v26, 0.0  ;;  %v5139_v45 = vpop.f32.mrf.mxu3  ;;  %v2348_v62 = vmax.f32 %v14540_v33, 0.0 }
 0x7d2   : > { %v5586_v25 = vmax.f32 %v5139_v45, 0.0 }
 0x7d3   : > { %v3599_v29 = vpack.c.bf16 %v3426_v10, %v3425_v19  ;;  %v4688_v21 = vpack.c.bf16 %v4506_v36, %v4505_v15  ;;  %v6195_v28 = vpop.f32.mrf.mxu0 }
 0x7d4   : > { %v5777_v54 = vpack.c.bf16 %v5586_v25, %v5585_v4  ;;  %v6667_v26 = vmax.f32 %v6195_v28, 0.0 }
 0x7d5   : > { %4128 = vmatmul.bf16.gmra.mxu2 %v3599_v29  ;;  %5181 = vmatmul.bf16.gmra.mxu3 %v4688_v21 }
 0x7d6   : > { %6234 = vmatmul.bf16.gmra.mxu0 %v5777_v54 }
 0x7d8   : > { %v3036_v47 = vpop.f32.mrf.mxu1  ;;  %v4089_v31 = vpop.f32.mrf.mxu2 }
 0x7d9   : > { %v5142_v35 = vpop.f32.mrf.mxu3  ;;  %v3427_v10 = vmax.f32 %v3036_v47, 0.0  ;;  %v4507_v36 = vmax.f32 %v4089_v31, 0.0 }
 0x7da   : > { %v5587_v29 = vmax.f32 %v5142_v35, 0.0 }
 0x7db   : > { %v6197_v42 = vpop.f32.mrf.mxu0  ;;  %3075 = vmatmul.bf16.gmra.mxu1 %v2511_v2  ;;  %v14541_v2 = vld [vmem:[#allocation46_spill] sm:$0xff] }
 0x7dc   : > { %v6668_v8 = vmax.f32 %v6197_v42, 0.0  ;;  %v2349_v28 = vmax.f32 %v14541_v2, 0.0 }
 0x7de   : > { %v13510_v45 = vpack.c.bf16 %v6668_v8, %v6667_v26  ;;  %v2512_v47 = vpack.c.bf16 %v2349_v28, %v2348_v62  ;;  %v14543_v28 = vld [vmem:[#allocation48_spill] sm:$0xff] }
 0x7e0   : > { %14539 = vst [vmem:[#allocation29_spill] sm:$0xff] %v13510_v45  ;;  %v3038_v19 = vpop.f32.mrf.mxu1  ;;  %v4091_v15 = vpop.f32.mrf.mxu2  ;;  %v2350_v45 = vmax.f32 %v14543_v28, 0.0 }
 0x7e1   : > { %v3428_v4 = vmax.f32 %v3038_v19, 0.0  ;;  %v4508_v25 = vmax.f32 %v4091_v15, 0.0  ;;  %v5144_v0 = vpop.f32.mrf.mxu3 }
 0x7e2   : > { %v5588_v21 = vmax.f32 %v5144_v0, 0.0 }
 0x7e3   : > { %v3600_v54 = vpack.c.bf16 %v3428_v4, %v3427_v10  ;;  %v4689_v16 = vpack.c.bf16 %v4508_v25, %v4507_v36  ;;  %v6200_v23 = vpop.f32.mrf.mxu0 }
 0x7e4   : > { %v5778_v11 = vpack.c.bf16 %v5588_v21, %v5587_v29  ;;  %v6669_v19 = vmax.f32 %v6200_v23, 0.0 }
 0x7e5   : > { %4133 = vmatmul.bf16.gmra.mxu2 %v3600_v54  ;;  %5186 = vmatmul.bf16.gmra.mxu3 %v4689_v16 }
 0x7e6   : > { %6239 = vmatmul.bf16.gmra.mxu0 %v5778_v11 }
 0x7e8   : > { %v3041_v42 = vpop.f32.mrf.mxu1  ;;  %v4094_v26 = vpop.f32.mrf.mxu2 }
 0x7e9   : > { %v5147_v31 = vpop.f32.mrf.mxu3  ;;  %v3429_v4 = vmax.f32 %v3041_v42, 0.0  ;;  %v4509_v25 = vmax.f32 %v4094_v26, 0.0 }
 0x7ea   : > { %v5589_v54 = vmax.f32 %v5147_v31, 0.0 }
 0x7eb   : > { %v6202_v8 = vpop.f32.mrf.mxu0  ;;  %3080 = vmatmul.bf16.gmra.mxu1 %v2512_v47  ;;  %v14544_v47 = vld [vmem:[#allocation50_spill] sm:$0xff] }
 0x7ec   : > { %v6670_v35 = vmax.f32 %v6202_v8, 0.0  ;;  %v2351_v23 = vmax.f32 %v14544_v47, 0.0 }
 0x7ee   : > { %v13514_v15 = vpack.c.bf16 %v6670_v35, %v6669_v19  ;;  %v2513_v42 = vpack.c.bf16 %v2351_v23, %v2350_v45  ;;  %v14546_v23 = vld [vmem:[#allocation53_spill] sm:$0xff] }
 0x7f0   : > { %14542 = vst [vmem:[#allocation30_spill] sm:$0xff] %v13514_v15  ;;  %v3043_v10 = vpop.f32.mrf.mxu1  ;;  %v4096_v36 = vpop.f32.mrf.mxu2  ;;  %v2352_v15 = vmax.f32 %v14546_v23, 0.0 }
 0x7f1   : > { %v3430_v0 = vmax.f32 %v3043_v10, 0.0  ;;  %v4510_v29 = vmax.f32 %v4096_v36, 0.0  ;;  %v5149_v21 = vpop.f32.mrf.mxu3 }
 0x7f2   : > { %v5590_v16 = vmax.f32 %v5149_v21, 0.0 }
 0x7f3   : > { %v3601_v11 = vpack.c.bf16 %v3430_v0, %v3429_v4  ;;  %v4690_v33 = vpack.c.bf16 %v4510_v29, %v4509_v25  ;;  %v6205_v2 = vpop.f32.mrf.mxu0 }
 0x7f4   : > { %v5779_v62 = vpack.c.bf16 %v5590_v16, %v5589_v54  ;;  %v6671_v10 = vmax.f32 %v6205_v2, 0.0 }
 0x7f5   : > { %4138 = vmatmul.bf16.gmra.mxu2 %v3601_v11  ;;  %5191 = vmatmul.bf16.gmra.mxu3 %v4690_v33 }
 0x7f6   : > { %6244 = vmatmul.bf16.gmra.mxu0 %v5779_v62 }
 0x7f8   : > { %v3046_v8 = vpop.f32.mrf.mxu1  ;;  %v4099_v19 = vpop.f32.mrf.mxu2 }
 0x7f9   : > { %v5152_v26 = vpop.f32.mrf.mxu3  ;;  %v3431_v0 = vmax.f32 %v3046_v8, 0.0  ;;  %v4511_v29 = vmax.f32 %v4099_v19, 0.0 }
 0x7fa   : > { %v5591_v11 = vmax.f32 %v5152_v26, 0.0 }
 0x7fb   : > { %v6207_v35 = vpop.f32.mrf.mxu0  ;;  %3085 = vmatmul.bf16.gmra.mxu1 %v2513_v42  ;;  %v14547_v42 = vld [vmem:[#allocation55_spill] sm:$0xff] }
 0x7fc   : > { %v6672_v31 = vmax.f32 %v6207_v35, 0.0  ;;  %v2353_v2 = vmax.f32 %v14547_v42, 0.0 }
 0x7fe   : > { %v13518_v36 = vpack.c.bf16 %v6672_v31, %v6671_v10  ;;  %v2514_v8 = vpack.c.bf16 %v2353_v2, %v2352_v15  ;;  %v14549_v2 = vld [vmem:[#allocation57_spill] sm:$0xff] }
 0x800   : > { %14545 = vst [vmem:[#allocation32_spill] sm:$0xff] %v13518_v36  ;;  %v3048_v4 = vpop.f32.mrf.mxu1  ;;  %v4101_v25 = vpop.f32.mrf.mxu2 }
 0x801   : > { %v3432_v21 = vmax.f32 %v3048_v4, 0.0  ;;  %v4512_v54 = vmax.f32 %v4101_v25, 0.0  ;;  %v5154_v16 = vpop.f32.mrf.mxu3 }
 0x802   : > { %v5592_v33 = vmax.f32 %v5154_v16, 0.0 }
 0x803   : > { %v3602_v62 = vpack.c.bf16 %v3432_v21, %v3431_v0  ;;  %v4691_v28 = vpack.c.bf16 %v4512_v54, %v4511_v29  ;;  %v6210_v47 = vpop.f32.mrf.mxu0  ;;  %v12443_v0 = vld [vmem:[%s14411_s2 + $0x108] sm:$0xff] }
 0x804   : > { %v5780_v45 = vpack.c.bf16 %v5592_v33, %v5591_v11  ;;  %v6673_v4 = vmax.f32 %v6210_v47, 0.0  ;;  %7010 = vmatpush.bf16.msra.mxu1 %v12443_v0 }
 0x805   : > { %4143 = vmatmul.bf16.gmra.mxu2 %v3602_v62  ;;  %5196 = vmatmul.bf16.gmra.mxu3 %v4691_v28 }
 0x806   : > { %6249 = vmatmul.bf16.gmra.mxu0 %v5780_v45 }
 0x808   : > { %v3051_v35 = vpop.f32.mrf.mxu1  ;;  %v4104_v10 = vpop.f32.mrf.mxu2 }
 0x809   : > { %v5157_v19 = vpop.f32.mrf.mxu3  ;;  %v3433_v54 = vmax.f32 %v3051_v35, 0.0  ;;  %v4513_v16 = vmax.f32 %v4104_v10, 0.0 }
 0x80a   : > { %v5593_v15 = vmax.f32 %v5157_v19, 0.0 }
 0x80b   : > { %v6212_v31 = vpop.f32.mrf.mxu0  ;;  %3090 = vmatmul.bf16.gmra.mxu1 %v2514_v8  ;;  %v2354_v8 = vmax.f32 %v14549_v2, 0.0 }
 0x80c   : > { %v6674_v26 = vmax.f32 %v6212_v31, 0.0  ;;  %v14550_v31 = vld [vmem:[#allocation59_spill] sm:$0xff] }
 0x80e   : > { %v13522_v25 = vpack.c.bf16 %v6674_v26, %v6673_v4  ;;  %v2355_v4 = vmax.f32 %v14550_v31, 0.0 }
 0x810   : > { %14548 = vst [vmem:[#allocation33_spill] sm:$0xff] %v13522_v25  ;;  %v3053_v29 = vpop.f32.mrf.mxu1  ;;  %v4106_v21 = vpop.f32.mrf.mxu2  ;;  %v2515_v35 = vpack.c.bf16 %v2355_v4, %v2354_v8  ;;  %v14552_v4 = vld [vmem:[#allocation61_spill] sm:$0xff] }
 0x811   : > { %v3434_v11 = vmax.f32 %v3053_v29, 0.0  ;;  %v4514_v33 = vmax.f32 %v4106_v21, 0.0  ;;  %v5159_v62 = vpop.f32.mrf.mxu3  ;;  %v2356_v36 = vmax.f32 %v14552_v4, 0.0 }
 0x812   : > { %v5594_v28 = vmax.f32 %v5159_v62, 0.0 }
 0x813   : > { %v3603_v45 = vpack.c.bf16 %v3434_v11, %v3433_v54  ;;  %v4692_v23 = vpack.c.bf16 %v4514_v33, %v4513_v16  ;;  %v6215_v47 = vpop.f32.mrf.mxu0 }
 0x814   : > { %v5781_v42 = vpack.c.bf16 %v5594_v28, %v5593_v15  ;;  %v6675_v21 = vmax.f32 %v6215_v47, 0.0 }
 0x815   : > { %4148 = vmatmul.bf16.gmra.mxu2 %v3603_v45  ;;  %5201 = vmatmul.bf16.gmra.mxu3 %v4692_v23 }
 0x816   : > { %6254 = vmatmul.bf16.gmra.mxu0 %v5781_v42 }
 0x818   : > { %v3056_v26 = vpop.f32.mrf.mxu1  ;;  %v4109_v0 = vpop.f32.mrf.mxu2 }
 0x819   : > { %v5162_v10 = vpop.f32.mrf.mxu3  ;;  %v3435_v11 = vmax.f32 %v3056_v26, 0.0  ;;  %v4515_v33 = vmax.f32 %v4109_v0, 0.0  ;;  %v12460_v26 = vld [vmem:[%s14411_s2 + $0x190] sm:$0xff] }
 0x81a   : > { %v5595_v45 = vmax.f32 %v5162_v10, 0.0  ;;  %9205 = vmatpush.bf16.msra.mxu3 %v12460_v26 }
 0x81b   : > { %v6217_v29 = vpop.f32.mrf.mxu0  ;;  %3095 = vmatmul.bf16.gmra.mxu1 %v2515_v35  ;;  %v14553_v35 = vld [vmem:[#allocation63_spill] sm:$0xff] }
 0x81c   : > { %v6676_v19 = vmax.f32 %v6217_v29, 0.0  ;;  %v2357_v47 = vmax.f32 %v14553_v35, 0.0 }
 0x81e   : > { %v13529_v62 = vpack.c.bf16 %v6676_v19, %v6675_v21  ;;  %v2516_v10 = vpack.c.bf16 %v2357_v47, %v2356_v36  ;;  %v14555_v47 = vld [vmem:[#allocation65_spill] sm:$0xff] }
 0x820   : > { %14551 = vst [vmem:[#allocation35_spill] sm:$0xff] %v13529_v62  ;;  %v3058_v54 = vpop.f32.mrf.mxu1  ;;  %v4111_v16 = vpop.f32.mrf.mxu2  ;;  %v2358_v62 = vmax.f32 %v14555_v47, 0.0 }
 0x821   : > { %v3436_v15 = vmax.f32 %v3058_v54, 0.0  ;;  %v4516_v28 = vmax.f32 %v4111_v16, 0.0  ;;  %v5164_v2 = vpop.f32.mrf.mxu3 }
 0x822   : > { %v5596_v23 = vmax.f32 %v5164_v2, 0.0 }
 0x823   : > { %v3604_v42 = vpack.c.bf16 %v3436_v15, %v3435_v11  ;;  %v4693_v31 = vpack.c.bf16 %v4516_v28, %v4515_v33  ;;  %v6220_v25 = vpop.f32.mrf.mxu0 }
 0x824   : > { %v5782_v8 = vpack.c.bf16 %v5596_v23, %v5595_v45  ;;  %v6677_v54 = vmax.f32 %v6220_v25, 0.0 }
 0x825   : > { %4153 = vmatmul.bf16.gmra.mxu2 %v3604_v42  ;;  %5206 = vmatmul.bf16.gmra.mxu3 %v4693_v31 }
 0x826   : > { %6259 = vmatmul.bf16.gmra.mxu0 %v5782_v8 }
 0x828   : > { %v3061_v0 = vpop.f32.mrf.mxu1  ;;  %v4114_v29 = vpop.f32.mrf.mxu2 }
 0x829   : > { %v5167_v21 = vpop.f32.mrf.mxu3  ;;  %v3437_v28 = vmax.f32 %v3061_v0, 0.0  ;;  %v4517_v2 = vmax.f32 %v4114_v29, 0.0 }
 0x82a   : > { %v5597_v31 = vmax.f32 %v5167_v21, 0.0 }
 0x82b   : > { %v6222_v19 = vpop.f32.mrf.mxu0  ;;  %3100 = vmatmul.bf16.gmra.mxu1 %v2516_v10  ;;  %v14556_v10 = vld [vmem:[#allocation67_spill] sm:$0xff] }
 0x82c   : > { %v6678_v16 = vmax.f32 %v6222_v19, 0.0  ;;  %v2359_v25 = vmax.f32 %v14556_v10, 0.0 }
 0x82e   : > { %v13536_v11 = vpack.c.bf16 %v6678_v16, %v6677_v54  ;;  %v2517_v0 = vpack.c.bf16 %v2359_v25, %v2358_v62 }
 0x830   : > { %14554 = vst [vmem:[#allocation37_spill] sm:$0xff] %v13536_v11  ;;  %v3063_v33 = vpop.f32.mrf.mxu1  ;;  %v4116_v15 = vpop.f32.mrf.mxu2 }
 0x831   : > { %v3438_v45 = vmax.f32 %v3063_v33, 0.0  ;;  %v4518_v23 = vmax.f32 %v4116_v15, 0.0  ;;  %v5169_v42 = vpop.f32.mrf.mxu3 }
 0x832   : > { %v5598_v8 = vmax.f32 %v5169_v42, 0.0 }
 0x833   : > { %v3605_v4 = vpack.c.bf16 %v3438_v45, %v3437_v28  ;;  %v4694_v35 = vpack.c.bf16 %v4518_v23, %v4517_v2  ;;  %v6225_v26 = vpop.f32.mrf.mxu0 }
 0x834   : > { %v5783_v36 = vpack.c.bf16 %v5598_v8, %v5597_v31  ;;  %v6679_v33 = vmax.f32 %v6225_v26, 0.0 }
 0x835   : > { %4158 = vmatmul.bf16.gmra.mxu2 %v3605_v4  ;;  %5211 = vmatmul.bf16.gmra.mxu3 %v4694_v35 }
 0x836   : > { %6264 = vmatmul.bf16.gmra.mxu0 %v5783_v36 }
 0x838   : > { %v3066_v19 = vpop.f32.mrf.mxu1  ;;  %v4119_v54 = vpop.f32.mrf.mxu2 }
 0x839   : > { %v5172_v29 = vpop.f32.mrf.mxu3  ;;  %v3439_v45 = vmax.f32 %v3066_v19, 0.0  ;;  %v4519_v23 = vmax.f32 %v4119_v54, 0.0 }
 0x83a   : > { %v5599_v4 = vmax.f32 %v5172_v29, 0.0 }
 0x83b   : > { %v6227_v16 = vpop.f32.mrf.mxu0  ;;  %3105 = vmatmul.bf16.gmra.mxu1 %v2517_v0 }
 0x83c   : > { %v6680_v21 = vmax.f32 %v6227_v16, 0.0 }
 0x83e   : > { %v13540_v15 = vpack.c.bf16 %v6680_v21, %v6679_v33  ;;  %v14558_v33 = vld [vmem:[#allocation9_spill] sm:$0xff] }
 0x840   : > { %14557 = vst [vmem:[#allocation38_spill] sm:$0xff] %v13540_v15  ;;  %v3068_v28 = vpop.f32.mrf.mxu1  ;;  %v4121_v2 = vpop.f32.mrf.mxu2  ;;  %v14594_v15 = vld [vmem:[#allocation51_spill] sm:$0xff] }
 0x841   : > { %v3440_v42 = vmax.f32 %v3068_v28, 0.0  ;;  %v4520_v31 = vmax.f32 %v4121_v2, 0.0  ;;  %v5174_v8 = vpop.f32.mrf.mxu3  ;;  %v2396_v11 = vmax.f32 %v14594_v15, 0.0 }
 0x842   : > { %v5600_v35 = vmax.f32 %v5174_v8, 0.0 }
 0x843   : > { %v3606_v36 = vpack.c.bf16 %v3440_v42, %v3439_v45  ;;  %v4695_v47 = vpack.c.bf16 %v4520_v31, %v4519_v23  ;;  %v6230_v10 = vpop.f32.mrf.mxu0 }
 0x844   : > { %v5784_v62 = vpack.c.bf16 %v5600_v35, %v5599_v4  ;;  %v6681_v19 = vmax.f32 %v6230_v10, 0.0 }
 0x845   : > { %4163 = vmatmul.bf16.gmra.mxu2 %v3606_v36  ;;  %5216 = vmatmul.bf16.gmra.mxu3 %v4695_v47 }
 0x846   : > { %6269 = vmatmul.bf16.gmra.mxu0 %v5784_v62 }
 0x848   : > { %v3071_v26 = vpop.f32.mrf.mxu1  ;;  %v4124_v25 = vpop.f32.mrf.mxu2 }
 0x849   : > { %v5177_v0 = vpop.f32.mrf.mxu3  ;;  %v3441_v2 = vmax.f32 %v3071_v26, 0.0  ;;  %v4521_v45 = vmax.f32 %v4124_v25, 0.0 }
 0x84a   : > { %v5601_v8 = vmax.f32 %v5177_v0, 0.0 }
 0x84b   : > { %v6232_v16 = vpop.f32.mrf.mxu0  ;;  %3110 = vmatmul.bf16.gmra.mxu1 %v14558_v33 }
 0x84c   : > { %v6682_v54 = vmax.f32 %v6232_v16, 0.0 }
 0x84e   : > { %v13543_v21 = vpack.c.bf16 %v6682_v54, %v6681_v19  ;;  %v14560_v54 = vld [vmem:[#allocation11_spill] sm:$0xff] }
 0x850   : > { %14559 = vst [vmem:[#allocation40_spill] sm:$0xff] %v13543_v21  ;;  %v3073_v28 = vpop.f32.mrf.mxu1  ;;  %v4126_v29 = vpop.f32.mrf.mxu2 }
 0x851   : > { %v3442_v23 = vmax.f32 %v3073_v28, 0.0  ;;  %v4522_v42 = vmax.f32 %v4126_v29, 0.0  ;;  %v5179_v31 = vpop.f32.mrf.mxu3 }
 0x852   : > { %v5602_v4 = vmax.f32 %v5179_v31, 0.0 }
 0x853   : > { %v3607_v35 = vpack.c.bf16 %v3442_v23, %v3441_v2  ;;  %v4696_v36 = vpack.c.bf16 %v4522_v42, %v4521_v45  ;;  %v6235_v47 = vpop.f32.mrf.mxu0 }
 0x854   : > { %v5785_v62 = vpack.c.bf16 %v5602_v4, %v5601_v8  ;;  %v6683_v26 = vmax.f32 %v6235_v47, 0.0 }
 0x855   : > { %4168 = vmatmul.bf16.gmra.mxu2 %v3607_v35  ;;  %5221 = vmatmul.bf16.gmra.mxu3 %v4696_v36 }
 0x856   : > { %6274 = vmatmul.bf16.gmra.mxu0 %v5785_v62 }
 0x858   : > { %v3076_v10 = vpop.f32.mrf.mxu1  ;;  %v4129_v16 = vpop.f32.mrf.mxu2 }
 0x859   : > { %v5182_v33 = vpop.f32.mrf.mxu3  ;;  %v3443_v31 = vmax.f32 %v3076_v10, 0.0  ;;  %v4523_v2 = vmax.f32 %v4129_v16, 0.0 }
 0x85a   : > { %v5603_v8 = vmax.f32 %v5182_v33, 0.0 }
 0x85b   : > { %v6237_v19 = vpop.f32.mrf.mxu0  ;;  %3115 = vmatmul.bf16.gmra.mxu1 %v14560_v54 }
 0x85c   : > { %v6684_v25 = vmax.f32 %v6237_v19, 0.0 }
 0x85e   : > { %v13546_v28 = vpack.c.bf16 %v6684_v25, %v6683_v26  ;;  %v14562_v25 = vld [vmem:[#allocation13_spill] sm:$0xff] }
 0x860   : > { %14561 = vst [vmem:[#allocation42_spill] sm:$0xff] %v13546_v28  ;;  %v3078_v29 = vpop.f32.mrf.mxu1  ;;  %v4131_v0 = vpop.f32.mrf.mxu2 }
 0x861   : > { %v3444_v45 = vmax.f32 %v3078_v29, 0.0  ;;  %v4524_v23 = vmax.f32 %v4131_v0, 0.0  ;;  %v5184_v42 = vpop.f32.mrf.mxu3 }
 0x862   : > { %v5604_v4 = vmax.f32 %v5184_v42, 0.0 }
 0x863   : > { %v3608_v35 = vpack.c.bf16 %v3444_v45, %v3443_v31  ;;  %v4697_v36 = vpack.c.bf16 %v4524_v23, %v4523_v2  ;;  %v6240_v62 = vpop.f32.mrf.mxu0 }
 0x864   : > { %v5786_v21 = vpack.c.bf16 %v5604_v4, %v5603_v8  ;;  %v6685_v10 = vmax.f32 %v6240_v62, 0.0 }
 0x865   : > { %4173 = vmatmul.bf16.gmra.mxu2 %v3608_v35  ;;  %5226 = vmatmul.bf16.gmra.mxu3 %v4697_v36 }
 0x866   : > { %6279 = vmatmul.bf16.gmra.mxu0 %v5786_v21 }
 0x868   : > { %v3081_v47 = vpop.f32.mrf.mxu1  ;;  %v4134_v19 = vpop.f32.mrf.mxu2 }
 0x869   : > { %v5187_v54 = vpop.f32.mrf.mxu3  ;;  %v3445_v42 = vmax.f32 %v3081_v47, 0.0  ;;  %v4525_v31 = vmax.f32 %v4134_v19, 0.0 }
 0x86a   : > { %v5605_v8 = vmax.f32 %v5187_v54, 0.0 }
 0x86b   : > { %v6242_v26 = vpop.f32.mrf.mxu0  ;;  %3120 = vmatmul.bf16.gmra.mxu1 %v14562_v25 }
 0x86c   : > { %v6686_v16 = vmax.f32 %v6242_v26, 0.0 }
 0x86e   : > { %v13549_v29 = vpack.c.bf16 %v6686_v16, %v6685_v10  ;;  %v14564_v16 = vld [vmem:[#allocation15_spill] sm:$0xff] }
 0x870   : > { %14563 = vst [vmem:[#allocation43_spill] sm:$0xff] %v13549_v29  ;;  %v3083_v0 = vpop.f32.mrf.mxu1  ;;  %v4136_v33 = vpop.f32.mrf.mxu2 }
 0x871   : > { %v3446_v2 = vmax.f32 %v3083_v0, 0.0  ;;  %v4526_v45 = vmax.f32 %v4136_v33, 0.0  ;;  %v5189_v23 = vpop.f32.mrf.mxu3 }
 0x872   : > { %v5606_v4 = vmax.f32 %v5189_v23, 0.0 }
 0x873   : > { %v3609_v21 = vpack.c.bf16 %v3446_v2, %v3445_v42  ;;  %v4698_v35 = vpack.c.bf16 %v4526_v45, %v4525_v31  ;;  %v6245_v36 = vpop.f32.mrf.mxu0 }
 0x874   : > { %v5787_v28 = vpack.c.bf16 %v5606_v4, %v5605_v8  ;;  %v6687_v47 = vmax.f32 %v6245_v36, 0.0 }
 0x875   : > { %4178 = vmatmul.bf16.gmra.mxu2 %v3609_v21  ;;  %5231 = vmatmul.bf16.gmra.mxu3 %v4698_v35 }
 0x876   : > { %6284 = vmatmul.bf16.gmra.mxu0 %v5787_v28 }
 0x878   : > { %v3086_v62 = vpop.f32.mrf.mxu1  ;;  %v4139_v26 = vpop.f32.mrf.mxu2 }
 0x879   : > { %v5192_v25 = vpop.f32.mrf.mxu3  ;;  %v3447_v23 = vmax.f32 %v3086_v62, 0.0  ;;  %v4527_v42 = vmax.f32 %v4139_v26, 0.0 }
 0x87a   : > { %v5607_v8 = vmax.f32 %v5192_v25, 0.0 }
 0x87b   : > { %v6247_v10 = vpop.f32.mrf.mxu0  ;;  %3125 = vmatmul.bf16.gmra.mxu1 %v14564_v16 }
 0x87c   : > { %v6688_v19 = vmax.f32 %v6247_v10, 0.0 }
 0x87e   : > { %v13552_v0 = vpack.c.bf16 %v6688_v19, %v6687_v47  ;;  %v14566_v19 = vld [vmem:[#allocation17_spill] sm:$0xff] }
 0x880   : > { %14565 = vst [vmem:[#allocation45_spill] sm:$0xff] %v13552_v0  ;;  %v3088_v33 = vpop.f32.mrf.mxu1  ;;  %v4141_v54 = vpop.f32.mrf.mxu2 }
 0x881   : > { %v3448_v31 = vmax.f32 %v3088_v33, 0.0  ;;  %v4528_v2 = vmax.f32 %v4141_v54, 0.0  ;;  %v5194_v45 = vpop.f32.mrf.mxu3 }
 0x882   : > { %v5608_v4 = vmax.f32 %v5194_v45, 0.0 }
 0x883   : > { %v3610_v28 = vpack.c.bf16 %v3448_v31, %v3447_v23  ;;  %v4699_v21 = vpack.c.bf16 %v4528_v2, %v4527_v42  ;;  %v6250_v35 = vpop.f32.mrf.mxu0 }
 0x884   : > { %v5788_v29 = vpack.c.bf16 %v5608_v4, %v5607_v8  ;;  %v6689_v62 = vmax.f32 %v6250_v35, 0.0  ;;  %v12451_v35 = vld [vmem:[%s14411_s2 + $0x148] sm:$0xff] }
 0x885   : > { %4183 = vmatmul.bf16.gmra.mxu2 %v3610_v28  ;;  %5236 = vmatmul.bf16.gmra.mxu3 %v4699_v21 }
 0x886   : > { %6289 = vmatmul.bf16.gmra.mxu0 %v5788_v29  ;;  %8108 = vmatpush.bf16.msra.mxu2 %v12451_v35 }
 0x888   : > { %v3091_v36 = vpop.f32.mrf.mxu1  ;;  %v4144_v10 = vpop.f32.mrf.mxu2 }
 0x889   : > { %v5197_v16 = vpop.f32.mrf.mxu3  ;;  %v3449_v45 = vmax.f32 %v3091_v36, 0.0  ;;  %v4529_v23 = vmax.f32 %v4144_v10, 0.0 }
 0x88a   : > { %v5609_v8 = vmax.f32 %v5197_v16, 0.0 }
 0x88b   : > { %v6252_v47 = vpop.f32.mrf.mxu0  ;;  %3130 = vmatmul.bf16.gmra.mxu1 %v14566_v19 }
 0x88c   : > { %v6690_v26 = vmax.f32 %v6252_v47, 0.0 }
 0x88e   : > { %v13555_v33 = vpack.c.bf16 %v6690_v26, %v6689_v62  ;;  %v14568_v62 = vld [vmem:[#allocation19_spill] sm:$0xff] }
 0x890   : > { %14567 = vst [vmem:[#allocation46_spill] sm:$0xff] %v13555_v33  ;;  %v3093_v54 = vpop.f32.mrf.mxu1  ;;  %v4146_v25 = vpop.f32.mrf.mxu2 }
 0x891   : > { %v3450_v42 = vmax.f32 %v3093_v54, 0.0  ;;  %v4530_v31 = vmax.f32 %v4146_v25, 0.0  ;;  %v5199_v2 = vpop.f32.mrf.mxu3 }
 0x892   : > { %v5610_v4 = vmax.f32 %v5199_v2, 0.0 }
 0x893   : > { %v3611_v29 = vpack.c.bf16 %v3450_v42, %v3449_v45  ;;  %v4700_v28 = vpack.c.bf16 %v4530_v31, %v4529_v23  ;;  %v6255_v21 = vpop.f32.mrf.mxu0 }
 0x894   : > { %v5789_v0 = vpack.c.bf16 %v5610_v4, %v5609_v8  ;;  %v6691_v16 = vmax.f32 %v6255_v21, 0.0 }
 0x895   : > { %4188 = vmatmul.bf16.gmra.mxu2 %v3611_v29  ;;  %5241 = vmatmul.bf16.gmra.mxu3 %v4700_v28 }
 0x896   : > { %6294 = vmatmul.bf16.gmra.mxu0 %v5789_v0 }
 0x898   : > { %v3096_v47 = vpop.f32.mrf.mxu1  ;;  %v4149_v19 = vpop.f32.mrf.mxu2 }
 0x899   : > { %v5202_v36 = vpop.f32.mrf.mxu3  ;;  %v3451_v23 = vmax.f32 %v3096_v47, 0.0  ;;  %v4531_v42 = vmax.f32 %v4149_v19, 0.0 }
 0x89a   : > { %v5611_v8 = vmax.f32 %v5202_v36, 0.0 }
 0x89b   : > { %v6257_v10 = vpop.f32.mrf.mxu0  ;;  %3135 = vmatmul.bf16.gmra.mxu1 %v14568_v62 }
 0x89c   : > { %v6692_v26 = vmax.f32 %v6257_v10, 0.0 }
 0x89e   : > { %v13561_v54 = vpack.c.bf16 %v6692_v26, %v6691_v16  ;;  %v14570_v26 = vld [vmem:[#allocation21_spill] sm:$0xff] }
 0x8a0   : > { %14569 = vst [vmem:[#allocation48_spill] sm:$0xff] %v13561_v54  ;;  %v3098_v25 = vpop.f32.mrf.mxu1  ;;  %v4151_v45 = vpop.f32.mrf.mxu2 }
 0x8a1   : > { %v3452_v0 = vmax.f32 %v3098_v25, 0.0  ;;  %v4532_v31 = vmax.f32 %v4151_v45, 0.0  ;;  %v5204_v2 = vpop.f32.mrf.mxu3 }
 0x8a2   : > { %v5612_v4 = vmax.f32 %v5204_v2, 0.0 }
 0x8a3   : > { %v3612_v29 = vpack.c.bf16 %v3452_v0, %v3451_v23  ;;  %v4701_v28 = vpack.c.bf16 %v4532_v31, %v4531_v42  ;;  %v6260_v35 = vpop.f32.mrf.mxu0 }
 0x8a4   : > { %v5790_v33 = vpack.c.bf16 %v5612_v4, %v5611_v8  ;;  %v6693_v47 = vmax.f32 %v6260_v35, 0.0 }
 0x8a5   : > { %4193 = vmatmul.bf16.gmra.mxu2 %v3612_v29  ;;  %5246 = vmatmul.bf16.gmra.mxu3 %v4701_v28 }
 0x8a6   : > { %6299 = vmatmul.bf16.gmra.mxu0 %v5790_v33 }
 0x8a8   : > { %v3101_v21 = vpop.f32.mrf.mxu1  ;;  %v4154_v10 = vpop.f32.mrf.mxu2 }
 0x8a9   : > { %v5207_v62 = vpop.f32.mrf.mxu3  ;;  %v3453_v2 = vmax.f32 %v3101_v21, 0.0  ;;  %v4533_v23 = vmax.f32 %v4154_v10, 0.0 }
 0x8aa   : > { %v5613_v8 = vmax.f32 %v5207_v62, 0.0 }
 0x8ab   : > { %v6262_v16 = vpop.f32.mrf.mxu0  ;;  %3140 = vmatmul.bf16.gmra.mxu1 %v14570_v26 }
 0x8ac   : > { %v6694_v19 = vmax.f32 %v6262_v16, 0.0 }
 0x8ae   : > { %v13564_v25 = vpack.c.bf16 %v6694_v19, %v6693_v47  ;;  %v14572_v19 = vld [vmem:[#allocation23_spill] sm:$0xff] }
 0x8b0   : > { %14571 = vst [vmem:[#allocation50_spill] sm:$0xff] %v13564_v25  ;;  %v3103_v45 = vpop.f32.mrf.mxu1  ;;  %v4156_v36 = vpop.f32.mrf.mxu2 }
 0x8b1   : > { %v3454_v42 = vmax.f32 %v3103_v45, 0.0  ;;  %v4534_v0 = vmax.f32 %v4156_v36, 0.0  ;;  %v5209_v31 = vpop.f32.mrf.mxu3 }
 0x8b2   : > { %v5614_v4 = vmax.f32 %v5209_v31, 0.0 }
 0x8b3   : > { %v3613_v33 = vpack.c.bf16 %v3454_v42, %v3453_v2  ;;  %v4702_v29 = vpack.c.bf16 %v4534_v0, %v4533_v23  ;;  %v6265_v28 = vpop.f32.mrf.mxu0 }
 0x8b4   : > { %v5791_v54 = vpack.c.bf16 %v5614_v4, %v5613_v8  ;;  %v6695_v21 = vmax.f32 %v6265_v28, 0.0 }
 0x8b5   : > { %4198 = vmatmul.bf16.gmra.mxu2 %v3613_v33  ;;  %5251 = vmatmul.bf16.gmra.mxu3 %v4702_v29 }
 0x8b6   : > { %6304 = vmatmul.bf16.gmra.mxu0 %v5791_v54 }
 0x8b8   : > { %v3106_v35 = vpop.f32.mrf.mxu1  ;;  %v4159_v16 = vpop.f32.mrf.mxu2 }
 0x8b9   : > { %v5212_v26 = vpop.f32.mrf.mxu3  ;;  %v3455_v31 = vmax.f32 %v3106_v35, 0.0  ;;  %v4535_v2 = vmax.f32 %v4159_v16, 0.0 }
 0x8ba   : > { %v5615_v8 = vmax.f32 %v5212_v26, 0.0  ;;  %v12468_v26 = vld [vmem:[%s14412_s3 + $0x10] sm:$0xff] }
 0x8bb   : > { %v6267_v47 = vpop.f32.mrf.mxu0  ;;  %3145 = vmatmul.bf16.gmra.mxu1 %v14572_v19  ;;  %10302 = vmatpush.bf16.msra.mxu0 %v12468_v26 }
 0x8bc   : > { %v6696_v10 = vmax.f32 %v6267_v47, 0.0 }
 0x8be   : > { %v13567_v45 = vpack.c.bf16 %v6696_v10, %v6695_v21  ;;  %v14574_v10 = vld [vmem:[#allocation25_spill] sm:$0xff] }
 0x8c0   : > { %14573 = vst [vmem:[#allocation53_spill] sm:$0xff] %v13567_v45  ;;  %v3108_v36 = vpop.f32.mrf.mxu1  ;;  %v4161_v62 = vpop.f32.mrf.mxu2  ;;  %v14576_v45 = vld [vmem:[#allocation28_spill] sm:$0xff] }
 0x8c1   : > { %v3456_v23 = vmax.f32 %v3108_v36, 0.0  ;;  %v4536_v42 = vmax.f32 %v4161_v62, 0.0  ;;  %v5214_v0 = vpop.f32.mrf.mxu3 }
 0x8c2   : > { %v5616_v4 = vmax.f32 %v5214_v0, 0.0 }
 0x8c3   : > { %v3614_v54 = vpack.c.bf16 %v3456_v23, %v3455_v31  ;;  %v4703_v33 = vpack.c.bf16 %v4536_v42, %v4535_v2  ;;  %v6270_v29 = vpop.f32.mrf.mxu0 }
 0x8c4   : > { %v5792_v25 = vpack.c.bf16 %v5616_v4, %v5615_v8  ;;  %v6697_v35 = vmax.f32 %v6270_v29, 0.0 }
 0x8c5   : > { %4203 = vmatmul.bf16.gmra.mxu2 %v3614_v54  ;;  %5256 = vmatmul.bf16.gmra.mxu3 %v4703_v33 }
 0x8c6   : > { %6309 = vmatmul.bf16.gmra.mxu0 %v5792_v25 }
 0x8c8   : > { %v3111_v28 = vpop.f32.mrf.mxu1  ;;  %v4164_v47 = vpop.f32.mrf.mxu2 }
 0x8c9   : > { %v5217_v19 = vpop.f32.mrf.mxu3  ;;  %v3457_v2 = vmax.f32 %v3111_v28, 0.0  ;;  %v4537_v23 = vmax.f32 %v4164_v47, 0.0 }
 0x8ca   : > { %v5617_v8 = vmax.f32 %v5217_v19, 0.0 }
 0x8cb   : > { %v6272_v21 = vpop.f32.mrf.mxu0  ;;  %3150 = vmatmul.bf16.gmra.mxu1 %v14574_v10 }
 0x8cc   : > { %v6698_v16 = vmax.f32 %v6272_v21, 0.0 }
 0x8ce   : > { %v13570_v36 = vpack.c.bf16 %v6698_v16, %v6697_v35 }
 0x8d0   : > { %14575 = vst [vmem:[#allocation55_spill] sm:$0xff] %v13570_v36  ;;  %v3113_v62 = vpop.f32.mrf.mxu1  ;;  %v4166_v31 = vpop.f32.mrf.mxu2 }
 0x8d1   : > { %v3458_v25 = vmax.f32 %v3113_v62, 0.0  ;;  %v4538_v42 = vmax.f32 %v4166_v31, 0.0  ;;  %v5219_v0 = vpop.f32.mrf.mxu3 }
 0x8d2   : > { %v5618_v4 = vmax.f32 %v5219_v0, 0.0 }
 0x8d3   : > { %v3615_v54 = vpack.c.bf16 %v3458_v25, %v3457_v2  ;;  %v4704_v33 = vpack.c.bf16 %v4538_v42, %v4537_v23  ;;  %v6275_v29 = vpop.f32.mrf.mxu0 }
 0x8d4   : > { %v5793_v21 = vpack.c.bf16 %v5618_v4, %v5617_v8  ;;  %v6699_v28 = vmax.f32 %v6275_v29, 0.0 }
 0x8d5   : > { %4208 = vmatmul.bf16.gmra.mxu2 %v3615_v54  ;;  %5261 = vmatmul.bf16.gmra.mxu3 %v4704_v33 }
 0x8d6   : > { %6314 = vmatmul.bf16.gmra.mxu0 %v5793_v21 }
 0x8d8   : > { %v3116_v10 = vpop.f32.mrf.mxu1  ;;  %v4169_v35 = vpop.f32.mrf.mxu2 }
 0x8d9   : > { %v5222_v16 = vpop.f32.mrf.mxu3  ;;  %v3459_v31 = vmax.f32 %v3116_v10, 0.0  ;;  %v4539_v2 = vmax.f32 %v4169_v35, 0.0 }
 0x8da   : > { %v5619_v0 = vmax.f32 %v5222_v16, 0.0 }
 0x8db   : > { %v6277_v36 = vpop.f32.mrf.mxu0  ;;  %3155 = vmatmul.bf16.gmra.mxu1 %v14576_v45 }
 0x8dc   : > { %v6700_v47 = vmax.f32 %v6277_v36, 0.0 }
 0x8de   : > { %v13576_v26 = vpack.c.bf16 %v6700_v47, %v6699_v28  ;;  %v14578_v47 = vld [vmem:[#allocation31_spill] sm:$0xff] }
 0x8e0   : > { %14577 = vst [vmem:[#allocation57_spill] sm:$0xff] %v13576_v26  ;;  %v3118_v62 = vpop.f32.mrf.mxu1  ;;  %v4171_v19 = vpop.f32.mrf.mxu2 }
 0x8e1   : > { %v3460_v23 = vmax.f32 %v3118_v62, 0.0  ;;  %v4540_v25 = vmax.f32 %v4171_v19, 0.0  ;;  %v5224_v42 = vpop.f32.mrf.mxu3 }
 0x8e2   : > { %v5620_v8 = vmax.f32 %v5224_v42, 0.0 }
 0x8e3   : > { %v3616_v4 = vpack.c.bf16 %v3460_v23, %v3459_v31  ;;  %v4705_v54 = vpack.c.bf16 %v4540_v25, %v4539_v2  ;;  %v6280_v33 = vpop.f32.mrf.mxu0 }
 0x8e4   : > { %v5794_v21 = vpack.c.bf16 %v5620_v8, %v5619_v0  ;;  %v6701_v10 = vmax.f32 %v6280_v33, 0.0 }
 0x8e5   : > { %4213 = vmatmul.bf16.gmra.mxu2 %v3616_v4  ;;  %5266 = vmatmul.bf16.gmra.mxu3 %v4705_v54 }
 0x8e6   : > { %6319 = vmatmul.bf16.gmra.mxu0 %v5794_v21 }
 0x8e8   : > { %v3121_v45 = vpop.f32.mrf.mxu1  ;;  %v4174_v36 = vpop.f32.mrf.mxu2 }
 0x8e9   : > { %v5227_v29 = vpop.f32.mrf.mxu3  ;;  %v3461_v42 = vmax.f32 %v3121_v45, 0.0  ;;  %v4541_v31 = vmax.f32 %v4174_v36, 0.0 }
 0x8ea   : > { %v5621_v0 = vmax.f32 %v5227_v29, 0.0 }
 0x8eb   : > { %v6282_v28 = vpop.f32.mrf.mxu0  ;;  %3160 = vmatmul.bf16.gmra.mxu1 %v14578_v47 }
 0x8ec   : > { %v6702_v35 = vmax.f32 %v6282_v28, 0.0 }
 0x8ee   : > { %v13579_v62 = vpack.c.bf16 %v6702_v35, %v6701_v10  ;;  %v14580_v35 = vld [vmem:[#allocation34_spill] sm:$0xff] }
 0x8f0   : > { %14579 = vst [vmem:[#allocation59_spill] sm:$0xff] %v13579_v62  ;;  %v3123_v19 = vpop.f32.mrf.mxu1  ;;  %v4176_v16 = vpop.f32.mrf.mxu2 }
 0x8f1   : > { %v3462_v2 = vmax.f32 %v3123_v19, 0.0  ;;  %v4542_v23 = vmax.f32 %v4176_v16, 0.0  ;;  %v5229_v25 = vpop.f32.mrf.mxu3 }
 0x8f2   : > { %v5622_v8 = vmax.f32 %v5229_v25, 0.0 }
 0x8f3   : > { %v3617_v4 = vpack.c.bf16 %v3462_v2, %v3461_v42  ;;  %v4706_v54 = vpack.c.bf16 %v4542_v23, %v4541_v31  ;;  %v6285_v21 = vpop.f32.mrf.mxu0 }
 0x8f4   : > { %v5795_v26 = vpack.c.bf16 %v5622_v8, %v5621_v0  ;;  %v6703_v45 = vmax.f32 %v6285_v21, 0.0 }
 0x8f5   : > { %4218 = vmatmul.bf16.gmra.mxu2 %v3617_v4  ;;  %5271 = vmatmul.bf16.gmra.mxu3 %v4706_v54 }
 0x8f6   : > { %6324 = vmatmul.bf16.gmra.mxu0 %v5795_v26 }
 0x8f8   : > { %v3126_v33 = vpop.f32.mrf.mxu1  ;;  %v4179_v28 = vpop.f32.mrf.mxu2 }
 0x8f9   : > { %v5232_v47 = vpop.f32.mrf.mxu3  ;;  %v3463_v25 = vmax.f32 %v3126_v33, 0.0  ;;  %v4543_v42 = vmax.f32 %v4179_v28, 0.0 }
 0x8fa   : > { %v5623_v0 = vmax.f32 %v5232_v47, 0.0  ;;  %v12442_v47 = vld [vmem:[%s14411_s2 + $0x100] sm:$0xff] }
 0x8fb   : > { %v6287_v10 = vpop.f32.mrf.mxu0  ;;  %3165 = vmatmul.bf16.gmra.mxu1 %v14580_v35 }
 0x8fc   : > { %v6704_v36 = vmax.f32 %v6287_v10, 0.0  ;;  %7011 = vmatpush.bf16.msra.mxu1 %v12442_v47 }
 0x8fe   : > { %v13582_v19 = vpack.c.bf16 %v6704_v36, %v6703_v45  ;;  %v14582_v36 = vld [vmem:[#allocation36_spill] sm:$0xff] }
 0x900   : > { %14581 = vst [vmem:[#allocation61_spill] sm:$0xff] %v13582_v19  ;;  %v3128_v16 = vpop.f32.mrf.mxu1  ;;  %v4181_v29 = vpop.f32.mrf.mxu2  ;;  %v14584_v19 = vld [vmem:[#allocation39_spill] sm:$0xff] }
 0x901   : > { %v3464_v31 = vmax.f32 %v3128_v16, 0.0  ;;  %v4544_v2 = vmax.f32 %v4181_v29, 0.0  ;;  %v5234_v23 = vpop.f32.mrf.mxu3 }
 0x902   : > { %v5624_v8 = vmax.f32 %v5234_v23, 0.0 }
 0x903   : > { %v3618_v26 = vpack.c.bf16 %v3464_v31, %v3463_v25  ;;  %v4707_v4 = vpack.c.bf16 %v4544_v2, %v4543_v42  ;;  %v6290_v54 = vpop.f32.mrf.mxu0 }
 0x904   : > { %v5796_v62 = vpack.c.bf16 %v5624_v8, %v5623_v0  ;;  %v6705_v33 = vmax.f32 %v6290_v54, 0.0 }
 0x905   : > { %4223 = vmatmul.bf16.gmra.mxu2 %v3618_v26  ;;  %5276 = vmatmul.bf16.gmra.mxu3 %v4707_v4 }
 0x906   : > { %6329 = vmatmul.bf16.gmra.mxu0 %v5796_v62 }
 0x908   : > { %v3131_v21 = vpop.f32.mrf.mxu1  ;;  %v4184_v10 = vpop.f32.mrf.mxu2 }
 0x909   : > { %v5237_v35 = vpop.f32.mrf.mxu3  ;;  %v3465_v42 = vmax.f32 %v3131_v21, 0.0  ;;  %v4545_v31 = vmax.f32 %v4184_v10, 0.0 }
 0x90a   : > { %v5625_v0 = vmax.f32 %v5237_v35, 0.0 }
 0x90b   : > { %v6292_v45 = vpop.f32.mrf.mxu0  ;;  %3170 = vmatmul.bf16.gmra.mxu1 %v14582_v36 }
 0x90c   : > { %v6706_v28 = vmax.f32 %v6292_v45, 0.0 }
 0x90e   : > { %v13585_v16 = vpack.c.bf16 %v6706_v28, %v6705_v33 }
 0x910   : > { %14583 = vst [vmem:[#allocation63_spill] sm:$0xff] %v13585_v16  ;;  %v3133_v29 = vpop.f32.mrf.mxu1  ;;  %v4186_v25 = vpop.f32.mrf.mxu2 }
 0x911   : > { %v3466_v62 = vmax.f32 %v3133_v29, 0.0  ;;  %v4546_v2 = vmax.f32 %v4186_v25, 0.0  ;;  %v5239_v23 = vpop.f32.mrf.mxu3 }
 0x912   : > { %v5626_v8 = vmax.f32 %v5239_v23, 0.0 }
 0x913   : > { %v3619_v26 = vpack.c.bf16 %v3466_v62, %v3465_v42  ;;  %v4708_v4 = vpack.c.bf16 %v4546_v2, %v4545_v31  ;;  %v6295_v54 = vpop.f32.mrf.mxu0 }
 0x914   : > { %v5797_v45 = vpack.c.bf16 %v5626_v8, %v5625_v0  ;;  %v6707_v21 = vmax.f32 %v6295_v54, 0.0 }
 0x915   : > { %4228 = vmatmul.bf16.gmra.mxu2 %v3619_v26  ;;  %5281 = vmatmul.bf16.gmra.mxu3 %v4708_v4 }
 0x916   : > { %6334 = vmatmul.bf16.gmra.mxu0 %v5797_v45 }
 0x918   : > { %v3136_v36 = vpop.f32.mrf.mxu1  ;;  %v4189_v33 = vpop.f32.mrf.mxu2 }
 0x919   : > { %v5242_v28 = vpop.f32.mrf.mxu3  ;;  %v3467_v25 = vmax.f32 %v3136_v36, 0.0  ;;  %v4547_v42 = vmax.f32 %v4189_v33, 0.0 }
 0x91a   : > { %v5627_v23 = vmax.f32 %v5242_v28, 0.0 }
 0x91b   : > { %v6297_v16 = vpop.f32.mrf.mxu0  ;;  %3175 = vmatmul.bf16.gmra.mxu1 %v14584_v19  ;;  %v12459_v19 = vld [vmem:[%s14411_s2 + $0x188] sm:$0xff] }
 0x91c   : > { %v6708_v10 = vmax.f32 %v6297_v16, 0.0  ;;  %9206 = vmatpush.bf16.msra.mxu3 %v12459_v19 }
 0x91e   : > { %v13591_v47 = vpack.c.bf16 %v6708_v10, %v6707_v21  ;;  %v14586_v21 = vld [vmem:[#allocation41_spill] sm:$0xff] }
 0x920   : > { %14585 = vst [vmem:[#allocation65_spill] sm:$0xff] %v13591_v47  ;;  %v3138_v29 = vpop.f32.mrf.mxu1  ;;  %v4191_v35 = vpop.f32.mrf.mxu2 }
 0x921   : > { %v3468_v31 = vmax.f32 %v3138_v29, 0.0  ;;  %v4548_v62 = vmax.f32 %v4191_v35, 0.0  ;;  %v5244_v2 = vpop.f32.mrf.mxu3 }
 0x922   : > { %v5628_v0 = vmax.f32 %v5244_v2, 0.0 }
 0x923   : > { %v3620_v8 = vpack.c.bf16 %v3468_v31, %v3467_v25  ;;  %v4709_v26 = vpack.c.bf16 %v4548_v62, %v4547_v42  ;;  %v6300_v4 = vpop.f32.mrf.mxu0 }
 0x924   : > { %v5798_v45 = vpack.c.bf16 %v5628_v0, %v5627_v23  ;;  %v6709_v28 = vmax.f32 %v6300_v4, 0.0 }
 0x925   : > { %4233 = vmatmul.bf16.gmra.mxu2 %v3620_v8  ;;  %5286 = vmatmul.bf16.gmra.mxu3 %v4709_v26 }
 0x926   : > { %6339 = vmatmul.bf16.gmra.mxu0 %v5798_v45 }
 0x928   : > { %v3141_v16 = vpop.f32.mrf.mxu1  ;;  %v4194_v54 = vpop.f32.mrf.mxu2 }
 0x929   : > { %v5247_v36 = vpop.f32.mrf.mxu3  ;;  %v3469_v42 = vmax.f32 %v3141_v16, 0.0  ;;  %v4549_v31 = vmax.f32 %v4194_v54, 0.0 }
 0x92a   : > { %v5629_v0 = vmax.f32 %v5247_v36, 0.0 }
 0x92b   : > { %v6302_v33 = vpop.f32.mrf.mxu0  ;;  %3180 = vmatmul.bf16.gmra.mxu1 %v14586_v21 }
 0x92c   : > { %v6710_v10 = vmax.f32 %v6302_v33, 0.0 }
 0x92e   : > { %v13597_v29 = vpack.c.bf16 %v6710_v10, %v6709_v28  ;;  %v14588_v10 = vld [vmem:[#allocation44_spill] sm:$0xff] }
 0x930   : > { %14587 = vst [vmem:[#allocation67_spill] sm:$0xff] %v13597_v29  ;;  %v3143_v35 = vpop.f32.mrf.mxu1  ;;  %v4196_v25 = vpop.f32.mrf.mxu2 }
 0x931   : > { %v3470_v62 = vmax.f32 %v3143_v35, 0.0  ;;  %v4550_v2 = vmax.f32 %v4196_v25, 0.0  ;;  %v5249_v23 = vpop.f32.mrf.mxu3 }
 0x932   : > { %v5630_v8 = vmax.f32 %v5249_v23, 0.0 }
 0x933   : > { %v3621_v26 = vpack.c.bf16 %v3470_v62, %v3469_v42  ;;  %v4710_v45 = vpack.c.bf16 %v4550_v2, %v4549_v31  ;;  %v6305_v19 = vpop.f32.mrf.mxu0 }
 0x934   : > { %v5799_v47 = vpack.c.bf16 %v5630_v8, %v5629_v0  ;;  %v6711_v16 = vmax.f32 %v6305_v19, 0.0 }
 0x935   : > { %4238 = vmatmul.bf16.gmra.mxu2 %v3621_v26  ;;  %5291 = vmatmul.bf16.gmra.mxu3 %v4710_v45 }
 0x936   : > { %6344 = vmatmul.bf16.gmra.mxu0 %v5799_v47 }
 0x938   : > { %v3146_v4 = vpop.f32.mrf.mxu1  ;;  %v4199_v33 = vpop.f32.mrf.mxu2 }
 0x939   : > { %v5252_v21 = vpop.f32.mrf.mxu3  ;;  %v3471_v23 = vmax.f32 %v3146_v4, 0.0  ;;  %v4551_v42 = vmax.f32 %v4199_v33, 0.0 }
 0x93a   : > { %v5631_v0 = vmax.f32 %v5252_v21, 0.0 }
 0x93b   : > { %v6307_v28 = vpop.f32.mrf.mxu0  ;;  %3185 = vmatmul.bf16.gmra.mxu1 %v14588_v10 }
 0x93c   : > { %v6712_v54 = vmax.f32 %v6307_v28, 0.0 }
 0x93e   : > { %v13600_v35 = vpack.c.bf16 %v6712_v54, %v6711_v16  ;;  %v14590_v54 = vld [vmem:[#allocation47_spill] sm:$0xff] }
 0x940   : > { %14589 = vst [vmem:[#allocation9_spill] sm:$0xff] %v13600_v35  ;;  %v3148_v25 = vpop.f32.mrf.mxu1  ;;  %v4201_v36 = vpop.f32.mrf.mxu2 }
 0x941   : > { %v3472_v31 = vmax.f32 %v3148_v25, 0.0  ;;  %v4552_v62 = vmax.f32 %v4201_v36, 0.0  ;;  %v5254_v2 = vpop.f32.mrf.mxu3 }
 0x942   : > { %v5632_v8 = vmax.f32 %v5254_v2, 0.0 }
 0x943   : > { %v3622_v47 = vpack.c.bf16 %v3472_v31, %v3471_v23  ;;  %v4711_v26 = vpack.c.bf16 %v4552_v62, %v4551_v42  ;;  %v6310_v45 = vpop.f32.mrf.mxu0 }
 0x944   : > { %v5800_v29 = vpack.c.bf16 %v5632_v8, %v5631_v0  ;;  %v6713_v4 = vmax.f32 %v6310_v45, 0.0 }
 0x945   : > { %4243 = vmatmul.bf16.gmra.mxu2 %v3622_v47  ;;  %5296 = vmatmul.bf16.gmra.mxu3 %v4711_v26 }
 0x946   : > { %6349 = vmatmul.bf16.gmra.mxu0 %v5800_v29 }
 0x948   : > { %v3151_v19 = vpop.f32.mrf.mxu1  ;;  %v4204_v28 = vpop.f32.mrf.mxu2 }
 0x949   : > { %v5257_v10 = vpop.f32.mrf.mxu3  ;;  %v3473_v2 = vmax.f32 %v3151_v19, 0.0  ;;  %v4553_v23 = vmax.f32 %v4204_v28, 0.0 }
 0x94a   : > { %v5633_v0 = vmax.f32 %v5257_v10, 0.0 }
 0x94b   : > { %v6312_v16 = vpop.f32.mrf.mxu0  ;;  %3190 = vmatmul.bf16.gmra.mxu1 %v14590_v54 }
 0x94c   : > { %v6714_v33 = vmax.f32 %v6312_v16, 0.0 }
 0x94e   : > { %v13603_v25 = vpack.c.bf16 %v6714_v33, %v6713_v4  ;;  %v14592_v33 = vld [vmem:[#allocation49_spill] sm:$0xff] }
 0x950   : > { %14591 = vst [vmem:[#allocation11_spill] sm:$0xff] %v13603_v25  ;;  %v3153_v36 = vpop.f32.mrf.mxu1  ;;  %v4206_v21 = vpop.f32.mrf.mxu2 }
 0x951   : > { %v3474_v42 = vmax.f32 %v3153_v36, 0.0  ;;  %v4554_v31 = vmax.f32 %v4206_v21, 0.0  ;;  %v5259_v62 = vpop.f32.mrf.mxu3 }
 0x952   : > { %v5634_v8 = vmax.f32 %v5259_v62, 0.0 }
 0x953   : > { %v3623_v29 = vpack.c.bf16 %v3474_v42, %v3473_v2  ;;  %v4712_v47 = vpack.c.bf16 %v4554_v31, %v4553_v23  ;;  %v6315_v26 = vpop.f32.mrf.mxu0 }
 0x954   : > { %v5801_v35 = vpack.c.bf16 %v5634_v8, %v5633_v0  ;;  %v6715_v19 = vmax.f32 %v6315_v26, 0.0 }
 0x955   : > { %4248 = vmatmul.bf16.gmra.mxu2 %v3623_v29  ;;  %5301 = vmatmul.bf16.gmra.mxu3 %v4712_v47 }
 0x956   : > { %6354 = vmatmul.bf16.gmra.mxu0 %v5801_v35 }
 0x958   : > { %v3156_v45 = vpop.f32.mrf.mxu1  ;;  %v4209_v16 = vpop.f32.mrf.mxu2 }
 0x959   : > { %v5262_v54 = vpop.f32.mrf.mxu3  ;;  %v3475_v62 = vmax.f32 %v3156_v45, 0.0  ;;  %v4555_v2 = vmax.f32 %v4209_v16, 0.0 }
 0x95a   : > { %v5635_v0 = vmax.f32 %v5262_v54, 0.0 }
 0x95b   : > { %v6317_v4 = vpop.f32.mrf.mxu0  ;;  %3195 = vmatmul.bf16.gmra.mxu1 %v14592_v33  ;;  %v14595_v33 = vld [vmem:[#allocation52_spill] sm:$0xff] }
 0x95c   : > { %v6716_v28 = vmax.f32 %v6317_v4, 0.0  ;;  %v2397_v26 = vmax.f32 %v14595_v33, 0.0 }
 0x95e   : > { %v13606_v36 = vpack.c.bf16 %v6716_v28, %v6715_v19  ;;  %v2536_v45 = vpack.c.bf16 %v2397_v26, %v2396_v11  ;;  %v14597_v26 = vld [vmem:[#allocation54_spill] sm:$0xff] }
 0x960   : > { %14593 = vst [vmem:[#allocation13_spill] sm:$0xff] %v13606_v36  ;;  %v3158_v21 = vpop.f32.mrf.mxu1  ;;  %v4211_v10 = vpop.f32.mrf.mxu2  ;;  %v2398_v36 = vmax.f32 %v14597_v26, 0.0 }
 0x961   : > { %v3476_v23 = vmax.f32 %v3158_v21, 0.0  ;;  %v4556_v42 = vmax.f32 %v4211_v10, 0.0  ;;  %v5264_v31 = vpop.f32.mrf.mxu3 }
 0x962   : > { %v5636_v8 = vmax.f32 %v5264_v31, 0.0 }
 0x963   : > { %v3624_v35 = vpack.c.bf16 %v3476_v23, %v3475_v62  ;;  %v4713_v29 = vpack.c.bf16 %v4556_v42, %v4555_v2  ;;  %v6320_v47 = vpop.f32.mrf.mxu0 }
 0x964   : > { %v5802_v25 = vpack.c.bf16 %v5636_v8, %v5635_v0  ;;  %v6717_v21 = vmax.f32 %v6320_v47, 0.0 }
 0x965   : > { %4253 = vmatmul.bf16.gmra.mxu2 %v3624_v35  ;;  %5306 = vmatmul.bf16.gmra.mxu3 %v4713_v29 }
 0x966   : > { %6359 = vmatmul.bf16.gmra.mxu0 %v5802_v25 }
 0x968   : > { %v3161_v4 = vpop.f32.mrf.mxu1  ;;  %v4214_v19 = vpop.f32.mrf.mxu2 }
 0x969   : > { %v5267_v16 = vpop.f32.mrf.mxu3  ;;  %v3477_v23 = vmax.f32 %v3161_v4, 0.0  ;;  %v4557_v42 = vmax.f32 %v4214_v19, 0.0 }
 0x96a   : > { %v5637_v8 = vmax.f32 %v5267_v16, 0.0 }
 0x96b   : > { %v6322_v28 = vpop.f32.mrf.mxu0  ;;  %3200 = vmatmul.bf16.gmra.mxu1 %v2536_v45  ;;  %v14598_v45 = vld [vmem:[#allocation56_spill] sm:$0xff] }
 0x96c   : > { %v6718_v54 = vmax.f32 %v6322_v28, 0.0  ;;  %v2399_v47 = vmax.f32 %v14598_v45, 0.0 }
 0x96e   : > { %v13610_v10 = vpack.c.bf16 %v6718_v54, %v6717_v21  ;;  %v2537_v4 = vpack.c.bf16 %v2399_v47, %v2398_v36  ;;  %v14600_v47 = vld [vmem:[#allocation58_spill] sm:$0xff] }
 0x970   : > { %14596 = vst [vmem:[#allocation15_spill] sm:$0xff] %v13610_v10  ;;  %v3163_v62 = vpop.f32.mrf.mxu1  ;;  %v4216_v2 = vpop.f32.mrf.mxu2  ;;  %v2400_v10 = vmax.f32 %v14600_v47, 0.0 }
 0x971   : > { %v3478_v15 = vmax.f32 %v3163_v62, 0.0  ;;  %v4558_v31 = vmax.f32 %v4216_v2, 0.0  ;;  %v5269_v0 = vpop.f32.mrf.mxu3 }
 0x972   : > { %v5638_v35 = vmax.f32 %v5269_v0, 0.0 }
 0x973   : > { %v3625_v25 = vpack.c.bf16 %v3478_v15, %v3477_v23  ;;  %v4714_v29 = vpack.c.bf16 %v4558_v31, %v4557_v42  ;;  %v6325_v33 = vpop.f32.mrf.mxu0 }
 0x974   : > { %v5803_v11 = vpack.c.bf16 %v5638_v35, %v5637_v8  ;;  %v6719_v62 = vmax.f32 %v6325_v33, 0.0 }
 0x975   : > { %4258 = vmatmul.bf16.gmra.mxu2 %v3625_v25  ;;  %5311 = vmatmul.bf16.gmra.mxu3 %v4714_v29 }
 0x976   : > { %6364 = vmatmul.bf16.gmra.mxu0 %v5803_v11 }
 0x978   : > { %v3166_v28 = vpop.f32.mrf.mxu1  ;;  %v4219_v21 = vpop.f32.mrf.mxu2 }
 0x979   : > { %v5272_v19 = vpop.f32.mrf.mxu3  ;;  %v3479_v15 = vmax.f32 %v3166_v28, 0.0  ;;  %v4559_v31 = vmax.f32 %v4219_v21, 0.0 }
 0x97a   : > { %v5639_v25 = vmax.f32 %v5272_v19, 0.0 }
 0x97b   : > { %v6327_v54 = vpop.f32.mrf.mxu0  ;;  %3205 = vmatmul.bf16.gmra.mxu1 %v2537_v4  ;;  %v14601_v4 = vld [vmem:[#allocation60_spill] sm:$0xff] }
 0x97c   : > { %v6720_v16 = vmax.f32 %v6327_v54, 0.0  ;;  %v2401_v33 = vmax.f32 %v14601_v4, 0.0 }
 0x97e   : > { %v13614_v2 = vpack.c.bf16 %v6720_v16, %v6719_v62  ;;  %v2538_v28 = vpack.c.bf16 %v2401_v33, %v2400_v10  ;;  %v14603_v33 = vld [vmem:[#allocation62_spill] sm:$0xff] }
 0x980   : > { %14599 = vst [vmem:[#allocation17_spill] sm:$0xff] %v13614_v2  ;;  %v3168_v23 = vpop.f32.mrf.mxu1  ;;  %v4221_v42 = vpop.f32.mrf.mxu2  ;;  %v2402_v2 = vmax.f32 %v14603_v33, 0.0 }
 0x981   : > { %v3480_v0 = vmax.f32 %v3168_v23, 0.0  ;;  %v4560_v8 = vmax.f32 %v4221_v42, 0.0  ;;  %v5274_v35 = vpop.f32.mrf.mxu3 }
 0x982   : > { %v5640_v29 = vmax.f32 %v5274_v35, 0.0 }
 0x983   : > { %v3626_v11 = vpack.c.bf16 %v3480_v0, %v3479_v15  ;;  %v4715_v26 = vpack.c.bf16 %v4560_v8, %v4559_v31  ;;  %v6330_v45 = vpop.f32.mrf.mxu0 }
 0x984   : > { %v5804_v36 = vpack.c.bf16 %v5640_v29, %v5639_v25  ;;  %v6721_v23 = vmax.f32 %v6330_v45, 0.0 }
 0x985   : > { %4263 = vmatmul.bf16.gmra.mxu2 %v3626_v11  ;;  %5316 = vmatmul.bf16.gmra.mxu3 %v4715_v26 }
 0x986   : > { %6369 = vmatmul.bf16.gmra.mxu0 %v5804_v36 }
 0x988   : > { %v3171_v54 = vpop.f32.mrf.mxu1  ;;  %v4224_v62 = vpop.f32.mrf.mxu2 }
 0x989   : > { %v5277_v21 = vpop.f32.mrf.mxu3  ;;  %v3481_v0 = vmax.f32 %v3171_v54, 0.0  ;;  %v4561_v8 = vmax.f32 %v4224_v62, 0.0  ;;  %v12450_v54 = vld [vmem:[%s14411_s2 + $0x140] sm:$0xff] }
 0x98a   : > { %v5641_v11 = vmax.f32 %v5277_v21, 0.0  ;;  %8109 = vmatpush.bf16.msra.mxu2 %v12450_v54 }
 0x98b   : > { %v6332_v16 = vpop.f32.mrf.mxu0  ;;  %3210 = vmatmul.bf16.gmra.mxu1 %v2538_v28  ;;  %v14604_v28 = vld [vmem:[#allocation64_spill] sm:$0xff] }
 0x98c   : > { %v6722_v19 = vmax.f32 %v6332_v16, 0.0  ;;  %v2403_v45 = vmax.f32 %v14604_v28, 0.0 }
 0x98e   : > { %v13618_v42 = vpack.c.bf16 %v6722_v19, %v6721_v23  ;;  %v2539_v21 = vpack.c.bf16 %v2403_v45, %v2402_v2  ;;  %v14606_v45 = vld [vmem:[#allocation66_spill] sm:$0xff] }
 0x990   : > { %14602 = vst [vmem:[#allocation19_spill] sm:$0xff] %v13618_v42  ;;  %v3173_v15 = vpop.f32.mrf.mxu1  ;;  %v4226_v31 = vpop.f32.mrf.mxu2  ;;  %v2404_v42 = vmax.f32 %v14606_v45, 0.0 }
 0x991   : > { %v3482_v35 = vmax.f32 %v3173_v15, 0.0  ;;  %v4562_v25 = vmax.f32 %v4226_v31, 0.0  ;;  %v5279_v29 = vpop.f32.mrf.mxu3 }
 0x992   : > { %v5642_v26 = vmax.f32 %v5279_v29, 0.0 }
 0x993   : > { %v3627_v36 = vpack.c.bf16 %v3482_v35, %v3481_v0  ;;  %v4716_v47 = vpack.c.bf16 %v4562_v25, %v4561_v8  ;;  %v6335_v4 = vpop.f32.mrf.mxu0 }
 0x994   : > { %v5805_v10 = vpack.c.bf16 %v5642_v26, %v5641_v11  ;;  %v6723_v15 = vmax.f32 %v6335_v4, 0.0 }
 0x995   : > { %4268 = vmatmul.bf16.gmra.mxu2 %v3627_v36  ;;  %5321 = vmatmul.bf16.gmra.mxu3 %v4716_v47 }
 0x996   : > { %6374 = vmatmul.bf16.gmra.mxu0 %v5805_v10 }
 0x998   : > { %v3176_v62 = vpop.f32.mrf.mxu1  ;;  %v4229_v16 = vpop.f32.mrf.mxu2 }
 0x999   : > { %v5282_v23 = vpop.f32.mrf.mxu3  ;;  %v3483_v25 = vmax.f32 %v3176_v62, 0.0  ;;  %v4563_v29 = vmax.f32 %v4229_v16, 0.0 }
 0x99a   : > { %v5643_v47 = vmax.f32 %v5282_v23, 0.0 }
 0x99b   : > { %v6337_v19 = vpop.f32.mrf.mxu0  ;;  %3215 = vmatmul.bf16.gmra.mxu1 %v2539_v21  ;;  %v14607_v21 = vld [vmem:[#allocation68_spill] sm:$0xff] }
 0x99c   : > { %v6724_v31 = vmax.f32 %v6337_v19, 0.0  ;;  %v2405_v4 = vmax.f32 %v14607_v21, 0.0 }
 0x99e   : > { %v13625_v0 = vpack.c.bf16 %v6724_v31, %v6723_v15  ;;  %v2540_v62 = vpack.c.bf16 %v2405_v4, %v2404_v42  ;;  %v14609_v4 = vld [vmem:[#allocation69_spill] sm:$0xff] }
 0x9a0   : > { %14605 = vst [vmem:[#allocation21_spill] sm:$0xff] %v13625_v0  ;;  %v3178_v8 = vpop.f32.mrf.mxu1  ;;  %v4231_v35 = vpop.f32.mrf.mxu2  ;;  %v2406_v0 = vmax.f32 %v14609_v4, 0.0 }
 0x9a1   : > { %v3484_v11 = vmax.f32 %v3178_v8, 0.0  ;;  %v4564_v26 = vmax.f32 %v4231_v35, 0.0  ;;  %v5284_v36 = vpop.f32.mrf.mxu3 }
 0x9a2   : > { %v5644_v10 = vmax.f32 %v5284_v36, 0.0 }
 0x9a3   : > { %v3628_v33 = vpack.c.bf16 %v3484_v11, %v3483_v25  ;;  %v4717_v28 = vpack.c.bf16 %v4564_v26, %v4563_v29  ;;  %v6340_v54 = vpop.f32.mrf.mxu0 }
 0x9a4   : > { %v5806_v2 = vpack.c.bf16 %v5644_v10, %v5643_v47  ;;  %v6725_v8 = vmax.f32 %v6340_v54, 0.0 }
 0x9a5   : > { %4273 = vmatmul.bf16.gmra.mxu2 %v3628_v33  ;;  %5326 = vmatmul.bf16.gmra.mxu3 %v4717_v28 }
 0x9a6   : > { %6379 = vmatmul.bf16.gmra.mxu0 %v5806_v2 }
 0x9a8   : > { %v3181_v19 = vpop.f32.mrf.mxu1  ;;  %v4234_v15 = vpop.f32.mrf.mxu2 }
 0x9a9   : > { %v5287_v16 = vpop.f32.mrf.mxu3  ;;  %v3485_v11 = vmax.f32 %v3181_v19, 0.0  ;;  %v4565_v26 = vmax.f32 %v4234_v15, 0.0 }
 0x9aa   : > { %v5645_v33 = vmax.f32 %v5287_v16, 0.0 }
 0x9ab   : > { %v6342_v31 = vpop.f32.mrf.mxu0  ;;  %3220 = vmatmul.bf16.gmra.mxu1 %v2540_v62  ;;  %v14610_v62 = vld [vmem:[#allocation70_spill] sm:$0xff] }
 0x9ac   : > { %v6726_v23 = vmax.f32 %v6342_v31, 0.0  ;;  %v2407_v54 = vmax.f32 %v14610_v62, 0.0 }
 0x9ae   : > { %v13629_v35 = vpack.c.bf16 %v6726_v23, %v6725_v8  ;;  %v2541_v19 = vpack.c.bf16 %v2407_v54, %v2406_v0  ;;  %v14612_v54 = vld [vmem:[#allocation71_spill] sm:$0xff] }
 0x9b0   : > { %14608 = vst [vmem:[#allocation23_spill] sm:$0xff] %v13629_v35  ;;  %v3183_v25 = vpop.f32.mrf.mxu1  ;;  %v4236_v29 = vpop.f32.mrf.mxu2  ;;  %v2408_v35 = vmax.f32 %v14612_v54, 0.0 }
 0x9b1   : > { %v3486_v36 = vmax.f32 %v3183_v25, 0.0  ;;  %v4566_v47 = vmax.f32 %v4236_v29, 0.0  ;;  %v5289_v10 = vpop.f32.mrf.mxu3 }
 0x9b2   : > { %v5646_v28 = vmax.f32 %v5289_v10, 0.0 }
 0x9b3   : > { %v3629_v2 = vpack.c.bf16 %v3486_v36, %v3485_v11  ;;  %v4718_v45 = vpack.c.bf16 %v4566_v47, %v4565_v26  ;;  %v6345_v21 = vpop.f32.mrf.mxu0 }
 0x9b4   : > { %v5807_v42 = vpack.c.bf16 %v5646_v28, %v5645_v33  ;;  %v6727_v25 = vmax.f32 %v6345_v21, 0.0 }
 0x9b5   : > { %4278 = vmatmul.bf16.gmra.mxu2 %v3629_v2  ;;  %5331 = vmatmul.bf16.gmra.mxu3 %v4718_v45 }
 0x9b6   : > { %6384 = vmatmul.bf16.gmra.mxu0 %v5807_v42 }
 0x9b8   : > { %v3186_v31 = vpop.f32.mrf.mxu1  ;;  %v4239_v8 = vpop.f32.mrf.mxu2 }
 0x9b9   : > { %v5292_v15 = vpop.f32.mrf.mxu3  ;;  %v3487_v36 = vmax.f32 %v3186_v31, 0.0  ;;  %v4567_v47 = vmax.f32 %v4239_v8, 0.0 }
 0x9ba   : > { %v5647_v2 = vmax.f32 %v5292_v15, 0.0 }
 0x9bb   : > { %v6347_v23 = vpop.f32.mrf.mxu0  ;;  %3225 = vmatmul.bf16.gmra.mxu1 %v2541_v19  ;;  %v14613_v19 = vld [vmem:[#allocation72_spill] sm:$0xff] }
 0x9bc   : > { %v6728_v16 = vmax.f32 %v6347_v23, 0.0  ;;  %v2409_v21 = vmax.f32 %v14613_v19, 0.0 }
 0x9be   : > { %v13633_v29 = vpack.c.bf16 %v6728_v16, %v6727_v25  ;;  %v2542_v31 = vpack.c.bf16 %v2409_v21, %v2408_v35  ;;  %v14615_v21 = vld [vmem:[#allocation73_spill] sm:$0xff] }
 0x9c0   : > { %14611 = vst [vmem:[#allocation25_spill] sm:$0xff] %v13633_v29  ;;  %v3188_v11 = vpop.f32.mrf.mxu1  ;;  %v4241_v26 = vpop.f32.mrf.mxu2 }
 0x9c1   : > { %v3488_v10 = vmax.f32 %v3188_v11, 0.0  ;;  %v4568_v33 = vmax.f32 %v4241_v26, 0.0  ;;  %v5294_v28 = vpop.f32.mrf.mxu3 }
 0x9c2   : > { %v5648_v45 = vmax.f32 %v5294_v28, 0.0 }
 0x9c3   : > { %v3630_v42 = vpack.c.bf16 %v3488_v10, %v3487_v36  ;;  %v4719_v4 = vpack.c.bf16 %v4568_v33, %v4567_v47  ;;  %v6350_v62 = vpop.f32.mrf.mxu0  ;;  %v13642_v36 = vld [vmem:[%s14412_s3 + $0x8] sm:$0xff] }
 0x9c4   : > { %v5808_v0 = vpack.c.bf16 %v5648_v45, %v5647_v2  ;;  %v6729_v11 = vmax.f32 %v6350_v62, 0.0  ;;  %10303 = vmatpush.bf16.msra.mxu0 %v13642_v36 }
 0x9c5   : > { %4283 = vmatmul.bf16.gmra.mxu2 %v3630_v42  ;;  %5336 = vmatmul.bf16.gmra.mxu3 %v4719_v4 }
 0x9c6   : > { %6389 = vmatmul.bf16.gmra.mxu0 %v5808_v0 }
 0x9c8   : > { %v3191_v23 = vpop.f32.mrf.mxu1  ;;  %v4244_v25 = vpop.f32.mrf.mxu2 }
 0x9c9   : > { %v5297_v8 = vpop.f32.mrf.mxu3  ;;  %v3489_v33 = vmax.f32 %v3191_v23, 0.0  ;;  %v4569_v28 = vmax.f32 %v4244_v25, 0.0 }
 0x9ca   : > { %v5649_v42 = vmax.f32 %v5297_v8, 0.0 }
 0x9cb   : > { %v6352_v16 = vpop.f32.mrf.mxu0  ;;  %3230 = vmatmul.bf16.gmra.mxu1 %v2542_v31  ;;  %v2410_v31 = vmax.f32 %v14615_v21, 0.0 }
 0x9cc   : > { %v6730_v15 = vmax.f32 %v6352_v16, 0.0  ;;  %v14616_v16 = vld [vmem:[#allocation74_spill] sm:$0xff] }
 0x9ce   : > { %v13637_v26 = vpack.c.bf16 %v6730_v15, %v6729_v11  ;;  %v2411_v11 = vmax.f32 %v14616_v16, 0.0 }
 0x9d0   : > { %14614 = vst [vmem:[#allocation28_spill] sm:$0xff] %v13637_v26  ;;  %v3193_v47 = vpop.f32.mrf.mxu1  ;;  %v4246_v10 = vpop.f32.mrf.mxu2  ;;  %v2543_v23 = vpack.c.bf16 %v2411_v11, %v2410_v31  ;;  %v14618_v11 = vld [vmem:[#allocation75_spill] sm:$0xff] }
 0x9d1   : > { %v3490_v2 = vmax.f32 %v3193_v47, 0.0  ;;  %v4570_v35 = vmax.f32 %v4246_v10, 0.0  ;;  %v5299_v45 = vpop.f32.mrf.mxu3  ;;  %v2412_v39 = vmax.f32 %v14618_v11, 0.0 }
 0x9d2   : > { %v5650_v4 = vmax.f32 %v5299_v45, 0.0 }
 0x9d3   : > { %v3631_v62 = vpack.c.bf16 %v3490_v2, %v3489_v33  ;;  %v4720_v0 = vpack.c.bf16 %v4570_v35, %v4569_v28  ;;  %v6355_v54 = vpop.f32.mrf.mxu0 }
 0x9d4   : > { %v5809_v19 = vpack.c.bf16 %v5650_v4, %v5649_v42  ;;  %v6731_v10 = vmax.f32 %v6355_v54, 0.0 }
 0x9d5   : > { %4288 = vmatmul.bf16.gmra.mxu2 %v3631_v62  ;;  %5341 = vmatmul.bf16.gmra.mxu3 %v4720_v0 }
 0x9d6   : > { %6394 = vmatmul.bf16.gmra.mxu0 %v5809_v19 }
 0x9d8   : > { %v3196_v15 = vpop.f32.mrf.mxu1  ;;  %v4249_v26 = vpop.f32.mrf.mxu2 }
 0x9d9   : > { %v5302_v25 = vpop.f32.mrf.mxu3  ;;  %v3491_v2 = vmax.f32 %v3196_v15, 0.0  ;;  %v4571_v35 = vmax.f32 %v4249_v26, 0.0 }
 0x9da   : > { %v5651_v62 = vmax.f32 %v5302_v25, 0.0 }
 0x9db   : > { %v6357_v47 = vpop.f32.mrf.mxu0  ;;  %3235 = vmatmul.bf16.gmra.mxu1 %v2543_v23  ;;  %v14619_v23 = vld [vmem:[#allocation76_spill] sm:$0xff] }
 0x9dc   : > { %v6732_v8 = vmax.f32 %v6357_v47, 0.0  ;;  %v2413_v54 = vmax.f32 %v14619_v23, 0.0 }
 0x9de   : > { %v13647_v45 = vpack.c.bf16 %v6732_v8, %v6731_v10  ;;  %v2544_v15 = vpack.c.bf16 %v2413_v54, %v2412_v39  ;;  %v14621_v54 = vld [vmem:[#allocation77_spill] sm:$0xff] }
 0x9e0   : > { %14617 = vst [vmem:[#allocation31_spill] sm:$0xff] %v13647_v45  ;;  %v3198_v33 = vpop.f32.mrf.mxu1  ;;  %v4251_v28 = vpop.f32.mrf.mxu2  ;;  %v2414_v45 = vmax.f32 %v14621_v54, 0.0 }
 0x9e1   : > { %v3492_v42 = vmax.f32 %v3198_v33, 0.0  ;;  %v4572_v4 = vmax.f32 %v4251_v28, 0.0  ;;  %v5304_v21 = vpop.f32.mrf.mxu3 }
 0x9e2   : > { %v5652_v0 = vmax.f32 %v5304_v21, 0.0 }
 0x9e3   : > { %v3632_v19 = vpack.c.bf16 %v3492_v42, %v3491_v2  ;;  %v4721_v16 = vpack.c.bf16 %v4572_v4, %v4571_v35  ;;  %v6360_v29 = vpop.f32.mrf.mxu0 }
 0x9e4   : > { %v5810_v31 = vpack.c.bf16 %v5652_v0, %v5651_v62  ;;  %v6733_v33 = vmax.f32 %v6360_v29, 0.0 }
 0x9e5   : > { %4293 = vmatmul.bf16.gmra.mxu2 %v3632_v19  ;;  %5346 = vmatmul.bf16.gmra.mxu3 %v4721_v16 }
 0x9e6   : > { %6399 = vmatmul.bf16.gmra.mxu0 %v5810_v31 }
 0x9e8   : > { %v3201_v47 = vpop.f32.mrf.mxu1  ;;  %v4254_v10 = vpop.f32.mrf.mxu2 }
 0x9e9   : > { %v5307_v26 = vpop.f32.mrf.mxu3  ;;  %v3493_v42 = vmax.f32 %v3201_v47, 0.0  ;;  %v4573_v4 = vmax.f32 %v4254_v10, 0.0 }
 0x9ea   : > { %v5653_v19 = vmax.f32 %v5307_v26, 0.0 }
 0x9eb   : > { %v6362_v8 = vpop.f32.mrf.mxu0  ;;  %3240 = vmatmul.bf16.gmra.mxu1 %v2544_v15  ;;  %v14622_v15 = vld [vmem:[#allocation78_spill] sm:$0xff] }
 0x9ec   : > { %v6734_v25 = vmax.f32 %v6362_v8, 0.0  ;;  %v2415_v29 = vmax.f32 %v14622_v15, 0.0 }
 0x9ee   : > { %v13651_v28 = vpack.c.bf16 %v6734_v25, %v6733_v33  ;;  %v2545_v47 = vpack.c.bf16 %v2415_v29, %v2414_v45  ;;  %v14624_v29 = vld [vmem:[#allocation79_spill] sm:$0xff] }
 0x9f0   : > { %14620 = vst [vmem:[#allocation34_spill] sm:$0xff] %v13651_v28  ;;  %v3203_v2 = vpop.f32.mrf.mxu1  ;;  %v4256_v35 = vpop.f32.mrf.mxu2  ;;  %v2416_v28 = vmax.f32 %v14624_v29, 0.0 }
 0x9f1   : > { %v3494_v21 = vmax.f32 %v3203_v2, 0.0  ;;  %v4574_v62 = vmax.f32 %v4256_v35, 0.0  ;;  %v5309_v0 = vpop.f32.mrf.mxu3 }
 0x9f2   : > { %v5654_v16 = vmax.f32 %v5309_v0, 0.0 }
 0x9f3   : > { %v3633_v31 = vpack.c.bf16 %v3494_v21, %v3493_v42  ;;  %v4722_v11 = vpack.c.bf16 %v4574_v62, %v4573_v4  ;;  %v6365_v23 = vpop.f32.mrf.mxu0 }
 0x9f4   : > { %v5811_v39 = vpack.c.bf16 %v5654_v16, %v5653_v19  ;;  %v6735_v2 = vmax.f32 %v6365_v23, 0.0 }
 0x9f5   : > { %4298 = vmatmul.bf16.gmra.mxu2 %v3633_v31  ;;  %5351 = vmatmul.bf16.gmra.mxu3 %v4722_v11 }
 0x9f6   : > { %6404 = vmatmul.bf16.gmra.mxu0 %v5811_v39 }
 0x9f8   : > { %v3206_v8 = vpop.f32.mrf.mxu1  ;;  %v4259_v33 = vpop.f32.mrf.mxu2 }
 0x9f9   : > { %v5312_v10 = vpop.f32.mrf.mxu3  ;;  %v3495_v21 = vmax.f32 %v3206_v8, 0.0  ;;  %v4575_v62 = vmax.f32 %v4259_v33, 0.0 }
 0x9fa   : > { %v5655_v31 = vmax.f32 %v5312_v10, 0.0 }
 0x9fb   : > { %v6367_v25 = vpop.f32.mrf.mxu0  ;;  %3245 = vmatmul.bf16.gmra.mxu1 %v2545_v47  ;;  %v14625_v47 = vld [vmem:[#allocation80_spill] sm:$0xff] }
 0x9fc   : > { %v6736_v26 = vmax.f32 %v6367_v25, 0.0  ;;  %v2417_v23 = vmax.f32 %v14625_v47, 0.0 }
 0x9fe   : > { %v13655_v35 = vpack.c.bf16 %v6736_v26, %v6735_v2  ;;  %v2546_v8 = vpack.c.bf16 %v2417_v23, %v2416_v28  ;;  %v14626_v23 = vld [vmem:[#allocation81_spill] sm:$0xff] }
 0xa00   : > { %14623 = vst [vmem:[#allocation36_spill] sm:$0xff] %v13655_v35  ;;  %v3208_v42 = vpop.f32.mrf.mxu1  ;;  %v4261_v4 = vpop.f32.mrf.mxu2  ;;  %v2418_v35 = vmax.f32 %v14626_v23, 0.0 }
 0xa01   : > { %v3496_v0 = vmax.f32 %v3208_v42, 0.0  ;;  %v4576_v19 = vmax.f32 %v4261_v4, 0.0  ;;  %v5314_v16 = vpop.f32.mrf.mxu3 }
 0xa02   : > { %v5656_v11 = vmax.f32 %v5314_v16, 0.0 }
 0xa03   : > { %v3634_v39 = vpack.c.bf16 %v3496_v0, %v3495_v21  ;;  %v4723_v54 = vpack.c.bf16 %v4576_v19, %v4575_v62  ;;  %v6370_v15 = vpop.f32.mrf.mxu0 }
 0xa04   : > { %v5812_v45 = vpack.c.bf16 %v5656_v11, %v5655_v31  ;;  %v6737_v42 = vmax.f32 %v6370_v15, 0.0 }
 0xa05   : > { %4303 = vmatmul.bf16.gmra.mxu2 %v3634_v39  ;;  %5356 = vmatmul.bf16.gmra.mxu3 %v4723_v54 }
 0xa06   : > { %6409 = vmatmul.bf16.gmra.mxu0 %v5812_v45 }
 0xa08   : > { %v3211_v25 = vpop.f32.mrf.mxu1  ;;  %v4264_v2 = vpop.f32.mrf.mxu2 }
 0xa09   : > { %v5317_v33 = vpop.f32.mrf.mxu3  ;;  %v3497_v0 = vmax.f32 %v3211_v25, 0.0  ;;  %v4577_v19 = vmax.f32 %v4264_v2, 0.0 }
 0xa0a   : > { %v5657_v39 = vmax.f32 %v5317_v33, 0.0 }
 0xa0b   : > { %v6372_v26 = vpop.f32.mrf.mxu0  ;;  %3250 = vmatmul.bf16.gmra.mxu1 %v2546_v8  ;;  %v14627_v8 = vld [vmem:[#allocation82_spill] sm:$0xff] }
 0xa0c   : > { %v6738_v10 = vmax.f32 %v6372_v26, 0.0  ;;  %v2419_v15 = vmax.f32 %v14627_v8, 0.0 }
 0xa0e   : > { %v13659_v4 = vpack.c.bf16 %v6738_v10, %v6737_v42  ;;  %v2547_v25 = vpack.c.bf16 %v2419_v15, %v2418_v35 }
 0xa10   : > { %v3213_v21 = vpop.f32.mrf.mxu1  ;;  %v4266_v62 = vpop.f32.mrf.mxu2 }
 0xa11   : > { %v3498_v16 = vmax.f32 %v3213_v21, 0.0  ;;  %v4578_v31 = vmax.f32 %v4266_v62, 0.0  ;;  %v5319_v11 = vpop.f32.mrf.mxu3 }
 0xa12   : > { %v5658_v54 = vmax.f32 %v5319_v11, 0.0 }
 0xa13   : > { %v3635_v45 = vpack.c.bf16 %v3498_v16, %v3497_v0  ;;  %v4724_v29 = vpack.c.bf16 %v4578_v31, %v4577_v19  ;;  %v6375_v47 = vpop.f32.mrf.mxu0 }
 0xa14   : > { %v5813_v28 = vpack.c.bf16 %v5658_v54, %v5657_v39  ;;  %v6739_v21 = vmax.f32 %v6375_v47, 0.0  ;;  %v12458_v47 = vld [vmem:[%s14411_s2 + $0x180] sm:$0xff] }
 0xa15   : > { %4308 = vmatmul.bf16.gmra.mxu2 %v3635_v45  ;;  %5361 = vmatmul.bf16.gmra.mxu3 %v4724_v29 }
 0xa16   : > { %6414 = vmatmul.bf16.gmra.mxu0 %v5813_v28  ;;  %9207 = vmatpush.bf16.msra.mxu3 %v12458_v47 }
 0xa18   : > { %v3216_v26 = vpop.f32.mrf.mxu1  ;;  %v4269_v42 = vpop.f32.mrf.mxu2 }
 0xa19   : > { %v5322_v2 = vpop.f32.mrf.mxu3  ;;  %v3499_v16 = vmax.f32 %v3216_v26, 0.0  ;;  %v4579_v31 = vmax.f32 %v4269_v42, 0.0  ;;  %v12502_v42 = vld [vmem:[%s14412_s3 + $0x38] sm:$0xff] }
 0xa1a   : > { %v5659_v45 = vmax.f32 %v5322_v2, 0.0  ;;  %12486 = vmatpush.bf16.msrb.mxu3 %v12502_v42 }
 0xa1b   : > { %v6377_v10 = vpop.f32.mrf.mxu0  ;;  %3255 = vmatmul.bf16.gmra.mxu1 %v2547_v25 }
 0xa1c   : > { %v6740_v33 = vmax.f32 %v6377_v10, 0.0 }
 0xa1e   : > { %v13663_v62 = vpack.c.bf16 %v6740_v33, %v6739_v21  ;;  %v12503_v33 = vld [vmem:[%s14412_s3 + $0x30] sm:$0xff] }
 0xa1f   : > { %12487 = vmatpush.bf16.msrb.mxu3 %v12503_v33 }
 0xa20   : > { %v3218_v0 = vpop.f32.mrf.mxu1  ;;  %v4271_v19 = vpop.f32.mrf.mxu2 }
 0xa21   : > { %v3500_v11 = vmax.f32 %v3218_v0, 0.0  ;;  %v4580_v39 = vmax.f32 %v4271_v19, 0.0  ;;  %v5324_v54 = vpop.f32.mrf.mxu3 }
 0xa22   : > { %v5660_v29 = vmax.f32 %v5324_v54, 0.0 }
 0xa23   : > { %v3636_v28 = vpack.c.bf16 %v3500_v11, %v3499_v16  ;;  %v4725_v23 = vpack.c.bf16 %v4580_v39, %v4579_v31  ;;  %v6380_v8 = vpop.f32.mrf.mxu0 }
 0xa24   : > { %v5814_v35 = vpack.c.bf16 %v5660_v29, %v5659_v45  ;;  %v6741_v10 = vmax.f32 %v6380_v8, 0.0 }
 0xa25   : > { %4313 = vmatmul.bf16.gmra.mxu2 %v3636_v28  ;;  %5366 = vmatmul.bf16.gmra.mxu3 %v4725_v23 }
 0xa26   : > { %6419 = vmatmul.bf16.gmra.mxu0 %v5814_v35 }
 0xa28   : > { %v3221_v15 = vpop.f32.mrf.mxu1  ;;  %v4274_v25 = vpop.f32.mrf.mxu2 }
 0xa29   : > { %v5327_v26 = vpop.f32.mrf.mxu3  ;;  %v3501_v31 = vmax.f32 %v3221_v15, 0.0  ;;  %v4581_v11 = vmax.f32 %v4274_v25, 0.0  ;;  %v12505_v15 = vld [vmem:[%s14412_s3 + $0x20] sm:$0xff] }
 0xa2a   : > { %v5661_v29 = vmax.f32 %v5327_v26, 0.0  ;;  %v12506_v26 = vld [vmem:[%s14412_s3 + $0x18] sm:$0xff] }
 0xa2b   : > { %v6382_v2 = vpop.f32.mrf.mxu0  ;;  %7012 = vmatmul.bf16.vlgmr.msra.gmra.mxu1 %v13294_v27  ;;  %v12504_v27 = vld [vmem:[%s14412_s3 + $0x28] sm:$0xff] }
 0xa2c   : > { %v6742_v21 = vmax.f32 %v6382_v2, 0.0  ;;  %12488 = vmatpush.bf16.msrb.mxu3 %v12504_v27 }
 0xa2e   : > { %v13675_v0 = vpack.c.bf16 %v6742_v21, %v6741_v10 }
 0xa30   : > { %v3223_v19 = vpop.f32.mrf.mxu1  ;;  %v4276_v16 = vpop.f32.mrf.mxu2  ;;  %12489 = vmatpush.bf16.msrb.mxu3 %v12505_v15 }
 0xa31   : > { %v3502_v39 = vmax.f32 %v3223_v19, 0.0  ;;  %v4582_v54 = vmax.f32 %v4276_v16, 0.0  ;;  %v5329_v45 = vpop.f32.mrf.mxu3  ;;  %v12507_v16 = vld [vmem:[%s14412_s3 + $0x10] sm:$0xff] }
 0xa32   : > { %v5662_v28 = vmax.f32 %v5329_v45, 0.0 }
 0xa33   : > { %v3637_v23 = vpack.c.bf16 %v3502_v39, %v3501_v31  ;;  %v4726_v8 = vpack.c.bf16 %v4582_v54, %v4581_v11  ;;  %v6385_v35 = vpop.f32.mrf.mxu0 }
 0xa34   : > { %v5815_v47 = vpack.c.bf16 %v5662_v28, %v5661_v29  ;;  %12490 = vmatpush.bf16.msrb.mxu3 %v12506_v26  ;;  %v6743_v21 = vmax.f32 %v6385_v35, 0.0 }
 0xa35   : > { %4318 = vmatmul.bf16.gmra.mxu2 %v3637_v23  ;;  %5371 = vmatmul.bf16.gmra.mxu3 %v4726_v8 }
 0xa36   : > { %6424 = vmatmul.bf16.gmra.mxu0 %v5815_v47 }
 0xa38   : > { %v3226_v25 = vpop.f32.mrf.mxu1  ;;  %v4279_v42 = vpop.f32.mrf.mxu2  ;;  %12491 = vmatpush.bf16.msrb.mxu3 %v12507_v16 }
 0xa39   : > { %v5332_v2 = vpop.f32.mrf.mxu3  ;;  %v3503_v39 = vmax.f32 %v3226_v25, 0.0  ;;  %v4583_v54 = vmax.f32 %v4279_v42, 0.0 }
 0xa3a   : > { %v5663_v28 = vmax.f32 %v5332_v2, 0.0 }
 0xa3b   : > { %v6387_v10 = vpop.f32.mrf.mxu0  ;;  %7017 = vmatmul.bf16.gmra.mxu1 %v13297_v59 }
 0xa3c   : > { %v6744_v33 = vmax.f32 %v6387_v10, 0.0  ;;  %12492 = vmatpush.bf16.msrb.mxu3 %v13642_v36 }
 0xa3e   : > { %v13687_v19 = vpack.c.bf16 %v6744_v33, %v6743_v21 }
 0xa40   : > { %v3228_v31 = vpop.f32.mrf.mxu1  ;;  %v4281_v11 = vpop.f32.mrf.mxu2 }
 0xa41   : > { %v3504_v45 = vmax.f32 %v3228_v31, 0.0  ;;  %v4584_v27 = vmax.f32 %v4281_v11, 0.0  ;;  %v5334_v29 = vpop.f32.mrf.mxu3 }
 0xa42   : > { %v5664_v23 = vmax.f32 %v5334_v29, 0.0 }
 0xa43   : > { %v3638_v59 = vpack.c.bf16 %v3504_v45, %v3503_v39  ;;  %v4727_v8 = vpack.c.bf16 %v4584_v27, %v4583_v54  ;;  %v6390_v35 = vpop.f32.mrf.mxu0 }
 0xa44   : > { %v5816_v47 = vpack.c.bf16 %v5664_v23, %v5663_v28  ;;  %v6745_v25 = vmax.f32 %v6390_v35, 0.0 }
 0xa45   : > { %4323 = vmatmul.bf16.gmra.mxu2 %v3638_v59  ;;  %5376 = vmatmul.bf16.gmra.mxu3 %v4727_v8 }
 0xa46   : > { %6429 = vmatmul.bf16.gmra.mxu0 %v5816_v47 }
 0xa48   : > { %v3231_v15 = vpop.f32.mrf.mxu1  ;;  %v4284_v26 = vpop.f32.mrf.mxu2 }
 0xa49   : > { %v5337_v10 = vpop.f32.mrf.mxu3  ;;  %v3505_v36 = vmax.f32 %v3231_v15, 0.0  ;;  %v4585_v31 = vmax.f32 %v4284_v26, 0.0 }
 0xa4a   : > { %v5665_v45 = vmax.f32 %v5337_v10, 0.0 }
 0xa4b   : > { %v6392_v21 = vpop.f32.mrf.mxu0  ;;  %7022 = vmatmul.bf16.gmra.mxu1 %v13300_v57 }
 0xa4c   : > { %v6746_v42 = vmax.f32 %v6392_v21, 0.0 }
 0xa4e   : > { %v13694_v33 = vpack.c.bf16 %v6746_v42, %v6745_v25 }
 0xa50   : > { %v3233_v2 = vpop.f32.mrf.mxu1  ;;  %v4286_v16 = vpop.f32.mrf.mxu2 }
 0xa51   : > { %v3506_v11 = vmax.f32 %v3233_v2, 0.0  ;;  %v4586_v39 = vmax.f32 %v4286_v16, 0.0  ;;  %v5339_v54 = vpop.f32.mrf.mxu3 }
 0xa52   : > { %v5666_v27 = vmax.f32 %v5339_v54, 0.0 }
 0xa53   : > { %v3639_v29 = vpack.c.bf16 %v3506_v11, %v3505_v36  ;;  %v4728_v28 = vpack.c.bf16 %v4586_v39, %v4585_v31  ;;  %v6395_v23 = vpop.f32.mrf.mxu0 }
 0xa54   : > { %v5817_v59 = vpack.c.bf16 %v5666_v27, %v5665_v45  ;;  %v6747_v15 = vmax.f32 %v6395_v23, 0.0 }
 0xa55   : > { %4328 = vmatmul.bf16.gmra.mxu2 %v3639_v29  ;;  %5381 = vmatmul.bf16.gmra.mxu3 %v4728_v28 }
 0xa56   : > { %6434 = vmatmul.bf16.gmra.mxu0 %v5817_v59 }
 0xa58   : > { %v3236_v57 = vpop.f32.mrf.mxu1  ;;  %v4289_v8 = vpop.f32.mrf.mxu2 }
 0xa59   : > { %v5342_v35 = vpop.f32.mrf.mxu3  ;;  %v3507_v42 = vmax.f32 %v3236_v57, 0.0  ;;  %v4587_v2 = vmax.f32 %v4289_v8, 0.0 }
 0xa5a   : > { %v5667_v11 = vmax.f32 %v5342_v35, 0.0 }
 0xa5b   : > { %v6397_v47 = vpop.f32.mrf.mxu0  ;;  %7027 = vmatmul.bf16.gmra.mxu1 %v13303_v7 }
 0xa5c   : > { %v6748_v26 = vmax.f32 %v6397_v47, 0.0 }
 0xa5e   : > { %v13697_v21 = vpack.c.bf16 %v6748_v26, %v6747_v15 }
 0xa60   : > { %v3238_v25 = vpop.f32.mrf.mxu1  ;;  %v4291_v10 = vpop.f32.mrf.mxu2 }
 0xa61   : > { %v3508_v16 = vmax.f32 %v3238_v25, 0.0  ;;  %v4588_v36 = vmax.f32 %v4291_v10, 0.0  ;;  %v5344_v31 = vpop.f32.mrf.mxu3 }
 0xa62   : > { %v5668_v39 = vmax.f32 %v5344_v31, 0.0 }
 0xa63   : > { %v3640_v54 = vpack.c.bf16 %v3508_v16, %v3507_v42  ;;  %v4729_v45 = vpack.c.bf16 %v4588_v36, %v4587_v2  ;;  %v6400_v27 = vpop.f32.mrf.mxu0 }
 0xa64   : > { %v5818_v29 = vpack.c.bf16 %v5668_v39, %v5667_v11  ;;  %v6749_v57 = vmax.f32 %v6400_v27, 0.0 }
 0xa65   : > { %4333 = vmatmul.bf16.gmra.mxu2 %v3640_v54  ;;  %5386 = vmatmul.bf16.gmra.mxu3 %v4729_v45 }
 0xa66   : > { %6439 = vmatmul.bf16.gmra.mxu0 %v5818_v29 }
 0xa68   : > { %v3241_v7 = vpop.f32.mrf.mxu1  ;;  %v4294_v28 = vpop.f32.mrf.mxu2 }
 0xa69   : > { %v5347_v23 = vpop.f32.mrf.mxu3  ;;  %v3509_v26 = vmax.f32 %v3241_v7, 0.0  ;;  %v4589_v25 = vmax.f32 %v4294_v28, 0.0 }
 0xa6a   : > { %v5669_v16 = vmax.f32 %v5347_v23, 0.0 }
 0xa6b   : > { %v6402_v59 = vpop.f32.mrf.mxu0  ;;  %7032 = vmatmul.bf16.gmra.mxu1 %v13309_v46 }
 0xa6c   : > { %v6750_v8 = vmax.f32 %v6402_v59, 0.0 }
 0xa6e   : > { %v13700_v47 = vpack.c.bf16 %v6750_v8, %v6749_v57 }
 0xa70   : > { %v3243_v15 = vpop.f32.mrf.mxu1  ;;  %v4296_v35 = vpop.f32.mrf.mxu2 }
 0xa71   : > { %v3510_v10 = vmax.f32 %v3243_v15, 0.0  ;;  %v4590_v42 = vmax.f32 %v4296_v35, 0.0  ;;  %v5349_v2 = vpop.f32.mrf.mxu3 }
 0xa72   : > { %v5670_v36 = vmax.f32 %v5349_v2, 0.0 }
 0xa73   : > { %v3641_v31 = vpack.c.bf16 %v3510_v10, %v3509_v26  ;;  %v4730_v11 = vpack.c.bf16 %v4590_v42, %v4589_v25  ;;  %v6405_v39 = vpop.f32.mrf.mxu0 }
 0xa74   : > { %v5819_v54 = vpack.c.bf16 %v5670_v36, %v5669_v16  ;;  %v6751_v7 = vmax.f32 %v6405_v39, 0.0 }
 0xa75   : > { %4338 = vmatmul.bf16.gmra.mxu2 %v3641_v31  ;;  %5391 = vmatmul.bf16.gmra.mxu3 %v4730_v11 }
 0xa76   : > { %6444 = vmatmul.bf16.gmra.mxu0 %v5819_v54 }
 0xa78   : > { %v3246_v46 = vpop.f32.mrf.mxu1  ;;  %v4299_v45 = vpop.f32.mrf.mxu2 }
 0xa79   : > { %v5352_v27 = vpop.f32.mrf.mxu3  ;;  %v3511_v8 = vmax.f32 %v3246_v46, 0.0  ;;  %v4591_v15 = vmax.f32 %v4299_v45, 0.0 }
 0xa7a   : > { %v5671_v10 = vmax.f32 %v5352_v27, 0.0 }
 0xa7b   : > { %v6407_v29 = vpop.f32.mrf.mxu0  ;;  %7037 = vmatmul.bf16.gmra.mxu1 %v13312_v63 }
 0xa7c   : > { %v6752_v28 = vmax.f32 %v6407_v29, 0.0 }
 0xa7e   : > { %v13703_v59 = vpack.c.bf16 %v6752_v28, %v6751_v7 }
 0xa80   : > { %v3248_v57 = vpop.f32.mrf.mxu1  ;;  %v4301_v23 = vpop.f32.mrf.mxu2 }
 0xa81   : > { %v3512_v35 = vmax.f32 %v3248_v57, 0.0  ;;  %v4592_v26 = vmax.f32 %v4301_v23, 0.0  ;;  %v5354_v25 = vpop.f32.mrf.mxu3 }
 0xa82   : > { %v5672_v42 = vmax.f32 %v5354_v25, 0.0 }
 0xa83   : > { %v3642_v2 = vpack.c.bf16 %v3512_v35, %v3511_v8  ;;  %v4731_v16 = vpack.c.bf16 %v4592_v26, %v4591_v15  ;;  %v6410_v36 = vpop.f32.mrf.mxu0 }
 0xa84   : > { %v5820_v31 = vpack.c.bf16 %v5672_v42, %v5671_v10  ;;  %v6753_v46 = vmax.f32 %v6410_v36, 0.0 }
 0xa85   : > { %4343 = vmatmul.bf16.gmra.mxu2 %v3642_v2  ;;  %5396 = vmatmul.bf16.gmra.mxu3 %v4731_v16 }
 0xa86   : > { %6449 = vmatmul.bf16.gmra.mxu0 %v5820_v31 }
 0xa88   : > { %v3251_v63 = vpop.f32.mrf.mxu1  ;;  %v4304_v11 = vpop.f32.mrf.mxu2 }
 0xa89   : > { %v5357_v39 = vpop.f32.mrf.mxu3  ;;  %v3513_v28 = vmax.f32 %v3251_v63, 0.0  ;;  %v4593_v57 = vmax.f32 %v4304_v11, 0.0 }
 0xa8a   : > { %v5673_v35 = vmax.f32 %v5357_v39, 0.0 }
 0xa8b   : > { %v6412_v54 = vpop.f32.mrf.mxu0  ;;  %7042 = vmatmul.bf16.gmra.mxu1 %v13315_v13 }
 0xa8c   : > { %v6754_v45 = vmax.f32 %v6412_v54, 0.0 }
 0xa8e   : > { %v13706_v29 = vpack.c.bf16 %v6754_v45, %v6753_v46 }
 0xa90   : > { %v3253_v7 = vpop.f32.mrf.mxu1  ;;  %v4306_v27 = vpop.f32.mrf.mxu2 }
 0xa91   : > { %v3514_v23 = vmax.f32 %v3253_v7, 0.0  ;;  %v4594_v8 = vmax.f32 %v4306_v27, 0.0  ;;  %v5359_v15 = vpop.f32.mrf.mxu3 }
 0xa92   : > { %v5674_v26 = vmax.f32 %v5359_v15, 0.0 }
 0xa93   : > { %v3643_v25 = vpack.c.bf16 %v3514_v23, %v3513_v28  ;;  %v4732_v10 = vpack.c.bf16 %v4594_v8, %v4593_v57  ;;  %v6415_v42 = vpop.f32.mrf.mxu0 }
 0xa94   : > { %v5821_v2 = vpack.c.bf16 %v5674_v26, %v5673_v35  ;;  %v6755_v63 = vmax.f32 %v6415_v42, 0.0 }
 0xa95   : > { %4348 = vmatmul.bf16.gmra.mxu2 %v3643_v25  ;;  %5401 = vmatmul.bf16.gmra.mxu3 %v4732_v10 }
 0xa96   : > { %6454 = vmatmul.bf16.gmra.mxu0 %v5821_v2 }
 0xa98   : > { %v3256_v13 = vpop.f32.mrf.mxu1  ;;  %v4309_v16 = vpop.f32.mrf.mxu2 }
 0xa99   : > { %v5362_v36 = vpop.f32.mrf.mxu3  ;;  %v3515_v45 = vmax.f32 %v3256_v13, 0.0  ;;  %v4595_v7 = vmax.f32 %v4309_v16, 0.0 }
 0xa9a   : > { %v5675_v23 = vmax.f32 %v5362_v36, 0.0 }
 0xa9b   : > { %v6417_v31 = vpop.f32.mrf.mxu0  ;;  %7047 = vmatmul.bf16.gmra.mxu1 %v13318_v30 }
 0xa9c   : > { %v6756_v11 = vmax.f32 %v6417_v31, 0.0 }
 0xa9e   : > { %v13709_v54 = vpack.c.bf16 %v6756_v11, %v6755_v63 }
 0xaa0   : > { %v3258_v46 = vpop.f32.mrf.mxu1  ;;  %v4311_v39 = vpop.f32.mrf.mxu2 }
 0xaa1   : > { %v3516_v27 = vmax.f32 %v3258_v46, 0.0  ;;  %v4596_v28 = vmax.f32 %v4311_v39, 0.0  ;;  %v5364_v57 = vpop.f32.mrf.mxu3 }
 0xaa2   : > { %v5676_v8 = vmax.f32 %v5364_v57, 0.0 }
 0xaa3   : > { %v3644_v15 = vpack.c.bf16 %v3516_v27, %v3515_v45  ;;  %v4733_v35 = vpack.c.bf16 %v4596_v28, %v4595_v7  ;;  %v6420_v26 = vpop.f32.mrf.mxu0 }
 0xaa4   : > { %v5822_v25 = vpack.c.bf16 %v5676_v8, %v5675_v23  ;;  %v6757_v13 = vmax.f32 %v6420_v26, 0.0 }
 0xaa5   : > { %4353 = vmatmul.bf16.gmra.mxu2 %v3644_v15  ;;  %5406 = vmatmul.bf16.gmra.mxu3 %v4733_v35 }
 0xaa6   : > { %6459 = vmatmul.bf16.gmra.mxu0 %v5822_v25 }
 0xaa8   : > { %v4314_v30 = vpop.f32.mrf.mxu2  ;;  %v7013_v10 = vpop.f32.mrf.mxu1 }
 0xaa9   : > { %v5367_v42 = vpop.f32.mrf.mxu3  ;;  %v4597_v11 = vmax.f32 %v4314_v30, 0.0  ;;  %v7653_v46 = vmax.f32 %v7013_v10, 0.0 }
 0xaaa   : > { %v5677_v27 = vmax.f32 %v5367_v42, 0.0 }
 0xaab   : > { %v6422_v2 = vpop.f32.mrf.mxu0  ;;  %7052 = vmatmul.bf16.gmra.mxu1 %v13324_v58 }
 0xaac   : > { %v6758_v16 = vmax.f32 %v6422_v2, 0.0 }
 0xaae   : > { %v13712_v31 = vpack.c.bf16 %v6758_v16, %v6757_v13 }
 0xab0   : > { %v4316_v63 = vpop.f32.mrf.mxu2  ;;  %v7015_v36 = vpop.f32.mrf.mxu1 }
 0xab1   : > { %v4598_v39 = vmax.f32 %v4316_v63, 0.0  ;;  %v5369_v45 = vpop.f32.mrf.mxu3  ;;  %v7654_v7 = vmax.f32 %v7015_v36, 0.0 }
 0xab2   : > { %v5678_v28 = vmax.f32 %v5369_v45, 0.0 }
 0xab3   : > { %v4734_v57 = vpack.c.bf16 %v4598_v39, %v4597_v11  ;;  %v7909_v23 = vpack.c.bf16 %v7654_v7, %v7653_v46  ;;  %v6425_v8 = vpop.f32.mrf.mxu0 }
 0xab4   : > { %v5823_v15 = vpack.c.bf16 %v5678_v28, %v5677_v27  ;;  %v6759_v30 = vmax.f32 %v6425_v8, 0.0 }
 0xab5   : > { %5411 = vmatmul.bf16.gmra.mxu3 %v4734_v57  ;;  %8110 = vmatmul.bf16.vlgmr.msra.gmra.mxu2 %v7909_v23 }
 0xab6   : > { %6464 = vmatmul.bf16.gmra.mxu0 %v5823_v15 }
 0xab8   : > { %v4319_v58 = vpop.f32.mrf.mxu2  ;;  %v7018_v35 = vpop.f32.mrf.mxu1 }
 0xab9   : > { %v5372_v26 = vpop.f32.mrf.mxu3  ;;  %v4599_v16 = vmax.f32 %v4319_v58, 0.0  ;;  %v7655_v63 = vmax.f32 %v7018_v35, 0.0 }
 0xaba   : > { %v5679_v39 = vmax.f32 %v5372_v26, 0.0  ;;  %v12466_v26 = vld [vmem:[%s14412_s3] sm:$0xff] }
 0xabb   : > { %v6427_v25 = vpop.f32.mrf.mxu0  ;;  %7057 = vmatmul.bf16.gmra.mxu1 %v13327_v40  ;;  %10304 = vmatpush.bf16.msra.mxu0 %v12466_v26 }
 0xabc   : > { %v6760_v10 = vmax.f32 %v6427_v25, 0.0  ;;  %12493 = vmatpush.bf16.msrb.mxu3 %v12466_v26 }
 0xabe   : > { %v13715_v2 = vpack.c.bf16 %v6760_v10, %v6759_v30 }
 0xac0   : > { %v4321_v13 = vpop.f32.mrf.mxu2  ;;  %v7020_v42 = vpop.f32.mrf.mxu1 }
 0xac1   : > { %v4600_v36 = vmax.f32 %v4321_v13, 0.0  ;;  %v5374_v11 = vpop.f32.mrf.mxu3  ;;  %v7656_v46 = vmax.f32 %v7020_v42, 0.0 }
 0xac2   : > { %v5680_v45 = vmax.f32 %v5374_v11, 0.0 }
 0xac3   : > { %v4735_v7 = vpack.c.bf16 %v4600_v36, %v4599_v16  ;;  %v7910_v27 = vpack.c.bf16 %v7656_v46, %v7655_v63  ;;  %v6430_v28 = vpop.f32.mrf.mxu0 }
 0xac4   : > { %v5824_v57 = vpack.c.bf16 %v5680_v45, %v5679_v39  ;;  %v6761_v58 = vmax.f32 %v6430_v28, 0.0 }
 0xac5   : > { %5416 = vmatmul.bf16.gmra.mxu3 %v4735_v7  ;;  %8115 = vmatmul.bf16.gmra.mxu2 %v7910_v27 }
 0xac6   : > { %6469 = vmatmul.bf16.gmra.mxu0 %v5824_v57 }
 0xac8   : > { %v4324_v40 = vpop.f32.mrf.mxu2  ;;  %v7023_v23 = vpop.f32.mrf.mxu1 }
 0xac9   : > { %v5377_v8 = vpop.f32.mrf.mxu3  ;;  %v4601_v13 = vmax.f32 %v4324_v40, 0.0  ;;  %v7657_v42 = vmax.f32 %v7023_v23, 0.0 }
 0xaca   : > { %v5681_v11 = vmax.f32 %v5377_v8, 0.0 }
 0xacb   : > { %v6432_v15 = vpop.f32.mrf.mxu0  ;;  %7062 = vmatmul.bf16.gmra.mxu1 %v13330_v22 }
 0xacc   : > { %v6762_v35 = vmax.f32 %v6432_v15, 0.0 }
 0xace   : > { %v13718_v25 = vpack.c.bf16 %v6762_v35, %v6761_v58 }
 0xad0   : > { %v4326_v30 = vpop.f32.mrf.mxu2  ;;  %v7025_v10 = vpop.f32.mrf.mxu1 }
 0xad1   : > { %v4602_v16 = vmax.f32 %v4326_v30, 0.0  ;;  %v5379_v63 = vpop.f32.mrf.mxu3  ;;  %v7658_v36 = vmax.f32 %v7025_v10, 0.0 }
 0xad2   : > { %v5682_v46 = vmax.f32 %v5379_v63, 0.0 }
 0xad3   : > { %v4736_v22 = vpack.c.bf16 %v4602_v16, %v4601_v13  ;;  %v7911_v39 = vpack.c.bf16 %v7658_v36, %v7657_v42  ;;  %v6435_v45 = vpop.f32.mrf.mxu0 }
 0xad4   : > { %v5825_v7 = vpack.c.bf16 %v5682_v46, %v5681_v11  ;;  %v6763_v40 = vmax.f32 %v6435_v45, 0.0 }
 0xad5   : > { %5421 = vmatmul.bf16.gmra.mxu3 %v4736_v22  ;;  %8120 = vmatmul.bf16.gmra.mxu2 %v7911_v39 }
 0xad6   : > { %6474 = vmatmul.bf16.gmra.mxu0 %v5825_v7 }
 0xad8   : > { %v4329_v27 = vpop.f32.mrf.mxu2  ;;  %v7028_v28 = vpop.f32.mrf.mxu1 }
 0xad9   : > { %v5382_v57 = vpop.f32.mrf.mxu3  ;;  %v4603_v26 = vmax.f32 %v4329_v27, 0.0  ;;  %v7659_v30 = vmax.f32 %v7028_v28, 0.0 }
 0xada   : > { %v5683_v16 = vmax.f32 %v5382_v57, 0.0 }
 0xadb   : > { %v6437_v15 = vpop.f32.mrf.mxu0  ;;  %7067 = vmatmul.bf16.gmra.mxu1 %v13333_v56 }
 0xadc   : > { %v6764_v23 = vmax.f32 %v6437_v15, 0.0 }
 0xade   : > { %v13724_v58 = vpack.c.bf16 %v6764_v23, %v6763_v40 }
 0xae0   : > { %v4331_v35 = vpop.f32.mrf.mxu2  ;;  %v7030_v8 = vpop.f32.mrf.mxu1 }
 0xae1   : > { %v4604_v10 = vmax.f32 %v4331_v35, 0.0  ;;  %v5384_v13 = vpop.f32.mrf.mxu3  ;;  %v7660_v42 = vmax.f32 %v7030_v8, 0.0 }
 0xae2   : > { %v5684_v63 = vmax.f32 %v5384_v13, 0.0 }
 0xae3   : > { %v4737_v36 = vpack.c.bf16 %v4604_v10, %v4603_v26  ;;  %v7912_v11 = vpack.c.bf16 %v7660_v42, %v7659_v30  ;;  %v6440_v46 = vpop.f32.mrf.mxu0 }
 0xae4   : > { %v5826_v22 = vpack.c.bf16 %v5684_v63, %v5683_v16  ;;  %v6765_v27 = vmax.f32 %v6440_v46, 0.0 }
 0xae5   : > { %5426 = vmatmul.bf16.gmra.mxu3 %v4737_v36  ;;  %8125 = vmatmul.bf16.gmra.mxu2 %v7912_v11 }
 0xae6   : > { %6479 = vmatmul.bf16.gmra.mxu0 %v5826_v22 }
 0xae8   : > { %v4334_v56 = vpop.f32.mrf.mxu2  ;;  %v7033_v39 = vpop.f32.mrf.mxu1 }
 0xae9   : > { %v5387_v45 = vpop.f32.mrf.mxu3  ;;  %v4605_v23 = vmax.f32 %v4334_v56, 0.0  ;;  %v7661_v35 = vmax.f32 %v7033_v39, 0.0 }
 0xaea   : > { %v5685_v10 = vmax.f32 %v5387_v45, 0.0 }
 0xaeb   : > { %v6442_v7 = vpop.f32.mrf.mxu0  ;;  %7072 = vmatmul.bf16.gmra.mxu1 %v13339_v5 }
 0xaec   : > { %v6766_v28 = vmax.f32 %v6442_v7, 0.0 }
 0xaee   : > { %v13727_v15 = vpack.c.bf16 %v6766_v28, %v6765_v27 }
 0xaf0   : > { %v4336_v40 = vpop.f32.mrf.mxu2  ;;  %v7035_v57 = vpop.f32.mrf.mxu1 }
 0xaf1   : > { %v4606_v8 = vmax.f32 %v4336_v40, 0.0  ;;  %v5389_v26 = vpop.f32.mrf.mxu3  ;;  %v7662_v30 = vmax.f32 %v7035_v57, 0.0 }
 0xaf2   : > { %v5686_v13 = vmax.f32 %v5389_v26, 0.0 }
 0xaf3   : > { %v4738_v42 = vpack.c.bf16 %v4606_v8, %v4605_v23  ;;  %v7913_v16 = vpack.c.bf16 %v7662_v30, %v7661_v35  ;;  %v6445_v63 = vpop.f32.mrf.mxu0 }
 0xaf4   : > { %v5827_v36 = vpack.c.bf16 %v5686_v13, %v5685_v10  ;;  %v6767_v56 = vmax.f32 %v6445_v63, 0.0 }
 0xaf5   : > { %5431 = vmatmul.bf16.gmra.mxu3 %v4738_v42  ;;  %8130 = vmatmul.bf16.gmra.mxu2 %v7913_v16 }
 0xaf6   : > { %6484 = vmatmul.bf16.gmra.mxu0 %v5827_v36 }
 0xaf8   : > { %v4339_v5 = vpop.f32.mrf.mxu2  ;;  %v7038_v11 = vpop.f32.mrf.mxu1 }
 0xaf9   : > { %v5392_v46 = vpop.f32.mrf.mxu3  ;;  %v4607_v28 = vmax.f32 %v4339_v5, 0.0  ;;  %v7663_v40 = vmax.f32 %v7038_v11, 0.0 }
 0xafa   : > { %v5687_v8 = vmax.f32 %v5392_v46, 0.0 }
 0xafb   : > { %v6447_v22 = vpop.f32.mrf.mxu0  ;;  %7077 = vmatmul.bf16.gmra.mxu1 %v13345_v50 }
 0xafc   : > { %v6768_v39 = vmax.f32 %v6447_v22, 0.0 }
 0xafe   : > { %v13730_v7 = vpack.c.bf16 %v6768_v39, %v6767_v56 }
 0xb00   : > { %v4341_v27 = vpop.f32.mrf.mxu2  ;;  %v7040_v45 = vpop.f32.mrf.mxu1 }
 0xb01   : > { %v4608_v57 = vmax.f32 %v4341_v27, 0.0  ;;  %v5394_v23 = vpop.f32.mrf.mxu3  ;;  %v7664_v35 = vmax.f32 %v7040_v45, 0.0 }
 0xb02   : > { %v5688_v26 = vmax.f32 %v5394_v23, 0.0 }
 0xb03   : > { %v4739_v30 = vpack.c.bf16 %v4608_v57, %v4607_v28  ;;  %v7914_v10 = vpack.c.bf16 %v7664_v35, %v7663_v40  ;;  %v6450_v13 = vpop.f32.mrf.mxu0 }
 0xb04   : > { %v5828_v42 = vpack.c.bf16 %v5688_v26, %v5687_v8  ;;  %v6769_v5 = vmax.f32 %v6450_v13, 0.0 }
 0xb05   : > { %5436 = vmatmul.bf16.gmra.mxu3 %v4739_v30  ;;  %8135 = vmatmul.bf16.gmra.mxu2 %v7914_v10 }
 0xb06   : > { %6489 = vmatmul.bf16.gmra.mxu0 %v5828_v42 }
 0xb08   : > { %v4344_v50 = vpop.f32.mrf.mxu2  ;;  %v7043_v16 = vpop.f32.mrf.mxu1 }
 0xb09   : > { %v5397_v63 = vpop.f32.mrf.mxu3  ;;  %v4609_v39 = vmax.f32 %v4344_v50, 0.0  ;;  %v7665_v27 = vmax.f32 %v7043_v16, 0.0 }
 0xb0a   : > { %v5689_v57 = vmax.f32 %v5397_v63, 0.0 }
 0xb0b   : > { %v6452_v36 = vpop.f32.mrf.mxu0  ;;  %7082 = vmatmul.bf16.gmra.mxu1 %v13348_v53 }
 0xb0c   : > { %v6770_v11 = vmax.f32 %v6452_v36, 0.0 }
 0xb0e   : > { %v13733_v22 = vpack.c.bf16 %v6770_v11, %v6769_v5 }
 0xb10   : > { %v4346_v56 = vpop.f32.mrf.mxu2  ;;  %v7045_v46 = vpop.f32.mrf.mxu1 }
 0xb11   : > { %v4610_v45 = vmax.f32 %v4346_v56, 0.0  ;;  %v5399_v28 = vpop.f32.mrf.mxu3  ;;  %v7666_v40 = vmax.f32 %v7045_v46, 0.0 }
 0xb12   : > { %v5690_v23 = vmax.f32 %v5399_v28, 0.0 }
 0xb13   : > { %v4740_v35 = vpack.c.bf16 %v4610_v45, %v4609_v39  ;;  %v7915_v8 = vpack.c.bf16 %v7666_v40, %v7665_v27  ;;  %v6455_v26 = vpop.f32.mrf.mxu0 }
 0xb14   : > { %v5829_v30 = vpack.c.bf16 %v5690_v23, %v5689_v57  ;;  %v6771_v50 = vmax.f32 %v6455_v26, 0.0 }
 0xb15   : > { %5441 = vmatmul.bf16.gmra.mxu3 %v4740_v35  ;;  %8140 = vmatmul.bf16.gmra.mxu2 %v7915_v8 }
 0xb16   : > { %6494 = vmatmul.bf16.gmra.mxu0 %v5829_v30 }
 0xb18   : > { %v4349_v53 = vpop.f32.mrf.mxu2  ;;  %v7048_v10 = vpop.f32.mrf.mxu1 }
 0xb19   : > { %v5402_v13 = vpop.f32.mrf.mxu3  ;;  %v4611_v11 = vmax.f32 %v4349_v53, 0.0  ;;  %v7667_v56 = vmax.f32 %v7048_v10, 0.0 }
 0xb1a   : > { %v5691_v45 = vmax.f32 %v5402_v13, 0.0 }
 0xb1b   : > { %v6457_v42 = vpop.f32.mrf.mxu0  ;;  %7087 = vmatmul.bf16.gmra.mxu1 %v13351_v60 }
 0xb1c   : > { %v6772_v16 = vmax.f32 %v6457_v42, 0.0 }
 0xb1e   : > { %v13736_v36 = vpack.c.bf16 %v6772_v16, %v6771_v50 }
 0xb20   : > { %v4351_v5 = vpop.f32.mrf.mxu2  ;;  %v7050_v63 = vpop.f32.mrf.mxu1 }
 0xb21   : > { %v4612_v46 = vmax.f32 %v4351_v5, 0.0  ;;  %v5404_v39 = vpop.f32.mrf.mxu3  ;;  %v7668_v27 = vmax.f32 %v7050_v63, 0.0 }
 0xb22   : > { %v5692_v28 = vmax.f32 %v5404_v39, 0.0 }
 0xb23   : > { %v4741_v40 = vpack.c.bf16 %v4612_v46, %v4611_v11  ;;  %v7916_v57 = vpack.c.bf16 %v7668_v27, %v7667_v56  ;;  %v6460_v23 = vpop.f32.mrf.mxu0 }
 0xb24   : > { %v5830_v35 = vpack.c.bf16 %v5692_v28, %v5691_v45  ;;  %v6773_v53 = vmax.f32 %v6460_v23, 0.0 }
 0xb25   : > { %5446 = vmatmul.bf16.gmra.mxu3 %v4741_v40  ;;  %8145 = vmatmul.bf16.gmra.mxu2 %v7916_v57 }
 0xb26   : > { %6499 = vmatmul.bf16.gmra.mxu0 %v5830_v35 }
 0xb28   : > { %v4354_v60 = vpop.f32.mrf.mxu2  ;;  %v7053_v8 = vpop.f32.mrf.mxu1 }
 0xb29   : > { %v5407_v26 = vpop.f32.mrf.mxu3  ;;  %v4613_v16 = vmax.f32 %v4354_v60, 0.0  ;;  %v7669_v5 = vmax.f32 %v7053_v8, 0.0 }
 0xb2a   : > { %v5693_v46 = vmax.f32 %v5407_v26, 0.0 }
 0xb2b   : > { %v6462_v30 = vpop.f32.mrf.mxu0  ;;  %7092 = vmatmul.bf16.gmra.mxu1 %v13354_v24 }
 0xb2c   : > { %v6774_v10 = vmax.f32 %v6462_v30, 0.0 }
 0xb2e   : > { %v13739_v42 = vpack.c.bf16 %v6774_v10, %v6773_v53 }
 0xb30   : > { %v4356_v50 = vpop.f32.mrf.mxu2  ;;  %v7055_v13 = vpop.f32.mrf.mxu1 }
 0xb31   : > { %v4614_v63 = vmax.f32 %v4356_v50, 0.0  ;;  %v5409_v11 = vpop.f32.mrf.mxu3  ;;  %v7670_v56 = vmax.f32 %v7055_v13, 0.0 }
 0xb32   : > { %v5694_v39 = vmax.f32 %v5409_v11, 0.0 }
 0xb33   : > { %v4742_v27 = vpack.c.bf16 %v4614_v63, %v4613_v16  ;;  %v7917_v45 = vpack.c.bf16 %v7670_v56, %v7669_v5  ;;  %v6465_v28 = vpop.f32.mrf.mxu0 }
 0xb34   : > { %v5831_v40 = vpack.c.bf16 %v5694_v39, %v5693_v46  ;;  %v6775_v60 = vmax.f32 %v6465_v28, 0.0 }
 0xb35   : > { %5451 = vmatmul.bf16.gmra.mxu3 %v4742_v27  ;;  %8150 = vmatmul.bf16.gmra.mxu2 %v7917_v45 }
 0xb36   : > { %6504 = vmatmul.bf16.gmra.mxu0 %v5831_v40 }
 0xb38   : > { %v7058_v24 = vpop.f32.mrf.mxu1  ;;  %v8111_v57 = vpop.f32.mrf.mxu2 }
 0xb39   : > { %v5412_v23 = vpop.f32.mrf.mxu3  ;;  %v7671_v10 = vmax.f32 %v7058_v24, 0.0  ;;  %v8751_v50 = vmax.f32 %v8111_v57, 0.0 }
 0xb3a   : > { %v5695_v63 = vmax.f32 %v5412_v23, 0.0 }
 0xb3b   : > { %v6467_v35 = vpop.f32.mrf.mxu0  ;;  %7097 = vmatmul.bf16.gmra.mxu1 %v13357_v51 }
 0xb3c   : > { %v6776_v8 = vmax.f32 %v6467_v35, 0.0 }
 0xb3e   : > { %v13742_v30 = vpack.c.bf16 %v6776_v8, %v6775_v60 }
 0xb40   : > { %v7060_v53 = vpop.f32.mrf.mxu1  ;;  %v8113_v26 = vpop.f32.mrf.mxu2 }
 0xb41   : > { %v5414_v13 = vpop.f32.mrf.mxu3  ;;  %v7672_v16 = vmax.f32 %v7060_v53, 0.0  ;;  %v8752_v5 = vmax.f32 %v8113_v26, 0.0 }
 0xb42   : > { %v5696_v11 = vmax.f32 %v5414_v13, 0.0 }
 0xb43   : > { %v7918_v56 = vpack.c.bf16 %v7672_v16, %v7671_v10  ;;  %v9007_v46 = vpack.c.bf16 %v8752_v5, %v8751_v50  ;;  %v6470_v39 = vpop.f32.mrf.mxu0 }
 0xb44   : > { %v5832_v27 = vpack.c.bf16 %v5696_v11, %v5695_v63  ;;  %v6777_v24 = vmax.f32 %v6470_v39, 0.0 }
 0xb45   : > { %8155 = vmatmul.bf16.gmra.mxu2 %v7918_v56  ;;  %9208 = vmatmul.bf16.vlgmr.msra.gmra.mxu3 %v9007_v46 }
 0xb46   : > { %6509 = vmatmul.bf16.gmra.mxu0 %v5832_v27 }
 0xb48   : > { %v7063_v51 = vpop.f32.mrf.mxu1  ;;  %v8116_v45 = vpop.f32.mrf.mxu2 }
 0xb49   : > { %v5417_v28 = vpop.f32.mrf.mxu3  ;;  %v7673_v8 = vmax.f32 %v7063_v51, 0.0  ;;  %v8753_v53 = vmax.f32 %v8116_v45, 0.0 }
 0xb4a   : > { %v5697_v13 = vmax.f32 %v5417_v28, 0.0 }
 0xb4b   : > { %v6472_v40 = vpop.f32.mrf.mxu0  ;;  %7102 = vmatmul.bf16.gmra.mxu1 %v13360_v20 }
 0xb4c   : > { %v6778_v57 = vmax.f32 %v6472_v40, 0.0 }
 0xb4e   : > { %v13745_v35 = vpack.c.bf16 %v6778_v57, %v6777_v24 }
 0xb50   : > { %v7065_v60 = vpop.f32.mrf.mxu1  ;;  %v8118_v23 = vpop.f32.mrf.mxu2 }
 0xb51   : > { %v5419_v26 = vpop.f32.mrf.mxu3  ;;  %v7674_v10 = vmax.f32 %v7065_v60, 0.0  ;;  %v8754_v50 = vmax.f32 %v8118_v23, 0.0 }
 0xb52   : > { %v5698_v16 = vmax.f32 %v5419_v26, 0.0 }
 0xb53   : > { %v7919_v5 = vpack.c.bf16 %v7674_v10, %v7673_v8  ;;  %v9008_v63 = vpack.c.bf16 %v8754_v50, %v8753_v53  ;;  %v6475_v11 = vpop.f32.mrf.mxu0 }
 0xb54   : > { %v5833_v56 = vpack.c.bf16 %v5698_v16, %v5697_v13  ;;  %v6779_v51 = vmax.f32 %v6475_v11, 0.0 }
 0xb55   : > { %8160 = vmatmul.bf16.gmra.mxu2 %v7919_v5  ;;  %9213 = vmatmul.bf16.gmra.mxu3 %v9008_v63 }
 0xb56   : > { %6514 = vmatmul.bf16.gmra.mxu0 %v5833_v56 }
 0xb58   : > { %v7068_v20 = vpop.f32.mrf.mxu1  ;;  %v8121_v46 = vpop.f32.mrf.mxu2 }
 0xb59   : > { %v5422_v39 = vpop.f32.mrf.mxu3  ;;  %v7675_v57 = vmax.f32 %v7068_v20, 0.0  ;;  %v8755_v60 = vmax.f32 %v8121_v46, 0.0 }
 0xb5a   : > { %v5699_v26 = vmax.f32 %v5422_v39, 0.0 }
 0xb5b   : > { %v6477_v27 = vpop.f32.mrf.mxu0  ;;  %7107 = vmatmul.bf16.gmra.mxu1 %v13363_v44 }
 0xb5c   : > { %v6780_v45 = vmax.f32 %v6477_v27, 0.0 }
 0xb5e   : > { %v13748_v40 = vpack.c.bf16 %v6780_v45, %v6779_v51 }
 0xb60   : > { %v7070_v24 = vpop.f32.mrf.mxu1  ;;  %v8123_v28 = vpop.f32.mrf.mxu2 }
 0xb61   : > { %v5424_v23 = vpop.f32.mrf.mxu3  ;;  %v7676_v8 = vmax.f32 %v7070_v24, 0.0  ;;  %v8756_v53 = vmax.f32 %v8123_v28, 0.0 }
 0xb62   : > { %v5700_v10 = vmax.f32 %v5424_v23, 0.0 }
 0xb63   : > { %v7920_v50 = vpack.c.bf16 %v7676_v8, %v7675_v57  ;;  %v9009_v13 = vpack.c.bf16 %v8756_v53, %v8755_v60  ;;  %v6480_v16 = vpop.f32.mrf.mxu0 }
 0xb64   : > { %v5834_v5 = vpack.c.bf16 %v5700_v10, %v5699_v26  ;;  %v6781_v20 = vmax.f32 %v6480_v16, 0.0 }
 0xb65   : > { %8165 = vmatmul.bf16.gmra.mxu2 %v7920_v50  ;;  %9218 = vmatmul.bf16.gmra.mxu3 %v9009_v13 }
 0xb66   : > { %6519 = vmatmul.bf16.gmra.mxu0 %v5834_v5 }
 0xb68   : > { %v7073_v44 = vpop.f32.mrf.mxu1  ;;  %v8126_v63 = vpop.f32.mrf.mxu2 }
 0xb69   : > { %v5427_v11 = vpop.f32.mrf.mxu3  ;;  %v7677_v45 = vmax.f32 %v7073_v44, 0.0  ;;  %v8757_v24 = vmax.f32 %v8126_v63, 0.0 }
 0xb6a   : > { %v5701_v23 = vmax.f32 %v5427_v11, 0.0 }
 0xb6b   : > { %v6482_v56 = vpop.f32.mrf.mxu0  ;;  %7112 = vmatmul.bf16.gmra.mxu1 %v13369_v52 }
 0xb6c   : > { %v6782_v46 = vmax.f32 %v6482_v56, 0.0 }
 0xb6e   : > { %v13751_v27 = vpack.c.bf16 %v6782_v46, %v6781_v20 }
 0xb70   : > { %v7075_v51 = vpop.f32.mrf.mxu1  ;;  %v8128_v39 = vpop.f32.mrf.mxu2 }
 0xb71   : > { %v5429_v28 = vpop.f32.mrf.mxu3  ;;  %v7678_v57 = vmax.f32 %v7075_v51, 0.0  ;;  %v8758_v60 = vmax.f32 %v8128_v39, 0.0 }
 0xb72   : > { %v5702_v8 = vmax.f32 %v5429_v28, 0.0 }
 0xb73   : > { %v7921_v53 = vpack.c.bf16 %v7678_v57, %v7677_v45  ;;  %v9010_v26 = vpack.c.bf16 %v8758_v60, %v8757_v24  ;;  %v6485_v10 = vpop.f32.mrf.mxu0 }
 0xb74   : > { %v5835_v50 = vpack.c.bf16 %v5702_v8, %v5701_v23  ;;  %v6783_v44 = vmax.f32 %v6485_v10, 0.0 }
 0xb75   : > { %8170 = vmatmul.bf16.gmra.mxu2 %v7921_v53  ;;  %9223 = vmatmul.bf16.gmra.mxu3 %v9010_v26 }
 0xb76   : > { %6524 = vmatmul.bf16.gmra.mxu0 %v5835_v50 }
 0xb78   : > { %v7078_v52 = vpop.f32.mrf.mxu1  ;;  %v8131_v13 = vpop.f32.mrf.mxu2 }
 0xb79   : > { %v5432_v16 = vpop.f32.mrf.mxu3  ;;  %v7679_v46 = vmax.f32 %v7078_v52, 0.0  ;;  %v8759_v51 = vmax.f32 %v8131_v13, 0.0 }
 0xb7a   : > { %v5703_v28 = vmax.f32 %v5432_v16, 0.0 }
 0xb7b   : > { %v6487_v5 = vpop.f32.mrf.mxu0  ;;  %7117 = vmatmul.bf16.gmra.mxu1 %v13372_v14 }
 0xb7c   : > { %v6784_v63 = vmax.f32 %v6487_v5, 0.0 }
 0xb7e   : > { %v13754_v56 = vpack.c.bf16 %v6784_v63, %v6783_v44 }
 0xb80   : > { %v7080_v20 = vpop.f32.mrf.mxu1  ;;  %v8133_v11 = vpop.f32.mrf.mxu2 }
 0xb81   : > { %v5434_v39 = vpop.f32.mrf.mxu3  ;;  %v7680_v45 = vmax.f32 %v7080_v20, 0.0  ;;  %v8760_v24 = vmax.f32 %v8133_v11, 0.0 }
 0xb82   : > { %v5704_v57 = vmax.f32 %v5434_v39, 0.0 }
 0xb83   : > { %v7922_v60 = vpack.c.bf16 %v7680_v45, %v7679_v46  ;;  %v9011_v23 = vpack.c.bf16 %v8760_v24, %v8759_v51  ;;  %v6490_v8 = vpop.f32.mrf.mxu0 }
 0xb84   : > { %v5836_v53 = vpack.c.bf16 %v5704_v57, %v5703_v28  ;;  %v6785_v52 = vmax.f32 %v6490_v8, 0.0 }
 0xb85   : > { %8175 = vmatmul.bf16.gmra.mxu2 %v7922_v60  ;;  %9228 = vmatmul.bf16.gmra.mxu3 %v9011_v23 }
 0xb86   : > { %6529 = vmatmul.bf16.gmra.mxu0 %v5836_v53 }
 0xb88   : > { %v7083_v14 = vpop.f32.mrf.mxu1  ;;  %v8136_v26 = vpop.f32.mrf.mxu2 }
 0xb89   : > { %v5437_v10 = vpop.f32.mrf.mxu3  ;;  %v7681_v63 = vmax.f32 %v7083_v14, 0.0  ;;  %v8761_v20 = vmax.f32 %v8136_v26, 0.0 }
 0xb8a   : > { %v5705_v39 = vmax.f32 %v5437_v10, 0.0 }
 0xb8b   : > { %v6492_v50 = vpop.f32.mrf.mxu0  ;;  %7122 = vmatmul.bf16.gmra.mxu1 %v13375_v37 }
 0xb8c   : > { %v6786_v13 = vmax.f32 %v6492_v50, 0.0 }
 0xb8e   : > { %v13757_v5 = vpack.c.bf16 %v6786_v13, %v6785_v52 }
 0xb90   : > { %v7085_v44 = vpop.f32.mrf.mxu1  ;;  %v8138_v16 = vpop.f32.mrf.mxu2 }
 0xb91   : > { %v5439_v11 = vpop.f32.mrf.mxu3  ;;  %v7682_v46 = vmax.f32 %v7085_v44, 0.0  ;;  %v8762_v51 = vmax.f32 %v8138_v16, 0.0 }
 0xb92   : > { %v5706_v45 = vmax.f32 %v5439_v11, 0.0 }
 0xb93   : > { %v7923_v24 = vpack.c.bf16 %v7682_v46, %v7681_v63  ;;  %v9012_v28 = vpack.c.bf16 %v8762_v51, %v8761_v20  ;;  %v6495_v57 = vpop.f32.mrf.mxu0 }
 0xb94   : > { %v5837_v60 = vpack.c.bf16 %v5706_v45, %v5705_v39  ;;  %v6787_v14 = vmax.f32 %v6495_v57, 0.0 }
 0xb95   : > { %8180 = vmatmul.bf16.gmra.mxu2 %v7923_v24  ;;  %9233 = vmatmul.bf16.gmra.mxu3 %v9012_v28 }
 0xb96   : > { %6534 = vmatmul.bf16.gmra.mxu0 %v5837_v60 }
 0xb98   : > { %v7088_v37 = vpop.f32.mrf.mxu1  ;;  %v8141_v23 = vpop.f32.mrf.mxu2 }
 0xb99   : > { %v5442_v8 = vpop.f32.mrf.mxu3  ;;  %v7683_v13 = vmax.f32 %v7088_v37, 0.0  ;;  %v8763_v44 = vmax.f32 %v8141_v23, 0.0 }
 0xb9a   : > { %v5707_v11 = vmax.f32 %v5442_v8, 0.0 }
 0xb9b   : > { %v6497_v53 = vpop.f32.mrf.mxu0  ;;  %7127 = vmatmul.bf16.gmra.mxu1 %v13378_v43 }
 0xb9c   : > { %v6788_v26 = vmax.f32 %v6497_v53, 0.0 }
 0xb9e   : > { %v13760_v50 = vpack.c.bf16 %v6788_v26, %v6787_v14 }
 0xba0   : > { %v7090_v52 = vpop.f32.mrf.mxu1  ;;  %v8143_v10 = vpop.f32.mrf.mxu2 }
 0xba1   : > { %v5444_v16 = vpop.f32.mrf.mxu3  ;;  %v7684_v63 = vmax.f32 %v7090_v52, 0.0  ;;  %v8764_v20 = vmax.f32 %v8143_v10, 0.0 }
 0xba2   : > { %v5708_v46 = vmax.f32 %v5444_v16, 0.0 }
 0xba3   : > { %v7924_v51 = vpack.c.bf16 %v7684_v63, %v7683_v13  ;;  %v9013_v39 = vpack.c.bf16 %v8764_v20, %v8763_v44  ;;  %v6500_v45 = vpop.f32.mrf.mxu0 }
 0xba4   : > { %v5838_v24 = vpack.c.bf16 %v5708_v46, %v5707_v11  ;;  %v6789_v37 = vmax.f32 %v6500_v45, 0.0 }
 0xba5   : > { %8185 = vmatmul.bf16.gmra.mxu2 %v7924_v51  ;;  %9238 = vmatmul.bf16.gmra.mxu3 %v9013_v39 }
 0xba6   : > { %6539 = vmatmul.bf16.gmra.mxu0 %v5838_v24 }
 0xba8   : > { %v7093_v43 = vpop.f32.mrf.mxu1  ;;  %v8146_v28 = vpop.f32.mrf.mxu2 }
 0xba9   : > { %v5447_v57 = vpop.f32.mrf.mxu3  ;;  %v7685_v26 = vmax.f32 %v7093_v43, 0.0  ;;  %v8765_v52 = vmax.f32 %v8146_v28, 0.0 }
 0xbaa   : > { %v5709_v16 = vmax.f32 %v5447_v57, 0.0 }
 0xbab   : > { %v6502_v60 = vpop.f32.mrf.mxu0  ;;  %7132 = vmatmul.bf16.gmra.mxu1 %v13384_v32 }
 0xbac   : > { %v6790_v23 = vmax.f32 %v6502_v60, 0.0 }
 0xbae   : > { %v13763_v53 = vpack.c.bf16 %v6790_v23, %v6789_v37 }
 0xbb0   : > { %v7095_v14 = vpop.f32.mrf.mxu1  ;;  %v8148_v8 = vpop.f32.mrf.mxu2 }
 0xbb1   : > { %v5449_v10 = vpop.f32.mrf.mxu3  ;;  %v7686_v13 = vmax.f32 %v7095_v14, 0.0  ;;  %v8766_v44 = vmax.f32 %v8148_v8, 0.0 }
 0xbb2   : > { %v5710_v63 = vmax.f32 %v5449_v10, 0.0 }
 0xbb3   : > { %v7925_v20 = vpack.c.bf16 %v7686_v13, %v7685_v26  ;;  %v9014_v11 = vpack.c.bf16 %v8766_v44, %v8765_v52  ;;  %v6505_v46 = vpop.f32.mrf.mxu0 }
 0xbb4   : > { %v5839_v51 = vpack.c.bf16 %v5710_v63, %v5709_v16  ;;  %v6791_v43 = vmax.f32 %v6505_v46, 0.0 }
 0xbb5   : > { %8190 = vmatmul.bf16.gmra.mxu2 %v7925_v20  ;;  %9243 = vmatmul.bf16.gmra.mxu3 %v9014_v11 }
 0xbb6   : > { %6544 = vmatmul.bf16.gmra.mxu0 %v5839_v51 }
 0xbb8   : > { %v7098_v32 = vpop.f32.mrf.mxu1  ;;  %v8151_v39 = vpop.f32.mrf.mxu2 }
 0xbb9   : > { %v5452_v45 = vpop.f32.mrf.mxu3  ;;  %v7687_v23 = vmax.f32 %v7098_v32, 0.0  ;;  %v8767_v14 = vmax.f32 %v8151_v39, 0.0 }
 0xbba   : > { %v5711_v10 = vmax.f32 %v5452_v45, 0.0 }
 0xbbb   : > { %v6507_v24 = vpop.f32.mrf.mxu0  ;;  %7137 = vmatmul.bf16.gmra.mxu1 %v13387_v1 }
 0xbbc   : > { %v6792_v28 = vmax.f32 %v6507_v24, 0.0 }
 0xbbe   : > { %v13766_v60 = vpack.c.bf16 %v6792_v28, %v6791_v43 }
 0xbc0   : > { %v7100_v37 = vpop.f32.mrf.mxu1  ;;  %v8153_v57 = vpop.f32.mrf.mxu2 }
 0xbc1   : > { %v5454_v8 = vpop.f32.mrf.mxu3  ;;  %v7688_v26 = vmax.f32 %v7100_v37, 0.0  ;;  %v8768_v52 = vmax.f32 %v8153_v57, 0.0 }
 0xbc2   : > { %v5712_v13 = vmax.f32 %v5454_v8, 0.0 }
 0xbc3   : > { %v7926_v44 = vpack.c.bf16 %v7688_v26, %v7687_v23  ;;  %v9015_v16 = vpack.c.bf16 %v8768_v52, %v8767_v14  ;;  %v6510_v63 = vpop.f32.mrf.mxu0 }
 0xbc4   : > { %v5840_v20 = vpack.c.bf16 %v5712_v13, %v5711_v10  ;;  %v6793_v32 = vmax.f32 %v6510_v63, 0.0 }
 0xbc5   : > { %8195 = vmatmul.bf16.gmra.mxu2 %v7926_v44  ;;  %9248 = vmatmul.bf16.gmra.mxu3 %v9015_v16 }
 0xbc6   : > { %6549 = vmatmul.bf16.gmra.mxu0 %v5840_v20 }
 0xbc8   : > { %v7103_v1 = vpop.f32.mrf.mxu1  ;;  %v8156_v11 = vpop.f32.mrf.mxu2 }
 0xbc9   : > { %v9209_v46 = vpop.f32.mrf.mxu3  ;;  %v7689_v28 = vmax.f32 %v7103_v1, 0.0  ;;  %v8769_v37 = vmax.f32 %v8156_v11, 0.0 }
 0xbca   : > { %v9849_v8 = vmax.f32 %v9209_v46, 0.0 }
 0xbcb   : > { %v6512_v51 = vpop.f32.mrf.mxu0  ;;  %7142 = vmatmul.bf16.gmra.mxu1 %v13390_v3 }
 0xbcc   : > { %v6794_v39 = vmax.f32 %v6512_v51, 0.0 }
 0xbce   : > { %v13769_v24 = vpack.c.bf16 %v6794_v39, %v6793_v32 }
 0xbd0   : > { %v7105_v43 = vpop.f32.mrf.mxu1  ;;  %v8158_v45 = vpop.f32.mrf.mxu2 }
 0xbd1   : > { %v7690_v57 = vmax.f32 %v7105_v43, 0.0  ;;  %v8770_v23 = vmax.f32 %v8158_v45, 0.0  ;;  %v9211_v14 = vpop.f32.mrf.mxu3 }
 0xbd2   : > { %v9850_v26 = vmax.f32 %v9211_v14, 0.0 }
 0xbd3   : > { %v7927_v52 = vpack.c.bf16 %v7690_v57, %v7689_v28  ;;  %v9016_v10 = vpack.c.bf16 %v8770_v23, %v8769_v37  ;;  %v6515_v13 = vpop.f32.mrf.mxu0 }
 0xbd4   : > { %v10105_v44 = vpack.c.bf16 %v9850_v26, %v9849_v8  ;;  %v6795_v1 = vmax.f32 %v6515_v13, 0.0 }
 0xbd5   : > { %8200 = vmatmul.bf16.gmra.mxu2 %v7927_v52  ;;  %9253 = vmatmul.bf16.gmra.mxu3 %v9016_v10 }
 0xbd6   : > { %10305 = vmatmul.bf16.vlgmr.msra.gmra.mxu0 %v10105_v44 }
 0xbd8   : > { %v7108_v3 = vpop.f32.mrf.mxu1  ;;  %v8161_v16 = vpop.f32.mrf.mxu2 }
 0xbd9   : > { %v9214_v63 = vpop.f32.mrf.mxu3  ;;  %v7691_v39 = vmax.f32 %v7108_v3, 0.0  ;;  %v8771_v43 = vmax.f32 %v8161_v16, 0.0 }
 0xbda   : > { %v9851_v57 = vmax.f32 %v9214_v63, 0.0 }
 0xbdb   : > { %v6517_v20 = vpop.f32.mrf.mxu0  ;;  %7147 = vmatmul.bf16.gmra.mxu1 %v13393_v12 }
 0xbdc   : > { %v6796_v11 = vmax.f32 %v6517_v20, 0.0 }
 0xbde   : > { %v13772_v51 = vpack.c.bf16 %v6796_v11, %v6795_v1 }
 0xbe0   : > { %v7110_v32 = vpop.f32.mrf.mxu1  ;;  %v8163_v46 = vpop.f32.mrf.mxu2 }
 0xbe1   : > { %v7692_v45 = vmax.f32 %v7110_v32, 0.0  ;;  %v8772_v28 = vmax.f32 %v8163_v46, 0.0  ;;  %v9216_v37 = vpop.f32.mrf.mxu3 }
 0xbe2   : > { %v9852_v23 = vmax.f32 %v9216_v37, 0.0 }
 0xbe3   : > { %v7928_v14 = vpack.c.bf16 %v7692_v45, %v7691_v39  ;;  %v9017_v8 = vpack.c.bf16 %v8772_v28, %v8771_v43  ;;  %v6520_v26 = vpop.f32.mrf.mxu0 }
 0xbe4   : > { %v10106_v52 = vpack.c.bf16 %v9852_v23, %v9851_v57  ;;  %v6797_v3 = vmax.f32 %v6520_v26, 0.0 }
 0xbe5   : > { %8205 = vmatmul.bf16.gmra.mxu2 %v7928_v14  ;;  %9258 = vmatmul.bf16.gmra.mxu3 %v9017_v8 }
 0xbe6   : > { %10310 = vmatmul.bf16.gmra.mxu0 %v10106_v52 }
 0xbe8   : > { %v7113_v12 = vpop.f32.mrf.mxu1  ;;  %v8166_v10 = vpop.f32.mrf.mxu2 }
 0xbe9   : > { %v9219_v13 = vpop.f32.mrf.mxu3  ;;  %v7693_v11 = vmax.f32 %v7113_v12, 0.0  ;;  %v8773_v32 = vmax.f32 %v8166_v10, 0.0 }
 0xbea   : > { %v9853_v45 = vmax.f32 %v9219_v13, 0.0 }
 0xbeb   : > { %v6522_v44 = vpop.f32.mrf.mxu0  ;;  %7152 = vmatmul.bf16.gmra.mxu1 %v13399_v9 }
 0xbec   : > { %v6798_v16 = vmax.f32 %v6522_v44, 0.0 }
 0xbee   : > { %v13775_v20 = vpack.c.bf16 %v6798_v16, %v6797_v3 }
 0xbf0   : > { %v7115_v1 = vpop.f32.mrf.mxu1  ;;  %v8168_v63 = vpop.f32.mrf.mxu2 }
 0xbf1   : > { %v7694_v46 = vmax.f32 %v7115_v1, 0.0  ;;  %v8774_v39 = vmax.f32 %v8168_v63, 0.0  ;;  %v9221_v43 = vpop.f32.mrf.mxu3 }
 0xbf2   : > { %v9854_v28 = vmax.f32 %v9221_v43, 0.0 }
 0xbf3   : > { %v7929_v37 = vpack.c.bf16 %v7694_v46, %v7693_v11  ;;  %v9018_v57 = vpack.c.bf16 %v8774_v39, %v8773_v32  ;;  %v6525_v23 = vpop.f32.mrf.mxu0 }
 0xbf4   : > { %v10107_v14 = vpack.c.bf16 %v9854_v28, %v9853_v45  ;;  %v6799_v12 = vmax.f32 %v6525_v23, 0.0 }
 0xbf5   : > { %8210 = vmatmul.bf16.gmra.mxu2 %v7929_v37  ;;  %9263 = vmatmul.bf16.gmra.mxu3 %v9018_v57 }
 0xbf6   : > { %10315 = vmatmul.bf16.gmra.mxu0 %v10107_v14 }
 0xbf8   : > { %v7118_v9 = vpop.f32.mrf.mxu1  ;;  %v8171_v8 = vpop.f32.mrf.mxu2 }
 0xbf9   : > { %v9224_v26 = vpop.f32.mrf.mxu3  ;;  %v7695_v16 = vmax.f32 %v7118_v9, 0.0  ;;  %v8775_v1 = vmax.f32 %v8171_v8, 0.0 }
 0xbfa   : > { %v9855_v46 = vmax.f32 %v9224_v26, 0.0 }
 0xbfb   : > { %v6527_v52 = vpop.f32.mrf.mxu0  ;;  %7157 = vmatmul.bf16.gmra.mxu1 %v13405_v61 }
 0xbfc   : > { %v6800_v10 = vmax.f32 %v6527_v52, 0.0 }
 0xbfe   : > { %v13778_v44 = vpack.c.bf16 %v6800_v10, %v6799_v12 }
 0xc00   : > { %v7120_v3 = vpop.f32.mrf.mxu1  ;;  %v8173_v13 = vpop.f32.mrf.mxu2 }
 0xc01   : > { %v7696_v63 = vmax.f32 %v7120_v3, 0.0  ;;  %v8776_v11 = vmax.f32 %v8173_v13, 0.0  ;;  %v9226_v32 = vpop.f32.mrf.mxu3 }
 0xc02   : > { %v9856_v39 = vmax.f32 %v9226_v32, 0.0 }
 0xc03   : > { %v7930_v43 = vpack.c.bf16 %v7696_v63, %v7695_v16  ;;  %v9019_v45 = vpack.c.bf16 %v8776_v11, %v8775_v1  ;;  %v6530_v28 = vpop.f32.mrf.mxu0 }
 0xc04   : > { %v10108_v37 = vpack.c.bf16 %v9856_v39, %v9855_v46  ;;  %v6801_v9 = vmax.f32 %v6530_v28, 0.0 }
 0xc05   : > { %8215 = vmatmul.bf16.gmra.mxu2 %v7930_v43  ;;  %9268 = vmatmul.bf16.gmra.mxu3 %v9019_v45 }
 0xc06   : > { %10320 = vmatmul.bf16.gmra.mxu0 %v10108_v37 }
 0xc08   : > { %v7123_v61 = vpop.f32.mrf.mxu1  ;;  %v8176_v57 = vpop.f32.mrf.mxu2 }
 0xc09   : > { %v9229_v23 = vpop.f32.mrf.mxu3  ;;  %v7697_v10 = vmax.f32 %v7123_v61, 0.0  ;;  %v8777_v3 = vmax.f32 %v8176_v57, 0.0 }
 0xc0a   : > { %v9857_v63 = vmax.f32 %v9229_v23, 0.0 }
 0xc0b   : > { %v6532_v14 = vpop.f32.mrf.mxu0  ;;  %7162 = vmatmul.bf16.gmra.mxu1 %v13408_v41 }
 0xc0c   : > { %v6802_v8 = vmax.f32 %v6532_v14, 0.0 }
 0xc0e   : > { %v13781_v52 = vpack.c.bf16 %v6802_v8, %v6801_v9 }
 0xc10   : > { %v7125_v12 = vpop.f32.mrf.mxu1  ;;  %v8178_v26 = vpop.f32.mrf.mxu2 }
 0xc11   : > { %v7698_v13 = vmax.f32 %v7125_v12, 0.0  ;;  %v8778_v16 = vmax.f32 %v8178_v26, 0.0  ;;  %v9231_v1 = vpop.f32.mrf.mxu3 }
 0xc12   : > { %v9858_v11 = vmax.f32 %v9231_v1, 0.0 }
 0xc13   : > { %v7931_v32 = vpack.c.bf16 %v7698_v13, %v7697_v10  ;;  %v9020_v46 = vpack.c.bf16 %v8778_v16, %v8777_v3  ;;  %v6535_v39 = vpop.f32.mrf.mxu0 }
 0xc14   : > { %v10109_v43 = vpack.c.bf16 %v9858_v11, %v9857_v63  ;;  %v6803_v61 = vmax.f32 %v6535_v39, 0.0 }
 0xc15   : > { %8220 = vmatmul.bf16.gmra.mxu2 %v7931_v32  ;;  %9273 = vmatmul.bf16.gmra.mxu3 %v9020_v46 }
 0xc16   : > { %10325 = vmatmul.bf16.gmra.mxu0 %v10109_v43 }
 0xc18   : > { %v7128_v41 = vpop.f32.mrf.mxu1  ;;  %v8181_v45 = vpop.f32.mrf.mxu2 }
 0xc19   : > { %v9234_v28 = vpop.f32.mrf.mxu3  ;;  %v7699_v8 = vmax.f32 %v7128_v41, 0.0  ;;  %v8779_v12 = vmax.f32 %v8181_v45, 0.0 }
 0xc1a   : > { %v9859_v13 = vmax.f32 %v9234_v28, 0.0 }
 0xc1b   : > { %v6537_v37 = vpop.f32.mrf.mxu0  ;;  %7167 = vmatmul.bf16.gmra.mxu1 %v13411_v17 }
 0xc1c   : > { %v6804_v57 = vmax.f32 %v6537_v37, 0.0 }
 0xc1e   : > { %v13784_v14 = vpack.c.bf16 %v6804_v57, %v6803_v61 }
 0xc20   : > { %v7130_v9 = vpop.f32.mrf.mxu1  ;;  %v8183_v23 = vpop.f32.mrf.mxu2 }
 0xc21   : > { %v7700_v26 = vmax.f32 %v7130_v9, 0.0  ;;  %v8780_v10 = vmax.f32 %v8183_v23, 0.0  ;;  %v9236_v3 = vpop.f32.mrf.mxu3 }
 0xc22   : > { %v9860_v16 = vmax.f32 %v9236_v3, 0.0 }
 0xc23   : > { %v7932_v1 = vpack.c.bf16 %v7700_v26, %v7699_v8  ;;  %v9021_v63 = vpack.c.bf16 %v8780_v10, %v8779_v12  ;;  %v6540_v11 = vpop.f32.mrf.mxu0 }
 0xc24   : > { %v10110_v32 = vpack.c.bf16 %v9860_v16, %v9859_v13  ;;  %v6805_v41 = vmax.f32 %v6540_v11, 0.0 }
 0xc25   : > { %8225 = vmatmul.bf16.gmra.mxu2 %v7932_v1  ;;  %9278 = vmatmul.bf16.gmra.mxu3 %v9021_v63 }
 0xc26   : > { %10330 = vmatmul.bf16.gmra.mxu0 %v10110_v32 }
 0xc28   : > { %v7133_v17 = vpop.f32.mrf.mxu1  ;;  %v8186_v46 = vpop.f32.mrf.mxu2 }
 0xc29   : > { %v9239_v39 = vpop.f32.mrf.mxu3  ;;  %v7701_v57 = vmax.f32 %v7133_v17, 0.0  ;;  %v8781_v9 = vmax.f32 %v8186_v46, 0.0 }
 0xc2a   : > { %v9861_v26 = vmax.f32 %v9239_v39, 0.0 }
 0xc2b   : > { %v6542_v43 = vpop.f32.mrf.mxu0  ;;  %7172 = vmatmul.bf16.gmra.mxu1 %v13414_v48 }
 0xc2c   : > { %v6806_v45 = vmax.f32 %v6542_v43, 0.0 }
 0xc2e   : > { %v13787_v37 = vpack.c.bf16 %v6806_v45, %v6805_v41 }
 0xc30   : > { %v7135_v61 = vpop.f32.mrf.mxu1  ;;  %v8188_v28 = vpop.f32.mrf.mxu2 }
 0xc31   : > { %v7702_v23 = vmax.f32 %v7135_v61, 0.0  ;;  %v8782_v8 = vmax.f32 %v8188_v28, 0.0  ;;  %v9241_v12 = vpop.f32.mrf.mxu3 }
 0xc32   : > { %v9862_v10 = vmax.f32 %v9241_v12, 0.0 }
 0xc33   : > { %v7933_v3 = vpack.c.bf16 %v7702_v23, %v7701_v57  ;;  %v9022_v13 = vpack.c.bf16 %v8782_v8, %v8781_v9  ;;  %v6545_v16 = vpop.f32.mrf.mxu0 }
 0xc34   : > { %v10111_v1 = vpack.c.bf16 %v9862_v10, %v9861_v26  ;;  %v6807_v17 = vmax.f32 %v6545_v16, 0.0 }
 0xc35   : > { %8230 = vmatmul.bf16.gmra.mxu2 %v7933_v3  ;;  %9283 = vmatmul.bf16.gmra.mxu3 %v9022_v13 }
 0xc36   : > { %10335 = vmatmul.bf16.gmra.mxu0 %v10111_v1 }
 0xc38   : > { %v7138_v48 = vpop.f32.mrf.mxu1  ;;  %v8191_v63 = vpop.f32.mrf.mxu2 }
 0xc39   : > { %v9244_v11 = vpop.f32.mrf.mxu3  ;;  %v7703_v45 = vmax.f32 %v7138_v48, 0.0  ;;  %v8783_v61 = vmax.f32 %v8191_v63, 0.0 }
 0xc3a   : > { %v9863_v23 = vmax.f32 %v9244_v11, 0.0 }
 0xc3b   : > { %v6547_v32 = vpop.f32.mrf.mxu0  ;;  %7177 = vmatmul.bf16.gmra.mxu1 %v13417_v34 }
 0xc3c   : > { %v6808_v46 = vmax.f32 %v6547_v32, 0.0 }
 0xc3e   : > { %v13790_v43 = vpack.c.bf16 %v6808_v46, %v6807_v17 }
 0xc40   : > { %v7140_v41 = vpop.f32.mrf.mxu1  ;;  %v8193_v39 = vpop.f32.mrf.mxu2 }
 0xc41   : > { %v7704_v28 = vmax.f32 %v7140_v41, 0.0  ;;  %v8784_v57 = vmax.f32 %v8193_v39, 0.0  ;;  %v9246_v9 = vpop.f32.mrf.mxu3 }
 0xc42   : > { %v9864_v8 = vmax.f32 %v9246_v9, 0.0 }
 0xc43   : > { %v7934_v12 = vpack.c.bf16 %v7704_v28, %v7703_v45  ;;  %v9023_v26 = vpack.c.bf16 %v8784_v57, %v8783_v61  ;;  %v6550_v10 = vpop.f32.mrf.mxu0 }
 0xc44   : > { %v10112_v3 = vpack.c.bf16 %v9864_v8, %v9863_v23  ;;  %v6809_v48 = vmax.f32 %v6550_v10, 0.0 }
 0xc45   : > { %8235 = vmatmul.bf16.gmra.mxu2 %v7934_v12  ;;  %9288 = vmatmul.bf16.gmra.mxu3 %v9023_v26 }
 0xc46   : > { %10340 = vmatmul.bf16.gmra.mxu0 %v10112_v3 }
 0xc48   : > { %v7143_v34 = vpop.f32.mrf.mxu1  ;;  %v8196_v13 = vpop.f32.mrf.mxu2 }
 0xc49   : > { %v9249_v16 = vpop.f32.mrf.mxu3  ;;  %v7705_v46 = vmax.f32 %v7143_v34, 0.0  ;;  %v8785_v41 = vmax.f32 %v8196_v13, 0.0 }
 0xc4b   : > { %v6552_v1 = vpop.f32.mrf.mxu0  ;;  %7182 = vmatmul.bf16.gmra.mxu1 %v13420_v38  ;;  %v9865_v38 = vmax.f32 %v9249_v16, 0.0 }
 0xc4c   : > { %v6810_v63 = vmax.f32 %v6552_v1, 0.0 }
 0xc4e   : > { %v13793_v32 = vpack.c.bf16 %v6810_v63, %v6809_v48 }
 0xc50   : > { %v7145_v11 = vpop.f32.mrf.mxu1  ;;  %v8198_v17 = vpop.f32.mrf.mxu2 }
 0xc51   : > { %v7706_v39 = vmax.f32 %v7145_v11, 0.0  ;;  %v8786_v45 = vmax.f32 %v8198_v17, 0.0  ;;  %v9251_v61 = vpop.f32.mrf.mxu3 }
 0xc52   : > { %v9866_v28 = vmax.f32 %v9251_v61, 0.0 }
 0xc53   : > { %v7935_v57 = vpack.c.bf16 %v7706_v39, %v7705_v46  ;;  %v9024_v9 = vpack.c.bf16 %v8786_v45, %v8785_v41  ;;  %v10306_v23 = vpop.f32.mrf.mxu0 }
 0xc54   : > { %v10113_v8 = vpack.c.bf16 %v9866_v28, %v9865_v38  ;;  %10947 = vst.msk [vmem:[%s13799_s5] sm:$0xff] %vm10946_vm1, %v10306_v23 }
 0xc55   : > { %8240 = vmatmul.bf16.gmra.mxu2 %v7935_v57  ;;  %9293 = vmatmul.bf16.gmra.mxu3 %v9024_v9 }
 0xc56   : > { %10345 = vmatmul.bf16.gmra.mxu0 %v10113_v8 }
 0xc58   : > { %v7148_v12 = vpop.f32.mrf.mxu1  ;;  %v8201_v26 = vpop.f32.mrf.mxu2 }
 0xc59   : > { %v9254_v10 = vpop.f32.mrf.mxu3  ;;  %v7707_v16 = vmax.f32 %v7148_v12, 0.0  ;;  %v8787_v1 = vmax.f32 %v8201_v26, 0.0 }
 0xc5a   : > { %v9867_v17 = vmax.f32 %v9254_v10, 0.0 }
 0xc5b   : > { %v10308_v3 = vpop.f32.mrf.mxu0  ;;  %7187 = vmatmul.bf16.gmra.mxu1 %v13423_v18 }
 0xc5c   : > { %10948 = vst.msk [vmem:[%s13799_s5 + $0x8] sm:$0xff] %vm10946_vm1, %v10308_v3 }
 0xc60   : > { %v7150_v34 = vpop.f32.mrf.mxu1  ;;  %v8203_v13 = vpop.f32.mrf.mxu2 }
 0xc61   : > { %v7708_v48 = vmax.f32 %v7150_v34, 0.0  ;;  %v8788_v63 = vmax.f32 %v8203_v13, 0.0  ;;  %v9256_v11 = vpop.f32.mrf.mxu3 }
 0xc62   : > { %v9868_v46 = vmax.f32 %v9256_v11, 0.0 }
 0xc63   : > { %v7936_v41 = vpack.c.bf16 %v7708_v48, %v7707_v16  ;;  %v9025_v39 = vpack.c.bf16 %v8788_v63, %v8787_v1  ;;  %v10311_v45 = vpop.f32.mrf.mxu0 }
 0xc64   : > { %v10114_v61 = vpack.c.bf16 %v9868_v46, %v9867_v17  ;;  %10949 = vst.msk [vmem:[%s13799_s5 + $0x10] sm:$0xff] %vm10946_vm1, %v10311_v45 }
 0xc65   : > { %8245 = vmatmul.bf16.gmra.mxu2 %v7936_v41  ;;  %9298 = vmatmul.bf16.gmra.mxu3 %v9025_v39 }
 0xc66   : > { %10350 = vmatmul.bf16.gmra.mxu0 %v10114_v61 }
 0xc68   : > { %v7153_v18 = vpop.f32.mrf.mxu1  ;;  %v8206_v38 = vpop.f32.mrf.mxu2 }
 0xc69   : > { %v9259_v28 = vpop.f32.mrf.mxu3  ;;  %v7709_v8 = vmax.f32 %v7153_v18, 0.0  ;;  %v8789_v12 = vmax.f32 %v8206_v38, 0.0 }
 0xc6a   : > { %v9869_v34 = vmax.f32 %v9259_v28, 0.0 }
 0xc6b   : > { %v10313_v57 = vpop.f32.mrf.mxu0  ;;  %7192 = vmatmul.bf16.gmra.mxu1 %v13429_v49 }
 0xc6c   : > { %10950 = vst.msk [vmem:[%s13799_s5 + $0x18] sm:$0xff] %vm10946_vm1, %v10313_v57 }
 0xc70   : > { %v7155_v9 = vpop.f32.mrf.mxu1  ;;  %v8208_v23 = vpop.f32.mrf.mxu2 }
 0xc71   : > { %v7710_v26 = vmax.f32 %v7155_v9, 0.0  ;;  %v8790_v10 = vmax.f32 %v8208_v23, 0.0  ;;  %v9261_v3 = vpop.f32.mrf.mxu3 }
 0xc72   : > { %v9870_v13 = vmax.f32 %v9261_v3, 0.0 }
 0xc73   : > { %v7937_v16 = vpack.c.bf16 %v7710_v26, %v7709_v8  ;;  %v9026_v1 = vpack.c.bf16 %v8790_v10, %v8789_v12  ;;  %v10316_v48 = vpop.f32.mrf.mxu0 }
 0xc74   : > { %v10115_v63 = vpack.c.bf16 %v9870_v13, %v9869_v34  ;;  %10951 = vst.msk [vmem:[%s13799_s5 + $0x20] sm:$0xff] %vm10946_vm1, %v10316_v48 }
 0xc75   : > { %8250 = vmatmul.bf16.gmra.mxu2 %v7937_v16  ;;  %9303 = vmatmul.bf16.gmra.mxu3 %v9026_v1 }
 0xc76   : > { %10355 = vmatmul.bf16.gmra.mxu0 %v10115_v63 }
 0xc78   : > { %v7158_v49 = vpop.f32.mrf.mxu1  ;;  %v8211_v11 = vpop.f32.mrf.mxu2 }
 0xc79   : > { %v9264_v17 = vpop.f32.mrf.mxu3  ;;  %v7711_v45 = vmax.f32 %v7158_v49, 0.0  ;;  %v8791_v61 = vmax.f32 %v8211_v11, 0.0 }
 0xc7a   : > { %v9871_v57 = vmax.f32 %v9264_v17, 0.0 }
 0xc7b   : > { %v10318_v46 = vpop.f32.mrf.mxu0  ;;  %7197 = vmatmul.bf16.gmra.mxu1 %v13432_v55 }
 0xc7c   : > { %10952 = vst.msk [vmem:[%s13799_s5 + $0x28] sm:$0xff] %vm10946_vm1, %v10318_v46 }
 0xc80   : > { %v7160_v41 = vpop.f32.mrf.mxu1  ;;  %v8213_v39 = vpop.f32.mrf.mxu2 }
 0xc81   : > { %v7712_v18 = vmax.f32 %v7160_v41, 0.0  ;;  %v8792_v38 = vmax.f32 %v8213_v39, 0.0  ;;  %v9266_v28 = vpop.f32.mrf.mxu3 }
 0xc82   : > { %v9872_v9 = vmax.f32 %v9266_v28, 0.0 }
 0xc83   : > { %v7938_v23 = vpack.c.bf16 %v7712_v18, %v7711_v45  ;;  %v9027_v8 = vpack.c.bf16 %v8792_v38, %v8791_v61  ;;  %v10321_v12 = vpop.f32.mrf.mxu0 }
 0xc84   : > { %v10116_v26 = vpack.c.bf16 %v9872_v9, %v9871_v57  ;;  %10953 = vst.msk [vmem:[%s13799_s5 + $0x30] sm:$0xff] %vm10946_vm1, %v10321_v12  ;;  %v14628_v57 = vld [vmem:[#allocation2_spill] sm:$0xff] }
 0xc85   : > { %8255 = vmatmul.bf16.gmra.mxu2 %v7938_v23  ;;  %9308 = vmatmul.bf16.gmra.mxu3 %v9027_v8 }
 0xc86   : > { %10360 = vmatmul.bf16.gmra.mxu0 %v10116_v26 }
 0xc88   : > { %v7163_v55 = vpop.f32.mrf.mxu1  ;;  %v8216_v10 = vpop.f32.mrf.mxu2 }
 0xc89   : > { %v9269_v3 = vpop.f32.mrf.mxu3  ;;  %v7713_v1 = vmax.f32 %v7163_v55, 0.0  ;;  %v8793_v48 = vmax.f32 %v8216_v10, 0.0 }
 0xc8a   : > { %v9873_v17 = vmax.f32 %v9269_v3, 0.0 }
 0xc8b   : > { %v10323_v34 = vpop.f32.mrf.mxu0  ;;  %7202 = vmatmul.bf16.gmra.mxu1 %v13435_v6 }
 0xc8c   : > { %10954 = vst.msk [vmem:[%s13799_s5 + $0x38] sm:$0xff] %vm10946_vm1, %v10323_v34 }
 0xc90   : > { %v7165_v13 = vpop.f32.mrf.mxu1  ;;  %v8218_v16 = vpop.f32.mrf.mxu2 }
 0xc91   : > { %v7714_v63 = vmax.f32 %v7165_v13, 0.0  ;;  %v8794_v49 = vmax.f32 %v8218_v16, 0.0  ;;  %v9271_v11 = vpop.f32.mrf.mxu3 }
 0xc92   : > { %v9874_v46 = vmax.f32 %v9271_v11, 0.0 }
 0xc93   : > { %v7939_v41 = vpack.c.bf16 %v7714_v63, %v7713_v1  ;;  %v9028_v39 = vpack.c.bf16 %v8794_v49, %v8793_v48  ;;  %v10326_v45 = vpop.f32.mrf.mxu0 }
 0xc94   : > { %v10117_v61 = vpack.c.bf16 %v9874_v46, %v9873_v17  ;;  %10955 = vst.msk [vmem:[%s13799_s5 + $0x40] sm:$0xff] %vm10946_vm1, %v10326_v45  ;;  %v14629_v46 = vld [vmem:[#allocation3_spill] sm:$0xff] }
 0xc95   : > { %8260 = vmatmul.bf16.gmra.mxu2 %v7939_v41  ;;  %9313 = vmatmul.bf16.gmra.mxu3 %v9028_v39 }
 0xc96   : > { %10365 = vmatmul.bf16.gmra.mxu0 %v10117_v61 }
 0xc98   : > { %v7168_v6 = vpop.f32.mrf.mxu1  ;;  %v8221_v18 = vpop.f32.mrf.mxu2 }
 0xc99   : > { %v9274_v38 = vpop.f32.mrf.mxu3  ;;  %v7715_v8 = vmax.f32 %v7168_v6, 0.0  ;;  %v8795_v12 = vmax.f32 %v8221_v18, 0.0 }
 0xc9a   : > { %v9875_v3 = vmax.f32 %v9274_v38, 0.0 }
 0xc9b   : > { %v10328_v28 = vpop.f32.mrf.mxu0  ;;  %7207 = vmatmul.bf16.gmra.mxu1 %v14628_v57 }
 0xc9c   : > { %10956 = vst.msk [vmem:[%s13799_s5 + $0x48] sm:$0xff] %vm10946_vm1, %v10328_v28 }
 0xca0   : > { %v7170_v9 = vpop.f32.mrf.mxu1  ;;  %v8223_v23 = vpop.f32.mrf.mxu2 }
 0xca1   : > { %v7716_v26 = vmax.f32 %v7170_v9, 0.0  ;;  %v8796_v55 = vmax.f32 %v8223_v23, 0.0  ;;  %v9276_v10 = vpop.f32.mrf.mxu3 }
 0xca2   : > { %v9876_v34 = vmax.f32 %v9276_v10, 0.0 }
 0xca3   : > { %v7940_v13 = vpack.c.bf16 %v7716_v26, %v7715_v8  ;;  %v9029_v16 = vpack.c.bf16 %v8796_v55, %v8795_v12  ;;  %v10331_v1 = vpop.f32.mrf.mxu0 }
 0xca4   : > { %v10118_v48 = vpack.c.bf16 %v9876_v34, %v9875_v3  ;;  %10957 = vst.msk [vmem:[%s13799_s5 + $0x50] sm:$0xff] %vm10946_vm1, %v10331_v1  ;;  %v14630_v34 = vld [vmem:[#allocation4_spill] sm:$0xff] }
 0xca5   : > { %8265 = vmatmul.bf16.gmra.mxu2 %v7940_v13  ;;  %9318 = vmatmul.bf16.gmra.mxu3 %v9029_v16 }
 0xca6   : > { %10370 = vmatmul.bf16.gmra.mxu0 %v10118_v48 }
 0xca8   : > { %v7173_v63 = vpop.f32.mrf.mxu1  ;;  %v8226_v49 = vpop.f32.mrf.mxu2 }
 0xca9   : > { %v9279_v11 = vpop.f32.mrf.mxu3  ;;  %v7717_v45 = vmax.f32 %v7173_v63, 0.0  ;;  %v8797_v61 = vmax.f32 %v8226_v49, 0.0 }
 0xcaa   : > { %v9877_v28 = vmax.f32 %v9279_v11, 0.0 }
 0xcab   : > { %v10333_v17 = vpop.f32.mrf.mxu0  ;;  %7212 = vmatmul.bf16.gmra.mxu1 %v14629_v46 }
 0xcac   : > { %10958 = vst.msk [vmem:[%s13799_s5 + $0x58] sm:$0xff] %vm10946_vm1, %v10333_v17 }
 0xcb0   : > { %v7175_v41 = vpop.f32.mrf.mxu1  ;;  %v8228_v39 = vpop.f32.mrf.mxu2 }
 0xcb1   : > { %v7718_v6 = vmax.f32 %v7175_v41, 0.0  ;;  %v8798_v18 = vmax.f32 %v8228_v39, 0.0  ;;  %v9281_v38 = vpop.f32.mrf.mxu3 }
 0xcb2   : > { %v9878_v57 = vmax.f32 %v9281_v38, 0.0 }
 0xcb3   : > { %v7941_v9 = vpack.c.bf16 %v7718_v6, %v7717_v45  ;;  %v9030_v23 = vpack.c.bf16 %v8798_v18, %v8797_v61  ;;  %v10336_v8 = vpop.f32.mrf.mxu0 }
 0xcb4   : > { %v10119_v12 = vpack.c.bf16 %v9878_v57, %v9877_v28  ;;  %10959 = vst.msk [vmem:[%s13799_s5 + $0x60] sm:$0xff] %vm10946_vm1, %v10336_v8  ;;  %v14631_v57 = vld [vmem:[#allocation5_spill] sm:$0xff] }
 0xcb5   : > { %8270 = vmatmul.bf16.gmra.mxu2 %v7941_v9  ;;  %9323 = vmatmul.bf16.gmra.mxu3 %v9030_v23 }
 0xcb6   : > { %10375 = vmatmul.bf16.gmra.mxu0 %v10119_v12 }
 0xcb8   : > { %v7178_v26 = vpop.f32.mrf.mxu1  ;;  %v8231_v55 = vpop.f32.mrf.mxu2 }
 0xcb9   : > { %v9284_v10 = vpop.f32.mrf.mxu3  ;;  %v7719_v1 = vmax.f32 %v7178_v26, 0.0  ;;  %v8799_v48 = vmax.f32 %v8231_v55, 0.0 }
 0xcba   : > { %v9879_v17 = vmax.f32 %v9284_v10, 0.0 }
 0xcbb   : > { %v10338_v3 = vpop.f32.mrf.mxu0  ;;  %7217 = vmatmul.bf16.gmra.mxu1 %v14630_v34 }
 0xcbc   : > { %10960 = vst.msk [vmem:[%s13799_s5 + $0x68] sm:$0xff] %vm10946_vm1, %v10338_v3 }
 0xcc0   : > { %v7180_v13 = vpop.f32.mrf.mxu1  ;;  %v8233_v16 = vpop.f32.mrf.mxu2 }
 0xcc1   : > { %v7720_v63 = vmax.f32 %v7180_v13, 0.0  ;;  %v8800_v49 = vmax.f32 %v8233_v16, 0.0  ;;  %v9286_v11 = vpop.f32.mrf.mxu3 }
 0xcc2   : > { %v9880_v46 = vmax.f32 %v9286_v11, 0.0 }
 0xcc3   : > { %v7942_v41 = vpack.c.bf16 %v7720_v63, %v7719_v1  ;;  %v9031_v39 = vpack.c.bf16 %v8800_v49, %v8799_v48  ;;  %v10341_v45 = vpop.f32.mrf.mxu0 }
 0xcc4   : > { %v10120_v61 = vpack.c.bf16 %v9880_v46, %v9879_v17  ;;  %10961 = vst.msk [vmem:[%s13799_s5 + $0x70] sm:$0xff] %vm10946_vm1, %v10341_v45  ;;  %v14632_v46 = vld [vmem:[#allocation6_spill] sm:$0xff] }
 0xcc5   : > { %8275 = vmatmul.bf16.gmra.mxu2 %v7942_v41  ;;  %9328 = vmatmul.bf16.gmra.mxu3 %v9031_v39 }
 0xcc6   : > { %10380 = vmatmul.bf16.gmra.mxu0 %v10120_v61 }
 0xcc8   : > { %v7183_v6 = vpop.f32.mrf.mxu1  ;;  %v8236_v18 = vpop.f32.mrf.mxu2 }
 0xcc9   : > { %v9289_v38 = vpop.f32.mrf.mxu3  ;;  %v7721_v8 = vmax.f32 %v7183_v6, 0.0  ;;  %v8801_v12 = vmax.f32 %v8236_v18, 0.0 }
 0xcca   : > { %v9881_v3 = vmax.f32 %v9289_v38, 0.0 }
 0xccb   : > { %v10343_v28 = vpop.f32.mrf.mxu0  ;;  %7222 = vmatmul.bf16.gmra.mxu1 %v14631_v57 }
 0xccc   : > { %10962 = vst.msk [vmem:[%s13799_s5 + $0x78] sm:$0xff] %vm10946_vm1, %v10343_v28 }
 0xcd0   : > { %v7185_v9 = vpop.f32.mrf.mxu1  ;;  %v8238_v23 = vpop.f32.mrf.mxu2 }
 0xcd1   : > { %v7722_v26 = vmax.f32 %v7185_v9, 0.0  ;;  %v8802_v55 = vmax.f32 %v8238_v23, 0.0  ;;  %v9291_v10 = vpop.f32.mrf.mxu3 }
 0xcd2   : > { %v9882_v34 = vmax.f32 %v9291_v10, 0.0 }
 0xcd3   : > { %v7943_v13 = vpack.c.bf16 %v7722_v26, %v7721_v8  ;;  %v9032_v16 = vpack.c.bf16 %v8802_v55, %v8801_v12  ;;  %v10346_v1 = vpop.f32.mrf.mxu0 }
 0xcd4   : > { %v10121_v48 = vpack.c.bf16 %v9882_v34, %v9881_v3  ;;  %10963 = vst.msk [vmem:[%s13799_s5 + $0x80] sm:$0xff] %vm10946_vm1, %v10346_v1  ;;  %v14633_v34 = vld [vmem:[#allocation7_spill] sm:$0xff] }
 0xcd5   : > { %8280 = vmatmul.bf16.gmra.mxu2 %v7943_v13  ;;  %9333 = vmatmul.bf16.gmra.mxu3 %v9032_v16 }
 0xcd6   : > { %10385 = vmatmul.bf16.gmra.mxu0 %v10121_v48 }
 0xcd8   : > { %v7188_v63 = vpop.f32.mrf.mxu1  ;;  %v8241_v49 = vpop.f32.mrf.mxu2 }
 0xcd9   : > { %v9294_v11 = vpop.f32.mrf.mxu3  ;;  %v7723_v45 = vmax.f32 %v7188_v63, 0.0  ;;  %v8803_v61 = vmax.f32 %v8241_v49, 0.0 }
 0xcda   : > { %v9883_v28 = vmax.f32 %v9294_v11, 0.0 }
 0xcdb   : > { %v10348_v17 = vpop.f32.mrf.mxu0  ;;  %7227 = vmatmul.bf16.gmra.mxu1 %v14632_v46 }
 0xcdc   : > { %10964 = vst.msk [vmem:[%s13799_s5 + $0x88] sm:$0xff] %vm10946_vm1, %v10348_v17 }
 0xce0   : > { %v7190_v41 = vpop.f32.mrf.mxu1  ;;  %v8243_v39 = vpop.f32.mrf.mxu2 }
 0xce1   : > { %v7724_v6 = vmax.f32 %v7190_v41, 0.0  ;;  %v8804_v18 = vmax.f32 %v8243_v39, 0.0  ;;  %v9296_v38 = vpop.f32.mrf.mxu3 }
 0xce2   : > { %v9884_v57 = vmax.f32 %v9296_v38, 0.0 }
 0xce3   : > { %v7944_v9 = vpack.c.bf16 %v7724_v6, %v7723_v45  ;;  %v9033_v23 = vpack.c.bf16 %v8804_v18, %v8803_v61  ;;  %v10351_v8 = vpop.f32.mrf.mxu0 }
 0xce4   : > { %v10122_v12 = vpack.c.bf16 %v9884_v57, %v9883_v28  ;;  %10965 = vst.msk [vmem:[%s13799_s5 + $0x90] sm:$0xff] %vm10946_vm1, %v10351_v8  ;;  %v14634_v57 = vld [vmem:[#allocation8_spill] sm:$0xff] }
 0xce5   : > { %8285 = vmatmul.bf16.gmra.mxu2 %v7944_v9  ;;  %9338 = vmatmul.bf16.gmra.mxu3 %v9033_v23 }
 0xce6   : > { %10390 = vmatmul.bf16.gmra.mxu0 %v10122_v12 }
 0xce8   : > { %v7193_v26 = vpop.f32.mrf.mxu1  ;;  %v8246_v55 = vpop.f32.mrf.mxu2 }
 0xce9   : > { %v9299_v10 = vpop.f32.mrf.mxu3  ;;  %v7725_v1 = vmax.f32 %v7193_v26, 0.0  ;;  %v8805_v48 = vmax.f32 %v8246_v55, 0.0 }
 0xcea   : > { %v9885_v17 = vmax.f32 %v9299_v10, 0.0 }
 0xceb   : > { %v10353_v3 = vpop.f32.mrf.mxu0  ;;  %7232 = vmatmul.bf16.gmra.mxu1 %v14633_v34 }
 0xcec   : > { %10966 = vst.msk [vmem:[%s13799_s5 + $0x98] sm:$0xff] %vm10946_vm1, %v10353_v3 }
 0xcf0   : > { %v7195_v13 = vpop.f32.mrf.mxu1  ;;  %v8248_v16 = vpop.f32.mrf.mxu2 }
 0xcf1   : > { %v7726_v63 = vmax.f32 %v7195_v13, 0.0  ;;  %v8806_v49 = vmax.f32 %v8248_v16, 0.0  ;;  %v9301_v11 = vpop.f32.mrf.mxu3 }
 0xcf2   : > { %v9886_v46 = vmax.f32 %v9301_v11, 0.0 }
 0xcf3   : > { %v7945_v41 = vpack.c.bf16 %v7726_v63, %v7725_v1  ;;  %v9034_v39 = vpack.c.bf16 %v8806_v49, %v8805_v48  ;;  %v10356_v45 = vpop.f32.mrf.mxu0 }
 0xcf4   : > { %v10123_v61 = vpack.c.bf16 %v9886_v46, %v9885_v17  ;;  %10967 = vst.msk [vmem:[%s13799_s5 + $0xa0] sm:$0xff] %vm10946_vm1, %v10356_v45  ;;  %v14635_v46 = vld [vmem:[#allocation10_spill] sm:$0xff] }
 0xcf5   : > { %8290 = vmatmul.bf16.gmra.mxu2 %v7945_v41  ;;  %9343 = vmatmul.bf16.gmra.mxu3 %v9034_v39 }
 0xcf6   : > { %10395 = vmatmul.bf16.gmra.mxu0 %v10123_v61 }
 0xcf8   : > { %v7198_v6 = vpop.f32.mrf.mxu1  ;;  %v8251_v18 = vpop.f32.mrf.mxu2 }
 0xcf9   : > { %v9304_v38 = vpop.f32.mrf.mxu3  ;;  %v7727_v8 = vmax.f32 %v7198_v6, 0.0  ;;  %v8807_v12 = vmax.f32 %v8251_v18, 0.0 }
 0xcfa   : > { %v9887_v3 = vmax.f32 %v9304_v38, 0.0 }
 0xcfb   : > { %v10358_v28 = vpop.f32.mrf.mxu0  ;;  %7237 = vmatmul.bf16.gmra.mxu1 %v14634_v57 }
 0xcfc   : > { %10968 = vst.msk [vmem:[%s13799_s5 + $0xa8] sm:$0xff] %vm10946_vm1, %v10358_v28 }
 0xd00   : > { %v7200_v9 = vpop.f32.mrf.mxu1  ;;  %v8253_v23 = vpop.f32.mrf.mxu2 }
 0xd01   : > { %v7728_v26 = vmax.f32 %v7200_v9, 0.0  ;;  %v8808_v55 = vmax.f32 %v8253_v23, 0.0  ;;  %v9306_v10 = vpop.f32.mrf.mxu3 }
 0xd02   : > { %v9888_v34 = vmax.f32 %v9306_v10, 0.0 }
 0xd03   : > { %v7946_v13 = vpack.c.bf16 %v7728_v26, %v7727_v8  ;;  %v9035_v16 = vpack.c.bf16 %v8808_v55, %v8807_v12  ;;  %v10361_v1 = vpop.f32.mrf.mxu0 }
 0xd04   : > { %v10124_v48 = vpack.c.bf16 %v9888_v34, %v9887_v3  ;;  %10969 = vst.msk [vmem:[%s13799_s5 + $0xb0] sm:$0xff] %vm10946_vm1, %v10361_v1  ;;  %v14636_v34 = vld [vmem:[#allocation12_spill] sm:$0xff] }
 0xd05   : > { %8295 = vmatmul.bf16.gmra.mxu2 %v7946_v13  ;;  %9348 = vmatmul.bf16.gmra.mxu3 %v9035_v16 }
 0xd06   : > { %10400 = vmatmul.bf16.gmra.mxu0 %v10124_v48 }
 0xd08   : > { %v7203_v63 = vpop.f32.mrf.mxu1  ;;  %v8256_v49 = vpop.f32.mrf.mxu2 }
 0xd09   : > { %v9309_v11 = vpop.f32.mrf.mxu3  ;;  %v7729_v45 = vmax.f32 %v7203_v63, 0.0  ;;  %v8809_v61 = vmax.f32 %v8256_v49, 0.0 }
 0xd0a   : > { %v9889_v28 = vmax.f32 %v9309_v11, 0.0 }
 0xd0b   : > { %v10363_v17 = vpop.f32.mrf.mxu0  ;;  %7242 = vmatmul.bf16.gmra.mxu1 %v14635_v46 }
 0xd0c   : > { %10970 = vst.msk [vmem:[%s13799_s5 + $0xb8] sm:$0xff] %vm10946_vm1, %v10363_v17 }
 0xd10   : > { %v7205_v41 = vpop.f32.mrf.mxu1  ;;  %v8258_v39 = vpop.f32.mrf.mxu2 }
 0xd11   : > { %v7730_v6 = vmax.f32 %v7205_v41, 0.0  ;;  %v8810_v18 = vmax.f32 %v8258_v39, 0.0  ;;  %v9311_v38 = vpop.f32.mrf.mxu3 }
 0xd12   : > { %v9890_v57 = vmax.f32 %v9311_v38, 0.0 }
 0xd13   : > { %v7947_v9 = vpack.c.bf16 %v7730_v6, %v7729_v45  ;;  %v9036_v23 = vpack.c.bf16 %v8810_v18, %v8809_v61  ;;  %v10366_v8 = vpop.f32.mrf.mxu0 }
 0xd14   : > { %v10125_v12 = vpack.c.bf16 %v9890_v57, %v9889_v28  ;;  %10971 = vst.msk [vmem:[%s13799_s5 + $0xc0] sm:$0xff] %vm10946_vm1, %v10366_v8  ;;  %v14637_v57 = vld [vmem:[#allocation14_spill] sm:$0xff] }
 0xd15   : > { %8300 = vmatmul.bf16.gmra.mxu2 %v7947_v9  ;;  %9353 = vmatmul.bf16.gmra.mxu3 %v9036_v23 }
 0xd16   : > { %10405 = vmatmul.bf16.gmra.mxu0 %v10125_v12 }
 0xd18   : > { %v7208_v26 = vpop.f32.mrf.mxu1  ;;  %v8261_v55 = vpop.f32.mrf.mxu2 }
 0xd19   : > { %v9314_v10 = vpop.f32.mrf.mxu3  ;;  %v7731_v1 = vmax.f32 %v7208_v26, 0.0  ;;  %v8811_v48 = vmax.f32 %v8261_v55, 0.0 }
 0xd1a   : > { %v9891_v17 = vmax.f32 %v9314_v10, 0.0 }
 0xd1b   : > { %v10368_v3 = vpop.f32.mrf.mxu0  ;;  %7247 = vmatmul.bf16.gmra.mxu1 %v14636_v34 }
 0xd1c   : > { %10972 = vst.msk [vmem:[%s13799_s5 + $0xc8] sm:$0xff] %vm10946_vm1, %v10368_v3 }
 0xd20   : > { %v7210_v13 = vpop.f32.mrf.mxu1  ;;  %v8263_v16 = vpop.f32.mrf.mxu2 }
 0xd21   : > { %v7732_v63 = vmax.f32 %v7210_v13, 0.0  ;;  %v8812_v49 = vmax.f32 %v8263_v16, 0.0  ;;  %v9316_v11 = vpop.f32.mrf.mxu3 }
 0xd22   : > { %v9892_v46 = vmax.f32 %v9316_v11, 0.0 }
 0xd23   : > { %v7948_v41 = vpack.c.bf16 %v7732_v63, %v7731_v1  ;;  %v9037_v39 = vpack.c.bf16 %v8812_v49, %v8811_v48  ;;  %v10371_v45 = vpop.f32.mrf.mxu0 }
 0xd24   : > { %v10126_v61 = vpack.c.bf16 %v9892_v46, %v9891_v17  ;;  %10973 = vst.msk [vmem:[%s13799_s5 + $0xd0] sm:$0xff] %vm10946_vm1, %v10371_v45  ;;  %v14638_v46 = vld [vmem:[#allocation16_spill] sm:$0xff] }
 0xd25   : > { %8305 = vmatmul.bf16.gmra.mxu2 %v7948_v41  ;;  %9358 = vmatmul.bf16.gmra.mxu3 %v9037_v39 }
 0xd26   : > { %10410 = vmatmul.bf16.gmra.mxu0 %v10126_v61 }
 0xd28   : > { %v7213_v6 = vpop.f32.mrf.mxu1  ;;  %v8266_v18 = vpop.f32.mrf.mxu2 }
 0xd29   : > { %v9319_v38 = vpop.f32.mrf.mxu3  ;;  %v7733_v8 = vmax.f32 %v7213_v6, 0.0  ;;  %v8813_v12 = vmax.f32 %v8266_v18, 0.0 }
 0xd2a   : > { %v9893_v3 = vmax.f32 %v9319_v38, 0.0 }
 0xd2b   : > { %v10373_v28 = vpop.f32.mrf.mxu0  ;;  %7252 = vmatmul.bf16.gmra.mxu1 %v14637_v57 }
 0xd2c   : > { %10974 = vst.msk [vmem:[%s13799_s5 + $0xd8] sm:$0xff] %vm10946_vm1, %v10373_v28 }
 0xd30   : > { %v7215_v9 = vpop.f32.mrf.mxu1  ;;  %v8268_v23 = vpop.f32.mrf.mxu2 }
 0xd31   : > { %v7734_v26 = vmax.f32 %v7215_v9, 0.0  ;;  %v8814_v55 = vmax.f32 %v8268_v23, 0.0  ;;  %v9321_v10 = vpop.f32.mrf.mxu3 }
 0xd32   : > { %v9894_v34 = vmax.f32 %v9321_v10, 0.0 }
 0xd33   : > { %v7949_v13 = vpack.c.bf16 %v7734_v26, %v7733_v8  ;;  %v9038_v16 = vpack.c.bf16 %v8814_v55, %v8813_v12  ;;  %v10376_v1 = vpop.f32.mrf.mxu0 }
 0xd34   : > { %v10127_v48 = vpack.c.bf16 %v9894_v34, %v9893_v3  ;;  %10975 = vst.msk [vmem:[%s13799_s5 + $0xe0] sm:$0xff] %vm10946_vm1, %v10376_v1  ;;  %v14639_v34 = vld [vmem:[#allocation18_spill] sm:$0xff] }
 0xd35   : > { %8310 = vmatmul.bf16.gmra.mxu2 %v7949_v13  ;;  %9363 = vmatmul.bf16.gmra.mxu3 %v9038_v16 }
 0xd36   : > { %10415 = vmatmul.bf16.gmra.mxu0 %v10127_v48 }
 0xd38   : > { %v7218_v63 = vpop.f32.mrf.mxu1  ;;  %v8271_v49 = vpop.f32.mrf.mxu2 }
 0xd39   : > { %v9324_v11 = vpop.f32.mrf.mxu3  ;;  %v7735_v45 = vmax.f32 %v7218_v63, 0.0  ;;  %v8815_v61 = vmax.f32 %v8271_v49, 0.0 }
 0xd3a   : > { %v9895_v28 = vmax.f32 %v9324_v11, 0.0 }
 0xd3b   : > { %v10378_v17 = vpop.f32.mrf.mxu0  ;;  %7257 = vmatmul.bf16.gmra.mxu1 %v14638_v46 }
 0xd3c   : > { %10976 = vst.msk [vmem:[%s13799_s5 + $0xe8] sm:$0xff] %vm10946_vm1, %v10378_v17 }
 0xd40   : > { %v7220_v41 = vpop.f32.mrf.mxu1  ;;  %v8273_v39 = vpop.f32.mrf.mxu2 }
 0xd41   : > { %v7736_v6 = vmax.f32 %v7220_v41, 0.0  ;;  %v8816_v18 = vmax.f32 %v8273_v39, 0.0  ;;  %v9326_v38 = vpop.f32.mrf.mxu3 }
 0xd42   : > { %v9896_v57 = vmax.f32 %v9326_v38, 0.0 }
 0xd43   : > { %v7950_v9 = vpack.c.bf16 %v7736_v6, %v7735_v45  ;;  %v9039_v23 = vpack.c.bf16 %v8816_v18, %v8815_v61  ;;  %v10381_v8 = vpop.f32.mrf.mxu0 }
 0xd44   : > { %v10128_v12 = vpack.c.bf16 %v9896_v57, %v9895_v28  ;;  %10977 = vst.msk [vmem:[%s13799_s5 + $0xf0] sm:$0xff] %vm10946_vm1, %v10381_v8  ;;  %v14640_v57 = vld [vmem:[#allocation20_spill] sm:$0xff] }
 0xd45   : > { %8315 = vmatmul.bf16.gmra.mxu2 %v7950_v9  ;;  %9368 = vmatmul.bf16.gmra.mxu3 %v9039_v23 }
 0xd46   : > { %10420 = vmatmul.bf16.gmra.mxu0 %v10128_v12 }
 0xd48   : > { %v7223_v26 = vpop.f32.mrf.mxu1  ;;  %v8276_v55 = vpop.f32.mrf.mxu2 }
 0xd49   : > { %v9329_v10 = vpop.f32.mrf.mxu3  ;;  %v7737_v1 = vmax.f32 %v7223_v26, 0.0  ;;  %v8817_v48 = vmax.f32 %v8276_v55, 0.0 }
 0xd4a   : > { %v9897_v17 = vmax.f32 %v9329_v10, 0.0 }
 0xd4b   : > { %v10383_v3 = vpop.f32.mrf.mxu0  ;;  %7262 = vmatmul.bf16.gmra.mxu1 %v14639_v34 }
 0xd4c   : > { %10978 = vst.msk [vmem:[%s13799_s5 + $0xf8] sm:$0xff] %vm10946_vm1, %v10383_v3 }
 0xd50   : > { %v7225_v13 = vpop.f32.mrf.mxu1  ;;  %v8278_v16 = vpop.f32.mrf.mxu2 }
 0xd51   : > { %v7738_v63 = vmax.f32 %v7225_v13, 0.0  ;;  %v8818_v49 = vmax.f32 %v8278_v16, 0.0  ;;  %v9331_v11 = vpop.f32.mrf.mxu3 }
 0xd52   : > { %v9898_v46 = vmax.f32 %v9331_v11, 0.0 }
 0xd53   : > { %v7951_v41 = vpack.c.bf16 %v7738_v63, %v7737_v1  ;;  %v9040_v39 = vpack.c.bf16 %v8818_v49, %v8817_v48  ;;  %v10386_v45 = vpop.f32.mrf.mxu0 }
 0xd54   : > { %v10129_v61 = vpack.c.bf16 %v9898_v46, %v9897_v17  ;;  %10979 = vst.msk [vmem:[%s13799_s5 + $0x100] sm:$0xff] %vm10946_vm1, %v10386_v45  ;;  %v14641_v46 = vld [vmem:[#allocation22_spill] sm:$0xff] }
 0xd55   : > { %8320 = vmatmul.bf16.gmra.mxu2 %v7951_v41  ;;  %9373 = vmatmul.bf16.gmra.mxu3 %v9040_v39 }
 0xd56   : > { %10425 = vmatmul.bf16.gmra.mxu0 %v10129_v61 }
 0xd58   : > { %v7228_v6 = vpop.f32.mrf.mxu1  ;;  %v8281_v18 = vpop.f32.mrf.mxu2 }
 0xd59   : > { %v9334_v38 = vpop.f32.mrf.mxu3  ;;  %v7739_v8 = vmax.f32 %v7228_v6, 0.0  ;;  %v8819_v12 = vmax.f32 %v8281_v18, 0.0 }
 0xd5a   : > { %v9899_v3 = vmax.f32 %v9334_v38, 0.0 }
 0xd5b   : > { %v10388_v28 = vpop.f32.mrf.mxu0  ;;  %7267 = vmatmul.bf16.gmra.mxu1 %v14640_v57 }
 0xd5c   : > { %10980 = vst.msk [vmem:[%s13799_s5 + $0x108] sm:$0xff] %vm10946_vm1, %v10388_v28 }
 0xd60   : > { %v7230_v9 = vpop.f32.mrf.mxu1  ;;  %v8283_v23 = vpop.f32.mrf.mxu2 }
 0xd61   : > { %v7740_v26 = vmax.f32 %v7230_v9, 0.0  ;;  %v8820_v55 = vmax.f32 %v8283_v23, 0.0  ;;  %v9336_v10 = vpop.f32.mrf.mxu3 }
 0xd62   : > { %v9900_v34 = vmax.f32 %v9336_v10, 0.0 }
 0xd63   : > { %v7952_v13 = vpack.c.bf16 %v7740_v26, %v7739_v8  ;;  %v9041_v16 = vpack.c.bf16 %v8820_v55, %v8819_v12  ;;  %v10391_v1 = vpop.f32.mrf.mxu0 }
 0xd64   : > { %v10130_v48 = vpack.c.bf16 %v9900_v34, %v9899_v3  ;;  %10981 = vst.msk [vmem:[%s13799_s5 + $0x110] sm:$0xff] %vm10946_vm1, %v10391_v1  ;;  %v14642_v34 = vld [vmem:[#allocation24_spill] sm:$0xff] }
 0xd65   : > { %8325 = vmatmul.bf16.gmra.mxu2 %v7952_v13  ;;  %9378 = vmatmul.bf16.gmra.mxu3 %v9041_v16 }
 0xd66   : > { %10430 = vmatmul.bf16.gmra.mxu0 %v10130_v48 }
 0xd68   : > { %v7233_v63 = vpop.f32.mrf.mxu1  ;;  %v8286_v49 = vpop.f32.mrf.mxu2 }
 0xd69   : > { %v9339_v11 = vpop.f32.mrf.mxu3  ;;  %v7741_v45 = vmax.f32 %v7233_v63, 0.0  ;;  %v8821_v61 = vmax.f32 %v8286_v49, 0.0 }
 0xd6a   : > { %v9901_v28 = vmax.f32 %v9339_v11, 0.0 }
 0xd6b   : > { %v10393_v17 = vpop.f32.mrf.mxu0  ;;  %7272 = vmatmul.bf16.gmra.mxu1 %v14641_v46 }
 0xd6c   : > { %10982 = vst.msk [vmem:[%s13799_s5 + $0x118] sm:$0xff] %vm10946_vm1, %v10393_v17 }
 0xd70   : > { %v7235_v41 = vpop.f32.mrf.mxu1  ;;  %v8288_v39 = vpop.f32.mrf.mxu2 }
 0xd71   : > { %v7742_v6 = vmax.f32 %v7235_v41, 0.0  ;;  %v8822_v18 = vmax.f32 %v8288_v39, 0.0  ;;  %v9341_v38 = vpop.f32.mrf.mxu3 }
 0xd72   : > { %v9902_v57 = vmax.f32 %v9341_v38, 0.0 }
 0xd73   : > { %v7953_v9 = vpack.c.bf16 %v7742_v6, %v7741_v45  ;;  %v9042_v23 = vpack.c.bf16 %v8822_v18, %v8821_v61  ;;  %v10396_v8 = vpop.f32.mrf.mxu0 }
 0xd74   : > { %v10131_v12 = vpack.c.bf16 %v9902_v57, %v9901_v28  ;;  %10983 = vst.msk [vmem:[%s13799_s5 + $0x120] sm:$0xff] %vm10946_vm1, %v10396_v8  ;;  %v14643_v57 = vld [vmem:[#allocation26_spill] sm:$0xff] }
 0xd75   : > { %8330 = vmatmul.bf16.gmra.mxu2 %v7953_v9  ;;  %9383 = vmatmul.bf16.gmra.mxu3 %v9042_v23 }
 0xd76   : > { %10435 = vmatmul.bf16.gmra.mxu0 %v10131_v12 }
 0xd78   : > { %v7238_v26 = vpop.f32.mrf.mxu1  ;;  %v8291_v55 = vpop.f32.mrf.mxu2 }
 0xd79   : > { %v9344_v10 = vpop.f32.mrf.mxu3  ;;  %v7743_v1 = vmax.f32 %v7238_v26, 0.0  ;;  %v8823_v48 = vmax.f32 %v8291_v55, 0.0 }
 0xd7a   : > { %v9903_v17 = vmax.f32 %v9344_v10, 0.0 }
 0xd7b   : > { %v10398_v3 = vpop.f32.mrf.mxu0  ;;  %7277 = vmatmul.bf16.gmra.mxu1 %v14642_v34 }
 0xd7c   : > { %10984 = vst.msk [vmem:[%s13799_s5 + $0x128] sm:$0xff] %vm10946_vm1, %v10398_v3 }
 0xd80   : > { %v7240_v13 = vpop.f32.mrf.mxu1  ;;  %v8293_v16 = vpop.f32.mrf.mxu2 }
 0xd81   : > { %v7744_v63 = vmax.f32 %v7240_v13, 0.0  ;;  %v8824_v49 = vmax.f32 %v8293_v16, 0.0  ;;  %v9346_v11 = vpop.f32.mrf.mxu3 }
 0xd82   : > { %v9904_v46 = vmax.f32 %v9346_v11, 0.0 }
 0xd83   : > { %v7954_v41 = vpack.c.bf16 %v7744_v63, %v7743_v1  ;;  %v9043_v39 = vpack.c.bf16 %v8824_v49, %v8823_v48  ;;  %v10401_v45 = vpop.f32.mrf.mxu0 }
 0xd84   : > { %v10132_v61 = vpack.c.bf16 %v9904_v46, %v9903_v17  ;;  %10985 = vst.msk [vmem:[%s13799_s5 + $0x130] sm:$0xff] %vm10946_vm1, %v10401_v45  ;;  %v14644_v46 = vld [vmem:[#allocation27_spill] sm:$0xff] }
 0xd85   : > { %8335 = vmatmul.bf16.gmra.mxu2 %v7954_v41  ;;  %9388 = vmatmul.bf16.gmra.mxu3 %v9043_v39 }
 0xd86   : > { %10440 = vmatmul.bf16.gmra.mxu0 %v10132_v61 }
 0xd88   : > { %v7243_v6 = vpop.f32.mrf.mxu1  ;;  %v8296_v18 = vpop.f32.mrf.mxu2 }
 0xd89   : > { %v9349_v38 = vpop.f32.mrf.mxu3  ;;  %v7745_v8 = vmax.f32 %v7243_v6, 0.0  ;;  %v8825_v12 = vmax.f32 %v8296_v18, 0.0 }
 0xd8a   : > { %v9905_v3 = vmax.f32 %v9349_v38, 0.0 }
 0xd8b   : > { %v10403_v28 = vpop.f32.mrf.mxu0  ;;  %7282 = vmatmul.bf16.gmra.mxu1 %v14643_v57 }
 0xd8c   : > { %10986 = vst.msk [vmem:[%s13799_s5 + $0x138] sm:$0xff] %vm10946_vm1, %v10403_v28 }
 0xd90   : > { %v7245_v9 = vpop.f32.mrf.mxu1  ;;  %v8298_v23 = vpop.f32.mrf.mxu2 }
 0xd91   : > { %v7746_v26 = vmax.f32 %v7245_v9, 0.0  ;;  %v8826_v55 = vmax.f32 %v8298_v23, 0.0  ;;  %v9351_v10 = vpop.f32.mrf.mxu3 }
 0xd92   : > { %v9906_v34 = vmax.f32 %v9351_v10, 0.0 }
 0xd93   : > { %v7955_v13 = vpack.c.bf16 %v7746_v26, %v7745_v8  ;;  %v9044_v16 = vpack.c.bf16 %v8826_v55, %v8825_v12  ;;  %v10406_v1 = vpop.f32.mrf.mxu0 }
 0xd94   : > { %v10133_v48 = vpack.c.bf16 %v9906_v34, %v9905_v3  ;;  %10987 = vst.msk [vmem:[%s13799_s5 + $0x140] sm:$0xff] %vm10946_vm1, %v10406_v1  ;;  %v14645_v34 = vld [vmem:[#allocation29_spill] sm:$0xff] }
 0xd95   : > { %8340 = vmatmul.bf16.gmra.mxu2 %v7955_v13  ;;  %9393 = vmatmul.bf16.gmra.mxu3 %v9044_v16 }
 0xd96   : > { %10445 = vmatmul.bf16.gmra.mxu0 %v10133_v48 }
 0xd98   : > { %v7248_v63 = vpop.f32.mrf.mxu1  ;;  %v8301_v49 = vpop.f32.mrf.mxu2 }
 0xd99   : > { %v9354_v11 = vpop.f32.mrf.mxu3  ;;  %v7747_v45 = vmax.f32 %v7248_v63, 0.0  ;;  %v8827_v61 = vmax.f32 %v8301_v49, 0.0 }
 0xd9a   : > { %v9907_v28 = vmax.f32 %v9354_v11, 0.0 }
 0xd9b   : > { %v10408_v17 = vpop.f32.mrf.mxu0  ;;  %7287 = vmatmul.bf16.gmra.mxu1 %v14644_v46 }
 0xd9c   : > { %10988 = vst.msk [vmem:[%s13799_s5 + $0x148] sm:$0xff] %vm10946_vm1, %v10408_v17 }
 0xda0   : > { %v7250_v41 = vpop.f32.mrf.mxu1  ;;  %v8303_v39 = vpop.f32.mrf.mxu2 }
 0xda1   : > { %v7748_v6 = vmax.f32 %v7250_v41, 0.0  ;;  %v8828_v18 = vmax.f32 %v8303_v39, 0.0  ;;  %v9356_v38 = vpop.f32.mrf.mxu3 }
 0xda2   : > { %v9908_v57 = vmax.f32 %v9356_v38, 0.0 }
 0xda3   : > { %v7956_v9 = vpack.c.bf16 %v7748_v6, %v7747_v45  ;;  %v9045_v23 = vpack.c.bf16 %v8828_v18, %v8827_v61  ;;  %v10411_v8 = vpop.f32.mrf.mxu0 }
 0xda4   : > { %v10134_v12 = vpack.c.bf16 %v9908_v57, %v9907_v28  ;;  %10989 = vst.msk [vmem:[%s13799_s5 + $0x150] sm:$0xff] %vm10946_vm1, %v10411_v8  ;;  %v14646_v57 = vld [vmem:[#allocation30_spill] sm:$0xff] }
 0xda5   : > { %8345 = vmatmul.bf16.gmra.mxu2 %v7956_v9  ;;  %9398 = vmatmul.bf16.gmra.mxu3 %v9045_v23 }
 0xda6   : > { %10450 = vmatmul.bf16.gmra.mxu0 %v10134_v12 }
 0xda8   : > { %v7253_v26 = vpop.f32.mrf.mxu1  ;;  %v8306_v55 = vpop.f32.mrf.mxu2 }
 0xda9   : > { %v9359_v10 = vpop.f32.mrf.mxu3  ;;  %v7749_v1 = vmax.f32 %v7253_v26, 0.0  ;;  %v8829_v48 = vmax.f32 %v8306_v55, 0.0 }
 0xdaa   : > { %v9909_v17 = vmax.f32 %v9359_v10, 0.0 }
 0xdab   : > { %v10413_v3 = vpop.f32.mrf.mxu0  ;;  %7292 = vmatmul.bf16.gmra.mxu1 %v14645_v34 }
 0xdac   : > { %10990 = vst.msk [vmem:[%s13799_s5 + $0x158] sm:$0xff] %vm10946_vm1, %v10413_v3 }
 0xdb0   : > { %v7255_v13 = vpop.f32.mrf.mxu1  ;;  %v8308_v16 = vpop.f32.mrf.mxu2 }
 0xdb1   : > { %v7750_v63 = vmax.f32 %v7255_v13, 0.0  ;;  %v8830_v49 = vmax.f32 %v8308_v16, 0.0  ;;  %v9361_v11 = vpop.f32.mrf.mxu3 }
 0xdb2   : > { %v9910_v46 = vmax.f32 %v9361_v11, 0.0 }
 0xdb3   : > { %v7957_v41 = vpack.c.bf16 %v7750_v63, %v7749_v1  ;;  %v9046_v39 = vpack.c.bf16 %v8830_v49, %v8829_v48  ;;  %v10416_v45 = vpop.f32.mrf.mxu0 }
 0xdb4   : > { %v10135_v61 = vpack.c.bf16 %v9910_v46, %v9909_v17  ;;  %10991 = vst.msk [vmem:[%s13799_s5 + $0x160] sm:$0xff] %vm10946_vm1, %v10416_v45  ;;  %v14647_v46 = vld [vmem:[#allocation32_spill] sm:$0xff] }
 0xdb5   : > { %8350 = vmatmul.bf16.gmra.mxu2 %v7957_v41  ;;  %9403 = vmatmul.bf16.gmra.mxu3 %v9046_v39 }
 0xdb6   : > { %10455 = vmatmul.bf16.gmra.mxu0 %v10135_v61 }
 0xdb8   : > { %v7258_v6 = vpop.f32.mrf.mxu1  ;;  %v8311_v18 = vpop.f32.mrf.mxu2 }
 0xdb9   : > { %v9364_v38 = vpop.f32.mrf.mxu3  ;;  %v7751_v8 = vmax.f32 %v7258_v6, 0.0  ;;  %v8831_v12 = vmax.f32 %v8311_v18, 0.0 }
 0xdba   : > { %v9911_v3 = vmax.f32 %v9364_v38, 0.0 }
 0xdbb   : > { %v10418_v28 = vpop.f32.mrf.mxu0  ;;  %7297 = vmatmul.bf16.gmra.mxu1 %v14646_v57 }
 0xdbc   : > { %10992 = vst.msk [vmem:[%s13799_s5 + $0x168] sm:$0xff] %vm10946_vm1, %v10418_v28 }
 0xdc0   : > { %v7260_v9 = vpop.f32.mrf.mxu1  ;;  %v8313_v23 = vpop.f32.mrf.mxu2 }
 0xdc1   : > { %v7752_v26 = vmax.f32 %v7260_v9, 0.0  ;;  %v8832_v55 = vmax.f32 %v8313_v23, 0.0  ;;  %v9366_v10 = vpop.f32.mrf.mxu3 }
 0xdc2   : > { %v9912_v34 = vmax.f32 %v9366_v10, 0.0 }
 0xdc3   : > { %v7958_v13 = vpack.c.bf16 %v7752_v26, %v7751_v8  ;;  %v9047_v16 = vpack.c.bf16 %v8832_v55, %v8831_v12  ;;  %v10421_v1 = vpop.f32.mrf.mxu0 }
 0xdc4   : > { %v10136_v48 = vpack.c.bf16 %v9912_v34, %v9911_v3  ;;  %10993 = vst.msk [vmem:[%s13799_s5 + $0x170] sm:$0xff] %vm10946_vm1, %v10421_v1  ;;  %v14648_v34 = vld [vmem:[#allocation33_spill] sm:$0xff] }
 0xdc5   : > { %8355 = vmatmul.bf16.gmra.mxu2 %v7958_v13  ;;  %9408 = vmatmul.bf16.gmra.mxu3 %v9047_v16 }
 0xdc6   : > { %10460 = vmatmul.bf16.gmra.mxu0 %v10136_v48 }
 0xdc8   : > { %v7263_v63 = vpop.f32.mrf.mxu1  ;;  %v8316_v49 = vpop.f32.mrf.mxu2 }
 0xdc9   : > { %v9369_v11 = vpop.f32.mrf.mxu3  ;;  %v7753_v45 = vmax.f32 %v7263_v63, 0.0  ;;  %v8833_v61 = vmax.f32 %v8316_v49, 0.0 }
 0xdca   : > { %v9913_v28 = vmax.f32 %v9369_v11, 0.0 }
 0xdcb   : > { %v10423_v17 = vpop.f32.mrf.mxu0  ;;  %7302 = vmatmul.bf16.gmra.mxu1 %v14647_v46 }
 0xdcc   : > { %10994 = vst.msk [vmem:[%s13799_s5 + $0x178] sm:$0xff] %vm10946_vm1, %v10423_v17 }
 0xdd0   : > { %v7265_v41 = vpop.f32.mrf.mxu1  ;;  %v8318_v39 = vpop.f32.mrf.mxu2 }
 0xdd1   : > { %v7754_v6 = vmax.f32 %v7265_v41, 0.0  ;;  %v8834_v18 = vmax.f32 %v8318_v39, 0.0  ;;  %v9371_v38 = vpop.f32.mrf.mxu3 }
 0xdd2   : > { %v9914_v57 = vmax.f32 %v9371_v38, 0.0 }
 0xdd3   : > { %v7959_v9 = vpack.c.bf16 %v7754_v6, %v7753_v45  ;;  %v9048_v23 = vpack.c.bf16 %v8834_v18, %v8833_v61  ;;  %v10426_v8 = vpop.f32.mrf.mxu0 }
 0xdd4   : > { %v10137_v12 = vpack.c.bf16 %v9914_v57, %v9913_v28  ;;  %10995 = vst.msk [vmem:[%s13799_s5 + $0x180] sm:$0xff] %vm10946_vm1, %v10426_v8  ;;  %v14649_v57 = vld [vmem:[#allocation35_spill] sm:$0xff] }
 0xdd5   : > { %8360 = vmatmul.bf16.gmra.mxu2 %v7959_v9  ;;  %9413 = vmatmul.bf16.gmra.mxu3 %v9048_v23 }
 0xdd6   : > { %10465 = vmatmul.bf16.gmra.mxu0 %v10137_v12 }
 0xdd8   : > { %v7268_v26 = vpop.f32.mrf.mxu1  ;;  %v8321_v55 = vpop.f32.mrf.mxu2 }
 0xdd9   : > { %v9374_v10 = vpop.f32.mrf.mxu3  ;;  %v7755_v1 = vmax.f32 %v7268_v26, 0.0  ;;  %v8835_v48 = vmax.f32 %v8321_v55, 0.0 }
 0xdda   : > { %v9915_v17 = vmax.f32 %v9374_v10, 0.0 }
 0xddb   : > { %v10428_v3 = vpop.f32.mrf.mxu0  ;;  %7307 = vmatmul.bf16.gmra.mxu1 %v14648_v34 }
 0xddc   : > { %10996 = vst.msk [vmem:[%s13799_s5 + $0x188] sm:$0xff] %vm10946_vm1, %v10428_v3 }
 0xde0   : > { %v7270_v13 = vpop.f32.mrf.mxu1  ;;  %v8323_v16 = vpop.f32.mrf.mxu2 }
 0xde1   : > { %v7756_v63 = vmax.f32 %v7270_v13, 0.0  ;;  %v8836_v49 = vmax.f32 %v8323_v16, 0.0  ;;  %v9376_v11 = vpop.f32.mrf.mxu3 }
 0xde2   : > { %v9916_v46 = vmax.f32 %v9376_v11, 0.0 }
 0xde3   : > { %v7960_v41 = vpack.c.bf16 %v7756_v63, %v7755_v1  ;;  %v9049_v39 = vpack.c.bf16 %v8836_v49, %v8835_v48  ;;  %v10431_v45 = vpop.f32.mrf.mxu0 }
 0xde4   : > { %v10138_v61 = vpack.c.bf16 %v9916_v46, %v9915_v17  ;;  %10997 = vst.msk [vmem:[%s13799_s5 + $0x190] sm:$0xff] %vm10946_vm1, %v10431_v45  ;;  %v14650_v46 = vld [vmem:[#allocation37_spill] sm:$0xff] }
 0xde5   : > { %8365 = vmatmul.bf16.gmra.mxu2 %v7960_v41  ;;  %9418 = vmatmul.bf16.gmra.mxu3 %v9049_v39 }
 0xde6   : > { %10470 = vmatmul.bf16.gmra.mxu0 %v10138_v61 }
 0xde8   : > { %v7273_v6 = vpop.f32.mrf.mxu1  ;;  %v8326_v18 = vpop.f32.mrf.mxu2 }
 0xde9   : > { %v9379_v38 = vpop.f32.mrf.mxu3  ;;  %v7757_v8 = vmax.f32 %v7273_v6, 0.0  ;;  %v8837_v12 = vmax.f32 %v8326_v18, 0.0 }
 0xdea   : > { %v9917_v3 = vmax.f32 %v9379_v38, 0.0 }
 0xdeb   : > { %v10433_v28 = vpop.f32.mrf.mxu0  ;;  %7312 = vmatmul.bf16.gmra.mxu1 %v14649_v57 }
 0xdec   : > { %10998 = vst.msk [vmem:[%s13799_s5 + $0x198] sm:$0xff] %vm10946_vm1, %v10433_v28 }
 0xdf0   : > { %v7275_v9 = vpop.f32.mrf.mxu1  ;;  %v8328_v23 = vpop.f32.mrf.mxu2 }
 0xdf1   : > { %v7758_v26 = vmax.f32 %v7275_v9, 0.0  ;;  %v8838_v55 = vmax.f32 %v8328_v23, 0.0  ;;  %v9381_v10 = vpop.f32.mrf.mxu3 }
 0xdf2   : > { %v9918_v34 = vmax.f32 %v9381_v10, 0.0 }
 0xdf3   : > { %v7961_v13 = vpack.c.bf16 %v7758_v26, %v7757_v8  ;;  %v9050_v16 = vpack.c.bf16 %v8838_v55, %v8837_v12  ;;  %v10436_v1 = vpop.f32.mrf.mxu0 }
 0xdf4   : > { %v10139_v48 = vpack.c.bf16 %v9918_v34, %v9917_v3  ;;  %10999 = vst.msk [vmem:[%s13799_s5 + $0x1a0] sm:$0xff] %vm10946_vm1, %v10436_v1  ;;  %v14651_v34 = vld [vmem:[#allocation38_spill] sm:$0xff] }
 0xdf5   : > { %8370 = vmatmul.bf16.gmra.mxu2 %v7961_v13  ;;  %9423 = vmatmul.bf16.gmra.mxu3 %v9050_v16 }
 0xdf6   : > { %10475 = vmatmul.bf16.gmra.mxu0 %v10139_v48 }
 0xdf8   : > { %v7278_v63 = vpop.f32.mrf.mxu1  ;;  %v8331_v49 = vpop.f32.mrf.mxu2 }
 0xdf9   : > { %v9384_v11 = vpop.f32.mrf.mxu3  ;;  %v7759_v45 = vmax.f32 %v7278_v63, 0.0  ;;  %v8839_v61 = vmax.f32 %v8331_v49, 0.0 }
 0xdfa   : > { %v9919_v28 = vmax.f32 %v9384_v11, 0.0 }
 0xdfb   : > { %v10438_v17 = vpop.f32.mrf.mxu0  ;;  %7317 = vmatmul.bf16.gmra.mxu1 %v14650_v46 }
 0xdfc   : > { %11000 = vst.msk [vmem:[%s13799_s5 + $0x1a8] sm:$0xff] %vm10946_vm1, %v10438_v17 }
 0xe00   : > { %v7280_v41 = vpop.f32.mrf.mxu1  ;;  %v8333_v39 = vpop.f32.mrf.mxu2 }
 0xe01   : > { %v7760_v6 = vmax.f32 %v7280_v41, 0.0  ;;  %v8840_v18 = vmax.f32 %v8333_v39, 0.0  ;;  %v9386_v38 = vpop.f32.mrf.mxu3 }
 0xe02   : > { %v9920_v57 = vmax.f32 %v9386_v38, 0.0 }
 0xe03   : > { %v7962_v9 = vpack.c.bf16 %v7760_v6, %v7759_v45  ;;  %v9051_v23 = vpack.c.bf16 %v8840_v18, %v8839_v61  ;;  %v10441_v8 = vpop.f32.mrf.mxu0 }
 0xe04   : > { %v10140_v12 = vpack.c.bf16 %v9920_v57, %v9919_v28  ;;  %11001 = vst.msk [vmem:[%s13799_s5 + $0x1b0] sm:$0xff] %vm10946_vm1, %v10441_v8  ;;  %v14652_v57 = vld [vmem:[#allocation40_spill] sm:$0xff] }
 0xe05   : > { %8375 = vmatmul.bf16.gmra.mxu2 %v7962_v9  ;;  %9428 = vmatmul.bf16.gmra.mxu3 %v9051_v23 }
 0xe06   : > { %10480 = vmatmul.bf16.gmra.mxu0 %v10140_v12 }
 0xe08   : > { %v7283_v26 = vpop.f32.mrf.mxu1  ;;  %v8336_v55 = vpop.f32.mrf.mxu2 }
 0xe09   : > { %v9389_v10 = vpop.f32.mrf.mxu3  ;;  %v7761_v1 = vmax.f32 %v7283_v26, 0.0  ;;  %v8841_v48 = vmax.f32 %v8336_v55, 0.0 }
 0xe0a   : > { %v9921_v17 = vmax.f32 %v9389_v10, 0.0 }
 0xe0b   : > { %v10443_v3 = vpop.f32.mrf.mxu0  ;;  %7322 = vmatmul.bf16.gmra.mxu1 %v14651_v34 }
 0xe0c   : > { %11002 = vst.msk [vmem:[%s13799_s5 + $0x1b8] sm:$0xff] %vm10946_vm1, %v10443_v3 }
 0xe10   : > { %v7285_v13 = vpop.f32.mrf.mxu1  ;;  %v8338_v16 = vpop.f32.mrf.mxu2 }
 0xe11   : > { %v7762_v63 = vmax.f32 %v7285_v13, 0.0  ;;  %v8842_v49 = vmax.f32 %v8338_v16, 0.0  ;;  %v9391_v11 = vpop.f32.mrf.mxu3 }
 0xe12   : > { %v9922_v46 = vmax.f32 %v9391_v11, 0.0 }
 0xe13   : > { %v7963_v41 = vpack.c.bf16 %v7762_v63, %v7761_v1  ;;  %v9052_v39 = vpack.c.bf16 %v8842_v49, %v8841_v48  ;;  %v10446_v45 = vpop.f32.mrf.mxu0 }
 0xe14   : > { %v10141_v61 = vpack.c.bf16 %v9922_v46, %v9921_v17  ;;  %11003 = vst.msk [vmem:[%s13799_s5 + $0x1c0] sm:$0xff] %vm10946_vm1, %v10446_v45  ;;  %v14653_v46 = vld [vmem:[#allocation42_spill] sm:$0xff] }
 0xe15   : > { %8380 = vmatmul.bf16.gmra.mxu2 %v7963_v41  ;;  %9433 = vmatmul.bf16.gmra.mxu3 %v9052_v39 }
 0xe16   : > { %10485 = vmatmul.bf16.gmra.mxu0 %v10141_v61 }
 0xe18   : > { %v7288_v6 = vpop.f32.mrf.mxu1  ;;  %v8341_v18 = vpop.f32.mrf.mxu2 }
 0xe19   : > { %v9394_v38 = vpop.f32.mrf.mxu3  ;;  %v7763_v8 = vmax.f32 %v7288_v6, 0.0  ;;  %v8843_v12 = vmax.f32 %v8341_v18, 0.0 }
 0xe1a   : > { %v9923_v3 = vmax.f32 %v9394_v38, 0.0 }
 0xe1b   : > { %v10448_v28 = vpop.f32.mrf.mxu0  ;;  %7327 = vmatmul.bf16.gmra.mxu1 %v14652_v57 }
 0xe1c   : > { %11004 = vst.msk [vmem:[%s13799_s5 + $0x1c8] sm:$0xff] %vm10946_vm1, %v10448_v28 }
 0xe20   : > { %v7290_v9 = vpop.f32.mrf.mxu1  ;;  %v8343_v23 = vpop.f32.mrf.mxu2 }
 0xe21   : > { %v7764_v26 = vmax.f32 %v7290_v9, 0.0  ;;  %v8844_v55 = vmax.f32 %v8343_v23, 0.0  ;;  %v9396_v10 = vpop.f32.mrf.mxu3 }
 0xe22   : > { %v9924_v34 = vmax.f32 %v9396_v10, 0.0 }
 0xe23   : > { %v7964_v13 = vpack.c.bf16 %v7764_v26, %v7763_v8  ;;  %v9053_v16 = vpack.c.bf16 %v8844_v55, %v8843_v12  ;;  %v10451_v1 = vpop.f32.mrf.mxu0 }
 0xe24   : > { %v10142_v48 = vpack.c.bf16 %v9924_v34, %v9923_v3  ;;  %11005 = vst.msk [vmem:[%s13799_s5 + $0x1d0] sm:$0xff] %vm10946_vm1, %v10451_v1  ;;  %v14654_v34 = vld [vmem:[#allocation43_spill] sm:$0xff] }
 0xe25   : > { %8385 = vmatmul.bf16.gmra.mxu2 %v7964_v13  ;;  %9438 = vmatmul.bf16.gmra.mxu3 %v9053_v16 }
 0xe26   : > { %10490 = vmatmul.bf16.gmra.mxu0 %v10142_v48 }
 0xe28   : > { %v7293_v63 = vpop.f32.mrf.mxu1  ;;  %v8346_v49 = vpop.f32.mrf.mxu2 }
 0xe29   : > { %v9399_v11 = vpop.f32.mrf.mxu3  ;;  %v7765_v45 = vmax.f32 %v7293_v63, 0.0  ;;  %v8845_v61 = vmax.f32 %v8346_v49, 0.0 }
 0xe2a   : > { %v9925_v28 = vmax.f32 %v9399_v11, 0.0 }
 0xe2b   : > { %v10453_v17 = vpop.f32.mrf.mxu0  ;;  %7332 = vmatmul.bf16.gmra.mxu1 %v14653_v46 }
 0xe2c   : > { %11006 = vst.msk [vmem:[%s13799_s5 + $0x1d8] sm:$0xff] %vm10946_vm1, %v10453_v17 }
 0xe30   : > { %v7295_v41 = vpop.f32.mrf.mxu1  ;;  %v8348_v39 = vpop.f32.mrf.mxu2 }
 0xe31   : > { %v7766_v6 = vmax.f32 %v7295_v41, 0.0  ;;  %v8846_v18 = vmax.f32 %v8348_v39, 0.0  ;;  %v9401_v38 = vpop.f32.mrf.mxu3 }
 0xe32   : > { %v9926_v57 = vmax.f32 %v9401_v38, 0.0 }
 0xe33   : > { %v7965_v9 = vpack.c.bf16 %v7766_v6, %v7765_v45  ;;  %v9054_v23 = vpack.c.bf16 %v8846_v18, %v8845_v61  ;;  %v10456_v8 = vpop.f32.mrf.mxu0 }
 0xe34   : > { %v10143_v12 = vpack.c.bf16 %v9926_v57, %v9925_v28  ;;  %11007 = vst.msk [vmem:[%s13799_s5 + $0x1e0] sm:$0xff] %vm10946_vm1, %v10456_v8  ;;  %v14655_v57 = vld [vmem:[#allocation45_spill] sm:$0xff] }
 0xe35   : > { %8390 = vmatmul.bf16.gmra.mxu2 %v7965_v9  ;;  %9443 = vmatmul.bf16.gmra.mxu3 %v9054_v23 }
 0xe36   : > { %10495 = vmatmul.bf16.gmra.mxu0 %v10143_v12 }
 0xe38   : > { %v7298_v26 = vpop.f32.mrf.mxu1  ;;  %v8351_v55 = vpop.f32.mrf.mxu2 }
 0xe39   : > { %v9404_v10 = vpop.f32.mrf.mxu3  ;;  %v7767_v1 = vmax.f32 %v7298_v26, 0.0  ;;  %v8847_v48 = vmax.f32 %v8351_v55, 0.0 }
 0xe3a   : > { %v9927_v17 = vmax.f32 %v9404_v10, 0.0 }
 0xe3b   : > { %v10458_v3 = vpop.f32.mrf.mxu0  ;;  %7337 = vmatmul.bf16.gmra.mxu1 %v14654_v34 }
 0xe3c   : > { %11008 = vst.msk [vmem:[%s13799_s5 + $0x1e8] sm:$0xff] %vm10946_vm1, %v10458_v3 }
 0xe40   : > { %v7300_v13 = vpop.f32.mrf.mxu1  ;;  %v8353_v16 = vpop.f32.mrf.mxu2 }
 0xe41   : > { %v7768_v63 = vmax.f32 %v7300_v13, 0.0  ;;  %v8848_v49 = vmax.f32 %v8353_v16, 0.0  ;;  %v9406_v11 = vpop.f32.mrf.mxu3 }
 0xe42   : > { %v9928_v46 = vmax.f32 %v9406_v11, 0.0 }
 0xe43   : > { %v7966_v41 = vpack.c.bf16 %v7768_v63, %v7767_v1  ;;  %v9055_v39 = vpack.c.bf16 %v8848_v49, %v8847_v48  ;;  %v10461_v45 = vpop.f32.mrf.mxu0 }
 0xe44   : > { %v10144_v61 = vpack.c.bf16 %v9928_v46, %v9927_v17  ;;  %11009 = vst.msk [vmem:[%s13799_s5 + $0x1f0] sm:$0xff] %vm10946_vm1, %v10461_v45  ;;  %v14656_v46 = vld [vmem:[#allocation46_spill] sm:$0xff] }
 0xe45   : > { %8395 = vmatmul.bf16.gmra.mxu2 %v7966_v41  ;;  %9448 = vmatmul.bf16.gmra.mxu3 %v9055_v39 }
 0xe46   : > { %10500 = vmatmul.bf16.gmra.mxu0 %v10144_v61 }
 0xe48   : > { %v7303_v6 = vpop.f32.mrf.mxu1  ;;  %v8356_v18 = vpop.f32.mrf.mxu2 }
 0xe49   : > { %v9409_v38 = vpop.f32.mrf.mxu3  ;;  %v7769_v8 = vmax.f32 %v7303_v6, 0.0  ;;  %v8849_v12 = vmax.f32 %v8356_v18, 0.0 }
 0xe4a   : > { %v9929_v3 = vmax.f32 %v9409_v38, 0.0 }
 0xe4b   : > { %v10463_v28 = vpop.f32.mrf.mxu0  ;;  %7342 = vmatmul.bf16.gmra.mxu1 %v14655_v57 }
 0xe4c   : > { %11010 = vst.msk [vmem:[%s13799_s5 + $0x1f8] sm:$0xff] %vm10946_vm1, %v10463_v28 }
 0xe50   : > { %v7305_v9 = vpop.f32.mrf.mxu1  ;;  %v8358_v23 = vpop.f32.mrf.mxu2 }
 0xe51   : > { %v7770_v26 = vmax.f32 %v7305_v9, 0.0  ;;  %v8850_v55 = vmax.f32 %v8358_v23, 0.0  ;;  %v9411_v10 = vpop.f32.mrf.mxu3 }
 0xe52   : > { %v9930_v34 = vmax.f32 %v9411_v10, 0.0 }
 0xe53   : > { %v7967_v13 = vpack.c.bf16 %v7770_v26, %v7769_v8  ;;  %v9056_v16 = vpack.c.bf16 %v8850_v55, %v8849_v12  ;;  %v10466_v1 = vpop.f32.mrf.mxu0 }
 0xe54   : > { %v10145_v48 = vpack.c.bf16 %v9930_v34, %v9929_v3  ;;  %11011 = vst.msk [vmem:[%s13799_s5 + $0x200] sm:$0xff] %vm10946_vm1, %v10466_v1  ;;  %v14657_v34 = vld [vmem:[#allocation48_spill] sm:$0xff] }
 0xe55   : > { %8400 = vmatmul.bf16.gmra.mxu2 %v7967_v13  ;;  %9453 = vmatmul.bf16.gmra.mxu3 %v9056_v16 }
 0xe56   : > { %10505 = vmatmul.bf16.gmra.mxu0 %v10145_v48 }
 0xe58   : > { %v7308_v63 = vpop.f32.mrf.mxu1  ;;  %v8361_v49 = vpop.f32.mrf.mxu2 }
 0xe59   : > { %v9414_v11 = vpop.f32.mrf.mxu3  ;;  %v7771_v45 = vmax.f32 %v7308_v63, 0.0  ;;  %v8851_v61 = vmax.f32 %v8361_v49, 0.0 }
 0xe5a   : > { %v9931_v28 = vmax.f32 %v9414_v11, 0.0 }
 0xe5b   : > { %v10468_v17 = vpop.f32.mrf.mxu0  ;;  %7347 = vmatmul.bf16.gmra.mxu1 %v14656_v46 }
 0xe5c   : > { %11012 = vst.msk [vmem:[%s13799_s5 + $0x208] sm:$0xff] %vm10946_vm1, %v10468_v17 }
 0xe60   : > { %v7310_v41 = vpop.f32.mrf.mxu1  ;;  %v8363_v39 = vpop.f32.mrf.mxu2 }
 0xe61   : > { %v7772_v6 = vmax.f32 %v7310_v41, 0.0  ;;  %v8852_v18 = vmax.f32 %v8363_v39, 0.0  ;;  %v9416_v38 = vpop.f32.mrf.mxu3 }
 0xe62   : > { %v9932_v57 = vmax.f32 %v9416_v38, 0.0 }
 0xe63   : > { %v7968_v9 = vpack.c.bf16 %v7772_v6, %v7771_v45  ;;  %v9057_v23 = vpack.c.bf16 %v8852_v18, %v8851_v61  ;;  %v10471_v8 = vpop.f32.mrf.mxu0 }
 0xe64   : > { %v10146_v12 = vpack.c.bf16 %v9932_v57, %v9931_v28  ;;  %11013 = vst.msk [vmem:[%s13799_s5 + $0x210] sm:$0xff] %vm10946_vm1, %v10471_v8  ;;  %v14658_v57 = vld [vmem:[#allocation50_spill] sm:$0xff] }
 0xe65   : > { %8405 = vmatmul.bf16.gmra.mxu2 %v7968_v9  ;;  %9458 = vmatmul.bf16.gmra.mxu3 %v9057_v23 }
 0xe66   : > { %10510 = vmatmul.bf16.gmra.mxu0 %v10146_v12 }
 0xe68   : > { %v7313_v26 = vpop.f32.mrf.mxu1  ;;  %v8366_v55 = vpop.f32.mrf.mxu2 }
 0xe69   : > { %v9419_v10 = vpop.f32.mrf.mxu3  ;;  %v7773_v1 = vmax.f32 %v7313_v26, 0.0  ;;  %v8853_v48 = vmax.f32 %v8366_v55, 0.0 }
 0xe6a   : > { %v9933_v17 = vmax.f32 %v9419_v10, 0.0 }
 0xe6b   : > { %v10473_v3 = vpop.f32.mrf.mxu0  ;;  %7352 = vmatmul.bf16.gmra.mxu1 %v14657_v34 }
 0xe6c   : > { %11014 = vst.msk [vmem:[%s13799_s5 + $0x218] sm:$0xff] %vm10946_vm1, %v10473_v3 }
 0xe70   : > { %v7315_v13 = vpop.f32.mrf.mxu1  ;;  %v8368_v16 = vpop.f32.mrf.mxu2 }
 0xe71   : > { %v7774_v63 = vmax.f32 %v7315_v13, 0.0  ;;  %v8854_v49 = vmax.f32 %v8368_v16, 0.0  ;;  %v9421_v11 = vpop.f32.mrf.mxu3 }
 0xe72   : > { %v9934_v46 = vmax.f32 %v9421_v11, 0.0 }
 0xe73   : > { %v7969_v41 = vpack.c.bf16 %v7774_v63, %v7773_v1  ;;  %v9058_v39 = vpack.c.bf16 %v8854_v49, %v8853_v48  ;;  %v10476_v45 = vpop.f32.mrf.mxu0 }
 0xe74   : > { %v10147_v61 = vpack.c.bf16 %v9934_v46, %v9933_v17  ;;  %11015 = vst.msk [vmem:[%s13799_s5 + $0x220] sm:$0xff] %vm10946_vm1, %v10476_v45  ;;  %v14659_v46 = vld [vmem:[#allocation53_spill] sm:$0xff] }
 0xe75   : > { %8410 = vmatmul.bf16.gmra.mxu2 %v7969_v41  ;;  %9463 = vmatmul.bf16.gmra.mxu3 %v9058_v39 }
 0xe76   : > { %10515 = vmatmul.bf16.gmra.mxu0 %v10147_v61 }
 0xe78   : > { %v7318_v6 = vpop.f32.mrf.mxu1  ;;  %v8371_v18 = vpop.f32.mrf.mxu2 }
 0xe79   : > { %v9424_v38 = vpop.f32.mrf.mxu3  ;;  %v7775_v8 = vmax.f32 %v7318_v6, 0.0  ;;  %v8855_v12 = vmax.f32 %v8371_v18, 0.0 }
 0xe7a   : > { %v9935_v3 = vmax.f32 %v9424_v38, 0.0 }
 0xe7b   : > { %v10478_v28 = vpop.f32.mrf.mxu0  ;;  %7357 = vmatmul.bf16.gmra.mxu1 %v14658_v57 }
 0xe7c   : > { %11016 = vst.msk [vmem:[%s13799_s5 + $0x228] sm:$0xff] %vm10946_vm1, %v10478_v28 }
 0xe80   : > { %v7320_v9 = vpop.f32.mrf.mxu1  ;;  %v8373_v23 = vpop.f32.mrf.mxu2 }
 0xe81   : > { %v7776_v26 = vmax.f32 %v7320_v9, 0.0  ;;  %v8856_v55 = vmax.f32 %v8373_v23, 0.0  ;;  %v9426_v10 = vpop.f32.mrf.mxu3 }
 0xe82   : > { %v9936_v34 = vmax.f32 %v9426_v10, 0.0 }
 0xe83   : > { %v7970_v13 = vpack.c.bf16 %v7776_v26, %v7775_v8  ;;  %v9059_v16 = vpack.c.bf16 %v8856_v55, %v8855_v12  ;;  %v10481_v1 = vpop.f32.mrf.mxu0 }
 0xe84   : > { %v10148_v48 = vpack.c.bf16 %v9936_v34, %v9935_v3  ;;  %11017 = vst.msk [vmem:[%s13799_s5 + $0x230] sm:$0xff] %vm10946_vm1, %v10481_v1  ;;  %v14660_v34 = vld [vmem:[#allocation55_spill] sm:$0xff] }
 0xe85   : > { %8415 = vmatmul.bf16.gmra.mxu2 %v7970_v13  ;;  %9468 = vmatmul.bf16.gmra.mxu3 %v9059_v16 }
 0xe86   : > { %10520 = vmatmul.bf16.gmra.mxu0 %v10148_v48 }
 0xe88   : > { %v7323_v63 = vpop.f32.mrf.mxu1  ;;  %v8376_v49 = vpop.f32.mrf.mxu2 }
 0xe89   : > { %v9429_v11 = vpop.f32.mrf.mxu3  ;;  %v7777_v45 = vmax.f32 %v7323_v63, 0.0  ;;  %v8857_v61 = vmax.f32 %v8376_v49, 0.0 }
 0xe8a   : > { %v9937_v28 = vmax.f32 %v9429_v11, 0.0 }
 0xe8b   : > { %v10483_v17 = vpop.f32.mrf.mxu0  ;;  %7362 = vmatmul.bf16.gmra.mxu1 %v14659_v46 }
 0xe8c   : > { %11018 = vst.msk [vmem:[%s13799_s5 + $0x238] sm:$0xff] %vm10946_vm1, %v10483_v17 }
 0xe90   : > { %v7325_v41 = vpop.f32.mrf.mxu1  ;;  %v8378_v39 = vpop.f32.mrf.mxu2 }
 0xe91   : > { %v7778_v6 = vmax.f32 %v7325_v41, 0.0  ;;  %v8858_v18 = vmax.f32 %v8378_v39, 0.0  ;;  %v9431_v38 = vpop.f32.mrf.mxu3 }
 0xe92   : > { %v9938_v57 = vmax.f32 %v9431_v38, 0.0 }
 0xe93   : > { %v7971_v9 = vpack.c.bf16 %v7778_v6, %v7777_v45  ;;  %v9060_v23 = vpack.c.bf16 %v8858_v18, %v8857_v61  ;;  %v10486_v8 = vpop.f32.mrf.mxu0 }
 0xe94   : > { %v10149_v12 = vpack.c.bf16 %v9938_v57, %v9937_v28  ;;  %11019 = vst.msk [vmem:[%s13799_s5 + $0x240] sm:$0xff] %vm10946_vm1, %v10486_v8  ;;  %v14661_v57 = vld [vmem:[#allocation57_spill] sm:$0xff] }
 0xe95   : > { %8420 = vmatmul.bf16.gmra.mxu2 %v7971_v9  ;;  %9473 = vmatmul.bf16.gmra.mxu3 %v9060_v23 }
 0xe96   : > { %10525 = vmatmul.bf16.gmra.mxu0 %v10149_v12 }
 0xe98   : > { %v7328_v26 = vpop.f32.mrf.mxu1  ;;  %v8381_v55 = vpop.f32.mrf.mxu2 }
 0xe99   : > { %v9434_v10 = vpop.f32.mrf.mxu3  ;;  %v7779_v1 = vmax.f32 %v7328_v26, 0.0  ;;  %v8859_v48 = vmax.f32 %v8381_v55, 0.0 }
 0xe9a   : > { %v9939_v17 = vmax.f32 %v9434_v10, 0.0 }
 0xe9b   : > { %v10488_v3 = vpop.f32.mrf.mxu0  ;;  %7367 = vmatmul.bf16.gmra.mxu1 %v14660_v34 }
 0xe9c   : > { %11020 = vst.msk [vmem:[%s13799_s5 + $0x248] sm:$0xff] %vm10946_vm1, %v10488_v3 }
 0xea0   : > { %v7330_v13 = vpop.f32.mrf.mxu1  ;;  %v8383_v16 = vpop.f32.mrf.mxu2 }
 0xea1   : > { %v7780_v63 = vmax.f32 %v7330_v13, 0.0  ;;  %v8860_v49 = vmax.f32 %v8383_v16, 0.0  ;;  %v9436_v11 = vpop.f32.mrf.mxu3 }
 0xea2   : > { %v9940_v46 = vmax.f32 %v9436_v11, 0.0 }
 0xea3   : > { %v7972_v41 = vpack.c.bf16 %v7780_v63, %v7779_v1  ;;  %v9061_v39 = vpack.c.bf16 %v8860_v49, %v8859_v48  ;;  %v10491_v45 = vpop.f32.mrf.mxu0 }
 0xea4   : > { %v10150_v61 = vpack.c.bf16 %v9940_v46, %v9939_v17  ;;  %11021 = vst.msk [vmem:[%s13799_s5 + $0x250] sm:$0xff] %vm10946_vm1, %v10491_v45  ;;  %v14662_v46 = vld [vmem:[#allocation59_spill] sm:$0xff] }
 0xea5   : > { %8425 = vmatmul.bf16.gmra.mxu2 %v7972_v41  ;;  %9478 = vmatmul.bf16.gmra.mxu3 %v9061_v39 }
 0xea6   : > { %10530 = vmatmul.bf16.gmra.mxu0 %v10150_v61 }
 0xea8   : > { %v7333_v6 = vpop.f32.mrf.mxu1  ;;  %v8386_v18 = vpop.f32.mrf.mxu2 }
 0xea9   : > { %v9439_v38 = vpop.f32.mrf.mxu3  ;;  %v7781_v8 = vmax.f32 %v7333_v6, 0.0  ;;  %v8861_v12 = vmax.f32 %v8386_v18, 0.0 }
 0xeaa   : > { %v9941_v3 = vmax.f32 %v9439_v38, 0.0 }
 0xeab   : > { %v10493_v28 = vpop.f32.mrf.mxu0  ;;  %7372 = vmatmul.bf16.gmra.mxu1 %v14661_v57 }
 0xeac   : > { %11022 = vst.msk [vmem:[%s13799_s5 + $0x258] sm:$0xff] %vm10946_vm1, %v10493_v28 }
 0xeb0   : > { %v7335_v9 = vpop.f32.mrf.mxu1  ;;  %v8388_v23 = vpop.f32.mrf.mxu2 }
 0xeb1   : > { %v7782_v26 = vmax.f32 %v7335_v9, 0.0  ;;  %v8862_v55 = vmax.f32 %v8388_v23, 0.0  ;;  %v9441_v10 = vpop.f32.mrf.mxu3 }
 0xeb2   : > { %v9942_v34 = vmax.f32 %v9441_v10, 0.0 }
 0xeb3   : > { %v7973_v13 = vpack.c.bf16 %v7782_v26, %v7781_v8  ;;  %v9062_v16 = vpack.c.bf16 %v8862_v55, %v8861_v12  ;;  %v10496_v1 = vpop.f32.mrf.mxu0 }
 0xeb4   : > { %v10151_v48 = vpack.c.bf16 %v9942_v34, %v9941_v3  ;;  %11023 = vst.msk [vmem:[%s13799_s5 + $0x260] sm:$0xff] %vm10946_vm1, %v10496_v1  ;;  %v14663_v34 = vld [vmem:[#allocation61_spill] sm:$0xff] }
 0xeb5   : > { %8430 = vmatmul.bf16.gmra.mxu2 %v7973_v13  ;;  %9483 = vmatmul.bf16.gmra.mxu3 %v9062_v16 }
 0xeb6   : > { %10535 = vmatmul.bf16.gmra.mxu0 %v10151_v48 }
 0xeb8   : > { %v7338_v63 = vpop.f32.mrf.mxu1  ;;  %v8391_v49 = vpop.f32.mrf.mxu2 }
 0xeb9   : > { %v9444_v11 = vpop.f32.mrf.mxu3  ;;  %v7783_v45 = vmax.f32 %v7338_v63, 0.0  ;;  %v8863_v61 = vmax.f32 %v8391_v49, 0.0 }
 0xeba   : > { %v9943_v28 = vmax.f32 %v9444_v11, 0.0 }
 0xebb   : > { %v10498_v17 = vpop.f32.mrf.mxu0  ;;  %7377 = vmatmul.bf16.gmra.mxu1 %v14662_v46 }
 0xebc   : > { %11024 = vst.msk [vmem:[%s13799_s5 + $0x268] sm:$0xff] %vm10946_vm1, %v10498_v17 }
 0xec0   : > { %v7340_v41 = vpop.f32.mrf.mxu1  ;;  %v8393_v39 = vpop.f32.mrf.mxu2 }
 0xec1   : > { %v7784_v6 = vmax.f32 %v7340_v41, 0.0  ;;  %v8864_v18 = vmax.f32 %v8393_v39, 0.0  ;;  %v9446_v38 = vpop.f32.mrf.mxu3 }
 0xec2   : > { %v9944_v57 = vmax.f32 %v9446_v38, 0.0 }
 0xec3   : > { %v7974_v9 = vpack.c.bf16 %v7784_v6, %v7783_v45  ;;  %v9063_v23 = vpack.c.bf16 %v8864_v18, %v8863_v61  ;;  %v10501_v8 = vpop.f32.mrf.mxu0 }
 0xec4   : > { %v10152_v12 = vpack.c.bf16 %v9944_v57, %v9943_v28  ;;  %11025 = vst.msk [vmem:[%s13799_s5 + $0x270] sm:$0xff] %vm10946_vm1, %v10501_v8  ;;  %v14664_v57 = vld [vmem:[#allocation63_spill] sm:$0xff] }
 0xec5   : > { %8435 = vmatmul.bf16.gmra.mxu2 %v7974_v9  ;;  %9488 = vmatmul.bf16.gmra.mxu3 %v9063_v23 }
 0xec6   : > { %10540 = vmatmul.bf16.gmra.mxu0 %v10152_v12 }
 0xec8   : > { %v7343_v26 = vpop.f32.mrf.mxu1  ;;  %v8396_v55 = vpop.f32.mrf.mxu2 }
 0xec9   : > { %v9449_v10 = vpop.f32.mrf.mxu3  ;;  %v7785_v1 = vmax.f32 %v7343_v26, 0.0  ;;  %v8865_v48 = vmax.f32 %v8396_v55, 0.0 }
 0xeca   : > { %v9945_v17 = vmax.f32 %v9449_v10, 0.0 }
 0xecb   : > { %v10503_v3 = vpop.f32.mrf.mxu0  ;;  %7382 = vmatmul.bf16.gmra.mxu1 %v14663_v34 }
 0xecc   : > { %11026 = vst.msk [vmem:[%s13799_s5 + $0x278] sm:$0xff] %vm10946_vm1, %v10503_v3 }
 0xed0   : > { %v7345_v13 = vpop.f32.mrf.mxu1  ;;  %v8398_v16 = vpop.f32.mrf.mxu2 }
 0xed1   : > { %v7786_v63 = vmax.f32 %v7345_v13, 0.0  ;;  %v8866_v49 = vmax.f32 %v8398_v16, 0.0  ;;  %v9451_v11 = vpop.f32.mrf.mxu3 }
 0xed2   : > { %v9946_v46 = vmax.f32 %v9451_v11, 0.0 }
 0xed3   : > { %v7975_v41 = vpack.c.bf16 %v7786_v63, %v7785_v1  ;;  %v9064_v39 = vpack.c.bf16 %v8866_v49, %v8865_v48  ;;  %v10506_v45 = vpop.f32.mrf.mxu0 }
 0xed4   : > { %v10153_v61 = vpack.c.bf16 %v9946_v46, %v9945_v17  ;;  %11027 = vst.msk [vmem:[%s13799_s5 + $0x280] sm:$0xff] %vm10946_vm1, %v10506_v45  ;;  %v14665_v46 = vld [vmem:[#allocation65_spill] sm:$0xff] }
 0xed5   : > { %8440 = vmatmul.bf16.gmra.mxu2 %v7975_v41  ;;  %9493 = vmatmul.bf16.gmra.mxu3 %v9064_v39 }
 0xed6   : > { %10545 = vmatmul.bf16.gmra.mxu0 %v10153_v61 }
 0xed8   : > { %v7348_v6 = vpop.f32.mrf.mxu1  ;;  %v8401_v18 = vpop.f32.mrf.mxu2 }
 0xed9   : > { %v9454_v38 = vpop.f32.mrf.mxu3  ;;  %v7787_v8 = vmax.f32 %v7348_v6, 0.0  ;;  %v8867_v12 = vmax.f32 %v8401_v18, 0.0 }
 0xeda   : > { %v9947_v3 = vmax.f32 %v9454_v38, 0.0 }
 0xedb   : > { %v10508_v28 = vpop.f32.mrf.mxu0  ;;  %7387 = vmatmul.bf16.gmra.mxu1 %v14664_v57 }
 0xedc   : > { %11028 = vst.msk [vmem:[%s13799_s5 + $0x288] sm:$0xff] %vm10946_vm1, %v10508_v28 }
 0xee0   : > { %v7350_v9 = vpop.f32.mrf.mxu1  ;;  %v8403_v23 = vpop.f32.mrf.mxu2 }
 0xee1   : > { %v7788_v26 = vmax.f32 %v7350_v9, 0.0  ;;  %v8868_v55 = vmax.f32 %v8403_v23, 0.0  ;;  %v9456_v10 = vpop.f32.mrf.mxu3 }
 0xee2   : > { %v9948_v34 = vmax.f32 %v9456_v10, 0.0 }
 0xee3   : > { %v7976_v13 = vpack.c.bf16 %v7788_v26, %v7787_v8  ;;  %v9065_v16 = vpack.c.bf16 %v8868_v55, %v8867_v12  ;;  %v10511_v1 = vpop.f32.mrf.mxu0 }
 0xee4   : > { %v10154_v48 = vpack.c.bf16 %v9948_v34, %v9947_v3  ;;  %11029 = vst.msk [vmem:[%s13799_s5 + $0x290] sm:$0xff] %vm10946_vm1, %v10511_v1  ;;  %v14666_v34 = vld [vmem:[#allocation67_spill] sm:$0xff] }
 0xee5   : > { %8445 = vmatmul.bf16.gmra.mxu2 %v7976_v13  ;;  %9498 = vmatmul.bf16.gmra.mxu3 %v9065_v16 }
 0xee6   : > { %10550 = vmatmul.bf16.gmra.mxu0 %v10154_v48 }
 0xee8   : > { %v7353_v63 = vpop.f32.mrf.mxu1  ;;  %v8406_v49 = vpop.f32.mrf.mxu2 }
 0xee9   : > { %v9459_v11 = vpop.f32.mrf.mxu3  ;;  %v7789_v45 = vmax.f32 %v7353_v63, 0.0  ;;  %v8869_v61 = vmax.f32 %v8406_v49, 0.0 }
 0xeea   : > { %v9949_v28 = vmax.f32 %v9459_v11, 0.0 }
 0xeeb   : > { %v10513_v17 = vpop.f32.mrf.mxu0  ;;  %7392 = vmatmul.bf16.gmra.mxu1 %v14665_v46 }
 0xeec   : > { %11030 = vst.msk [vmem:[%s13799_s5 + $0x298] sm:$0xff] %vm10946_vm1, %v10513_v17 }
 0xef0   : > { %v7355_v41 = vpop.f32.mrf.mxu1  ;;  %v8408_v39 = vpop.f32.mrf.mxu2 }
 0xef1   : > { %v7790_v6 = vmax.f32 %v7355_v41, 0.0  ;;  %v8870_v18 = vmax.f32 %v8408_v39, 0.0  ;;  %v9461_v38 = vpop.f32.mrf.mxu3 }
 0xef2   : > { %v9950_v57 = vmax.f32 %v9461_v38, 0.0 }
 0xef3   : > { %v7977_v9 = vpack.c.bf16 %v7790_v6, %v7789_v45  ;;  %v9066_v23 = vpack.c.bf16 %v8870_v18, %v8869_v61  ;;  %v10516_v8 = vpop.f32.mrf.mxu0 }
 0xef4   : > { %v10155_v12 = vpack.c.bf16 %v9950_v57, %v9949_v28  ;;  %11031 = vst.msk [vmem:[%s13799_s5 + $0x2a0] sm:$0xff] %vm10946_vm1, %v10516_v8  ;;  %v14667_v57 = vld [vmem:[#allocation9_spill] sm:$0xff] }
 0xef5   : > { %8450 = vmatmul.bf16.gmra.mxu2 %v7977_v9  ;;  %9503 = vmatmul.bf16.gmra.mxu3 %v9066_v23 }
 0xef6   : > { %10555 = vmatmul.bf16.gmra.mxu0 %v10155_v12 }
 0xef8   : > { %v7358_v26 = vpop.f32.mrf.mxu1  ;;  %v8411_v55 = vpop.f32.mrf.mxu2 }
 0xef9   : > { %v9464_v10 = vpop.f32.mrf.mxu3  ;;  %v7791_v1 = vmax.f32 %v7358_v26, 0.0  ;;  %v8871_v48 = vmax.f32 %v8411_v55, 0.0 }
 0xefa   : > { %v9951_v17 = vmax.f32 %v9464_v10, 0.0 }
 0xefb   : > { %v10518_v3 = vpop.f32.mrf.mxu0  ;;  %7397 = vmatmul.bf16.gmra.mxu1 %v14666_v34 }
 0xefc   : > { %11032 = vst.msk [vmem:[%s13799_s5 + $0x2a8] sm:$0xff] %vm10946_vm1, %v10518_v3 }
 0xf00   : > { %v7360_v13 = vpop.f32.mrf.mxu1  ;;  %v8413_v16 = vpop.f32.mrf.mxu2 }
 0xf01   : > { %v7792_v63 = vmax.f32 %v7360_v13, 0.0  ;;  %v8872_v49 = vmax.f32 %v8413_v16, 0.0  ;;  %v9466_v11 = vpop.f32.mrf.mxu3 }
 0xf02   : > { %v9952_v46 = vmax.f32 %v9466_v11, 0.0 }
 0xf03   : > { %v7978_v41 = vpack.c.bf16 %v7792_v63, %v7791_v1  ;;  %v9067_v39 = vpack.c.bf16 %v8872_v49, %v8871_v48  ;;  %v10521_v45 = vpop.f32.mrf.mxu0 }
 0xf04   : > { %v10156_v61 = vpack.c.bf16 %v9952_v46, %v9951_v17  ;;  %11033 = vst.msk [vmem:[%s13799_s5 + $0x2b0] sm:$0xff] %vm10946_vm1, %v10521_v45  ;;  %v14668_v46 = vld [vmem:[#allocation11_spill] sm:$0xff] }
 0xf05   : > { %8455 = vmatmul.bf16.gmra.mxu2 %v7978_v41  ;;  %9508 = vmatmul.bf16.gmra.mxu3 %v9067_v39 }
 0xf06   : > { %10560 = vmatmul.bf16.gmra.mxu0 %v10156_v61 }
 0xf08   : > { %v7363_v6 = vpop.f32.mrf.mxu1  ;;  %v8416_v18 = vpop.f32.mrf.mxu2 }
 0xf09   : > { %v9469_v38 = vpop.f32.mrf.mxu3  ;;  %v7793_v8 = vmax.f32 %v7363_v6, 0.0  ;;  %v8873_v12 = vmax.f32 %v8416_v18, 0.0 }
 0xf0a   : > { %v9953_v3 = vmax.f32 %v9469_v38, 0.0 }
 0xf0b   : > { %v10523_v28 = vpop.f32.mrf.mxu0  ;;  %7402 = vmatmul.bf16.gmra.mxu1 %v14667_v57 }
 0xf0c   : > { %11034 = vst.msk [vmem:[%s13799_s5 + $0x2b8] sm:$0xff] %vm10946_vm1, %v10523_v28 }
 0xf10   : > { %v7365_v9 = vpop.f32.mrf.mxu1  ;;  %v8418_v23 = vpop.f32.mrf.mxu2 }
 0xf11   : > { %v7794_v26 = vmax.f32 %v7365_v9, 0.0  ;;  %v8874_v55 = vmax.f32 %v8418_v23, 0.0  ;;  %v9471_v10 = vpop.f32.mrf.mxu3 }
 0xf12   : > { %v9954_v34 = vmax.f32 %v9471_v10, 0.0 }
 0xf13   : > { %v7979_v13 = vpack.c.bf16 %v7794_v26, %v7793_v8  ;;  %v9068_v16 = vpack.c.bf16 %v8874_v55, %v8873_v12  ;;  %v10526_v1 = vpop.f32.mrf.mxu0 }
 0xf14   : > { %v10157_v48 = vpack.c.bf16 %v9954_v34, %v9953_v3  ;;  %11035 = vst.msk [vmem:[%s13799_s5 + $0x2c0] sm:$0xff] %vm10946_vm1, %v10526_v1  ;;  %v14669_v34 = vld [vmem:[#allocation13_spill] sm:$0xff] }
 0xf15   : > { %8460 = vmatmul.bf16.gmra.mxu2 %v7979_v13  ;;  %9513 = vmatmul.bf16.gmra.mxu3 %v9068_v16 }
 0xf16   : > { %10565 = vmatmul.bf16.gmra.mxu0 %v10157_v48 }
 0xf18   : > { %v7368_v63 = vpop.f32.mrf.mxu1  ;;  %v8421_v49 = vpop.f32.mrf.mxu2 }
 0xf19   : > { %v9474_v11 = vpop.f32.mrf.mxu3  ;;  %v7795_v45 = vmax.f32 %v7368_v63, 0.0  ;;  %v8875_v61 = vmax.f32 %v8421_v49, 0.0 }
 0xf1a   : > { %v9955_v28 = vmax.f32 %v9474_v11, 0.0 }
 0xf1b   : > { %v10528_v17 = vpop.f32.mrf.mxu0  ;;  %7407 = vmatmul.bf16.gmra.mxu1 %v14668_v46 }
 0xf1c   : > { %11036 = vst.msk [vmem:[%s13799_s5 + $0x2c8] sm:$0xff] %vm10946_vm1, %v10528_v17 }
 0xf20   : > { %v7370_v41 = vpop.f32.mrf.mxu1  ;;  %v8423_v39 = vpop.f32.mrf.mxu2 }
 0xf21   : > { %v7796_v6 = vmax.f32 %v7370_v41, 0.0  ;;  %v8876_v18 = vmax.f32 %v8423_v39, 0.0  ;;  %v9476_v38 = vpop.f32.mrf.mxu3 }
 0xf22   : > { %v9956_v57 = vmax.f32 %v9476_v38, 0.0 }
 0xf23   : > { %v7980_v9 = vpack.c.bf16 %v7796_v6, %v7795_v45  ;;  %v9069_v23 = vpack.c.bf16 %v8876_v18, %v8875_v61  ;;  %v10531_v8 = vpop.f32.mrf.mxu0 }
 0xf24   : > { %v10158_v12 = vpack.c.bf16 %v9956_v57, %v9955_v28  ;;  %11037 = vst.msk [vmem:[%s13799_s5 + $0x2d0] sm:$0xff] %vm10946_vm1, %v10531_v8  ;;  %v14670_v57 = vld [vmem:[#allocation15_spill] sm:$0xff] }
 0xf25   : > { %8465 = vmatmul.bf16.gmra.mxu2 %v7980_v9  ;;  %9518 = vmatmul.bf16.gmra.mxu3 %v9069_v23 }
 0xf26   : > { %10570 = vmatmul.bf16.gmra.mxu0 %v10158_v12 }
 0xf28   : > { %v7373_v26 = vpop.f32.mrf.mxu1  ;;  %v8426_v55 = vpop.f32.mrf.mxu2 }
 0xf29   : > { %v9479_v10 = vpop.f32.mrf.mxu3  ;;  %v7797_v1 = vmax.f32 %v7373_v26, 0.0  ;;  %v8877_v48 = vmax.f32 %v8426_v55, 0.0 }
 0xf2a   : > { %v9957_v17 = vmax.f32 %v9479_v10, 0.0 }
 0xf2b   : > { %v10533_v3 = vpop.f32.mrf.mxu0  ;;  %7412 = vmatmul.bf16.gmra.mxu1 %v14669_v34 }
 0xf2c   : > { %11038 = vst.msk [vmem:[%s13799_s5 + $0x2d8] sm:$0xff] %vm10946_vm1, %v10533_v3 }
 0xf30   : > { %v7375_v13 = vpop.f32.mrf.mxu1  ;;  %v8428_v16 = vpop.f32.mrf.mxu2 }
 0xf31   : > { %v7798_v63 = vmax.f32 %v7375_v13, 0.0  ;;  %v8878_v49 = vmax.f32 %v8428_v16, 0.0  ;;  %v9481_v11 = vpop.f32.mrf.mxu3 }
 0xf32   : > { %v9958_v46 = vmax.f32 %v9481_v11, 0.0 }
 0xf33   : > { %v7981_v41 = vpack.c.bf16 %v7798_v63, %v7797_v1  ;;  %v9070_v39 = vpack.c.bf16 %v8878_v49, %v8877_v48  ;;  %v10536_v45 = vpop.f32.mrf.mxu0 }
 0xf34   : > { %v10159_v61 = vpack.c.bf16 %v9958_v46, %v9957_v17  ;;  %11039 = vst.msk [vmem:[%s13799_s5 + $0x2e0] sm:$0xff] %vm10946_vm1, %v10536_v45  ;;  %v14671_v46 = vld [vmem:[#allocation17_spill] sm:$0xff] }
 0xf35   : > { %8470 = vmatmul.bf16.gmra.mxu2 %v7981_v41  ;;  %9523 = vmatmul.bf16.gmra.mxu3 %v9070_v39 }
 0xf36   : > { %10575 = vmatmul.bf16.gmra.mxu0 %v10159_v61 }
 0xf38   : > { %v7378_v6 = vpop.f32.mrf.mxu1  ;;  %v8431_v18 = vpop.f32.mrf.mxu2 }
 0xf39   : > { %v9484_v38 = vpop.f32.mrf.mxu3  ;;  %v7799_v8 = vmax.f32 %v7378_v6, 0.0  ;;  %v8879_v12 = vmax.f32 %v8431_v18, 0.0 }
 0xf3a   : > { %v9959_v3 = vmax.f32 %v9484_v38, 0.0 }
 0xf3b   : > { %v10538_v28 = vpop.f32.mrf.mxu0  ;;  %7417 = vmatmul.bf16.gmra.mxu1 %v14670_v57 }
 0xf3c   : > { %11040 = vst.msk [vmem:[%s13799_s5 + $0x2e8] sm:$0xff] %vm10946_vm1, %v10538_v28 }
 0xf40   : > { %v7380_v9 = vpop.f32.mrf.mxu1  ;;  %v8433_v23 = vpop.f32.mrf.mxu2 }
 0xf41   : > { %v7800_v26 = vmax.f32 %v7380_v9, 0.0  ;;  %v8880_v55 = vmax.f32 %v8433_v23, 0.0  ;;  %v9486_v10 = vpop.f32.mrf.mxu3 }
 0xf42   : > { %v9960_v34 = vmax.f32 %v9486_v10, 0.0 }
 0xf43   : > { %v7982_v13 = vpack.c.bf16 %v7800_v26, %v7799_v8  ;;  %v9071_v16 = vpack.c.bf16 %v8880_v55, %v8879_v12  ;;  %v10541_v1 = vpop.f32.mrf.mxu0 }
 0xf44   : > { %v10160_v48 = vpack.c.bf16 %v9960_v34, %v9959_v3  ;;  %11041 = vst.msk [vmem:[%s13799_s5 + $0x2f0] sm:$0xff] %vm10946_vm1, %v10541_v1  ;;  %v14672_v34 = vld [vmem:[#allocation19_spill] sm:$0xff] }
 0xf45   : > { %8475 = vmatmul.bf16.gmra.mxu2 %v7982_v13  ;;  %9528 = vmatmul.bf16.gmra.mxu3 %v9071_v16 }
 0xf46   : > { %10580 = vmatmul.bf16.gmra.mxu0 %v10160_v48 }
 0xf48   : > { %v7383_v63 = vpop.f32.mrf.mxu1  ;;  %v8436_v49 = vpop.f32.mrf.mxu2 }
 0xf49   : > { %v9489_v11 = vpop.f32.mrf.mxu3  ;;  %v7801_v45 = vmax.f32 %v7383_v63, 0.0  ;;  %v8881_v61 = vmax.f32 %v8436_v49, 0.0 }
 0xf4a   : > { %v9961_v28 = vmax.f32 %v9489_v11, 0.0 }
 0xf4b   : > { %v10543_v17 = vpop.f32.mrf.mxu0  ;;  %7422 = vmatmul.bf16.gmra.mxu1 %v14671_v46 }
 0xf4c   : > { %11042 = vst.msk [vmem:[%s13799_s5 + $0x2f8] sm:$0xff] %vm10946_vm1, %v10543_v17 }
 0xf50   : > { %v7385_v41 = vpop.f32.mrf.mxu1  ;;  %v8438_v39 = vpop.f32.mrf.mxu2 }
 0xf51   : > { %v7802_v6 = vmax.f32 %v7385_v41, 0.0  ;;  %v8882_v18 = vmax.f32 %v8438_v39, 0.0  ;;  %v9491_v38 = vpop.f32.mrf.mxu3 }
 0xf52   : > { %v9962_v57 = vmax.f32 %v9491_v38, 0.0 }
 0xf53   : > { %v7983_v9 = vpack.c.bf16 %v7802_v6, %v7801_v45  ;;  %v9072_v23 = vpack.c.bf16 %v8882_v18, %v8881_v61  ;;  %v10546_v8 = vpop.f32.mrf.mxu0 }
 0xf54   : > { %v10161_v12 = vpack.c.bf16 %v9962_v57, %v9961_v28  ;;  %11043 = vst.msk [vmem:[%s13799_s5 + $0x300] sm:$0xff] %vm10946_vm1, %v10546_v8  ;;  %v14673_v57 = vld [vmem:[#allocation21_spill] sm:$0xff] }
 0xf55   : > { %8480 = vmatmul.bf16.gmra.mxu2 %v7983_v9  ;;  %9533 = vmatmul.bf16.gmra.mxu3 %v9072_v23 }
 0xf56   : > { %10585 = vmatmul.bf16.gmra.mxu0 %v10161_v12 }
 0xf58   : > { %v7388_v26 = vpop.f32.mrf.mxu1  ;;  %v8441_v55 = vpop.f32.mrf.mxu2 }
 0xf59   : > { %v9494_v10 = vpop.f32.mrf.mxu3  ;;  %v7803_v1 = vmax.f32 %v7388_v26, 0.0  ;;  %v8883_v48 = vmax.f32 %v8441_v55, 0.0 }
 0xf5a   : > { %v9963_v17 = vmax.f32 %v9494_v10, 0.0 }
 0xf5b   : > { %v10548_v3 = vpop.f32.mrf.mxu0  ;;  %7427 = vmatmul.bf16.gmra.mxu1 %v14672_v34 }
 0xf5c   : > { %11044 = vst.msk [vmem:[%s13799_s5 + $0x308] sm:$0xff] %vm10946_vm1, %v10548_v3 }
 0xf60   : > { %v7390_v13 = vpop.f32.mrf.mxu1  ;;  %v8443_v16 = vpop.f32.mrf.mxu2 }
 0xf61   : > { %v7804_v63 = vmax.f32 %v7390_v13, 0.0  ;;  %v8884_v49 = vmax.f32 %v8443_v16, 0.0  ;;  %v9496_v11 = vpop.f32.mrf.mxu3 }
 0xf62   : > { %v9964_v46 = vmax.f32 %v9496_v11, 0.0 }
 0xf63   : > { %v7984_v41 = vpack.c.bf16 %v7804_v63, %v7803_v1  ;;  %v9073_v39 = vpack.c.bf16 %v8884_v49, %v8883_v48  ;;  %v10551_v45 = vpop.f32.mrf.mxu0 }
 0xf64   : > { %v10162_v61 = vpack.c.bf16 %v9964_v46, %v9963_v17  ;;  %11045 = vst.msk [vmem:[%s13799_s5 + $0x310] sm:$0xff] %vm10946_vm1, %v10551_v45  ;;  %v14674_v46 = vld [vmem:[#allocation23_spill] sm:$0xff] }
 0xf65   : > { %8485 = vmatmul.bf16.gmra.mxu2 %v7984_v41  ;;  %9538 = vmatmul.bf16.gmra.mxu3 %v9073_v39 }
 0xf66   : > { %10590 = vmatmul.bf16.gmra.mxu0 %v10162_v61 }
 0xf68   : > { %v7393_v6 = vpop.f32.mrf.mxu1  ;;  %v8446_v18 = vpop.f32.mrf.mxu2 }
 0xf69   : > { %v9499_v38 = vpop.f32.mrf.mxu3  ;;  %v7805_v8 = vmax.f32 %v7393_v6, 0.0  ;;  %v8885_v12 = vmax.f32 %v8446_v18, 0.0 }
 0xf6a   : > { %v9965_v3 = vmax.f32 %v9499_v38, 0.0 }
 0xf6b   : > { %v10553_v28 = vpop.f32.mrf.mxu0  ;;  %7432 = vmatmul.bf16.gmra.mxu1 %v14673_v57 }
 0xf6c   : > { %11046 = vst.msk [vmem:[%s13799_s5 + $0x318] sm:$0xff] %vm10946_vm1, %v10553_v28 }
 0xf70   : > { %v7395_v9 = vpop.f32.mrf.mxu1  ;;  %v8448_v23 = vpop.f32.mrf.mxu2 }
 0xf71   : > { %v7806_v26 = vmax.f32 %v7395_v9, 0.0  ;;  %v8886_v55 = vmax.f32 %v8448_v23, 0.0  ;;  %v9501_v10 = vpop.f32.mrf.mxu3 }
 0xf72   : > { %v9966_v34 = vmax.f32 %v9501_v10, 0.0 }
 0xf73   : > { %v7985_v13 = vpack.c.bf16 %v7806_v26, %v7805_v8  ;;  %v9074_v16 = vpack.c.bf16 %v8886_v55, %v8885_v12  ;;  %v10556_v1 = vpop.f32.mrf.mxu0 }
 0xf74   : > { %v10163_v48 = vpack.c.bf16 %v9966_v34, %v9965_v3  ;;  %11047 = vst.msk [vmem:[%s13799_s5 + $0x320] sm:$0xff] %vm10946_vm1, %v10556_v1  ;;  %v14675_v34 = vld [vmem:[#allocation25_spill] sm:$0xff] }
 0xf75   : > { %8490 = vmatmul.bf16.gmra.mxu2 %v7985_v13  ;;  %9543 = vmatmul.bf16.gmra.mxu3 %v9074_v16 }
 0xf76   : > { %10595 = vmatmul.bf16.gmra.mxu0 %v10163_v48 }
 0xf78   : > { %v7398_v63 = vpop.f32.mrf.mxu1  ;;  %v8451_v49 = vpop.f32.mrf.mxu2 }
 0xf79   : > { %v9504_v11 = vpop.f32.mrf.mxu3  ;;  %v7807_v45 = vmax.f32 %v7398_v63, 0.0  ;;  %v8887_v61 = vmax.f32 %v8451_v49, 0.0 }
 0xf7a   : > { %v9967_v28 = vmax.f32 %v9504_v11, 0.0 }
 0xf7b   : > { %v10558_v17 = vpop.f32.mrf.mxu0  ;;  %7437 = vmatmul.bf16.gmra.mxu1 %v14674_v46 }
 0xf7c   : > { %11048 = vst.msk [vmem:[%s13799_s5 + $0x328] sm:$0xff] %vm10946_vm1, %v10558_v17 }
 0xf80   : > { %v7400_v41 = vpop.f32.mrf.mxu1  ;;  %v8453_v39 = vpop.f32.mrf.mxu2 }
 0xf81   : > { %v7808_v6 = vmax.f32 %v7400_v41, 0.0  ;;  %v8888_v18 = vmax.f32 %v8453_v39, 0.0  ;;  %v9506_v38 = vpop.f32.mrf.mxu3 }
 0xf82   : > { %v9968_v57 = vmax.f32 %v9506_v38, 0.0 }
 0xf83   : > { %v7986_v9 = vpack.c.bf16 %v7808_v6, %v7807_v45  ;;  %v9075_v23 = vpack.c.bf16 %v8888_v18, %v8887_v61  ;;  %v10561_v8 = vpop.f32.mrf.mxu0 }
 0xf84   : > { %v10164_v12 = vpack.c.bf16 %v9968_v57, %v9967_v28  ;;  %11049 = vst.msk [vmem:[%s13799_s5 + $0x330] sm:$0xff] %vm10946_vm1, %v10561_v8  ;;  %v14676_v57 = vld [vmem:[#allocation28_spill] sm:$0xff] }
 0xf85   : > { %8495 = vmatmul.bf16.gmra.mxu2 %v7986_v9  ;;  %9548 = vmatmul.bf16.gmra.mxu3 %v9075_v23 }
 0xf86   : > { %10600 = vmatmul.bf16.gmra.mxu0 %v10164_v12 }
 0xf88   : > { %v7403_v26 = vpop.f32.mrf.mxu1  ;;  %v8456_v55 = vpop.f32.mrf.mxu2 }
 0xf89   : > { %v9509_v10 = vpop.f32.mrf.mxu3  ;;  %v7809_v1 = vmax.f32 %v7403_v26, 0.0  ;;  %v8889_v48 = vmax.f32 %v8456_v55, 0.0 }
 0xf8a   : > { %v9969_v17 = vmax.f32 %v9509_v10, 0.0 }
 0xf8b   : > { %v10563_v3 = vpop.f32.mrf.mxu0  ;;  %7442 = vmatmul.bf16.gmra.mxu1 %v14675_v34 }
 0xf8c   : > { %11050 = vst.msk [vmem:[%s13799_s5 + $0x338] sm:$0xff] %vm10946_vm1, %v10563_v3 }
 0xf90   : > { %v7405_v13 = vpop.f32.mrf.mxu1  ;;  %v8458_v16 = vpop.f32.mrf.mxu2 }
 0xf91   : > { %v7810_v63 = vmax.f32 %v7405_v13, 0.0  ;;  %v8890_v49 = vmax.f32 %v8458_v16, 0.0  ;;  %v9511_v11 = vpop.f32.mrf.mxu3 }
 0xf92   : > { %v9970_v46 = vmax.f32 %v9511_v11, 0.0 }
 0xf93   : > { %v7987_v41 = vpack.c.bf16 %v7810_v63, %v7809_v1  ;;  %v9076_v39 = vpack.c.bf16 %v8890_v49, %v8889_v48  ;;  %v10566_v45 = vpop.f32.mrf.mxu0 }
 0xf94   : > { %v10165_v61 = vpack.c.bf16 %v9970_v46, %v9969_v17  ;;  %11051 = vst.msk [vmem:[%s13799_s5 + $0x340] sm:$0xff] %vm10946_vm1, %v10566_v45  ;;  %v14677_v46 = vld [vmem:[#allocation31_spill] sm:$0xff] }
 0xf95   : > { %8500 = vmatmul.bf16.gmra.mxu2 %v7987_v41  ;;  %9553 = vmatmul.bf16.gmra.mxu3 %v9076_v39 }
 0xf96   : > { %10605 = vmatmul.bf16.gmra.mxu0 %v10165_v61 }
 0xf98   : > { %v7408_v6 = vpop.f32.mrf.mxu1  ;;  %v8461_v18 = vpop.f32.mrf.mxu2 }
 0xf99   : > { %v9514_v38 = vpop.f32.mrf.mxu3  ;;  %v7811_v8 = vmax.f32 %v7408_v6, 0.0  ;;  %v8891_v12 = vmax.f32 %v8461_v18, 0.0 }
 0xf9a   : > { %v9971_v3 = vmax.f32 %v9514_v38, 0.0 }
 0xf9b   : > { %v10568_v28 = vpop.f32.mrf.mxu0  ;;  %7447 = vmatmul.bf16.gmra.mxu1 %v14676_v57 }
 0xf9c   : > { %11052 = vst.msk [vmem:[%s13799_s5 + $0x348] sm:$0xff] %vm10946_vm1, %v10568_v28 }
 0xfa0   : > { %v7410_v9 = vpop.f32.mrf.mxu1  ;;  %v8463_v23 = vpop.f32.mrf.mxu2 }
 0xfa1   : > { %v7812_v26 = vmax.f32 %v7410_v9, 0.0  ;;  %v8892_v55 = vmax.f32 %v8463_v23, 0.0  ;;  %v9516_v10 = vpop.f32.mrf.mxu3 }
 0xfa2   : > { %v9972_v34 = vmax.f32 %v9516_v10, 0.0 }
 0xfa3   : > { %v7988_v13 = vpack.c.bf16 %v7812_v26, %v7811_v8  ;;  %v9077_v16 = vpack.c.bf16 %v8892_v55, %v8891_v12  ;;  %v10571_v1 = vpop.f32.mrf.mxu0 }
 0xfa4   : > { %v10166_v48 = vpack.c.bf16 %v9972_v34, %v9971_v3  ;;  %11053 = vst.msk [vmem:[%s13799_s5 + $0x350] sm:$0xff] %vm10946_vm1, %v10571_v1  ;;  %v14678_v34 = vld [vmem:[#allocation34_spill] sm:$0xff] }
 0xfa5   : > { %8505 = vmatmul.bf16.gmra.mxu2 %v7988_v13  ;;  %9558 = vmatmul.bf16.gmra.mxu3 %v9077_v16 }
 0xfa6   : > { %10610 = vmatmul.bf16.gmra.mxu0 %v10166_v48 }
 0xfa8   : > { %v7413_v63 = vpop.f32.mrf.mxu1  ;;  %v8466_v49 = vpop.f32.mrf.mxu2 }
 0xfa9   : > { %v9519_v11 = vpop.f32.mrf.mxu3  ;;  %v7813_v45 = vmax.f32 %v7413_v63, 0.0  ;;  %v8893_v61 = vmax.f32 %v8466_v49, 0.0 }
 0xfaa   : > { %v9973_v28 = vmax.f32 %v9519_v11, 0.0 }
 0xfab   : > { %v10573_v17 = vpop.f32.mrf.mxu0  ;;  %7452 = vmatmul.bf16.gmra.mxu1 %v14677_v46 }
 0xfac   : > { %11054 = vst.msk [vmem:[%s13799_s5 + $0x358] sm:$0xff] %vm10946_vm1, %v10573_v17 }
 0xfb0   : > { %v7415_v41 = vpop.f32.mrf.mxu1  ;;  %v8468_v39 = vpop.f32.mrf.mxu2 }
 0xfb1   : > { %v7814_v6 = vmax.f32 %v7415_v41, 0.0  ;;  %v8894_v18 = vmax.f32 %v8468_v39, 0.0  ;;  %v9521_v38 = vpop.f32.mrf.mxu3 }
 0xfb2   : > { %v9974_v57 = vmax.f32 %v9521_v38, 0.0 }
 0xfb3   : > { %v7989_v9 = vpack.c.bf16 %v7814_v6, %v7813_v45  ;;  %v9078_v23 = vpack.c.bf16 %v8894_v18, %v8893_v61  ;;  %v10576_v8 = vpop.f32.mrf.mxu0 }
 0xfb4   : > { %v10167_v12 = vpack.c.bf16 %v9974_v57, %v9973_v28  ;;  %11055 = vst.msk [vmem:[%s13799_s5 + $0x360] sm:$0xff] %vm10946_vm1, %v10576_v8  ;;  %v14679_v57 = vld [vmem:[#allocation36_spill] sm:$0xff] }
 0xfb5   : > { %8510 = vmatmul.bf16.gmra.mxu2 %v7989_v9  ;;  %9563 = vmatmul.bf16.gmra.mxu3 %v9078_v23 }
 0xfb6   : > { %10615 = vmatmul.bf16.gmra.mxu0 %v10167_v12 }
 0xfb8   : > { %v7418_v26 = vpop.f32.mrf.mxu1  ;;  %v8471_v55 = vpop.f32.mrf.mxu2 }
 0xfb9   : > { %v9524_v10 = vpop.f32.mrf.mxu3  ;;  %v7815_v1 = vmax.f32 %v7418_v26, 0.0  ;;  %v8895_v48 = vmax.f32 %v8471_v55, 0.0 }
 0xfba   : > { %v9975_v17 = vmax.f32 %v9524_v10, 0.0 }
 0xfbb   : > { %v10578_v3 = vpop.f32.mrf.mxu0  ;;  %7457 = vmatmul.bf16.gmra.mxu1 %v14678_v34 }
 0xfbc   : > { %11056 = vst.msk [vmem:[%s13799_s5 + $0x368] sm:$0xff] %vm10946_vm1, %v10578_v3 }
 0xfc0   : > { %v7420_v13 = vpop.f32.mrf.mxu1  ;;  %v8473_v16 = vpop.f32.mrf.mxu2 }
 0xfc1   : > { %v7816_v63 = vmax.f32 %v7420_v13, 0.0  ;;  %v8896_v49 = vmax.f32 %v8473_v16, 0.0  ;;  %v9526_v11 = vpop.f32.mrf.mxu3 }
 0xfc2   : > { %v9976_v46 = vmax.f32 %v9526_v11, 0.0 }
 0xfc3   : > { %v7990_v41 = vpack.c.bf16 %v7816_v63, %v7815_v1  ;;  %v9079_v39 = vpack.c.bf16 %v8896_v49, %v8895_v48  ;;  %v10581_v45 = vpop.f32.mrf.mxu0 }
 0xfc4   : > { %v10168_v61 = vpack.c.bf16 %v9976_v46, %v9975_v17  ;;  %11057 = vst.msk [vmem:[%s13799_s5 + $0x370] sm:$0xff] %vm10946_vm1, %v10581_v45 }
 0xfc5   : > { %8515 = vmatmul.bf16.gmra.mxu2 %v7990_v41  ;;  %9568 = vmatmul.bf16.gmra.mxu3 %v9079_v39 }
 0xfc6   : > { %10620 = vmatmul.bf16.gmra.mxu0 %v10168_v61 }
 0xfc8   : > { %v7423_v6 = vpop.f32.mrf.mxu1  ;;  %v8476_v18 = vpop.f32.mrf.mxu2 }
 0xfc9   : > { %v9529_v38 = vpop.f32.mrf.mxu3  ;;  %v7817_v8 = vmax.f32 %v7423_v6, 0.0  ;;  %v8897_v12 = vmax.f32 %v8476_v18, 0.0 }
 0xfca   : > { %v9977_v3 = vmax.f32 %v9529_v38, 0.0 }
 0xfcb   : > { %v10583_v28 = vpop.f32.mrf.mxu0  ;;  %7462 = vmatmul.bf16.gmra.mxu1 %v14679_v57 }
 0xfcc   : > { %11058 = vst.msk [vmem:[%s13799_s5 + $0x378] sm:$0xff] %vm10946_vm1, %v10583_v28 }
 0xfd0   : > { %v7425_v9 = vpop.f32.mrf.mxu1  ;;  %v8478_v23 = vpop.f32.mrf.mxu2 }
 0xfd1   : > { %v7818_v26 = vmax.f32 %v7425_v9, 0.0  ;;  %v8898_v55 = vmax.f32 %v8478_v23, 0.0  ;;  %v9531_v10 = vpop.f32.mrf.mxu3 }
 0xfd2   : > { %v9978_v34 = vmax.f32 %v9531_v10, 0.0 }
 0xfd3   : > { %v7991_v13 = vpack.c.bf16 %v7818_v26, %v7817_v8  ;;  %v9080_v16 = vpack.c.bf16 %v8898_v55, %v8897_v12  ;;  %v10586_v1 = vpop.f32.mrf.mxu0 }
 0xfd4   : > { %v10169_v48 = vpack.c.bf16 %v9978_v34, %v9977_v3  ;;  %11059 = vst.msk [vmem:[%s13799_s5 + $0x380] sm:$0xff] %vm10946_vm1, %v10586_v1 }
 0xfd5   : > { %8520 = vmatmul.bf16.gmra.mxu2 %v7991_v13  ;;  %9573 = vmatmul.bf16.gmra.mxu3 %v9080_v16 }
 0xfd6   : > { %10625 = vmatmul.bf16.gmra.mxu0 %v10169_v48 }
 0xfd8   : > { %v7428_v63 = vpop.f32.mrf.mxu1  ;;  %v8481_v49 = vpop.f32.mrf.mxu2 }
 0xfd9   : > { %v9534_v11 = vpop.f32.mrf.mxu3  ;;  %v7819_v39 = vmax.f32 %v7428_v63, 0.0  ;;  %v8899_v45 = vmax.f32 %v8481_v49, 0.0 }
 0xfda   : > { %v9979_v38 = vmax.f32 %v9534_v11, 0.0 }
 0xfdb   : > { %v10588_v17 = vpop.f32.mrf.mxu0  ;;  %7467 = vmatmul.bf16.gmra.mxu1 %v13659_v4 }
 0xfdc   : > { %11060 = vst.msk [vmem:[%s13799_s5 + $0x388] sm:$0xff] %vm10946_vm1, %v10588_v17 }
 0xfe0   : > { %v7430_v46 = vpop.f32.mrf.mxu1  ;;  %v8483_v41 = vpop.f32.mrf.mxu2 }
 0xfe1   : > { %v7820_v61 = vmax.f32 %v7430_v46, 0.0  ;;  %v8900_v6 = vmax.f32 %v8483_v41, 0.0  ;;  %v9536_v18 = vpop.f32.mrf.mxu3 }
 0xfe2   : > { %v9980_v28 = vmax.f32 %v9536_v18, 0.0 }
 0xfe3   : > { %v7992_v57 = vpack.c.bf16 %v7820_v61, %v7819_v39  ;;  %v9081_v9 = vpack.c.bf16 %v8900_v6, %v8899_v45  ;;  %v10591_v23 = vpop.f32.mrf.mxu0 }
 0xfe4   : > { %v10170_v8 = vpack.c.bf16 %v9980_v28, %v9979_v38  ;;  %11061 = vst.msk [vmem:[%s13799_s5 + $0x390] sm:$0xff] %vm10946_vm1, %v10591_v23 }
 0xfe5   : > { %8525 = vmatmul.bf16.gmra.mxu2 %v7992_v57  ;;  %9578 = vmatmul.bf16.gmra.mxu3 %v9081_v9 }
 0xfe6   : > { %10630 = vmatmul.bf16.gmra.mxu0 %v10170_v8 }
 0xfe8   : > { %v7433_v4 = vpop.f32.mrf.mxu1  ;;  %v8486_v12 = vpop.f32.mrf.mxu2 }
 0xfe9   : > { %v9539_v26 = vpop.f32.mrf.mxu3  ;;  %v7821_v34 = vmax.f32 %v7433_v4, 0.0  ;;  %v8901_v13 = vmax.f32 %v8486_v12, 0.0 }
 0xfea   : > { %v9981_v63 = vmax.f32 %v9539_v26, 0.0 }
 0xfeb   : > { %v10593_v55 = vpop.f32.mrf.mxu0  ;;  %7472 = vmatmul.bf16.gmra.mxu1 %v13663_v62 }
 0xfec   : > { %11062 = vst.msk [vmem:[%s13799_s5 + $0x398] sm:$0xff] %vm10946_vm1, %v10593_v55 }
 0xff0   : > { %v7435_v10 = vpop.f32.mrf.mxu1  ;;  %v8488_v3 = vpop.f32.mrf.mxu2 }
 0xff1   : > { %v7822_v16 = vmax.f32 %v7435_v10, 0.0  ;;  %v8902_v1 = vmax.f32 %v8488_v3, 0.0  ;;  %v9541_v48 = vpop.f32.mrf.mxu3 }
 0xff2   : > { %v9982_v49 = vmax.f32 %v9541_v48, 0.0 }
 0xff3   : > { %v7993_v11 = vpack.c.bf16 %v7822_v16, %v7821_v34  ;;  %v9082_v17 = vpack.c.bf16 %v8902_v1, %v8901_v13  ;;  %v10596_v46 = vpop.f32.mrf.mxu0 }
 0xff4   : > { %v10171_v41 = vpack.c.bf16 %v9982_v49, %v9981_v63  ;;  %11063 = vst.msk [vmem:[%s13799_s5 + $0x3a0] sm:$0xff] %vm10946_vm1, %v10596_v46 }
 0xff5   : > { %8530 = vmatmul.bf16.gmra.mxu2 %v7993_v11  ;;  %9583 = vmatmul.bf16.gmra.mxu3 %v9082_v17 }
 0xff6   : > { %10635 = vmatmul.bf16.gmra.mxu0 %v10171_v41 }
 0xff8   : > { %v7438_v62 = vpop.f32.mrf.mxu1  ;;  %v8491_v39 = vpop.f32.mrf.mxu2 }
 0xff9   : > { %v9544_v45 = vpop.f32.mrf.mxu3  ;;  %v7823_v38 = vmax.f32 %v7438_v62, 0.0  ;;  %v8903_v28 = vmax.f32 %v8491_v39, 0.0 }
 0xffa   : > { %v9983_v8 = vmax.f32 %v9544_v45, 0.0 }
 0xffb   : > { %v10598_v61 = vpop.f32.mrf.mxu0  ;;  %7477 = vmatmul.bf16.gmra.mxu1 %v13675_v0 }
 0xffc   : > { %11064 = vst.msk [vmem:[%s13799_s5 + $0x3a8] sm:$0xff] %vm10946_vm1, %v10598_v61 }
0x1000   : > { %v7440_v6 = vpop.f32.mrf.mxu1  ;;  %v8493_v18 = vpop.f32.mrf.mxu2 }
0x1001   : > { %v7824_v57 = vmax.f32 %v7440_v6, 0.0  ;;  %v8904_v9 = vmax.f32 %v8493_v18, 0.0  ;;  %v9546_v23 = vpop.f32.mrf.mxu3 }
0x1002   : > { %v9984_v4 = vmax.f32 %v9546_v23, 0.0 }
0x1003   : > { %v7994_v12 = vpack.c.bf16 %v7824_v57, %v7823_v38  ;;  %v9083_v26 = vpack.c.bf16 %v8904_v9, %v8903_v28  ;;  %v10601_v55 = vpop.f32.mrf.mxu0 }
0x1004   : > { %v10172_v10 = vpack.c.bf16 %v9984_v4, %v9983_v8  ;;  %11065 = vst.msk [vmem:[%s13799_s5 + $0x3b0] sm:$0xff] %vm10946_vm1, %v10601_v55 }
0x1005   : > { %8535 = vmatmul.bf16.gmra.mxu2 %v7994_v12  ;;  %9588 = vmatmul.bf16.gmra.mxu3 %v9083_v26 }
0x1006   : > { %10640 = vmatmul.bf16.gmra.mxu0 %v10172_v10 }
0x1008   : > { %v7443_v0 = vpop.f32.mrf.mxu1  ;;  %v8496_v3 = vpop.f32.mrf.mxu2 }
0x1009   : > { %v9549_v34 = vpop.f32.mrf.mxu3  ;;  %v7825_v48 = vmax.f32 %v7443_v0, 0.0  ;;  %v8905_v63 = vmax.f32 %v8496_v3, 0.0 }
0x100a   : > { %v9985_v46 = vmax.f32 %v9549_v34, 0.0 }
0x100b   : > { %v10603_v13 = vpop.f32.mrf.mxu0  ;;  %7482 = vmatmul.bf16.gmra.mxu1 %v13687_v19 }
0x100c   : > { %11066 = vst.msk [vmem:[%s13799_s5 + $0x3b8] sm:$0xff] %vm10946_vm1, %v10603_v13 }
0x1010   : > { %v7445_v16 = vpop.f32.mrf.mxu1  ;;  %v8498_v1 = vpop.f32.mrf.mxu2 }
0x1011   : > { %v7826_v49 = vmax.f32 %v7445_v16, 0.0  ;;  %v8906_v11 = vmax.f32 %v8498_v1, 0.0  ;;  %v9551_v17 = vpop.f32.mrf.mxu3 }
0x1012   : > { %v9986_v41 = vmax.f32 %v9551_v17, 0.0 }
0x1013   : > { %v7995_v62 = vpack.c.bf16 %v7826_v49, %v7825_v48  ;;  %v9084_v39 = vpack.c.bf16 %v8906_v11, %v8905_v63  ;;  %v10606_v45 = vpop.f32.mrf.mxu0 }
0x1014   : > { %v10173_v61 = vpack.c.bf16 %v9986_v41, %v9985_v46  ;;  %11067 = vst.msk [vmem:[%s13799_s5 + $0x3c0] sm:$0xff] %vm10946_vm1, %v10606_v45 }
0x1015   : > { %8540 = vmatmul.bf16.gmra.mxu2 %v7995_v62  ;;  %9593 = vmatmul.bf16.gmra.mxu3 %v9084_v39 }
0x1016   : > { %10645 = vmatmul.bf16.gmra.mxu0 %v10173_v61 }
0x1018   : > { %v7448_v19 = vpop.f32.mrf.mxu1  ;;  %v8501_v6 = vpop.f32.mrf.mxu2 }
0x1019   : > { %v9554_v18 = vpop.f32.mrf.mxu3  ;;  %v7827_v9 = vmax.f32 %v7448_v19, 0.0  ;;  %v8907_v23 = vmax.f32 %v8501_v6, 0.0 }
0x101a   : > { %v9987_v26 = vmax.f32 %v9554_v18, 0.0 }
0x101b   : > { %v10608_v38 = vpop.f32.mrf.mxu0  ;;  %7487 = vmatmul.bf16.gmra.mxu1 %v13694_v33 }
0x101c   : > { %11068 = vst.msk [vmem:[%s13799_s5 + $0x3c8] sm:$0xff] %vm10946_vm1, %v10608_v38 }
0x1020   : > { %v7450_v28 = vpop.f32.mrf.mxu1  ;;  %v8503_v57 = vpop.f32.mrf.mxu2 }
0x1021   : > { %v7828_v8 = vmax.f32 %v7450_v28, 0.0  ;;  %v8908_v4 = vmax.f32 %v8503_v57, 0.0  ;;  %v9556_v12 = vpop.f32.mrf.mxu3 }
0x1022   : > { %v9988_v55 = vmax.f32 %v9556_v12, 0.0 }
0x1023   : > { %v7996_v10 = vpack.c.bf16 %v7828_v8, %v7827_v9  ;;  %v9085_v0 = vpack.c.bf16 %v8908_v4, %v8907_v23  ;;  %v10611_v3 = vpop.f32.mrf.mxu0 }
0x1024   : > { %v10174_v34 = vpack.c.bf16 %v9988_v55, %v9987_v26  ;;  %11069 = vst.msk [vmem:[%s13799_s5 + $0x3d0] sm:$0xff] %vm10946_vm1, %v10611_v3 }
0x1025   : > { %8545 = vmatmul.bf16.gmra.mxu2 %v7996_v10  ;;  %9598 = vmatmul.bf16.gmra.mxu3 %v9085_v0 }
0x1026   : > { %10650 = vmatmul.bf16.gmra.mxu0 %v10174_v34 }
0x1028   : > { %v7453_v33 = vpop.f32.mrf.mxu1  ;;  %v8506_v13 = vpop.f32.mrf.mxu2 }
0x1029   : > { %v9559_v16 = vpop.f32.mrf.mxu3  ;;  %v7829_v49 = vmax.f32 %v7453_v33, 0.0  ;;  %v8909_v11 = vmax.f32 %v8506_v13, 0.0 }
0x102a   : > { %v9989_v62 = vmax.f32 %v9559_v16, 0.0 }
0x102b   : > { %v10613_v1 = vpop.f32.mrf.mxu0  ;;  %7492 = vmatmul.bf16.gmra.mxu1 %v13697_v21 }
0x102c   : > { %11070 = vst.msk [vmem:[%s13799_s5 + $0x3d8] sm:$0xff] %vm10946_vm1, %v10613_v1 }
0x1030   : > { %v7455_v48 = vpop.f32.mrf.mxu1  ;;  %v8508_v63 = vpop.f32.mrf.mxu2 }
0x1031   : > { %v7830_v17 = vmax.f32 %v7455_v48, 0.0  ;;  %v8910_v46 = vmax.f32 %v8508_v63, 0.0  ;;  %v9561_v41 = vpop.f32.mrf.mxu3 }
0x1032   : > { %v9990_v39 = vmax.f32 %v9561_v41, 0.0 }
0x1033   : > { %v7997_v45 = vpack.c.bf16 %v7830_v17, %v7829_v49  ;;  %v9086_v61 = vpack.c.bf16 %v8910_v46, %v8909_v11  ;;  %v10616_v19 = vpop.f32.mrf.mxu0 }
0x1034   : > { %v10175_v6 = vpack.c.bf16 %v9990_v39, %v9989_v62  ;;  %11071 = vst.msk [vmem:[%s13799_s5 + $0x3e0] sm:$0xff] %vm10946_vm1, %v10616_v19 }
0x1035   : > { %8550 = vmatmul.bf16.gmra.mxu2 %v7997_v45  ;;  %9603 = vmatmul.bf16.gmra.mxu3 %v9086_v61 }
0x1036   : > { %10655 = vmatmul.bf16.gmra.mxu0 %v10175_v6 }
0x1038   : > { %v7458_v21 = vpop.f32.mrf.mxu1  ;;  %v8511_v18 = vpop.f32.mrf.mxu2 }
0x1039   : > { %v9564_v38 = vpop.f32.mrf.mxu3  ;;  %v7831_v23 = vmax.f32 %v7458_v21, 0.0  ;;  %v8911_v8 = vmax.f32 %v8511_v18, 0.0 }
0x103a   : > { %v9991_v55 = vmax.f32 %v9564_v38, 0.0 }
0x103b   : > { %v10618_v28 = vpop.f32.mrf.mxu0  ;;  %7497 = vmatmul.bf16.gmra.mxu1 %v13700_v47 }
0x103c   : > { %11072 = vst.msk [vmem:[%s13799_s5 + $0x3e8] sm:$0xff] %vm10946_vm1, %v10618_v28 }
0x1040   : > { %v7460_v57 = vpop.f32.mrf.mxu1  ;;  %v8513_v9 = vpop.f32.mrf.mxu2 }
0x1041   : > { %v7832_v4 = vmax.f32 %v7460_v57, 0.0  ;;  %v8912_v12 = vmax.f32 %v8513_v9, 0.0  ;;  %v9566_v26 = vpop.f32.mrf.mxu3 }
0x1042   : > { %v9992_v10 = vmax.f32 %v9566_v26, 0.0 }
0x1043   : > { %v7998_v0 = vpack.c.bf16 %v7832_v4, %v7831_v23  ;;  %v9087_v3 = vpack.c.bf16 %v8912_v12, %v8911_v8  ;;  %v10621_v34 = vpop.f32.mrf.mxu0 }
0x1044   : > { %v10176_v33 = vpack.c.bf16 %v9992_v10, %v9991_v55  ;;  %11073 = vst.msk [vmem:[%s13799_s5 + $0x3f0] sm:$0xff] %vm10946_vm1, %v10621_v34 }
0x1045   : > { %8555 = vmatmul.bf16.gmra.mxu2 %v7998_v0  ;;  %9608 = vmatmul.bf16.gmra.mxu3 %v9087_v3 }
0x1046   : > { %10660 = vmatmul.bf16.gmra.mxu0 %v10176_v33 }
0x1048   : > { %v7463_v47 = vpop.f32.mrf.mxu1  ;;  %v8516_v13 = vpop.f32.mrf.mxu2 }
0x1049   : > { %v9569_v16 = vpop.f32.mrf.mxu3  ;;  %v7833_v49 = vmax.f32 %v7463_v47, 0.0  ;;  %v8913_v11 = vmax.f32 %v8516_v13, 0.0 }
0x104a   : > { %v9993_v62 = vmax.f32 %v9569_v16, 0.0 }
0x104b   : > { %v10623_v1 = vpop.f32.mrf.mxu0  ;;  %7502 = vmatmul.bf16.gmra.mxu1 %v13703_v59 }
0x104c   : > { %11074 = vst.msk [vmem:[%s13799_s5 + $0x3f8] sm:$0xff] %vm10946_vm1, %v10623_v1 }
0x1050   : > { %v7465_v48 = vpop.f32.mrf.mxu1  ;;  %v8518_v63 = vpop.f32.mrf.mxu2 }
0x1051   : > { %v7834_v17 = vmax.f32 %v7465_v48, 0.0  ;;  %v8914_v46 = vmax.f32 %v8518_v63, 0.0  ;;  %v9571_v41 = vpop.f32.mrf.mxu3 }
0x1052   : > { %v9994_v39 = vmax.f32 %v9571_v41, 0.0 }
0x1053   : > { %v7999_v45 = vpack.c.bf16 %v7834_v17, %v7833_v49  ;;  %v9088_v61 = vpack.c.bf16 %v8914_v46, %v8913_v11  ;;  %v10626_v19 = vpop.f32.mrf.mxu0 }
0x1054   : > { %v10177_v6 = vpack.c.bf16 %v9994_v39, %v9993_v62  ;;  %11075 = vst.msk [vmem:[%s13799_s5 + $0x400] sm:$0xff] %vm10946_vm1, %v10626_v19 }
0x1055   : > { %8560 = vmatmul.bf16.gmra.mxu2 %v7999_v45  ;;  %9613 = vmatmul.bf16.gmra.mxu3 %v9088_v61 }
0x1056   : > { %10665 = vmatmul.bf16.gmra.mxu0 %v10177_v6 }
0x1058   : > { %v7468_v59 = vpop.f32.mrf.mxu1  ;;  %v8521_v21 = vpop.f32.mrf.mxu2 }
0x1059   : > { %v9574_v18 = vpop.f32.mrf.mxu3  ;;  %v7835_v9 = vmax.f32 %v7468_v59, 0.0  ;;  %v8915_v23 = vmax.f32 %v8521_v21, 0.0 }
0x105a   : > { %v9995_v26 = vmax.f32 %v9574_v18, 0.0 }
0x105b   : > { %v10628_v38 = vpop.f32.mrf.mxu0  ;;  %7507 = vmatmul.bf16.gmra.mxu1 %v13706_v29 }
0x105c   : > { %11076 = vst.msk [vmem:[%s13799_s5 + $0x408] sm:$0xff] %vm10946_vm1, %v10628_v38 }
0x1060   : > { %v7470_v28 = vpop.f32.mrf.mxu1  ;;  %v8523_v57 = vpop.f32.mrf.mxu2 }
0x1061   : > { %v7836_v8 = vmax.f32 %v7470_v28, 0.0  ;;  %v8916_v4 = vmax.f32 %v8523_v57, 0.0  ;;  %v9576_v12 = vpop.f32.mrf.mxu3 }
0x1062   : > { %v9996_v55 = vmax.f32 %v9576_v12, 0.0 }
0x1063   : > { %v8000_v10 = vpack.c.bf16 %v7836_v8, %v7835_v9  ;;  %v9089_v0 = vpack.c.bf16 %v8916_v4, %v8915_v23  ;;  %v10631_v3 = vpop.f32.mrf.mxu0 }
0x1064   : > { %v10178_v34 = vpack.c.bf16 %v9996_v55, %v9995_v26  ;;  %11077 = vst.msk [vmem:[%s13799_s5 + $0x410] sm:$0xff] %vm10946_vm1, %v10631_v3 }
0x1065   : > { %8565 = vmatmul.bf16.gmra.mxu2 %v8000_v10  ;;  %9618 = vmatmul.bf16.gmra.mxu3 %v9089_v0 }
0x1066   : > { %10670 = vmatmul.bf16.gmra.mxu0 %v10178_v34 }
0x1068   : > { %v7473_v29 = vpop.f32.mrf.mxu1  ;;  %v8526_v33 = vpop.f32.mrf.mxu2 }
0x1069   : > { %v9579_v47 = vpop.f32.mrf.mxu3  ;;  %v7837_v48 = vmax.f32 %v7473_v29, 0.0  ;;  %v8917_v63 = vmax.f32 %v8526_v33, 0.0 }
0x106a   : > { %v9997_v46 = vmax.f32 %v9579_v47, 0.0 }
0x106b   : > { %v10633_v13 = vpop.f32.mrf.mxu0  ;;  %7512 = vmatmul.bf16.gmra.mxu1 %v13709_v54 }
0x106c   : > { %11078 = vst.msk [vmem:[%s13799_s5 + $0x418] sm:$0xff] %vm10946_vm1, %v10633_v13 }
0x1070   : > { %v7475_v16 = vpop.f32.mrf.mxu1  ;;  %v8528_v1 = vpop.f32.mrf.mxu2 }
0x1071   : > { %v7838_v49 = vmax.f32 %v7475_v16, 0.0  ;;  %v8918_v11 = vmax.f32 %v8528_v1, 0.0  ;;  %v9581_v17 = vpop.f32.mrf.mxu3 }
0x1072   : > { %v9998_v41 = vmax.f32 %v9581_v17, 0.0 }
0x1073   : > { %v8001_v62 = vpack.c.bf16 %v7838_v49, %v7837_v48  ;;  %v9090_v39 = vpack.c.bf16 %v8918_v11, %v8917_v63  ;;  %v10636_v45 = vpop.f32.mrf.mxu0 }
0x1074   : > { %v10179_v61 = vpack.c.bf16 %v9998_v41, %v9997_v46  ;;  %11079 = vst.msk [vmem:[%s13799_s5 + $0x420] sm:$0xff] %vm10946_vm1, %v10636_v45 }
0x1075   : > { %8570 = vmatmul.bf16.gmra.mxu2 %v8001_v62  ;;  %9623 = vmatmul.bf16.gmra.mxu3 %v9090_v39 }
0x1076   : > { %10675 = vmatmul.bf16.gmra.mxu0 %v10179_v61 }
0x1078   : > { %v7478_v54 = vpop.f32.mrf.mxu1  ;;  %v8531_v19 = vpop.f32.mrf.mxu2 }
0x1079   : > { %v9584_v6 = vpop.f32.mrf.mxu3  ;;  %v7839_v38 = vmax.f32 %v7478_v54, 0.0  ;;  %v8919_v28 = vmax.f32 %v8531_v19, 0.0 }
0x107a   : > { %v9999_v8 = vmax.f32 %v9584_v6, 0.0 }
0x107b   : > { %v10638_v59 = vpop.f32.mrf.mxu0  ;;  %7517 = vmatmul.bf16.gmra.mxu1 %v13712_v31 }
0x107c   : > { %11080 = vst.msk [vmem:[%s13799_s5 + $0x428] sm:$0xff] %vm10946_vm1, %v10638_v59 }
0x1080   : > { %v7480_v21 = vpop.f32.mrf.mxu1  ;;  %v8533_v18 = vpop.f32.mrf.mxu2 }
0x1081   : > { %v7840_v57 = vmax.f32 %v7480_v21, 0.0  ;;  %v8920_v9 = vmax.f32 %v8533_v18, 0.0  ;;  %v9586_v23 = vpop.f32.mrf.mxu3 }
0x1082   : > { %v10000_v4 = vmax.f32 %v9586_v23, 0.0 }
0x1083   : > { %v8002_v12 = vpack.c.bf16 %v7840_v57, %v7839_v38  ;;  %v9091_v26 = vpack.c.bf16 %v8920_v9, %v8919_v28  ;;  %v10641_v55 = vpop.f32.mrf.mxu0 }
0x1084   : > { %v10180_v10 = vpack.c.bf16 %v10000_v4, %v9999_v8  ;;  %11081 = vst.msk [vmem:[%s13799_s5 + $0x430] sm:$0xff] %vm10946_vm1, %v10641_v55 }
0x1085   : > { %8575 = vmatmul.bf16.gmra.mxu2 %v8002_v12  ;;  %9628 = vmatmul.bf16.gmra.mxu3 %v9091_v26 }
0x1086   : > { %10680 = vmatmul.bf16.gmra.mxu0 %v10180_v10 }
0x1088   : > { %v7483_v31 = vpop.f32.mrf.mxu1  ;;  %v8536_v0 = vpop.f32.mrf.mxu2 }
0x1089   : > { %v9589_v3 = vpop.f32.mrf.mxu3  ;;  %v7841_v47 = vmax.f32 %v7483_v31, 0.0  ;;  %v8921_v13 = vmax.f32 %v8536_v0, 0.0 }
0x108a   : > { %v10001_v63 = vmax.f32 %v9589_v3, 0.0 }
0x108b   : > { %v10643_v34 = vpop.f32.mrf.mxu0  ;;  %7522 = vmatmul.bf16.gmra.mxu1 %v13715_v2 }
0x108c   : > { %11082 = vst.msk [vmem:[%s13799_s5 + $0x438] sm:$0xff] %vm10946_vm1, %v10643_v34 }
0x1090   : > { %v7485_v29 = vpop.f32.mrf.mxu1  ;;  %v8538_v33 = vpop.f32.mrf.mxu2 }
0x1091   : > { %v7842_v16 = vmax.f32 %v7485_v29, 0.0  ;;  %v8922_v1 = vmax.f32 %v8538_v33, 0.0  ;;  %v9591_v48 = vpop.f32.mrf.mxu3 }
0x1092   : > { %v10002_v49 = vmax.f32 %v9591_v48, 0.0 }
0x1093   : > { %v8003_v11 = vpack.c.bf16 %v7842_v16, %v7841_v47  ;;  %v9092_v17 = vpack.c.bf16 %v8922_v1, %v8921_v13  ;;  %v10646_v46 = vpop.f32.mrf.mxu0 }
0x1094   : > { %v10181_v41 = vpack.c.bf16 %v10002_v49, %v10001_v63  ;;  %11083 = vst.msk [vmem:[%s13799_s5 + $0x440] sm:$0xff] %vm10946_vm1, %v10646_v46 }
0x1095   : > { %8580 = vmatmul.bf16.gmra.mxu2 %v8003_v11  ;;  %9633 = vmatmul.bf16.gmra.mxu3 %v9092_v17 }
0x1096   : > { %10685 = vmatmul.bf16.gmra.mxu0 %v10181_v41 }
0x1098   : > { %v7488_v2 = vpop.f32.mrf.mxu1  ;;  %v8541_v62 = vpop.f32.mrf.mxu2 }
0x1099   : > { %v9594_v39 = vpop.f32.mrf.mxu3  ;;  %v7843_v19 = vmax.f32 %v7488_v2, 0.0  ;;  %v8923_v6 = vmax.f32 %v8541_v62, 0.0 }
0x109a   : > { %v10003_v38 = vmax.f32 %v9594_v39, 0.0 }
0x109b   : > { %v10648_v45 = vpop.f32.mrf.mxu0  ;;  %7527 = vmatmul.bf16.gmra.mxu1 %v13718_v25 }
0x109c   : > { %11084 = vst.msk [vmem:[%s13799_s5 + $0x448] sm:$0xff] %vm10946_vm1, %v10648_v45 }
0x10a0   : > { %v7490_v61 = vpop.f32.mrf.mxu1  ;;  %v8543_v54 = vpop.f32.mrf.mxu2 }
0x10a1   : > { %v7844_v59 = vmax.f32 %v7490_v61, 0.0  ;;  %v8924_v21 = vmax.f32 %v8543_v54, 0.0  ;;  %v9596_v18 = vpop.f32.mrf.mxu3 }
0x10a2   : > { %v10004_v28 = vmax.f32 %v9596_v18, 0.0 }
0x10a3   : > { %v8004_v57 = vpack.c.bf16 %v7844_v59, %v7843_v19  ;;  %v9093_v9 = vpack.c.bf16 %v8924_v21, %v8923_v6  ;;  %v10651_v23 = vpop.f32.mrf.mxu0 }
0x10a4   : > { %v10182_v8 = vpack.c.bf16 %v10004_v28, %v10003_v38  ;;  %11085 = vst.msk [vmem:[%s13799_s5 + $0x450] sm:$0xff] %vm10946_vm1, %v10651_v23 }
0x10a5   : > { %8585 = vmatmul.bf16.gmra.mxu2 %v8004_v57  ;;  %9638 = vmatmul.bf16.gmra.mxu3 %v9093_v9 }
0x10a6   : > { %10690 = vmatmul.bf16.gmra.mxu0 %v10182_v8 }
0x10a8   : > { %v7493_v25 = vpop.f32.mrf.mxu1  ;;  %v8546_v4 = vpop.f32.mrf.mxu2 }
0x10a9   : > { %v9599_v12 = vpop.f32.mrf.mxu3  ;;  %v7845_v31 = vmax.f32 %v7493_v25, 0.0  ;;  %v8925_v0 = vmax.f32 %v8546_v4, 0.0 }
0x10aa   : > { %v10005_v33 = vmax.f32 %v9599_v12, 0.0 }
0x10ab   : > { %v10653_v26 = vpop.f32.mrf.mxu0  ;;  %7532 = vmatmul.bf16.gmra.mxu1 %v13724_v58 }
0x10ac   : > { %11086 = vst.msk [vmem:[%s13799_s5 + $0x458] sm:$0xff] %vm10946_vm1, %v10653_v26 }
0x10b0   : > { %v7495_v55 = vpop.f32.mrf.mxu1  ;;  %v8548_v10 = vpop.f32.mrf.mxu2 }
0x10b1   : > { %v7846_v3 = vmax.f32 %v7495_v55, 0.0  ;;  %v8926_v34 = vmax.f32 %v8548_v10, 0.0  ;;  %v9601_v29 = vpop.f32.mrf.mxu3 }
0x10b2   : > { %v10006_v47 = vmax.f32 %v9601_v29, 0.0 }
0x10b3   : > { %v8005_v13 = vpack.c.bf16 %v7846_v3, %v7845_v31  ;;  %v9094_v16 = vpack.c.bf16 %v8926_v34, %v8925_v0  ;;  %v10656_v1 = vpop.f32.mrf.mxu0 }
0x10b4   : > { %v10183_v48 = vpack.c.bf16 %v10006_v47, %v10005_v33  ;;  %11087 = vst.msk [vmem:[%s13799_s5 + $0x460] sm:$0xff] %vm10946_vm1, %v10656_v1 }
0x10b5   : > { %8590 = vmatmul.bf16.gmra.mxu2 %v8005_v13  ;;  %9643 = vmatmul.bf16.gmra.mxu3 %v9094_v16 }
0x10b6   : > { %10695 = vmatmul.bf16.gmra.mxu0 %v10183_v48 }
0x10b8   : > { %v7498_v58 = vpop.f32.mrf.mxu1  ;;  %v8551_v63 = vpop.f32.mrf.mxu2 }
0x10b9   : > { %v9604_v49 = vpop.f32.mrf.mxu3  ;;  %v7847_v41 = vmax.f32 %v7498_v58, 0.0  ;;  %v8927_v2 = vmax.f32 %v8551_v63, 0.0 }
0x10ba   : > { %v10007_v61 = vmax.f32 %v9604_v49, 0.0 }
0x10bb   : > { %v10658_v11 = vpop.f32.mrf.mxu0  ;;  %7537 = vmatmul.bf16.gmra.mxu1 %v13727_v15 }
0x10bc   : > { %11088 = vst.msk [vmem:[%s13799_s5 + $0x468] sm:$0xff] %vm10946_vm1, %v10658_v11 }
0x10c0   : > { %v7500_v17 = vpop.f32.mrf.mxu1  ;;  %v8553_v46 = vpop.f32.mrf.mxu2 }
0x10c1   : > { %v7848_v62 = vmax.f32 %v7500_v17, 0.0  ;;  %v8928_v39 = vmax.f32 %v8553_v46, 0.0  ;;  %v9606_v45 = vpop.f32.mrf.mxu3 }
0x10c2   : > { %v10008_v54 = vmax.f32 %v9606_v45, 0.0 }
0x10c3   : > { %v8006_v19 = vpack.c.bf16 %v7848_v62, %v7847_v41  ;;  %v9095_v6 = vpack.c.bf16 %v8928_v39, %v8927_v2  ;;  %v10661_v59 = vpop.f32.mrf.mxu0 }
0x10c4   : > { %v10184_v21 = vpack.c.bf16 %v10008_v54, %v10007_v61  ;;  %11089 = vst.msk [vmem:[%s13799_s5 + $0x470] sm:$0xff] %vm10946_vm1, %v10661_v59 }
0x10c5   : > { %8595 = vmatmul.bf16.gmra.mxu2 %v8006_v19  ;;  %9648 = vmatmul.bf16.gmra.mxu3 %v9095_v6 }
0x10c6   : > { %10700 = vmatmul.bf16.gmra.mxu0 %v10184_v21 }
0x10c8   : > { %v7503_v15 = vpop.f32.mrf.mxu1  ;;  %v8556_v18 = vpop.f32.mrf.mxu2 }
0x10c9   : > { %v9609_v38 = vpop.f32.mrf.mxu3  ;;  %v7849_v23 = vmax.f32 %v7503_v15, 0.0  ;;  %v8929_v8 = vmax.f32 %v8556_v18, 0.0 }
0x10ca   : > { %v10009_v26 = vmax.f32 %v9609_v38, 0.0 }
0x10cb   : > { %v10663_v28 = vpop.f32.mrf.mxu0  ;;  %7542 = vmatmul.bf16.gmra.mxu1 %v13730_v7 }
0x10cc   : > { %11090 = vst.msk [vmem:[%s13799_s5 + $0x478] sm:$0xff] %vm10946_vm1, %v10663_v28 }
0x10d0   : > { %v7505_v57 = vpop.f32.mrf.mxu1  ;;  %v8558_v9 = vpop.f32.mrf.mxu2 }
0x10d1   : > { %v7850_v25 = vmax.f32 %v7505_v57, 0.0  ;;  %v8930_v4 = vmax.f32 %v8558_v9, 0.0  ;;  %v9611_v12 = vpop.f32.mrf.mxu3 }
0x10d2   : > { %v10010_v55 = vmax.f32 %v9611_v12, 0.0 }
0x10d3   : > { %v8007_v10 = vpack.c.bf16 %v7850_v25, %v7849_v23  ;;  %v9096_v31 = vpack.c.bf16 %v8930_v4, %v8929_v8  ;;  %v10666_v0 = vpop.f32.mrf.mxu0 }
0x10d4   : > { %v10185_v3 = vpack.c.bf16 %v10010_v55, %v10009_v26  ;;  %11091 = vst.msk [vmem:[%s13799_s5 + $0x480] sm:$0xff] %vm10946_vm1, %v10666_v0 }
0x10d5   : > { %8600 = vmatmul.bf16.gmra.mxu2 %v8007_v10  ;;  %9653 = vmatmul.bf16.gmra.mxu3 %v9096_v31 }
0x10d6   : > { %10705 = vmatmul.bf16.gmra.mxu0 %v10185_v3 }
0x10d8   : > { %v7508_v7 = vpop.f32.mrf.mxu1  ;;  %v8561_v34 = vpop.f32.mrf.mxu2 }
0x10d9   : > { %v9614_v29 = vpop.f32.mrf.mxu3  ;;  %v7851_v16 = vmax.f32 %v7508_v7, 0.0  ;;  %v8931_v1 = vmax.f32 %v8561_v34, 0.0 }
0x10da   : > { %v10011_v49 = vmax.f32 %v9614_v29, 0.0 }
0x10db   : > { %v10668_v33 = vpop.f32.mrf.mxu0  ;;  %7547 = vmatmul.bf16.gmra.mxu1 %v13733_v22 }
0x10dc   : > { %11092 = vst.msk [vmem:[%s13799_s5 + $0x488] sm:$0xff] %vm10946_vm1, %v10668_v33 }
0x10e0   : > { %v7510_v47 = vpop.f32.mrf.mxu1  ;;  %v8563_v13 = vpop.f32.mrf.mxu2 }
0x10e1   : > { %v7852_v48 = vmax.f32 %v7510_v47, 0.0  ;;  %v8932_v58 = vmax.f32 %v8563_v13, 0.0  ;;  %v9616_v63 = vpop.f32.mrf.mxu3 }
0x10e2   : > { %v10012_v11 = vmax.f32 %v9616_v63, 0.0 }
0x10e3   : > { %v8008_v17 = vpack.c.bf16 %v7852_v48, %v7851_v16  ;;  %v9097_v46 = vpack.c.bf16 %v8932_v58, %v8931_v1  ;;  %v10671_v41 = vpop.f32.mrf.mxu0 }
0x10e4   : > { %v10186_v2 = vpack.c.bf16 %v10012_v11, %v10011_v49  ;;  %11093 = vst.msk [vmem:[%s13799_s5 + $0x490] sm:$0xff] %vm10946_vm1, %v10671_v41 }
0x10e5   : > { %8605 = vmatmul.bf16.gmra.mxu2 %v8008_v17  ;;  %9658 = vmatmul.bf16.gmra.mxu3 %v9097_v46 }
0x10e6   : > { %10710 = vmatmul.bf16.gmra.mxu0 %v10186_v2 }
0x10e8   : > { %v7513_v22 = vpop.f32.mrf.mxu1  ;;  %v8566_v62 = vpop.f32.mrf.mxu2 }
0x10e9   : > { %v9619_v39 = vpop.f32.mrf.mxu3  ;;  %v7853_v19 = vmax.f32 %v7513_v22, 0.0  ;;  %v8933_v6 = vmax.f32 %v8566_v62, 0.0 }
0x10ea   : > { %v10013_v18 = vmax.f32 %v9619_v39, 0.0 }
0x10eb   : > { %v10673_v45 = vpop.f32.mrf.mxu0  ;;  %7552 = vmatmul.bf16.gmra.mxu1 %v13736_v36 }
0x10ec   : > { %11094 = vst.msk [vmem:[%s13799_s5 + $0x498] sm:$0xff] %vm10946_vm1, %v10673_v45 }
0x10f0   : > { %v7515_v61 = vpop.f32.mrf.mxu1  ;;  %v8568_v54 = vpop.f32.mrf.mxu2 }
0x10f1   : > { %v7854_v59 = vmax.f32 %v7515_v61, 0.0  ;;  %v8934_v21 = vmax.f32 %v8568_v54, 0.0  ;;  %v9621_v15 = vpop.f32.mrf.mxu3 }
0x10f2   : > { %v10014_v38 = vmax.f32 %v9621_v15, 0.0 }
0x10f3   : > { %v8009_v28 = vpack.c.bf16 %v7854_v59, %v7853_v19  ;;  %v9098_v57 = vpack.c.bf16 %v8934_v21, %v8933_v6  ;;  %v10676_v9 = vpop.f32.mrf.mxu0 }
0x10f4   : > { %v10187_v23 = vpack.c.bf16 %v10014_v38, %v10013_v18  ;;  %11095 = vst.msk [vmem:[%s13799_s5 + $0x4a0] sm:$0xff] %vm10946_vm1, %v10676_v9 }
0x10f5   : > { %8610 = vmatmul.bf16.gmra.mxu2 %v8009_v28  ;;  %9663 = vmatmul.bf16.gmra.mxu3 %v9098_v57 }
0x10f6   : > { %10715 = vmatmul.bf16.gmra.mxu0 %v10187_v23 }
0x10f8   : > { %v7518_v36 = vpop.f32.mrf.mxu1  ;;  %v8571_v8 = vpop.f32.mrf.mxu2 }
0x10f9   : > { %v9624_v25 = vpop.f32.mrf.mxu3  ;;  %v7855_v55 = vmax.f32 %v7518_v36, 0.0  ;;  %v8935_v10 = vmax.f32 %v8571_v8, 0.0 }
0x10fa   : > { %v10015_v7 = vmax.f32 %v9624_v25, 0.0 }
0x10fb   : > { %v10678_v4 = vpop.f32.mrf.mxu0  ;;  %7557 = vmatmul.bf16.gmra.mxu1 %v13739_v42 }
0x10fc   : > { %11096 = vst.msk [vmem:[%s13799_s5 + $0x4a8] sm:$0xff] %vm10946_vm1, %v10678_v4 }
0x1100   : > { %v7520_v12 = vpop.f32.mrf.mxu1  ;;  %v8573_v26 = vpop.f32.mrf.mxu2 }
0x1101   : > { %v7856_v31 = vmax.f32 %v7520_v12, 0.0  ;;  %v8936_v0 = vmax.f32 %v8573_v26, 0.0  ;;  %v9626_v3 = vpop.f32.mrf.mxu3 }
0x1102   : > { %v10016_v34 = vmax.f32 %v9626_v3, 0.0 }
0x1103   : > { %v8010_v29 = vpack.c.bf16 %v7856_v31, %v7855_v55  ;;  %v9099_v33 = vpack.c.bf16 %v8936_v0, %v8935_v10  ;;  %v10681_v47 = vpop.f32.mrf.mxu0 }
0x1104   : > { %v10188_v13 = vpack.c.bf16 %v10016_v34, %v10015_v7  ;;  %11097 = vst.msk [vmem:[%s13799_s5 + $0x4b0] sm:$0xff] %vm10946_vm1, %v10681_v47 }
0x1105   : > { %8615 = vmatmul.bf16.gmra.mxu2 %v8010_v29  ;;  %9668 = vmatmul.bf16.gmra.mxu3 %v9099_v33 }
0x1106   : > { %10720 = vmatmul.bf16.gmra.mxu0 %v10188_v13 }
0x1108   : > { %v7523_v42 = vpop.f32.mrf.mxu1  ;;  %v8576_v16 = vpop.f32.mrf.mxu2 }
0x1109   : > { %v9629_v1 = vpop.f32.mrf.mxu3  ;;  %v7857_v49 = vmax.f32 %v7523_v42, 0.0  ;;  %v8937_v11 = vmax.f32 %v8576_v16, 0.0 }
0x110a   : > { %v10017_v2 = vmax.f32 %v9629_v1, 0.0 }
0x110b   : > { %v10683_v48 = vpop.f32.mrf.mxu0  ;;  %7562 = vmatmul.bf16.gmra.mxu1 %v13742_v30 }
0x110c   : > { %11098 = vst.msk [vmem:[%s13799_s5 + $0x4b8] sm:$0xff] %vm10946_vm1, %v10683_v48 }
0x1110   : > { %v7525_v58 = vpop.f32.mrf.mxu1  ;;  %v8578_v63 = vpop.f32.mrf.mxu2 }
0x1111   : > { %v7858_v17 = vmax.f32 %v7525_v58, 0.0  ;;  %v8938_v46 = vmax.f32 %v8578_v63, 0.0  ;;  %v9631_v41 = vpop.f32.mrf.mxu3 }
0x1112   : > { %v10018_v22 = vmax.f32 %v9631_v41, 0.0 }
0x1113   : > { %v8011_v62 = vpack.c.bf16 %v7858_v17, %v7857_v49  ;;  %v9100_v39 = vpack.c.bf16 %v8938_v46, %v8937_v11  ;;  %v10686_v45 = vpop.f32.mrf.mxu0 }
0x1114   : > { %v10189_v61 = vpack.c.bf16 %v10018_v22, %v10017_v2  ;;  %11099 = vst.msk [vmem:[%s13799_s5 + $0x4c0] sm:$0xff] %vm10946_vm1, %v10686_v45 }
0x1115   : > { %8620 = vmatmul.bf16.gmra.mxu2 %v8011_v62  ;;  %9673 = vmatmul.bf16.gmra.mxu3 %v9100_v39 }
0x1116   : > { %10725 = vmatmul.bf16.gmra.mxu0 %v10189_v61 }
0x1118   : > { %v7528_v30 = vpop.f32.mrf.mxu1  ;;  %v8581_v54 = vpop.f32.mrf.mxu2 }
0x1119   : > { %v9634_v19 = vpop.f32.mrf.mxu3  ;;  %v7859_v15 = vmax.f32 %v7528_v30, 0.0  ;;  %v8939_v18 = vmax.f32 %v8581_v54, 0.0 }
0x111a   : > { %v10019_v9 = vmax.f32 %v9634_v19, 0.0 }
0x111b   : > { %v10688_v6 = vpop.f32.mrf.mxu0  ;;  %7567 = vmatmul.bf16.gmra.mxu1 %v13745_v35 }
0x111c   : > { %11100 = vst.msk [vmem:[%s13799_s5 + $0x4c8] sm:$0xff] %vm10946_vm1, %v10688_v6 }
0x1120   : > { %v7530_v59 = vpop.f32.mrf.mxu1  ;;  %v8583_v21 = vpop.f32.mrf.mxu2 }
0x1121   : > { %v7860_v38 = vmax.f32 %v7530_v59, 0.0  ;;  %v8940_v28 = vmax.f32 %v8583_v21, 0.0  ;;  %v9636_v57 = vpop.f32.mrf.mxu3 }
0x1122   : > { %v10020_v23 = vmax.f32 %v9636_v57, 0.0 }
0x1123   : > { %v8012_v36 = vpack.c.bf16 %v7860_v38, %v7859_v15  ;;  %v9101_v8 = vpack.c.bf16 %v8940_v28, %v8939_v18  ;;  %v10691_v25 = vpop.f32.mrf.mxu0 }
0x1124   : > { %v10190_v4 = vpack.c.bf16 %v10020_v23, %v10019_v9  ;;  %11101 = vst.msk [vmem:[%s13799_s5 + $0x4d0] sm:$0xff] %vm10946_vm1, %v10691_v25 }
0x1125   : > { %8625 = vmatmul.bf16.gmra.mxu2 %v8012_v36  ;;  %9678 = vmatmul.bf16.gmra.mxu3 %v9101_v8 }
0x1126   : > { %10730 = vmatmul.bf16.gmra.mxu0 %v10190_v4 }
0x1128   : > { %v7533_v35 = vpop.f32.mrf.mxu1  ;;  %v8586_v12 = vpop.f32.mrf.mxu2 }
0x1129   : > { %v9639_v26 = vpop.f32.mrf.mxu3  ;;  %v7861_v0 = vmax.f32 %v7533_v35, 0.0  ;;  %v8941_v3 = vmax.f32 %v8586_v12, 0.0 }
0x112a   : > { %v10021_v33 = vmax.f32 %v9639_v26, 0.0 }
0x112b   : > { %v10693_v55 = vpop.f32.mrf.mxu0  ;;  %7572 = vmatmul.bf16.gmra.mxu1 %v13748_v40 }
0x112c   : > { %11102 = vst.msk [vmem:[%s13799_s5 + $0x4d8] sm:$0xff] %vm10946_vm1, %v10693_v55 }
0x1130   : > { %v7535_v10 = vpop.f32.mrf.mxu1  ;;  %v8588_v31 = vpop.f32.mrf.mxu2 }
0x1131   : > { %v7862_v7 = vmax.f32 %v7535_v10, 0.0  ;;  %v8942_v34 = vmax.f32 %v8588_v31, 0.0  ;;  %v9641_v29 = vpop.f32.mrf.mxu3 }
0x1132   : > { %v10022_v47 = vmax.f32 %v9641_v29, 0.0 }
0x1133   : > { %v8013_v13 = vpack.c.bf16 %v7862_v7, %v7861_v0  ;;  %v9102_v42 = vpack.c.bf16 %v8942_v34, %v8941_v3  ;;  %v10696_v16 = vpop.f32.mrf.mxu0 }
0x1134   : > { %v10191_v1 = vpack.c.bf16 %v10022_v47, %v10021_v33  ;;  %11103 = vst.msk [vmem:[%s13799_s5 + $0x4e0] sm:$0xff] %vm10946_vm1, %v10696_v16 }
0x1135   : > { %8630 = vmatmul.bf16.gmra.mxu2 %v8013_v13  ;;  %9683 = vmatmul.bf16.gmra.mxu3 %v9102_v42 }
0x1136   : > { %10735 = vmatmul.bf16.gmra.mxu0 %v10191_v1 }
0x1138   : > { %v7538_v40 = vpop.f32.mrf.mxu1  ;;  %v8591_v48 = vpop.f32.mrf.mxu2 }
0x1139   : > { %v9644_v58 = vpop.f32.mrf.mxu3  ;;  %v7863_v17 = vmax.f32 %v7538_v40, 0.0  ;;  %v8943_v46 = vmax.f32 %v8591_v48, 0.0 }
0x113a   : > { %v10023_v62 = vmax.f32 %v9644_v58, 0.0 }
0x113b   : > { %v10698_v63 = vpop.f32.mrf.mxu0  ;;  %7577 = vmatmul.bf16.gmra.mxu1 %v13751_v27 }
0x113c   : > { %11104 = vst.msk [vmem:[%s13799_s5 + $0x4e8] sm:$0xff] %vm10946_vm1, %v10698_v63 }
0x1140   : > { %v7540_v49 = vpop.f32.mrf.mxu1  ;;  %v8593_v11 = vpop.f32.mrf.mxu2 }
0x1141   : > { %v7864_v41 = vmax.f32 %v7540_v49, 0.0  ;;  %v8944_v2 = vmax.f32 %v8593_v11, 0.0  ;;  %v9646_v22 = vpop.f32.mrf.mxu3 }
0x1142   : > { %v10024_v39 = vmax.f32 %v9646_v22, 0.0 }
0x1143   : > { %v8014_v45 = vpack.c.bf16 %v7864_v41, %v7863_v17  ;;  %v9103_v61 = vpack.c.bf16 %v8944_v2, %v8943_v46  ;;  %v10701_v30 = vpop.f32.mrf.mxu0 }
0x1144   : > { %v10192_v54 = vpack.c.bf16 %v10024_v39, %v10023_v62  ;;  %11105 = vst.msk [vmem:[%s13799_s5 + $0x4f0] sm:$0xff] %vm10946_vm1, %v10701_v30 }
0x1145   : > { %8635 = vmatmul.bf16.gmra.mxu2 %v8014_v45  ;;  %9688 = vmatmul.bf16.gmra.mxu3 %v9103_v61 }
0x1146   : > { %10740 = vmatmul.bf16.gmra.mxu0 %v10192_v54 }
0x1148   : > { %v7543_v27 = vpop.f32.mrf.mxu1  ;;  %v8596_v19 = vpop.f32.mrf.mxu2 }
0x1149   : > { %v9649_v6 = vpop.f32.mrf.mxu3  ;;  %v7865_v18 = vmax.f32 %v7543_v27, 0.0  ;;  %v8945_v38 = vmax.f32 %v8596_v19, 0.0 }
0x114a   : > { %v10025_v23 = vmax.f32 %v9649_v6, 0.0 }
0x114b   : > { %v10703_v59 = vpop.f32.mrf.mxu0  ;;  %7582 = vmatmul.bf16.gmra.mxu1 %v13754_v56 }
0x114c   : > { %11106 = vst.msk [vmem:[%s13799_s5 + $0x4f8] sm:$0xff] %vm10946_vm1, %v10703_v59 }
0x1150   : > { %v7545_v21 = vpop.f32.mrf.mxu1  ;;  %v8598_v15 = vpop.f32.mrf.mxu2 }
0x1151   : > { %v7866_v28 = vmax.f32 %v7545_v21, 0.0  ;;  %v8946_v57 = vmax.f32 %v8598_v15, 0.0  ;;  %v9651_v9 = vpop.f32.mrf.mxu3 }
0x1152   : > { %v10026_v36 = vmax.f32 %v9651_v9, 0.0 }
0x1153   : > { %v8015_v8 = vpack.c.bf16 %v7866_v28, %v7865_v18  ;;  %v9104_v25 = vpack.c.bf16 %v8946_v57, %v8945_v38  ;;  %v10706_v4 = vpop.f32.mrf.mxu0 }
0x1154   : > { %v10193_v35 = vpack.c.bf16 %v10026_v36, %v10025_v23  ;;  %11107 = vst.msk [vmem:[%s13799_s5 + $0x500] sm:$0xff] %vm10946_vm1, %v10706_v4 }
0x1155   : > { %8640 = vmatmul.bf16.gmra.mxu2 %v8015_v8  ;;  %9693 = vmatmul.bf16.gmra.mxu3 %v9104_v25 }
0x1156   : > { %10745 = vmatmul.bf16.gmra.mxu0 %v10193_v35 }
0x1158   : > { %v7548_v56 = vpop.f32.mrf.mxu1  ;;  %v8601_v12 = vpop.f32.mrf.mxu2 }
0x1159   : > { %v9654_v26 = vpop.f32.mrf.mxu3  ;;  %v7867_v0 = vmax.f32 %v7548_v56, 0.0  ;;  %v8947_v3 = vmax.f32 %v8601_v12, 0.0 }
0x115a   : > { %v10027_v33 = vmax.f32 %v9654_v26, 0.0 }
0x115b   : > { %v10708_v55 = vpop.f32.mrf.mxu0  ;;  %7587 = vmatmul.bf16.gmra.mxu1 %v13757_v5 }
0x115c   : > { %11108 = vst.msk [vmem:[%s13799_s5 + $0x508] sm:$0xff] %vm10946_vm1, %v10708_v55 }
0x1160   : > { %v7550_v10 = vpop.f32.mrf.mxu1  ;;  %v8603_v31 = vpop.f32.mrf.mxu2 }
0x1161   : > { %v7868_v7 = vmax.f32 %v7550_v10, 0.0  ;;  %v8948_v34 = vmax.f32 %v8603_v31, 0.0  ;;  %v9656_v29 = vpop.f32.mrf.mxu3 }
0x1162   : > { %v10028_v47 = vmax.f32 %v9656_v29, 0.0 }
0x1163   : > { %v8016_v13 = vpack.c.bf16 %v7868_v7, %v7867_v0  ;;  %v9105_v42 = vpack.c.bf16 %v8948_v34, %v8947_v3  ;;  %v10711_v16 = vpop.f32.mrf.mxu0 }
0x1164   : > { %v10194_v1 = vpack.c.bf16 %v10028_v47, %v10027_v33  ;;  %11109 = vst.msk [vmem:[%s13799_s5 + $0x510] sm:$0xff] %vm10946_vm1, %v10711_v16 }
0x1165   : > { %8645 = vmatmul.bf16.gmra.mxu2 %v8016_v13  ;;  %9698 = vmatmul.bf16.gmra.mxu3 %v9105_v42 }
0x1166   : > { %10750 = vmatmul.bf16.gmra.mxu0 %v10194_v1 }
0x1168   : > { %v7553_v5 = vpop.f32.mrf.mxu1  ;;  %v8606_v40 = vpop.f32.mrf.mxu2 }
0x1169   : > { %v9659_v48 = vpop.f32.mrf.mxu3  ;;  %v7869_v11 = vmax.f32 %v7553_v5, 0.0  ;;  %v8949_v17 = vmax.f32 %v8606_v40, 0.0 }
0x116a   : > { %v10029_v22 = vmax.f32 %v9659_v48, 0.0 }
0x116b   : > { %v10713_v58 = vpop.f32.mrf.mxu0  ;;  %7592 = vmatmul.bf16.gmra.mxu1 %v13760_v50 }
0x116c   : > { %11110 = vst.msk [vmem:[%s13799_s5 + $0x518] sm:$0xff] %vm10946_vm1, %v10713_v58 }
0x1170   : > { %v7555_v63 = vpop.f32.mrf.mxu1  ;;  %v8608_v49 = vpop.f32.mrf.mxu2 }
0x1171   : > { %v7870_v46 = vmax.f32 %v7555_v63, 0.0  ;;  %v8950_v41 = vmax.f32 %v8608_v49, 0.0  ;;  %v9661_v2 = vpop.f32.mrf.mxu3 }
0x1172   : > { %v10030_v62 = vmax.f32 %v9661_v2, 0.0 }
0x1173   : > { %v8017_v39 = vpack.c.bf16 %v7870_v46, %v7869_v11  ;;  %v9106_v45 = vpack.c.bf16 %v8950_v41, %v8949_v17  ;;  %v10716_v61 = vpop.f32.mrf.mxu0 }
0x1174   : > { %v10195_v30 = vpack.c.bf16 %v10030_v62, %v10029_v22  ;;  %11111 = vst.msk [vmem:[%s13799_s5 + $0x520] sm:$0xff] %vm10946_vm1, %v10716_v61 }
0x1175   : > { %8650 = vmatmul.bf16.gmra.mxu2 %v8017_v39  ;;  %9703 = vmatmul.bf16.gmra.mxu3 %v9106_v45 }
0x1176   : > { %10755 = vmatmul.bf16.gmra.mxu0 %v10195_v30 }
0x1178   : > { %v7558_v50 = vpop.f32.mrf.mxu1  ;;  %v8611_v54 = vpop.f32.mrf.mxu2 }
0x1179   : > { %v9664_v27 = vpop.f32.mrf.mxu3  ;;  %v7871_v21 = vmax.f32 %v7558_v50, 0.0  ;;  %v8951_v15 = vmax.f32 %v8611_v54, 0.0 }
0x117a   : > { %v10031_v57 = vmax.f32 %v9664_v27, 0.0 }
0x117b   : > { %v10718_v19 = vpop.f32.mrf.mxu0  ;;  %7597 = vmatmul.bf16.gmra.mxu1 %v13763_v53 }
0x117c   : > { %11112 = vst.msk [vmem:[%s13799_s5 + $0x528] sm:$0xff] %vm10946_vm1, %v10718_v19 }
0x1180   : > { %v7560_v6 = vpop.f32.mrf.mxu1  ;;  %v8613_v59 = vpop.f32.mrf.mxu2 }
0x1181   : > { %v7872_v18 = vmax.f32 %v7560_v6, 0.0  ;;  %v8952_v38 = vmax.f32 %v8613_v59, 0.0  ;;  %v9666_v28 = vpop.f32.mrf.mxu3 }
0x1182   : > { %v10032_v9 = vmax.f32 %v9666_v28, 0.0 }
0x1183   : > { %v8018_v23 = vpack.c.bf16 %v7872_v18, %v7871_v21  ;;  %v9107_v36 = vpack.c.bf16 %v8952_v38, %v8951_v15  ;;  %v10721_v8 = vpop.f32.mrf.mxu0 }
0x1184   : > { %v10196_v25 = vpack.c.bf16 %v10032_v9, %v10031_v57  ;;  %11113 = vst.msk [vmem:[%s13799_s5 + $0x530] sm:$0xff] %vm10946_vm1, %v10721_v8 }
0x1185   : > { %8655 = vmatmul.bf16.gmra.mxu2 %v8018_v23  ;;  %9708 = vmatmul.bf16.gmra.mxu3 %v9107_v36 }
0x1186   : > { %10760 = vmatmul.bf16.gmra.mxu0 %v10196_v25 }
0x1188   : > { %v7563_v53 = vpop.f32.mrf.mxu1  ;;  %v8616_v4 = vpop.f32.mrf.mxu2 }
0x1189   : > { %v9669_v35 = vpop.f32.mrf.mxu3  ;;  %v7873_v55 = vmax.f32 %v7563_v53, 0.0  ;;  %v8953_v10 = vmax.f32 %v8616_v4, 0.0 }
0x118a   : > { %v10033_v7 = vmax.f32 %v9669_v35, 0.0 }
0x118b   : > { %v10723_v56 = vpop.f32.mrf.mxu0  ;;  %7602 = vmatmul.bf16.gmra.mxu1 %v13766_v60 }
0x118c   : > { %11114 = vst.msk [vmem:[%s13799_s5 + $0x538] sm:$0xff] %vm10946_vm1, %v10723_v56 }
0x1190   : > { %v7565_v12 = vpop.f32.mrf.mxu1  ;;  %v8618_v26 = vpop.f32.mrf.mxu2 }
0x1191   : > { %v7874_v31 = vmax.f32 %v7565_v12, 0.0  ;;  %v8954_v0 = vmax.f32 %v8618_v26, 0.0  ;;  %v9671_v3 = vpop.f32.mrf.mxu3 }
0x1192   : > { %v10034_v34 = vmax.f32 %v9671_v3, 0.0 }
0x1193   : > { %v8019_v29 = vpack.c.bf16 %v7874_v31, %v7873_v55  ;;  %v9108_v33 = vpack.c.bf16 %v8954_v0, %v8953_v10  ;;  %v10726_v47 = vpop.f32.mrf.mxu0 }
0x1194   : > { %v10197_v13 = vpack.c.bf16 %v10034_v34, %v10033_v7  ;;  %11115 = vst.msk [vmem:[%s13799_s5 + $0x540] sm:$0xff] %vm10946_vm1, %v10726_v47 }
0x1195   : > { %8660 = vmatmul.bf16.gmra.mxu2 %v8019_v29  ;;  %9713 = vmatmul.bf16.gmra.mxu3 %v9108_v33 }
0x1196   : > { %10765 = vmatmul.bf16.gmra.mxu0 %v10197_v13 }
0x1198   : > { %v7568_v60 = vpop.f32.mrf.mxu1  ;;  %v8621_v42 = vpop.f32.mrf.mxu2 }
0x1199   : > { %v9674_v16 = vpop.f32.mrf.mxu3  ;;  %v7875_v48 = vmax.f32 %v7568_v60, 0.0  ;;  %v8955_v58 = vmax.f32 %v8621_v42, 0.0 }
0x119a   : > { %v10035_v17 = vmax.f32 %v9674_v16, 0.0 }
0x119b   : > { %v10728_v1 = vpop.f32.mrf.mxu0  ;;  %7607 = vmatmul.bf16.gmra.mxu1 %v13769_v24 }
0x119c   : > { %11116 = vst.msk [vmem:[%s13799_s5 + $0x548] sm:$0xff] %vm10946_vm1, %v10728_v1 }
0x11a0   : > { %v7570_v5 = vpop.f32.mrf.mxu1  ;;  %v8623_v40 = vpop.f32.mrf.mxu2 }
0x11a1   : > { %v7876_v63 = vmax.f32 %v7570_v5, 0.0  ;;  %v8956_v49 = vmax.f32 %v8623_v40, 0.0  ;;  %v9676_v11 = vpop.f32.mrf.mxu3 }
0x11a2   : > { %v10036_v46 = vmax.f32 %v9676_v11, 0.0 }
0x11a3   : > { %v8020_v41 = vpack.c.bf16 %v7876_v63, %v7875_v48  ;;  %v9109_v2 = vpack.c.bf16 %v8956_v49, %v8955_v58  ;;  %v10731_v22 = vpop.f32.mrf.mxu0 }
0x11a4   : > { %v10198_v62 = vpack.c.bf16 %v10036_v46, %v10035_v17  ;;  %11117 = vst.msk [vmem:[%s13799_s5 + $0x550] sm:$0xff] %vm10946_vm1, %v10731_v22 }
0x11a5   : > { %8665 = vmatmul.bf16.gmra.mxu2 %v8020_v41  ;;  %9718 = vmatmul.bf16.gmra.mxu3 %v9109_v2 }
0x11a6   : > { %10770 = vmatmul.bf16.gmra.mxu0 %v10198_v62 }
0x11a8   : > { %v7573_v24 = vpop.f32.mrf.mxu1  ;;  %v8626_v39 = vpop.f32.mrf.mxu2 }
0x11a9   : > { %v9679_v45 = vpop.f32.mrf.mxu3  ;;  %v7877_v54 = vmax.f32 %v7573_v24, 0.0  ;;  %v8957_v27 = vmax.f32 %v8626_v39, 0.0 }
0x11aa   : > { %v10037_v21 = vmax.f32 %v9679_v45, 0.0 }
0x11ab   : > { %v10733_v61 = vpop.f32.mrf.mxu0  ;;  %7612 = vmatmul.bf16.gmra.mxu1 %v13772_v51 }
0x11ac   : > { %11118 = vst.msk [vmem:[%s13799_s5 + $0x558] sm:$0xff] %vm10946_vm1, %v10733_v61 }
0x11b0   : > { %v7575_v30 = vpop.f32.mrf.mxu1  ;;  %v8628_v50 = vpop.f32.mrf.mxu2 }
0x11b1   : > { %v7878_v19 = vmax.f32 %v7575_v30, 0.0  ;;  %v8958_v6 = vmax.f32 %v8628_v50, 0.0  ;;  %v9681_v59 = vpop.f32.mrf.mxu3 }
0x11b2   : > { %v10038_v15 = vmax.f32 %v9681_v59, 0.0 }
0x11b3   : > { %v8021_v18 = vpack.c.bf16 %v7878_v19, %v7877_v54  ;;  %v9110_v38 = vpack.c.bf16 %v8958_v6, %v8957_v27  ;;  %v10736_v28 = vpop.f32.mrf.mxu0 }
0x11b4   : > { %v10199_v57 = vpack.c.bf16 %v10038_v15, %v10037_v21  ;;  %11119 = vst.msk [vmem:[%s13799_s5 + $0x560] sm:$0xff] %vm10946_vm1, %v10736_v28 }
0x11b5   : > { %8670 = vmatmul.bf16.gmra.mxu2 %v8021_v18  ;;  %9723 = vmatmul.bf16.gmra.mxu3 %v9110_v38 }
0x11b6   : > { %10775 = vmatmul.bf16.gmra.mxu0 %v10199_v57 }
0x11b8   : > { %v7578_v51 = vpop.f32.mrf.mxu1  ;;  %v8631_v9 = vpop.f32.mrf.mxu2 }
0x11b9   : > { %v9684_v23 = vpop.f32.mrf.mxu3  ;;  %v7879_v53 = vmax.f32 %v7578_v51, 0.0  ;;  %v8959_v4 = vmax.f32 %v8631_v9, 0.0 }
0x11ba   : > { %v10039_v26 = vmax.f32 %v9684_v23, 0.0 }
0x11bb   : > { %v10738_v36 = vpop.f32.mrf.mxu0  ;;  %7617 = vmatmul.bf16.gmra.mxu1 %v13775_v20 }
0x11bc   : > { %11120 = vst.msk [vmem:[%s13799_s5 + $0x568] sm:$0xff] %vm10946_vm1, %v10738_v36 }
0x11c0   : > { %v7580_v8 = vpop.f32.mrf.mxu1  ;;  %v8633_v25 = vpop.f32.mrf.mxu2 }
0x11c1   : > { %v7880_v35 = vmax.f32 %v7580_v8, 0.0  ;;  %v8960_v56 = vmax.f32 %v8633_v25, 0.0  ;;  %v9686_v12 = vpop.f32.mrf.mxu3 }
0x11c2   : > { %v10040_v55 = vmax.f32 %v9686_v12, 0.0 }
0x11c3   : > { %v8022_v10 = vpack.c.bf16 %v7880_v35, %v7879_v53  ;;  %v9111_v31 = vpack.c.bf16 %v8960_v56, %v8959_v4  ;;  %v10741_v0 = vpop.f32.mrf.mxu0 }
0x11c4   : > { %v10200_v3 = vpack.c.bf16 %v10040_v55, %v10039_v26  ;;  %11121 = vst.msk [vmem:[%s13799_s5 + $0x570] sm:$0xff] %vm10946_vm1, %v10741_v0 }
0x11c5   : > { %8675 = vmatmul.bf16.gmra.mxu2 %v8022_v10  ;;  %9728 = vmatmul.bf16.gmra.mxu3 %v9111_v31 }
0x11c6   : > { %10780 = vmatmul.bf16.gmra.mxu0 %v10200_v3 }
0x11c8   : > { %v7583_v20 = vpop.f32.mrf.mxu1  ;;  %v8636_v7 = vpop.f32.mrf.mxu2 }
0x11c9   : > { %v9689_v34 = vpop.f32.mrf.mxu3  ;;  %v7881_v13 = vmax.f32 %v7583_v20, 0.0  ;;  %v8961_v60 = vmax.f32 %v8636_v7, 0.0 }
0x11ca   : > { %v10041_v5 = vmax.f32 %v9689_v34, 0.0 }
0x11cb   : > { %v10743_v29 = vpop.f32.mrf.mxu0  ;;  %7622 = vmatmul.bf16.gmra.mxu1 %v13778_v44 }
0x11cc   : > { %11122 = vst.msk [vmem:[%s13799_s5 + $0x578] sm:$0xff] %vm10946_vm1, %v10743_v29 }
0x11d0   : > { %v7585_v33 = vpop.f32.mrf.mxu1  ;;  %v8638_v47 = vpop.f32.mrf.mxu2 }
0x11d1   : > { %v7882_v42 = vmax.f32 %v7585_v33, 0.0  ;;  %v8962_v16 = vmax.f32 %v8638_v47, 0.0  ;;  %v9691_v1 = vpop.f32.mrf.mxu3 }
0x11d2   : > { %v10042_v40 = vmax.f32 %v9691_v1, 0.0 }
0x11d3   : > { %v8023_v48 = vpack.c.bf16 %v7882_v42, %v7881_v13  ;;  %v9112_v58 = vpack.c.bf16 %v8962_v16, %v8961_v60  ;;  %v10746_v63 = vpop.f32.mrf.mxu0 }
0x11d4   : > { %v10201_v49 = vpack.c.bf16 %v10042_v40, %v10041_v5  ;;  %11123 = vst.msk [vmem:[%s13799_s5 + $0x580] sm:$0xff] %vm10946_vm1, %v10746_v63 }
0x11d5   : > { %8680 = vmatmul.bf16.gmra.mxu2 %v8023_v48  ;;  %9733 = vmatmul.bf16.gmra.mxu3 %v9112_v58 }
0x11d6   : > { %10785 = vmatmul.bf16.gmra.mxu0 %v10201_v49 }
0x11d8   : > { %v7588_v44 = vpop.f32.mrf.mxu1  ;;  %v8641_v11 = vpop.f32.mrf.mxu2 }
0x11d9   : > { %v9694_v17 = vpop.f32.mrf.mxu3  ;;  %v7883_v22 = vmax.f32 %v7588_v44, 0.0  ;;  %v8963_v62 = vmax.f32 %v8641_v11, 0.0 }
0x11da   : > { %v10043_v61 = vmax.f32 %v9694_v17, 0.0 }
0x11db   : > { %v10748_v46 = vpop.f32.mrf.mxu0  ;;  %7627 = vmatmul.bf16.gmra.mxu1 %v13781_v52 }
0x11dc   : > { %11124 = vst.msk [vmem:[%s13799_s5 + $0x588] sm:$0xff] %vm10946_vm1, %v10748_v46 }
0x11e0   : > { %v7590_v41 = vpop.f32.mrf.mxu1  ;;  %v8643_v2 = vpop.f32.mrf.mxu2 }
0x11e1   : > { %v7884_v24 = vmax.f32 %v7590_v41, 0.0  ;;  %v8964_v39 = vmax.f32 %v8643_v2, 0.0  ;;  %v9696_v45 = vpop.f32.mrf.mxu3 }
0x11e2   : > { %v10044_v30 = vmax.f32 %v9696_v45, 0.0 }
0x11e3   : > { %v8024_v50 = vpack.c.bf16 %v7884_v24, %v7883_v22  ;;  %v9113_v54 = vpack.c.bf16 %v8964_v39, %v8963_v62  ;;  %v10751_v27 = vpop.f32.mrf.mxu0 }
0x11e4   : > { %v10202_v19 = vpack.c.bf16 %v10044_v30, %v10043_v61  ;;  %11125 = vst.msk [vmem:[%s13799_s5 + $0x590] sm:$0xff] %vm10946_vm1, %v10751_v27 }
0x11e5   : > { %8685 = vmatmul.bf16.gmra.mxu2 %v8024_v50  ;;  %9738 = vmatmul.bf16.gmra.mxu3 %v9113_v54 }
0x11e6   : > { %10790 = vmatmul.bf16.gmra.mxu0 %v10202_v19 }
0x11e8   : > { %v7593_v52 = vpop.f32.mrf.mxu1  ;;  %v8646_v6 = vpop.f32.mrf.mxu2 }
0x11e9   : > { %v9699_v59 = vpop.f32.mrf.mxu3  ;;  %v7885_v38 = vmax.f32 %v7593_v52, 0.0  ;;  %v8965_v28 = vmax.f32 %v8646_v6, 0.0 }
0x11ea   : > { %v10045_v23 = vmax.f32 %v9699_v59, 0.0 }
0x11eb   : > { %v10753_v21 = vpop.f32.mrf.mxu0  ;;  %7632 = vmatmul.bf16.gmra.mxu1 %v13784_v14 }
0x11ec   : > { %11126 = vst.msk [vmem:[%s13799_s5 + $0x598] sm:$0xff] %vm10946_vm1, %v10753_v21 }
0x11f0   : > { %v7595_v15 = vpop.f32.mrf.mxu1  ;;  %v8648_v18 = vpop.f32.mrf.mxu2 }
0x11f1   : > { %v7886_v57 = vmax.f32 %v7595_v15, 0.0  ;;  %v8966_v51 = vmax.f32 %v8648_v18, 0.0  ;;  %v9701_v9 = vpop.f32.mrf.mxu3 }
0x11f2   : > { %v10046_v36 = vmax.f32 %v9701_v9, 0.0 }
0x11f3   : > { %v8025_v8 = vpack.c.bf16 %v7886_v57, %v7885_v38  ;;  %v9114_v25 = vpack.c.bf16 %v8966_v51, %v8965_v28  ;;  %v10756_v53 = vpop.f32.mrf.mxu0 }
0x11f4   : > { %v10203_v4 = vpack.c.bf16 %v10046_v36, %v10045_v23  ;;  %11127 = vst.msk [vmem:[%s13799_s5 + $0x5a0] sm:$0xff] %vm10946_vm1, %v10756_v53 }
0x11f5   : > { %8690 = vmatmul.bf16.gmra.mxu2 %v8025_v8  ;;  %9743 = vmatmul.bf16.gmra.mxu3 %v9114_v25 }
0x11f6   : > { %10795 = vmatmul.bf16.gmra.mxu0 %v10203_v4 }
0x11f8   : > { %v7598_v14 = vpop.f32.mrf.mxu1  ;;  %v8651_v35 = vpop.f32.mrf.mxu2 }
0x11f9   : > { %v9704_v56 = vpop.f32.mrf.mxu3  ;;  %v7887_v10 = vmax.f32 %v7598_v14, 0.0  ;;  %v8967_v31 = vmax.f32 %v8651_v35, 0.0 }
0x11fa   : > { %v10047_v7 = vmax.f32 %v9704_v56, 0.0 }
0x11fb   : > { %v10758_v12 = vpop.f32.mrf.mxu0  ;;  %7637 = vmatmul.bf16.gmra.mxu1 %v13787_v37 }
0x11fc   : > { %11128 = vst.msk [vmem:[%s13799_s5 + $0x5a8] sm:$0xff] %vm10946_vm1, %v10758_v12 }
0x1200   : > { %v7600_v26 = vpop.f32.mrf.mxu1  ;;  %v8653_v55 = vpop.f32.mrf.mxu2 }
0x1201   : > { %v7888_v0 = vmax.f32 %v7600_v26, 0.0  ;;  %v8968_v3 = vmax.f32 %v8653_v55, 0.0  ;;  %v9706_v20 = vpop.f32.mrf.mxu3 }
0x1202   : > { %v10048_v34 = vmax.f32 %v9706_v20, 0.0 }
0x1203   : > { %v8026_v29 = vpack.c.bf16 %v7888_v0, %v7887_v10  ;;  %v9115_v33 = vpack.c.bf16 %v8968_v3, %v8967_v31  ;;  %v10761_v47 = vpop.f32.mrf.mxu0 }
0x1204   : > { %v10204_v13 = vpack.c.bf16 %v10048_v34, %v10047_v7  ;;  %11129 = vst.msk [vmem:[%s13799_s5 + $0x5b0] sm:$0xff] %vm10946_vm1, %v10761_v47 }
0x1205   : > { %8695 = vmatmul.bf16.gmra.mxu2 %v8026_v29  ;;  %9748 = vmatmul.bf16.gmra.mxu3 %v9115_v33 }
0x1206   : > { %10800 = vmatmul.bf16.gmra.mxu0 %v10204_v13 }
0x1208   : > { %v7603_v37 = vpop.f32.mrf.mxu1  ;;  %v8656_v60 = vpop.f32.mrf.mxu2 }
0x1209   : > { %v9709_v42 = vpop.f32.mrf.mxu3  ;;  %v7889_v40 = vmax.f32 %v7603_v37, 0.0  ;;  %v8969_v48 = vmax.f32 %v8656_v60, 0.0 }
0x120a   : > { %v10049_v44 = vmax.f32 %v9709_v42, 0.0 }
0x120b   : > { %v10763_v16 = vpop.f32.mrf.mxu0  ;;  %7642 = vmatmul.bf16.gmra.mxu1 %v13790_v43 }
0x120c   : > { %11130 = vst.msk [vmem:[%s13799_s5 + $0x5b8] sm:$0xff] %vm10946_vm1, %v10763_v16 }
0x1210   : > { %v7605_v1 = vpop.f32.mrf.mxu1  ;;  %v8658_v5 = vpop.f32.mrf.mxu2 }
0x1211   : > { %v7890_v58 = vmax.f32 %v7605_v1, 0.0  ;;  %v8970_v63 = vmax.f32 %v8658_v5, 0.0  ;;  %v9711_v49 = vpop.f32.mrf.mxu3 }
0x1212   : > { %v10050_v11 = vmax.f32 %v9711_v49, 0.0 }
0x1213   : > { %v8027_v17 = vpack.c.bf16 %v7890_v58, %v7889_v40  ;;  %v9116_v46 = vpack.c.bf16 %v8970_v63, %v8969_v48  ;;  %v10766_v41 = vpop.f32.mrf.mxu0 }
0x1214   : > { %v10205_v2 = vpack.c.bf16 %v10050_v11, %v10049_v44  ;;  %11131 = vst.msk [vmem:[%s13799_s5 + $0x5c0] sm:$0xff] %vm10946_vm1, %v10766_v41 }
0x1215   : > { %8700 = vmatmul.bf16.gmra.mxu2 %v8027_v17  ;;  %9753 = vmatmul.bf16.gmra.mxu3 %v9116_v46 }
0x1216   : > { %10805 = vmatmul.bf16.gmra.mxu0 %v10205_v2 }
0x1218   : > { %v7608_v43 = vpop.f32.mrf.mxu1  ;;  %v8661_v22 = vpop.f32.mrf.mxu2 }
0x1219   : > { %v9714_v62 = vpop.f32.mrf.mxu3  ;;  %v7891_v61 = vmax.f32 %v7608_v43, 0.0  ;;  %v8971_v30 = vmax.f32 %v8661_v22, 0.0 }
0x121a   : > { %v10051_v19 = vmax.f32 %v9714_v62, 0.0 }
0x121b   : > { %v10768_v24 = vpop.f32.mrf.mxu0  ;;  %7647 = vmatmul.bf16.gmra.mxu1 %v13793_v32 }
0x121c   : > { %11132 = vst.msk [vmem:[%s13799_s5 + $0x5c8] sm:$0xff] %vm10946_vm1, %v10768_v24 }
0x1220   : > { %v7610_v39 = vpop.f32.mrf.mxu1  ;;  %v8663_v45 = vpop.f32.mrf.mxu2 }
0x1221   : > { %v7892_v50 = vmax.f32 %v7610_v39, 0.0  ;;  %v8972_v54 = vmax.f32 %v8663_v45, 0.0  ;;  %v9716_v27 = vpop.f32.mrf.mxu3 }
0x1222   : > { %v10052_v52 = vmax.f32 %v9716_v27, 0.0 }
0x1223   : > { %v8028_v6 = vpack.c.bf16 %v7892_v50, %v7891_v61  ;;  %v9117_v59 = vpack.c.bf16 %v8972_v54, %v8971_v30  ;;  %v10771_v21 = vpop.f32.mrf.mxu0 }
0x1224   : > { %v10206_v15 = vpack.c.bf16 %v10052_v52, %v10051_v19  ;;  %11133 = vst.msk [vmem:[%s13799_s5 + $0x5d0] sm:$0xff] %vm10946_vm1, %v10771_v21 }
0x1225   : > { %8705 = vmatmul.bf16.gmra.mxu2 %v8028_v6  ;;  %9758 = vmatmul.bf16.gmra.mxu3 %v9117_v59 }
0x1226   : > { %10810 = vmatmul.bf16.gmra.mxu0 %v10206_v15 }
0x1228   : > { %v7613_v32 = vpop.f32.mrf.mxu1  ;;  %v8666_v18 = vpop.f32.mrf.mxu2 }
0x1229   : > { %v9719_v38 = vpop.f32.mrf.mxu3  ;;  %v7893_v9 = vmax.f32 %v7613_v32, 0.0  ;;  %v8973_v23 = vmax.f32 %v8666_v18, 0.0 }
0x122a   : > { %v10053_v53 = vmax.f32 %v9719_v38, 0.0 }
0x122b   : > { %v10773_v28 = vpop.f32.mrf.mxu0 }
0x122c   : > { %11134 = vst.msk [vmem:[%s13799_s5 + $0x5d8] sm:$0xff] %vm10946_vm1, %v10773_v28 }
0x1230   : > { %v7615_v57 = vpop.f32.mrf.mxu1  ;;  %v8668_v51 = vpop.f32.mrf.mxu2 }
0x1231   : > { %v7894_v36 = vmax.f32 %v7615_v57, 0.0  ;;  %v8974_v8 = vmax.f32 %v8668_v51, 0.0  ;;  %v9721_v25 = vpop.f32.mrf.mxu3 }
0x1232   : > { %v10054_v4 = vmax.f32 %v9721_v25, 0.0 }
0x1233   : > { %v8029_v14 = vpack.c.bf16 %v7894_v36, %v7893_v9  ;;  %v9118_v35 = vpack.c.bf16 %v8974_v8, %v8973_v23  ;;  %v10776_v56 = vpop.f32.mrf.mxu0 }
0x1234   : > { %v10207_v12 = vpack.c.bf16 %v10054_v4, %v10053_v53  ;;  %11135 = vst.msk [vmem:[%s13799_s5 + $0x5e0] sm:$0xff] %vm10946_vm1, %v10776_v56 }
0x1235   : > { %8710 = vmatmul.bf16.gmra.mxu2 %v8029_v14  ;;  %9763 = vmatmul.bf16.gmra.mxu3 %v9118_v35 }
0x1236   : > { %10815 = vmatmul.bf16.gmra.mxu0 %v10207_v12 }
0x1238   : > { %v7618_v26 = vpop.f32.mrf.mxu1  ;;  %v8671_v55 = vpop.f32.mrf.mxu2 }
0x1239   : > { %v9724_v10 = vpop.f32.mrf.mxu3  ;;  %v7895_v20 = vmax.f32 %v7618_v26, 0.0  ;;  %v8975_v7 = vmax.f32 %v8671_v55, 0.0 }
0x123a   : > { %v10055_v47 = vmax.f32 %v9724_v10, 0.0 }
0x123b   : > { %v10778_v31 = vpop.f32.mrf.mxu0 }
0x123c   : > { %11136 = vst.msk [vmem:[%s13799_s5 + $0x5e8] sm:$0xff] %vm10946_vm1, %v10778_v31 }
0x1240   : > { %v7620_v0 = vpop.f32.mrf.mxu1  ;;  %v8673_v3 = vpop.f32.mrf.mxu2 }
0x1241   : > { %v7896_v34 = vmax.f32 %v7620_v0, 0.0  ;;  %v8976_v29 = vmax.f32 %v8673_v3, 0.0  ;;  %v9726_v33 = vpop.f32.mrf.mxu3 }
0x1242   : > { %v10056_v13 = vmax.f32 %v9726_v33, 0.0 }
0x1243   : > { %v8030_v37 = vpack.c.bf16 %v7896_v34, %v7895_v20  ;;  %v9119_v60 = vpack.c.bf16 %v8976_v29, %v8975_v7  ;;  %v10781_v42 = vpop.f32.mrf.mxu0 }
0x1244   : > { %v10208_v16 = vpack.c.bf16 %v10056_v13, %v10055_v47  ;;  %11137 = vst.msk [vmem:[%s13799_s5 + $0x5f0] sm:$0xff] %vm10946_vm1, %v10781_v42 }
0x1245   : > { %8715 = vmatmul.bf16.gmra.mxu2 %v8030_v37  ;;  %9768 = vmatmul.bf16.gmra.mxu3 %v9119_v60 }
0x1246   : > { %10820 = vmatmul.bf16.gmra.mxu0 %v10208_v16 }
0x1248   : > { %v7623_v1 = vpop.f32.mrf.mxu1  ;;  %v8676_v5 = vpop.f32.mrf.mxu2 }
0x1249   : > { %v9729_v40 = vpop.f32.mrf.mxu3  ;;  %v7897_v49 = vmax.f32 %v7623_v1, 0.0  ;;  %v8977_v44 = vmax.f32 %v8676_v5, 0.0 }
0x124a   : > { %v10057_v41 = vmax.f32 %v9729_v40, 0.0 }
0x124b   : > { %v10783_v48 = vpop.f32.mrf.mxu0 }
0x124c   : > { %11138 = vst.msk [vmem:[%s13799_s5 + $0x5f8] sm:$0xff] %vm10946_vm1, %v10783_v48 }
0x1250   : > { %v7625_v58 = vpop.f32.mrf.mxu1  ;;  %v8678_v63 = vpop.f32.mrf.mxu2 }
0x1251   : > { %v7898_v11 = vmax.f32 %v7625_v58, 0.0  ;;  %v8978_v17 = vmax.f32 %v8678_v63, 0.0  ;;  %v9731_v46 = vpop.f32.mrf.mxu3 }
0x1252   : > { %v10058_v2 = vmax.f32 %v9731_v46, 0.0 }
0x1253   : > { %v8031_v43 = vpack.c.bf16 %v7898_v11, %v7897_v49  ;;  %v9120_v22 = vpack.c.bf16 %v8978_v17, %v8977_v44  ;;  %v10786_v62 = vpop.f32.mrf.mxu0 }
0x1254   : > { %v10209_v24 = vpack.c.bf16 %v10058_v2, %v10057_v41  ;;  %11139 = vst.msk [vmem:[%s13799_s5 + $0x600] sm:$0xff] %vm10946_vm1, %v10786_v62 }
0x1255   : > { %8720 = vmatmul.bf16.gmra.mxu2 %v8031_v43  ;;  %9773 = vmatmul.bf16.gmra.mxu3 %v9120_v22 }
0x1256   : > { %10825 = vmatmul.bf16.gmra.mxu0 %v10209_v24 }
0x1258   : > { %v7628_v39 = vpop.f32.mrf.mxu1  ;;  %v8681_v45 = vpop.f32.mrf.mxu2 }
0x1259   : > { %v9734_v61 = vpop.f32.mrf.mxu3  ;;  %v7899_v27 = vmax.f32 %v7628_v39, 0.0  ;;  %v8979_v19 = vmax.f32 %v8681_v45, 0.0 }
0x125a   : > { %v10059_v21 = vmax.f32 %v9734_v61, 0.0 }
0x125b   : > { %v10788_v30 = vpop.f32.mrf.mxu0 }
0x125c   : > { %11140 = vst.msk [vmem:[%s13799_s5 + $0x608] sm:$0xff] %vm10946_vm1, %v10788_v30 }
0x1260   : > { %v7630_v50 = vpop.f32.mrf.mxu1  ;;  %v8683_v54 = vpop.f32.mrf.mxu2 }
0x1261   : > { %v7900_v52 = vmax.f32 %v7630_v50, 0.0  ;;  %v8980_v6 = vmax.f32 %v8683_v54, 0.0  ;;  %v9736_v59 = vpop.f32.mrf.mxu3 }
0x1262   : > { %v10060_v15 = vmax.f32 %v9736_v59, 0.0 }
0x1263   : > { %v8032_v32 = vpack.c.bf16 %v7900_v52, %v7899_v27  ;;  %v9121_v18 = vpack.c.bf16 %v8980_v6, %v8979_v19  ;;  %v10791_v38 = vpop.f32.mrf.mxu0 }
0x1264   : > { %v10210_v28 = vpack.c.bf16 %v10060_v15, %v10059_v21  ;;  %11141 = vst.msk [vmem:[%s13799_s5 + $0x610] sm:$0xff] %vm10946_vm1, %v10791_v38 }
0x1265   : > { %8725 = vmatmul.bf16.gmra.mxu2 %v8032_v32  ;;  %9778 = vmatmul.bf16.gmra.mxu3 %v9121_v18 }
0x1266   : > { %10830 = vmatmul.bf16.gmra.mxu0 %v10210_v28 }
0x1268   : > { %v7633_v57 = vpop.f32.mrf.mxu1  ;;  %v8686_v51 = vpop.f32.mrf.mxu2 }
0x1269   : > { %v9739_v9 = vpop.f32.mrf.mxu3  ;;  %v7901_v25 = vmax.f32 %v7633_v57, 0.0  ;;  %v8981_v53 = vmax.f32 %v8686_v51, 0.0 }
0x126a   : > { %v10061_v56 = vmax.f32 %v9739_v9, 0.0 }
0x126b   : > { %v10793_v23 = vpop.f32.mrf.mxu0 }
0x126c   : > { %11142 = vst.msk [vmem:[%s13799_s5 + $0x618] sm:$0xff] %vm10946_vm1, %v10793_v23 }
0x1270   : > { %v7635_v36 = vpop.f32.mrf.mxu1  ;;  %v8688_v8 = vpop.f32.mrf.mxu2 }
0x1271   : > { %v7902_v4 = vmax.f32 %v7635_v36, 0.0  ;;  %v8982_v14 = vmax.f32 %v8688_v8, 0.0  ;;  %v9741_v35 = vpop.f32.mrf.mxu3 }
0x1272   : > { %v10062_v12 = vmax.f32 %v9741_v35, 0.0 }
0x1273   : > { %v8033_v26 = vpack.c.bf16 %v7902_v4, %v7901_v25  ;;  %v9122_v55 = vpack.c.bf16 %v8982_v14, %v8981_v53  ;;  %v10796_v10 = vpop.f32.mrf.mxu0 }
0x1274   : > { %v10211_v31 = vpack.c.bf16 %v10062_v12, %v10061_v56  ;;  %11143 = vst.msk [vmem:[%s13799_s5 + $0x620] sm:$0xff] %vm10946_vm1, %v10796_v10 }
0x1275   : > { %8730 = vmatmul.bf16.gmra.mxu2 %v8033_v26  ;;  %9783 = vmatmul.bf16.gmra.mxu3 %v9122_v55 }
0x1276   : > { %10835 = vmatmul.bf16.gmra.mxu0 %v10211_v31 }
0x1278   : > { %v7638_v0 = vpop.f32.mrf.mxu1  ;;  %v8691_v3 = vpop.f32.mrf.mxu2 }
0x1279   : > { %v9744_v20 = vpop.f32.mrf.mxu3  ;;  %v7903_v33 = vmax.f32 %v7638_v0, 0.0  ;;  %v8983_v47 = vmax.f32 %v8691_v3, 0.0 }
0x127a   : > { %v10063_v42 = vmax.f32 %v9744_v20, 0.0 }
0x127b   : > { %v10798_v7 = vpop.f32.mrf.mxu0 }
0x127c   : > { %11144 = vst.msk [vmem:[%s13799_s5 + $0x628] sm:$0xff] %vm10946_vm1, %v10798_v7 }
0x1280   : > { %v7640_v34 = vpop.f32.mrf.mxu1  ;;  %v8693_v29 = vpop.f32.mrf.mxu2 }
0x1281   : > { %v7904_v13 = vmax.f32 %v7640_v34, 0.0  ;;  %v8984_v37 = vmax.f32 %v8693_v29, 0.0  ;;  %v9746_v60 = vpop.f32.mrf.mxu3 }
0x1282   : > { %v10064_v16 = vmax.f32 %v9746_v60, 0.0 }
0x1283   : > { %v8034_v1 = vpack.c.bf16 %v7904_v13, %v7903_v33  ;;  %v9123_v5 = vpack.c.bf16 %v8984_v37, %v8983_v47  ;;  %v10801_v40 = vpop.f32.mrf.mxu0 }
0x1284   : > { %v10212_v48 = vpack.c.bf16 %v10064_v16, %v10063_v42  ;;  %11145 = vst.msk [vmem:[%s13799_s5 + $0x630] sm:$0xff] %vm10946_vm1, %v10801_v40 }
0x1285   : > { %8735 = vmatmul.bf16.gmra.mxu2 %v8034_v1  ;;  %9788 = vmatmul.bf16.gmra.mxu3 %v9123_v5 }
0x1286   : > { %10840 = vmatmul.bf16.gmra.mxu0 %v10212_v48 }
0x1288   : > { %v7643_v58 = vpop.f32.mrf.mxu1  ;;  %v8696_v63 = vpop.f32.mrf.mxu2 }
0x1289   : > { %v9749_v49 = vpop.f32.mrf.mxu3  ;;  %v7905_v46 = vmax.f32 %v7643_v58, 0.0  ;;  %v8985_v41 = vmax.f32 %v8696_v63, 0.0 }
0x128a   : > { %v10065_v62 = vmax.f32 %v9749_v49, 0.0 }
0x128b   : > { %v10803_v44 = vpop.f32.mrf.mxu0 }
0x128c   : > { %11146 = vst.msk [vmem:[%s13799_s5 + $0x638] sm:$0xff] %vm10946_vm1, %v10803_v44 }
0x1290   : > { %v7645_v11 = vpop.f32.mrf.mxu1  ;;  %v8698_v17 = vpop.f32.mrf.mxu2 }
0x1291   : > { %v7906_v2 = vmax.f32 %v7645_v11, 0.0  ;;  %v8986_v43 = vmax.f32 %v8698_v17, 0.0  ;;  %v9751_v22 = vpop.f32.mrf.mxu3 }
0x1292   : > { %v10066_v24 = vmax.f32 %v9751_v22, 0.0 }
0x1293   : > { %v8035_v39 = vpack.c.bf16 %v7906_v2, %v7905_v46  ;;  %v9124_v45 = vpack.c.bf16 %v8986_v43, %v8985_v41  ;;  %v10806_v61 = vpop.f32.mrf.mxu0 }
0x1294   : > { %v10213_v30 = vpack.c.bf16 %v10066_v24, %v10065_v62  ;;  %11147 = vst.msk [vmem:[%s13799_s5 + $0x640] sm:$0xff] %vm10946_vm1, %v10806_v61 }
0x1295   : > { %8740 = vmatmul.bf16.gmra.mxu2 %v8035_v39  ;;  %9793 = vmatmul.bf16.gmra.mxu3 %v9124_v45 }
0x1296   : > { %10845 = vmatmul.bf16.gmra.mxu0 %v10213_v30 }
0x1298   : > { %v7648_v50 = vpop.f32.mrf.mxu1  ;;  %v8701_v54 = vpop.f32.mrf.mxu2 }
0x1299   : > { %v9754_v27 = vpop.f32.mrf.mxu3  ;;  %v7907_v59 = vmax.f32 %v7648_v50, 0.0  ;;  %v8987_v21 = vmax.f32 %v8701_v54, 0.0 }
0x129a   : > { %v10067_v38 = vmax.f32 %v9754_v27, 0.0 }
0x129b   : > { %v10808_v19 = vpop.f32.mrf.mxu0 }
0x129c   : > { %11148 = vst.msk [vmem:[%s13799_s5 + $0x648] sm:$0xff] %vm10946_vm1, %v10808_v19 }
0x12a0   : > { %v7650_v52 = vpop.f32.mrf.mxu1  ;;  %v8703_v6 = vpop.f32.mrf.mxu2 }
0x12a1   : > { %v7908_v15 = vmax.f32 %v7650_v52, 0.0  ;;  %v8988_v32 = vmax.f32 %v8703_v6, 0.0  ;;  %v9756_v18 = vpop.f32.mrf.mxu3 }
0x12a2   : > { %v10068_v28 = vmax.f32 %v9756_v18, 0.0 }
0x12a3   : > { %v8036_v57 = vpack.c.bf16 %v7908_v15, %v7907_v59  ;;  %v9125_v51 = vpack.c.bf16 %v8988_v32, %v8987_v21  ;;  %v10811_v9 = vpop.f32.mrf.mxu0 }
0x12a4   : > { %v10214_v23 = vpack.c.bf16 %v10068_v28, %v10067_v38  ;;  %11149 = vst.msk [vmem:[%s13799_s5 + $0x650] sm:$0xff] %vm10946_vm1, %v10811_v9 }
0x12a5   : > { %8745 = vmatmul.bf16.gmra.mxu2 %v8036_v57  ;;  %9798 = vmatmul.bf16.gmra.mxu3 %v9125_v51 }
0x12a6   : > { %10850 = vmatmul.bf16.gmra.mxu0 %v10214_v23 }
0x12a8   : > { %v8706_v36 = vpop.f32.mrf.mxu2 }
0x12a9   : > { %v9759_v8 = vpop.f32.mrf.mxu3  ;;  %v8989_v4 = vmax.f32 %v8706_v36, 0.0 }
0x12aa   : > { %v10069_v56 = vmax.f32 %v9759_v8, 0.0 }
0x12ab   : > { %v10813_v25 = vpop.f32.mrf.mxu0 }
0x12ac   : > { %11150 = vst.msk [vmem:[%s13799_s5 + $0x658] sm:$0xff] %vm10946_vm1, %v10813_v25 }
0x12b0   : > { %v8708_v53 = vpop.f32.mrf.mxu2 }
0x12b1   : > { %v8990_v14 = vmax.f32 %v8708_v53, 0.0  ;;  %v9761_v35 = vpop.f32.mrf.mxu3 }
0x12b2   : > { %v10070_v12 = vmax.f32 %v9761_v35, 0.0 }
0x12b3   : > { %v9126_v26 = vpack.c.bf16 %v8990_v14, %v8989_v4  ;;  %v10816_v55 = vpop.f32.mrf.mxu0 }
0x12b4   : > { %v10215_v10 = vpack.c.bf16 %v10070_v12, %v10069_v56  ;;  %11151 = vst.msk [vmem:[%s13799_s5 + $0x660] sm:$0xff] %vm10946_vm1, %v10816_v55 }
0x12b5   : > { %9803 = vmatmul.bf16.gmra.mxu3 %v9126_v26 }
0x12b6   : > { %10855 = vmatmul.bf16.gmra.mxu0 %v10215_v10 }
0x12b8   : > { %v8711_v31 = vpop.f32.mrf.mxu2 }
0x12b9   : > { %v9764_v0 = vpop.f32.mrf.mxu3  ;;  %v8991_v7 = vmax.f32 %v8711_v31, 0.0 }
0x12ba   : > { %v10071_v33 = vmax.f32 %v9764_v0, 0.0 }
0x12bb   : > { %v10818_v3 = vpop.f32.mrf.mxu0 }
0x12bc   : > { %11152 = vst.msk [vmem:[%s13799_s5 + $0x668] sm:$0xff] %vm10946_vm1, %v10818_v3 }
0x12c0   : > { %v8713_v20 = vpop.f32.mrf.mxu2 }
0x12c1   : > { %v8992_v34 = vmax.f32 %v8713_v20, 0.0  ;;  %v9766_v29 = vpop.f32.mrf.mxu3 }
0x12c2   : > { %v10072_v47 = vmax.f32 %v9766_v29, 0.0 }
0x12c3   : > { %v9127_v13 = vpack.c.bf16 %v8992_v34, %v8991_v7  ;;  %v10821_v37 = vpop.f32.mrf.mxu0 }
0x12c4   : > { %v10216_v60 = vpack.c.bf16 %v10072_v47, %v10071_v33  ;;  %11153 = vst.msk [vmem:[%s13799_s5 + $0x670] sm:$0xff] %vm10946_vm1, %v10821_v37 }
0x12c5   : > { %9808 = vmatmul.bf16.gmra.mxu3 %v9127_v13 }
0x12c6   : > { %10860 = vmatmul.bf16.gmra.mxu0 %v10216_v60 }
0x12c8   : > { %v8716_v42 = vpop.f32.mrf.mxu2 }
0x12c9   : > { %v9769_v16 = vpop.f32.mrf.mxu3  ;;  %v8993_v40 = vmax.f32 %v8716_v42, 0.0 }
0x12ca   : > { %v10073_v63 = vmax.f32 %v9769_v16, 0.0 }
0x12cb   : > { %v10823_v1 = vpop.f32.mrf.mxu0 }
0x12cc   : > { %11154 = vst.msk [vmem:[%s13799_s5 + $0x678] sm:$0xff] %vm10946_vm1, %v10823_v1 }
0x12d0   : > { %v8718_v5 = vpop.f32.mrf.mxu2 }
0x12d1   : > { %v8994_v48 = vmax.f32 %v8718_v5, 0.0  ;;  %v9771_v58 = vpop.f32.mrf.mxu3 }
0x12d2   : > { %v10074_v49 = vmax.f32 %v9771_v58, 0.0 }
0x12d3   : > { %v9128_v44 = vpack.c.bf16 %v8994_v48, %v8993_v40  ;;  %v10826_v11 = vpop.f32.mrf.mxu0 }
0x12d4   : > { %v10217_v17 = vpack.c.bf16 %v10074_v49, %v10073_v63  ;;  %11155 = vst.msk [vmem:[%s13799_s5 + $0x680] sm:$0xff] %vm10946_vm1, %v10826_v11 }
0x12d5   : > { %9813 = vmatmul.bf16.gmra.mxu3 %v9128_v44 }
0x12d6   : > { %10865 = vmatmul.bf16.gmra.mxu0 %v10217_v17 }
0x12d8   : > { %v8721_v46 = vpop.f32.mrf.mxu2 }
0x12d9   : > { %v9774_v41 = vpop.f32.mrf.mxu3  ;;  %v8995_v22 = vmax.f32 %v8721_v46, 0.0 }
0x12da   : > { %v10075_v39 = vmax.f32 %v9774_v41, 0.0 }
0x12db   : > { %v10828_v2 = vpop.f32.mrf.mxu0 }
0x12dc   : > { %11156 = vst.msk [vmem:[%s13799_s5 + $0x688] sm:$0xff] %vm10946_vm1, %v10828_v2 }
0x12e0   : > { %v8723_v43 = vpop.f32.mrf.mxu2 }
0x12e1   : > { %v8996_v62 = vmax.f32 %v8723_v43, 0.0  ;;  %v9776_v24 = vpop.f32.mrf.mxu3 }
0x12e2   : > { %v10076_v45 = vmax.f32 %v9776_v24, 0.0 }
0x12e3   : > { %v9129_v61 = vpack.c.bf16 %v8996_v62, %v8995_v22  ;;  %v10831_v30 = vpop.f32.mrf.mxu0 }
0x12e4   : > { %v10218_v50 = vpack.c.bf16 %v10076_v45, %v10075_v39  ;;  %11157 = vst.msk [vmem:[%s13799_s5 + $0x690] sm:$0xff] %vm10946_vm1, %v10831_v30 }
0x12e5   : > { %9818 = vmatmul.bf16.gmra.mxu3 %v9129_v61 }
0x12e6   : > { %10870 = vmatmul.bf16.gmra.mxu0 %v10218_v50 }
0x12e8   : > { %v8726_v54 = vpop.f32.mrf.mxu2 }
0x12e9   : > { %v9779_v27 = vpop.f32.mrf.mxu3  ;;  %v8997_v6 = vmax.f32 %v8726_v54, 0.0 }
0x12ea   : > { %v10077_v15 = vmax.f32 %v9779_v27, 0.0 }
0x12eb   : > { %v10833_v19 = vpop.f32.mrf.mxu0 }
0x12ec   : > { %11158 = vst.msk [vmem:[%s13799_s5 + $0x698] sm:$0xff] %vm10946_vm1, %v10833_v19 }
0x12f0   : > { %v8728_v52 = vpop.f32.mrf.mxu2 }
0x12f1   : > { %v8998_v59 = vmax.f32 %v8728_v52, 0.0  ;;  %v9781_v21 = vpop.f32.mrf.mxu3 }
0x12f2   : > { %v10078_v32 = vmax.f32 %v9781_v21, 0.0 }
0x12f3   : > { %v9130_v18 = vpack.c.bf16 %v8998_v59, %v8997_v6  ;;  %v10836_v38 = vpop.f32.mrf.mxu0 }
0x12f4   : > { %v10219_v28 = vpack.c.bf16 %v10078_v32, %v10077_v15  ;;  %11159 = vst.msk [vmem:[%s13799_s5 + $0x6a0] sm:$0xff] %vm10946_vm1, %v10836_v38 }
0x12f5   : > { %9823 = vmatmul.bf16.gmra.mxu3 %v9130_v18 }
0x12f6   : > { %10875 = vmatmul.bf16.gmra.mxu0 %v10219_v28 }
0x12f8   : > { %v8731_v57 = vpop.f32.mrf.mxu2 }
0x12f9   : > { %v9784_v51 = vpop.f32.mrf.mxu3  ;;  %v8999_v36 = vmax.f32 %v8731_v57, 0.0 }
0x12fa   : > { %v10079_v53 = vmax.f32 %v9784_v51, 0.0 }
0x12fb   : > { %v10838_v9 = vpop.f32.mrf.mxu0 }
0x12fc   : > { %11160 = vst.msk [vmem:[%s13799_s5 + $0x6a8] sm:$0xff] %vm10946_vm1, %v10838_v9 }
0x1300   : > { %v8733_v23 = vpop.f32.mrf.mxu2 }
0x1301   : > { %v9000_v8 = vmax.f32 %v8733_v23, 0.0  ;;  %v9786_v25 = vpop.f32.mrf.mxu3 }
0x1302   : > { %v10080_v4 = vmax.f32 %v9786_v25, 0.0 }
0x1303   : > { %v9131_v14 = vpack.c.bf16 %v9000_v8, %v8999_v36  ;;  %v10841_v35 = vpop.f32.mrf.mxu0 }
0x1304   : > { %v10220_v56 = vpack.c.bf16 %v10080_v4, %v10079_v53  ;;  %11161 = vst.msk [vmem:[%s13799_s5 + $0x6b0] sm:$0xff] %vm10946_vm1, %v10841_v35 }
0x1305   : > { %9828 = vmatmul.bf16.gmra.mxu3 %v9131_v14 }
0x1306   : > { %10880 = vmatmul.bf16.gmra.mxu0 %v10220_v56 }
0x1308   : > { %v8736_v12 = vpop.f32.mrf.mxu2 }
0x1309   : > { %v9789_v26 = vpop.f32.mrf.mxu3  ;;  %v9001_v31 = vmax.f32 %v8736_v12, 0.0 }
0x130a   : > { %v10081_v20 = vmax.f32 %v9789_v26, 0.0 }
0x130b   : > { %v10843_v55 = vpop.f32.mrf.mxu0 }
0x130c   : > { %11162 = vst.msk [vmem:[%s13799_s5 + $0x6b8] sm:$0xff] %vm10946_vm1, %v10843_v55 }
0x1310   : > { %v8738_v10 = vpop.f32.mrf.mxu2 }
0x1311   : > { %v9002_v0 = vmax.f32 %v8738_v10, 0.0  ;;  %v9791_v3 = vpop.f32.mrf.mxu3 }
0x1312   : > { %v10082_v7 = vmax.f32 %v9791_v3, 0.0 }
0x1313   : > { %v9132_v34 = vpack.c.bf16 %v9002_v0, %v9001_v31  ;;  %v10846_v29 = vpop.f32.mrf.mxu0 }
0x1314   : > { %v10221_v33 = vpack.c.bf16 %v10082_v7, %v10081_v20  ;;  %11163 = vst.msk [vmem:[%s13799_s5 + $0x6c0] sm:$0xff] %vm10946_vm1, %v10846_v29 }
0x1315   : > { %9833 = vmatmul.bf16.gmra.mxu3 %v9132_v34 }
0x1316   : > { %10885 = vmatmul.bf16.gmra.mxu0 %v10221_v33 }
0x1318   : > { %v8741_v47 = vpop.f32.mrf.mxu2 }
0x1319   : > { %v9794_v13 = vpop.f32.mrf.mxu3  ;;  %v9003_v42 = vmax.f32 %v8741_v47, 0.0 }
0x131a   : > { %v10083_v5 = vmax.f32 %v9794_v13, 0.0 }
0x131b   : > { %v10848_v37 = vpop.f32.mrf.mxu0 }
0x131c   : > { %11164 = vst.msk [vmem:[%s13799_s5 + $0x6c8] sm:$0xff] %vm10946_vm1, %v10848_v37 }
0x1320   : > { %v8743_v60 = vpop.f32.mrf.mxu2 }
0x1321   : > { %v9004_v16 = vmax.f32 %v8743_v60, 0.0  ;;  %v9796_v1 = vpop.f32.mrf.mxu3 }
0x1322   : > { %v10084_v40 = vmax.f32 %v9796_v1, 0.0 }
0x1323   : > { %v9133_v48 = vpack.c.bf16 %v9004_v16, %v9003_v42  ;;  %v10851_v58 = vpop.f32.mrf.mxu0 }
0x1324   : > { %v10222_v63 = vpack.c.bf16 %v10084_v40, %v10083_v5  ;;  %11165 = vst.msk [vmem:[%s13799_s5 + $0x6d0] sm:$0xff] %vm10946_vm1, %v10851_v58 }
0x1325   : > { %9838 = vmatmul.bf16.gmra.mxu3 %v9133_v48 }
0x1326   : > { %10890 = vmatmul.bf16.gmra.mxu0 %v10222_v63 }
0x1328   : > { %v8746_v49 = vpop.f32.mrf.mxu2 }
0x1329   : > { %v9799_v44 = vpop.f32.mrf.mxu3  ;;  %v9005_v46 = vmax.f32 %v8746_v49, 0.0 }
0x132a   : > { %v10085_v43 = vmax.f32 %v9799_v44, 0.0 }
0x132b   : > { %v10853_v11 = vpop.f32.mrf.mxu0 }
0x132c   : > { %11166 = vst.msk [vmem:[%s13799_s5 + $0x6d8] sm:$0xff] %vm10946_vm1, %v10853_v11 }
0x1330   : > { %v8748_v17 = vpop.f32.mrf.mxu2 }
0x1331   : > { %v9006_v41 = vmax.f32 %v8748_v17, 0.0  ;;  %v9801_v2 = vpop.f32.mrf.mxu3 }
0x1332   : > { %v10086_v22 = vmax.f32 %v9801_v2, 0.0 }
0x1333   : > { %v9134_v62 = vpack.c.bf16 %v9006_v41, %v9005_v46  ;;  %v10856_v24 = vpop.f32.mrf.mxu0 }
0x1334   : > { %v10223_v39 = vpack.c.bf16 %v10086_v22, %v10085_v43  ;;  %11167 = vst.msk [vmem:[%s13799_s5 + $0x6e0] sm:$0xff] %vm10946_vm1, %v10856_v24 }
0x1335   : > { %9843 = vmatmul.bf16.gmra.mxu3 %v9134_v62 }
0x1336   : > { %10895 = vmatmul.bf16.gmra.mxu0 %v10223_v39 }
0x1339   : > { %v9804_v45 = vpop.f32.mrf.mxu3 }
0x133a   : > { %v10087_v50 = vmax.f32 %v9804_v45, 0.0 }
0x133b   : > { %v10858_v61 = vpop.f32.mrf.mxu0 }
0x133c   : > { %11168 = vst.msk [vmem:[%s13799_s5 + $0x6e8] sm:$0xff] %vm10946_vm1, %v10858_v61 }
0x1341   : > { %v9806_v30 = vpop.f32.mrf.mxu3 }
0x1342   : > { %v10088_v54 = vmax.f32 %v9806_v30, 0.0 }
0x1343   : > { %v10861_v27 = vpop.f32.mrf.mxu0 }
0x1344   : > { %v10224_v19 = vpack.c.bf16 %v10088_v54, %v10087_v50  ;;  %11169 = vst.msk [vmem:[%s13799_s5 + $0x6f0] sm:$0xff] %vm10946_vm1, %v10861_v27 }
0x1346   : > { %10900 = vmatmul.bf16.gmra.mxu0 %v10224_v19 }
0x1349   : > { %v9809_v52 = vpop.f32.mrf.mxu3 }
0x134a   : > { %v10089_v21 = vmax.f32 %v9809_v52, 0.0 }
0x134b   : > { %v10863_v6 = vpop.f32.mrf.mxu0 }
0x134c   : > { %11170 = vst.msk [vmem:[%s13799_s5 + $0x6f8] sm:$0xff] %vm10946_vm1, %v10863_v6 }
0x1351   : > { %v9811_v59 = vpop.f32.mrf.mxu3 }
0x1352   : > { %v10090_v15 = vmax.f32 %v9811_v59, 0.0 }
0x1353   : > { %v10866_v32 = vpop.f32.mrf.mxu0 }
0x1354   : > { %v10225_v18 = vpack.c.bf16 %v10090_v15, %v10089_v21  ;;  %11171 = vst.msk [vmem:[%s13799_s5 + $0x700] sm:$0xff] %vm10946_vm1, %v10866_v32 }
0x1356   : > { %10905 = vmatmul.bf16.gmra.mxu0 %v10225_v18 }
0x1359   : > { %v9814_v38 = vpop.f32.mrf.mxu3 }
0x135a   : > { %v10091_v51 = vmax.f32 %v9814_v38, 0.0 }
0x135b   : > { %v10868_v28 = vpop.f32.mrf.mxu0 }
0x135c   : > { %11172 = vst.msk [vmem:[%s13799_s5 + $0x708] sm:$0xff] %vm10946_vm1, %v10868_v28 }
0x1361   : > { %v9816_v57 = vpop.f32.mrf.mxu3 }
0x1362   : > { %v10092_v9 = vmax.f32 %v9816_v57, 0.0 }
0x1363   : > { %v10871_v23 = vpop.f32.mrf.mxu0 }
0x1364   : > { %v10226_v36 = vpack.c.bf16 %v10092_v9, %v10091_v51  ;;  %11173 = vst.msk [vmem:[%s13799_s5 + $0x710] sm:$0xff] %vm10946_vm1, %v10871_v23 }
0x1366   : > { %10910 = vmatmul.bf16.gmra.mxu0 %v10226_v36 }
0x1369   : > { %v9819_v8 = vpop.f32.mrf.mxu3 }
0x136a   : > { %v10093_v4 = vmax.f32 %v9819_v8, 0.0 }
0x136b   : > { %v10873_v25 = vpop.f32.mrf.mxu0 }
0x136c   : > { %11174 = vst.msk [vmem:[%s13799_s5 + $0x718] sm:$0xff] %vm10946_vm1, %v10873_v25 }
0x1371   : > { %v9821_v53 = vpop.f32.mrf.mxu3 }
0x1372   : > { %v10094_v14 = vmax.f32 %v9821_v53, 0.0 }
0x1373   : > { %v10876_v35 = vpop.f32.mrf.mxu0 }
0x1374   : > { %v10227_v56 = vpack.c.bf16 %v10094_v14, %v10093_v4  ;;  %11175 = vst.msk [vmem:[%s13799_s5 + $0x720] sm:$0xff] %vm10946_vm1, %v10876_v35 }
0x1376   : > { %10915 = vmatmul.bf16.gmra.mxu0 %v10227_v56 }
0x1379   : > { %v9824_v12 = vpop.f32.mrf.mxu3 }
0x137a   : > { %v10095_v10 = vmax.f32 %v9824_v12, 0.0 }
0x137b   : > { %v10878_v26 = vpop.f32.mrf.mxu0 }
0x137c   : > { %11176 = vst.msk [vmem:[%s13799_s5 + $0x728] sm:$0xff] %vm10946_vm1, %v10878_v26 }
0x1381   : > { %v9826_v55 = vpop.f32.mrf.mxu3 }
0x1382   : > { %v10096_v31 = vmax.f32 %v9826_v55, 0.0 }
0x1383   : > { %v10881_v0 = vpop.f32.mrf.mxu0 }
0x1384   : > { %v10228_v3 = vpack.c.bf16 %v10096_v31, %v10095_v10  ;;  %11177 = vst.msk [vmem:[%s13799_s5 + $0x730] sm:$0xff] %vm10946_vm1, %v10881_v0 }
0x1386   : > { %10920 = vmatmul.bf16.gmra.mxu0 %v10228_v3 }
0x1389   : > { %v9829_v20 = vpop.f32.mrf.mxu3 }
0x138a   : > { %v10097_v29 = vmax.f32 %v9829_v20, 0.0 }
0x138b   : > { %v10883_v7 = vpop.f32.mrf.mxu0 }
0x138c   : > { %11178 = vst.msk [vmem:[%s13799_s5 + $0x738] sm:$0xff] %vm10946_vm1, %v10883_v7 }
0x1391   : > { %v9831_v34 = vpop.f32.mrf.mxu3 }
0x1392   : > { %v10098_v33 = vmax.f32 %v9831_v34, 0.0 }
0x1393   : > { %v10886_v47 = vpop.f32.mrf.mxu0 }
0x1394   : > { %v10229_v13 = vpack.c.bf16 %v10098_v33, %v10097_v29  ;;  %11179 = vst.msk [vmem:[%s13799_s5 + $0x740] sm:$0xff] %vm10946_vm1, %v10886_v47 }
0x1396   : > { %10925 = vmatmul.bf16.gmra.mxu0 %v10229_v13 }
0x1399   : > { %v9834_v37 = vpop.f32.mrf.mxu3 }
0x139a   : > { %v10099_v16 = vmax.f32 %v9834_v37, 0.0 }
0x139b   : > { %v10888_v60 = vpop.f32.mrf.mxu0 }
0x139c   : > { %11180 = vst.msk [vmem:[%s13799_s5 + $0x748] sm:$0xff] %vm10946_vm1, %v10888_v60 }
0x13a1   : > { %v9836_v42 = vpop.f32.mrf.mxu3 }
0x13a2   : > { %v10100_v1 = vmax.f32 %v9836_v42, 0.0 }
0x13a3   : > { %v10891_v5 = vpop.f32.mrf.mxu0 }
0x13a4   : > { %v10230_v40 = vpack.c.bf16 %v10100_v1, %v10099_v16  ;;  %11181 = vst.msk [vmem:[%s13799_s5 + $0x750] sm:$0xff] %vm10946_vm1, %v10891_v5 }
0x13a6   : > { %10930 = vmatmul.bf16.gmra.mxu0 %v10230_v40 }
0x13a9   : > { %v9839_v48 = vpop.f32.mrf.mxu3 }
0x13aa   : > { %v10101_v49 = vmax.f32 %v9839_v48, 0.0 }
0x13ab   : > { %v10893_v58 = vpop.f32.mrf.mxu0 }
0x13ac   : > { %11182 = vst.msk [vmem:[%s13799_s5 + $0x758] sm:$0xff] %vm10946_vm1, %v10893_v58 }
0x13b1   : > { %v9841_v63 = vpop.f32.mrf.mxu3 }
0x13b2   : > { %v10102_v44 = vmax.f32 %v9841_v63, 0.0 }
0x13b3   : > { %v10896_v11 = vpop.f32.mrf.mxu0 }
0x13b4   : > { %v10231_v17 = vpack.c.bf16 %v10102_v44, %v10101_v49  ;;  %11183 = vst.msk [vmem:[%s13799_s5 + $0x760] sm:$0xff] %vm10946_vm1, %v10896_v11 }
0x13b6   : > { %10935 = vmatmul.bf16.gmra.mxu0 %v10231_v17 }
0x13b9   : > { %v9844_v46 = vpop.f32.mrf.mxu3 }
0x13ba   : > { %v10103_v43 = vmax.f32 %v9844_v46, 0.0 }
0x13bb   : > { %v10898_v41 = vpop.f32.mrf.mxu0 }
0x13bc   : > { %11184 = vst.msk [vmem:[%s13799_s5 + $0x768] sm:$0xff] %vm10946_vm1, %v10898_v41 }
0x13c1   : > { %v9846_v2 = vpop.f32.mrf.mxu3 }
0x13c2   : > { %v10104_v22 = vmax.f32 %v9846_v2, 0.0 }
0x13c3   : > { %v10901_v62 = vpop.f32.mrf.mxu0 }
0x13c4   : > { %v10232_v24 = vpack.c.bf16 %v10104_v22, %v10103_v43  ;;  %11185 = vst.msk [vmem:[%s13799_s5 + $0x770] sm:$0xff] %vm10946_vm1, %v10901_v62 }
0x13c6   : > { %10940 = vmatmul.bf16.vlgmr.msrb.gmra.mxu3 %v10232_v24 }
0x13cb   : > { %v10903_v39 = vpop.f32.mrf.mxu0 }
0x13cc   : > { %11186 = vst.msk [vmem:[%s13799_s5 + $0x778] sm:$0xff] %vm10946_vm1, %v10903_v39 }
0x13d3   : > { %v10906_v45 = vpop.f32.mrf.mxu0 }
0x13d4   : > { %11187 = vst.msk [vmem:[%s13799_s5 + $0x780] sm:$0xff] %vm10946_vm1, %v10906_v45 }
0x13db   : > { %v10908_v61 = vpop.f32.mrf.mxu0 }
0x13dc   : > { %11188 = vst.msk [vmem:[%s13799_s5 + $0x788] sm:$0xff] %vm10946_vm1, %v10908_v61 }
0x13e3   : > { %v10911_v30 = vpop.f32.mrf.mxu0 }
0x13e4   : > { %11189 = vst.msk [vmem:[%s13799_s5 + $0x790] sm:$0xff] %vm10946_vm1, %v10911_v30 }
0x13eb   : > { %v10913_v50 = vpop.f32.mrf.mxu0 }
0x13ec   : > { %11190 = vst.msk [vmem:[%s13799_s5 + $0x798] sm:$0xff] %vm10946_vm1, %v10913_v50 }
0x13f3   : > { %v10916_v54 = vpop.f32.mrf.mxu0 }
0x13f4   : > { %11191 = vst.msk [vmem:[%s13799_s5 + $0x7a0] sm:$0xff] %vm10946_vm1, %v10916_v54 }
0x13fb   : > { %v10918_v27 = vpop.f32.mrf.mxu0 }
0x13fc   : > { %11192 = vst.msk [vmem:[%s13799_s5 + $0x7a8] sm:$0xff] %vm10946_vm1, %v10918_v27 }
0x1403   : > { %v10921_v19 = vpop.f32.mrf.mxu0 }
0x1404   : > { %11193 = vst.msk [vmem:[%s13799_s5 + $0x7b0] sm:$0xff] %vm10946_vm1, %v10921_v19 }
0x140b   : > { %v10923_v52 = vpop.f32.mrf.mxu0 }
0x140c   : > { %11194 = vst.msk [vmem:[%s13799_s5 + $0x7b8] sm:$0xff] %vm10946_vm1, %v10923_v52 }
0x1413   : > { %v10926_v6 = vpop.f32.mrf.mxu0 }
0x1414   : > { %11195 = vst.msk [vmem:[%s13799_s5 + $0x7c0] sm:$0xff] %vm10946_vm1, %v10926_v6 }
0x141b   : > { %v10928_v59 = vpop.f32.mrf.mxu0 }
0x141c   : > { %11196 = vst.msk [vmem:[%s13799_s5 + $0x7c8] sm:$0xff] %vm10946_vm1, %v10928_v59 }
0x1423   : > { %v10931_v21 = vpop.f32.mrf.mxu0 }
0x1424   : > { %11197 = vst.msk [vmem:[%s13799_s5 + $0x7d0] sm:$0xff] %vm10946_vm1, %v10931_v21 }
0x142b   : > { %v10933_v15 = vpop.f32.mrf.mxu0 }
0x142c   : > { %11198 = vst.msk [vmem:[%s13799_s5 + $0x7d8] sm:$0xff] %vm10946_vm1, %v10933_v15 }
0x1433   : > { %v10936_v32 = vpop.f32.mrf.mxu0 }
0x1434   : > { %11199 = vst.msk [vmem:[%s13799_s5 + $0x7e0] sm:$0xff] %vm10946_vm1, %v10936_v32 }
0x143b   : > { %v10938_v18 = vpop.f32.mrf.mxu0 }
0x143c   : > { %11200 = vst.msk [vmem:[%s13799_s5 + $0x7e8] sm:$0xff] %vm10946_vm1, %v10938_v18 }
0x1449   : > { %v10941_v38 = vpop.f32.mrf.mxu3 }
0x144a   : > { %11201 = vst.msk [vmem:[%s13799_s5 + $0x7f0] sm:$0xff] %vm10946_vm1, %v10941_v38 }
0x1451   : > { %v10943_v28 = vpop.f32.mrf.mxu3 }
0x1452   : > { %11202 = vst.msk [vmem:[%s13799_s5 + $0x7f8] sm:$0xff] %vm10946_vm1, %v10943_v28 }
0x1453 PF: > { %s14_s15 = sadd.s32 1, %s12514_s15  }
0x1454   : > { %p11_p4 = scmp.ge.s32.totalorder %s14_s15, 5  }
0x1456   :  { %13 = sbr.rel (!%p11_p4) target bundleno = 1 (0x1), region = 72 }

</bundles_post_ra>
